<compile_context>
chip_gen: v7x
topology: tpu7x:2x2x1
jax: 0.10.0
libtpu: 0.0.40
codegen_flags: <defaults>
</compile_context>

<pallas_src>
import numpy as np

import jax
import jax.numpy as jnp
from jax.experimental import pallas as pl
from jax.experimental.pallas import tpu as pltpu

# ----------------------------- model constants ------------------------------
LATENT = 64                       # encoder.latent_size == d_latent
D_HIDDEN = 64                     # ResnetFC hidden width
N_BLOCKS = 3                      # ResnetFC n_blocks
COMBINE_LAYER = 3                 # >= N_BLOCKS and NS=1 -> no combine step
NUM_FREQS = 6
D_IN = 3                          # use_xyz
D_EMB_CODE = 2 * NUM_FREQS * D_IN     # 36 sin/cos features
D_CODE = D_IN + D_EMB_CODE            # PositionalEncoding.d_out = 39
D_MLP_IN = LATENT + D_CODE            # 103  (mlp_input = [latent | z_feature])
D_TZ = N_BLOCKS * D_HIDDEN            # 192  (fused latent-injection width)
D_EMBED = 28
D_OUT = 4 + D_EMBED               # 32
TN_MAX = 512                      # points per kernel tile


def _round_up(x, m):
    return (x + m - 1) // m * m


# ------------------------------ Pallas kernel -------------------------------
def _mlp_kernel(lat_ref,                 # (tn, 64)   bf16  sampled latent
                xyz_ref,                 # (tn, 3)    f32   rotated xyz
                cm_ref,                  # (4, 36)    f32   rows 0-2: freq sel, row 3: phase
                wzc_ref, bf_ref,         # (64, 192)  bf16 / (1, 192) f32 (fused lin_z[0..2] + b_in)
                wx_ref, we_ref,          # (3, 64) / (36, 64) bf16 (lin_in split: raw-xyz / sin-code rows)
                w0_ref, b0_ref,          # (3, 64, 64) bf16 / (3, 1, 64) f32
                w1_ref, b1_ref,          # (3, 64, 64) bf16 / (3, 1, 64) f32
                wo_ref, bo_ref,          # (64, 32)   bf16 / (1, 32)  f32
                out_ref):                # (tn, 32)   f32
    """ResnetFC forward (incl. positional code) + output activation for one tile.

    first = latent @ [wz0|wz1|wz2] + [b_in+bz0 | bz1 | bz2]:
      cols   0: 64  -> latent injection of block 0 (+ lin_in bias)
      cols  64:128  -> latent injection of block 1
      cols 128:192  -> latent injection of block 2
    lin_in(code) is computed separately (it only feeds block 0).
    """
    x3 = xyz_ref[...]                                            # (tn, 3) f32
    # Positional code: arg[:, k] = x[:, k%3] * freq[k//3] + phase[k//3]
    arg = (x3[:, 0:1] * cm_ref[0:1, :]
           + x3[:, 1:2] * cm_ref[1:2, :]
           + x3[:, 2:3] * cm_ref[2:3, :]
           + cm_ref[3:4, :])                                     # (tn, 36) f32
    emb = jnp.sin(arg).astype(jnp.bfloat16)                      # EUP
    x3b = x3.astype(jnp.bfloat16)

    lat = lat_ref[...]                                           # bf16
    first = jnp.dot(lat, wzc_ref[...],
                    preferred_element_type=jnp.float32) + bf_ref[...]   # (tn,192)
    x_in = (jnp.dot(x3b, wx_ref[...], preferred_element_type=jnp.float32)
            + jnp.dot(emb, we_ref[...], preferred_element_type=jnp.float32))

    x = first[:, 0:D_HIDDEN] + x_in                              # after blk-0 inject
    for blk in range(N_BLOCKS):
        if blk > 0:
            x = x + first[:, blk * D_HIDDEN:(blk + 1) * D_HIDDEN]  # + tz_blk
        h0 = jnp.maximum(x, 0.0).astype(jnp.bfloat16)
        net = jnp.dot(h0, w0_ref[blk],
                      preferred_element_type=jnp.float32) + b0_ref[blk]
        h1 = jnp.maximum(net, 0.0).astype(jnp.bfloat16)
        dx = jnp.dot(h1, w1_ref[blk],
                     preferred_element_type=jnp.float32) + b1_ref[blk]
        x = x + dx                                               # identity shortcut

    ho = jnp.maximum(x, 0.0).astype(jnp.bfloat16)
    out = jnp.dot(ho, wo_ref[...],
                  preferred_element_type=jnp.float32) + bo_ref[...]

    # final per-channel activation: sigmoid(rgb) | relu(sigma) | identity(embed)
    col = jax.lax.broadcasted_iota(jnp.int32, out.shape, 1)
    out = jnp.where(col < 3, jax.nn.sigmoid(out),
                    jnp.where(col == 3, jnp.maximum(out, 0.0), out))
    out_ref[...] = out.astype(out_ref.dtype)


def run_mlp_pallas(latent, xyz_rot, packed_params):
    """latent: (N, 64) f32, xyz_rot: (N, 3) f32 -> (N, D_OUT) f32."""
    (code_mat, wz_cat, b_first, wx, wemb,
     w0, b0, w1, b1, w_out, b_out) = packed_params
    n = latent.shape[0]
    tn = min(TN_MAX, _round_up(n, 128))        # big tiles, grid stays exact
    n_pad = _round_up(n, tn)

    lat = latent.astype(jnp.bfloat16)          # halve latent DMA bytes
    xyz = xyz_rot.astype(jnp.float32)          # keep xyz f32 (code precision)
    if n_pad != n:
        lat = jnp.pad(lat, ((0, n_pad - n), (0, 0)))
        xyz = jnp.pad(xyz, ((0, n_pad - n), (0, 0)))

    grid = (n_pad // tn,)
    full2 = lambda i: (0, 0)
    full3 = lambda i: (0, 0, 0)

    out = pl.pallas_call(
        _mlp_kernel,
        out_shape=jax.ShapeDtypeStruct((n_pad, D_OUT), jnp.float32),
        grid_spec=pltpu.PrefetchScalarGridSpec(
            num_scalar_prefetch=0,
            grid=grid,
            in_specs=[
                pl.BlockSpec((tn, LATENT), lambda i: (i, 0)),
                pl.BlockSpec((tn, D_IN), lambda i: (i, 0)),
                pl.BlockSpec((4, D_EMB_CODE), full2),
                pl.BlockSpec((LATENT, D_TZ), full2),
                pl.BlockSpec((1, D_TZ), full2),
                pl.BlockSpec((D_IN, D_HIDDEN), full2),
                pl.BlockSpec((D_EMB_CODE, D_HIDDEN), full2),
                pl.BlockSpec((N_BLOCKS, D_HIDDEN, D_HIDDEN), full3),
                pl.BlockSpec((N_BLOCKS, 1, D_HIDDEN), full3),
                pl.BlockSpec((N_BLOCKS, D_HIDDEN, D_HIDDEN), full3),
                pl.BlockSpec((N_BLOCKS, 1, D_HIDDEN), full3),
                pl.BlockSpec((D_HIDDEN, D_OUT), full2),
                pl.BlockSpec((1, D_OUT), full2),
            ],
            out_specs=pl.BlockSpec((tn, D_OUT), lambda i: (i, 0)),
        ),
        compiler_params=pltpu.CompilerParams(
            dimension_semantics=("parallel",)),   # megacore split on v7x
    )(lat, xyz, code_mat, wz_cat, b_first, wx, wemb,
      w0, b0, w1, b1, w_out, b_out)

    return out[:n] if n_pad != n else out


# ------------------------------ JAX glue ops ---------------------------------
def positional_encoding(x, num_freqs=NUM_FREQS, freq_factor=np.pi):
    """Matches pixelNeRF PositionalEncoding (include_input=True). Reference only."""
    freqs = freq_factor * (2.0 ** jnp.arange(num_freqs, dtype=jnp.float32))
    freqs_rep = jnp.repeat(freqs, 2)                             # (2nf,)
    phases = jnp.zeros((2 * num_freqs,), jnp.float32).at[1::2].set(np.pi * 0.5)
    emb = x[:, None, :] * freqs_rep[None, :, None] + phases[None, :, None]
    emb = jnp.sin(emb).reshape(x.shape[0], -1)
    return jnp.concatenate([x, emb], axis=-1)                    # (N, 3 + 6*nf)


def make_code_matrix():
    """(4, 36) f32: rows 0-2 = per-coordinate frequency selection, row 3 = phase."""
    freqs = np.pi * (2.0 ** np.arange(NUM_FREQS, dtype=np.float64))
    freqs_rep = np.repeat(freqs, 2)                              # (12,)
    phases = np.zeros((2 * NUM_FREQS,), np.float64)
    phases[1::2] = np.pi * 0.5
    s = np.zeros((3, D_EMB_CODE), np.float32)
    p = np.zeros((D_EMB_CODE,), np.float32)
    for f2 in range(2 * NUM_FREQS):
        for j in range(3):
            k = f2 * 3 + j
            s[j, k] = freqs_rep[f2]
            p[k] = phases[f2]
    return jnp.asarray(np.concatenate([s, p[None, :]], axis=0))  # (4, 36)


def grid_sample_bilinear_border_onehot(feat, uv_norm):
    """F.grid_sample(mode='bilinear', padding_mode='border', align_corners=True)
    rewritten gather-free: one-hot bilinear-weight matrix @ flattened features.

    feat: (C, Hf, Wf); uv_norm: (N, 2) in [-1, 1], (x, y) order. -> (N, C)
    """
    c, hf, wf = feat.shape
    x = (uv_norm[:, 0] + 1.0) * 0.5 * (wf - 1)
    y = (uv_norm[:, 1] + 1.0) * 0.5 * (hf - 1)
    x = jnp.clip(x, 0.0, wf - 1.0)       # border padding
    y = jnp.clip(y, 0.0, hf - 1.0)
    x0 = jnp.floor(x); y0 = jnp.floor(y)
    wx1 = x - x0; wy1 = y - y0
    x0i = x0.astype(jnp.int32); y0i = y0.astype(jnp.int32)
    x1i = jnp.minimum(x0i + 1, wf - 1); y1i = jnp.minimum(y0i + 1, hf - 1)

    cols = jnp.arange(wf, dtype=jnp.int32)[None, :]
    rows = jnp.arange(hf, dtype=jnp.int32)[None, :]
    wx = ((cols == x0i[:, None]) * (1.0 - wx1)[:, None]
          + (cols == x1i[:, None]) * wx1[:, None])               # (N, Wf)
    wy = ((rows == y0i[:, None]) * (1.0 - wy1)[:, None]
          + (rows == y1i[:, None]) * wy1[:, None])               # (N, Hf)
    w_bilin = (wy[:, :, None] * wx[:, None, :]).reshape(-1, hf * wf)  # (N, Hf*Wf)
    # TODO(synk): for very large feature maps the dense (N, Hf*Wf) weight matrix
    # would not scale; an in-kernel DMA gather would be needed there.
    return w_bilin @ feat.reshape(c, hf * wf).T                  # (N, C)


def grid_sample_bilinear_border_gather(feat, uv_norm):
    """Reference gather-based version (used only for correctness checking)."""
    c, hf, wf = feat.shape
    x = (uv_norm[:, 0] + 1.0) * 0.5 * (wf - 1)
    y = (uv_norm[:, 1] + 1.0) * 0.5 * (hf - 1)
    x = jnp.clip(x, 0.0, wf - 1.0)
    y = jnp.clip(y, 0.0, hf - 1.0)
    x0 = jnp.floor(x); y0 = jnp.floor(y)
    wx1 = x - x0; wy1 = y - y0
    wx0 = 1.0 - wx1; wy0 = 1.0 - wy1
    x0i = x0.astype(jnp.int32); y0i = y0.astype(jnp.int32)
    x1i = jnp.clip(x0i + 1, 0, wf - 1); y1i = jnp.clip(y0i + 1, 0, hf - 1)

    def gather(yi, xi):
        return feat[:, yi, xi]           # (C, N)

    out = (gather(y0i, x0i) * (wy0 * wx0)[None, :]
           + gather(y0i, x1i) * (wy0 * wx1)[None, :]
           + gather(y1i, x0i) * (wy1 * wx0)[None, :]
           + gather(y1i, x1i) * (wy1 * wx1)[None, :])
    return out.T                          # (N, C)


# ------------------------------ model wrapper --------------------------------
class PixelNeRFEmbedNetPallas:
    def __init__(self, key):
        ks = jax.random.split(key, 12)
        s = 0.1
        w_in = s * jax.random.normal(ks[0], (D_CODE, D_HIDDEN), jnp.float32)
        b_in = s * jax.random.normal(ks[1], (1, D_HIDDEN), jnp.float32)
        wz = s * jax.random.normal(ks[2], (N_BLOCKS, LATENT, D_HIDDEN), jnp.float32)
        bz = s * jax.random.normal(ks[3], (N_BLOCKS, 1, D_HIDDEN), jnp.float32)
        w0 = s * jax.random.normal(ks[4], (N_BLOCKS, D_HIDDEN, D_HIDDEN), jnp.float32)
        b0 = s * jax.random.normal(ks[5], (N_BLOCKS, 1, D_HIDDEN), jnp.float32)
        w1 = s * jax.random.normal(ks[6], (N_BLOCKS, D_HIDDEN, D_HIDDEN), jnp.float32)
        b1 = s * jax.random.normal(ks[7], (N_BLOCKS, 1, D_HIDDEN), jnp.float32)
        w_out = s * jax.random.normal(ks[8], (D_HIDDEN, D_OUT), jnp.float32)
        b_out = s * jax.random.normal(ks[9], (1, D_OUT), jnp.float32)
        self.raw_params = (w_in, b_in, wz, bz, w0, b0, w1, b1, w_out, b_out)

        # Fuse all latent injections into one (64, 192) weight (columns per block);
        # lin_in stays separate but is split into raw-xyz rows and sin-code rows
        # (the positional code is generated inside the kernel).
        wz_cat = jnp.concatenate([wz[0], wz[1], wz[2]], axis=1)               # (64, 192)
        b_first = jnp.concatenate([b_in + bz[0], bz[1], bz[2]], axis=1)       # (1, 192)
        wx = w_in[:D_IN]                                                      # (3, 64)
        wemb = w_in[D_IN:]                                                    # (36, 64)

        self.mlp_params = (
            make_code_matrix(),                       # (4, 36) f32
            wz_cat.astype(jnp.bfloat16), b_first,
            wx.astype(jnp.bfloat16), wemb.astype(jnp.bfloat16),
            w0.astype(jnp.bfloat16), b0,
            w1.astype(jnp.bfloat16), b1,
            w_out.astype(jnp.bfloat16), b_out,
        )
        self._enc_key = ks[10]

    def encode(self, images, poses, focal, c=None):
        """images: (NS, 3, H, W), poses: (NS, 4, 4) c2w, focal: scalar."""
        ns, _, h, w = images.shape
        # TODO(synk): real SpatialEncoder (ResNet34 CNN) backbone not implemented;
        # it runs in encode(), not forward(). Use a deterministic synthetic latent map.
        hf, wf = h // 2, w // 2
        self.latent = jax.random.normal(self._enc_key, (ns, LATENT, hf, wf), jnp.float32)
        ls = jnp.array([wf, hf], jnp.float32)
        self.latent_scaling = ls / (ls - 1.0) * 2.0

        rot = jnp.swapaxes(poses[:, :3, :3], 1, 2)                        # w2c rotation
        trans = -jnp.einsum('nij,njk->nik', rot, poses[:, :3, 3:])
        self.poses = jnp.concatenate([rot, trans], axis=-1)               # (NS, 3, 4)

        self.image_shape = jnp.array([w, h], jnp.float32)
        focal = jnp.full((1, 2), focal, jnp.float32)
        self.focal = focal.at[:, 1].multiply(-1.0)
        if c is None:
            c = (self.image_shape * 0.5)[None, :]
        self.c = c

    def forward(self, xyz):
        """xyz: (SB, B, 3) -> (SB, B, D_OUT)  [sigmoid(rgb), relu(sigma), embed]."""
        sb, b, _ = xyz.shape
        # NS = 1 -> repeat_interleave is identity, no combine step in the MLP.
        xyz_rot = jnp.einsum('nij,nbj->nbi', self.poses[:, :3, :3], xyz)
        xyz_cam = xyz_rot + self.poses[:, None, :3, 3]

        # encoder.index: project to image plane and bilinearly sample latent map
        uv = -xyz_cam[:, :, :2] / xyz_cam[:, :, 2:]
        uv = uv * self.focal[:, None, :] + self.c[:, None, :]
        scale = self.latent_scaling / self.image_shape
        uv_norm = uv * scale[None, None, :] - 1.0
        latent = jax.vmap(grid_sample_bilinear_border_onehot)(self.latent, uv_norm)
        latent = latent.reshape(-1, LATENT)                               # (SB*B, 64)

        # positional code + lin_in + ResnetFC + output activation all fused in kernel
        out = run_mlp_pallas(latent, xyz_rot.reshape(-1, 3), self.mlp_params)
        return out.reshape(sb, b, D_OUT)


# ------------------------- pure-JAX reference (check) ------------------------
def _mlp_ref_bf16(mlp_in, raw_params):
    """Reference MLP with inputs/weights quantized to bf16 (f32 math),
    matching the kernel's bf16-input / f32-accumulate precision."""
    (w_in, b_in, wz, bz, w0, b0, w1, b1, w_out, b_out) = raw_params
    q = lambda a: a.astype(jnp.bfloat16).astype(jnp.float32)
    z = q(mlp_in[:, :LATENT])
    xf = q(mlp_in[:, LATENT:])
    x = xf @ q(w_in) + b_in[0]
    for blk in range(N_BLOCKS):
        x = x + z @ q(wz[blk]) + bz[blk, 0]
        net = q(jnp.maximum(x, 0.0)) @ q(w0[blk]) + b0[blk, 0]
        dx = q(jnp.maximum(net, 0.0)) @ q(w1[blk]) + b1[blk, 0]
        x = x + dx
    out = q(jnp.maximum(x, 0.0)) @ q(w_out) + b_out[0]
    return jnp.concatenate(
        [jax.nn.sigmoid(out[:, :3]), jnp.maximum(out[:, 3:4], 0.0), out[:, 4:]], axis=-1)


# ----------------------------------- main ------------------------------------
if __name__ == "__main__":
    key = jax.random.PRNGKey(0)
    k_xyz, k_img, k_params, k_t = jax.random.split(key, 4)

    SB, B, H, W = 2, 128, 16, 16

    model = PixelNeRFEmbedNetPallas(k_params)

    # deterministic example inputs
    images = jax.random.normal(k_img, (SB, 3, H, W), jnp.float32)        # NCHW
    eye = jnp.eye(4, dtype=jnp.float32)
    t = jnp.concatenate(
        [0.1 * jax.random.normal(k_t, (SB, 2), jnp.float32),
         jnp.full((SB, 1), -3.0, jnp.float32)], axis=-1)
    poses = jnp.broadcast_to(eye, (SB, 4, 4)).at[:, :3, 3].set(t)        # c2w
    focal = jnp.float32(20.0)
    xyz = jax.random.normal(k_xyz, (SB, B, 3), jnp.float32)

    model.encode(images, poses, focal)
    out = model.forward(xyz)
    out = jax.block_until_ready(out)
    assert out.shape == (SB, B, D_OUT)

    # ---- correctness checks --------------------------------------------------
    xyz_rot = jnp.einsum('nij,nbj->nbi', model.poses[:, :3, :3], xyz)
    xyz_cam = xyz_rot + model.poses[:, None, :3, 3]
    zf = positional_encoding(xyz_rot.reshape(-1, 3))
    uv = -xyz_cam[:, :, :2] / xyz_cam[:, :, 2:]
    uv = uv * model.focal[:, None, :] + model.c[:, None, :]
    uv_norm = uv * (model.latent_scaling / model.image_shape)[None, None, :] - 1.0

    # 1) gather-free bilinear sampling matches the gather reference
    lat_onehot = jax.vmap(grid_sample_bilinear_border_onehot)(model.latent, uv_norm)
    lat_gather = jax.vmap(grid_sample_bilinear_border_gather)(model.latent, uv_norm)
    assert bool(jnp.allclose(lat_onehot, lat_gather, atol=1e-4, rtol=1e-4)), \
        "grid_sample mismatch"

    # 2) Pallas MLP (with in-kernel positional code) matches pure-JAX reference
    mlp_in_ref = jnp.concatenate([lat_onehot.reshape(-1, LATENT), zf], axis=-1)
    ref = _mlp_ref_bf16(mlp_in_ref, model.raw_params).reshape(SB, B, D_OUT)
    assert bool(jnp.allclose(out, ref, atol=2e-2, rtol=2e-2)), "MLP mismatch vs reference"

    print("KERNEL_OK")
</pallas_src>

<mosaic_0001>
module attributes {stable_mosaic.version = 11 : i64} {
  func.func @_mlp_kernel(%arg0: i32, %arg1: memref<256x64xbf16, #tpu.memory_space<vmem>>, %arg2: memref<256x3xf32, #tpu.memory_space<vmem>>, %arg3: memref<4x36xf32, #tpu.memory_space<vmem>>, %arg4: memref<64x192xbf16, #tpu.memory_space<vmem>>, %arg5: memref<1x192xf32, #tpu.memory_space<vmem>>, %arg6: memref<3x64xbf16, #tpu.memory_space<vmem>>, %arg7: memref<36x64xbf16, #tpu.memory_space<vmem>>, %arg8: memref<3x64x64xbf16, #tpu.memory_space<vmem>>, %arg9: memref<3x1x64xf32, #tpu.memory_space<vmem>>, %arg10: memref<3x64x64xbf16, #tpu.memory_space<vmem>>, %arg11: memref<3x1x64xf32, #tpu.memory_space<vmem>>, %arg12: memref<64x32xbf16, #tpu.memory_space<vmem>>, %arg13: memref<1x32xf32, #tpu.memory_space<vmem>>, %arg14: memref<256x32xf32, #tpu.memory_space<vmem>>) attributes {dimension_semantics = [#tpu.dimension_semantics<parallel>], iteration_bounds = array<i64: 1>, scalar_prefetch = 0 : i64, scratch_operands = 0 : i64, tpu.core_type = #tpu.core_type<tc>, window_params = [{transform_indices = @transform_0, window_bounds = array<i64: 256, 64>}, {transform_indices = @transform_1, window_bounds = array<i64: 256, 3>}, {pipeline_mode = #tpu.pipeline_mode<synchronous>, transform_indices = @transform_2, window_bounds = array<i64: 4, 36>}, {pipeline_mode = #tpu.pipeline_mode<synchronous>, transform_indices = @transform_3, window_bounds = array<i64: 64, 192>}, {pipeline_mode = #tpu.pipeline_mode<synchronous>, transform_indices = @transform_4, window_bounds = array<i64: 1, 192>}, {pipeline_mode = #tpu.pipeline_mode<synchronous>, transform_indices = @transform_5, window_bounds = array<i64: 3, 64>}, {pipeline_mode = #tpu.pipeline_mode<synchronous>, transform_indices = @transform_6, window_bounds = array<i64: 36, 64>}, {pipeline_mode = #tpu.pipeline_mode<synchronous>, transform_indices = @transform_7, window_bounds = array<i64: 3, 64, 64>}, {pipeline_mode = #tpu.pipeline_mode<synchronous>, transform_indices = @transform_8, window_bounds = array<i64: 3, 1, 64>}, {pipeline_mode = #tpu.pipeline_mode<synchronous>, transform_indices = @transform_9, window_bounds = array<i64: 3, 64, 64>}, {pipeline_mode = #tpu.pipeline_mode<synchronous>, transform_indices = @transform_10, window_bounds = array<i64: 3, 1, 64>}, {pipeline_mode = #tpu.pipeline_mode<synchronous>, transform_indices = @transform_11, window_bounds = array<i64: 64, 32>}, {pipeline_mode = #tpu.pipeline_mode<synchronous>, transform_indices = @transform_12, window_bounds = array<i64: 1, 32>}, {transform_indices = @transform_13, window_bounds = array<i64: 256, 32>}]} {
    %c0 = arith.constant 0 : index
    %c0_0 = arith.constant 0 : index
    %0 = vector.load %arg2[%c0, %c0_0] : memref<256x3xf32, #tpu.memory_space<vmem>>, vector<256x3xf32>
    %1 = vector.extract_strided_slice %0 {offsets = [0, 0], sizes = [256, 1], strides = [1, 1]} : vector<256x3xf32> to vector<256x1xf32>
    %c0_1 = arith.constant 0 : index
    %c0_2 = arith.constant 0 : index
    %2 = vector.load %arg3[%c0_1, %c0_2] : memref<4x36xf32, #tpu.memory_space<vmem>>, vector<1x36xf32>
    %3 = vector.broadcast %1 : vector<256x1xf32> to vector<256x36xf32>
    %4 = vector.broadcast %2 : vector<1x36xf32> to vector<256x36xf32>
    %5 = arith.mulf %3, %4 : vector<256x36xf32>
    %6 = vector.extract_strided_slice %0 {offsets = [0, 1], sizes = [256, 1], strides = [1, 1]} : vector<256x3xf32> to vector<256x1xf32>
    %c1 = arith.constant 1 : index
    %c0_3 = arith.constant 0 : index
    %7 = vector.load %arg3[%c1, %c0_3] : memref<4x36xf32, #tpu.memory_space<vmem>>, vector<1x36xf32>
    %8 = vector.broadcast %6 : vector<256x1xf32> to vector<256x36xf32>
    %9 = vector.broadcast %7 : vector<1x36xf32> to vector<256x36xf32>
    %10 = arith.mulf %8, %9 : vector<256x36xf32>
    %11 = arith.addf %5, %10 : vector<256x36xf32>
    %12 = vector.extract_strided_slice %0 {offsets = [0, 2], sizes = [256, 1], strides = [1, 1]} : vector<256x3xf32> to vector<256x1xf32>
    %c2 = arith.constant 2 : index
    %c0_4 = arith.constant 0 : index
    %13 = vector.load %arg3[%c2, %c0_4] : memref<4x36xf32, #tpu.memory_space<vmem>>, vector<1x36xf32>
    %14 = vector.broadcast %12 : vector<256x1xf32> to vector<256x36xf32>
    %15 = vector.broadcast %13 : vector<1x36xf32> to vector<256x36xf32>
    %16 = arith.mulf %14, %15 : vector<256x36xf32>
    %17 = arith.addf %11, %16 : vector<256x36xf32>
    %c3 = arith.constant 3 : index
    %c0_5 = arith.constant 0 : index
    %18 = vector.load %arg3[%c3, %c0_5] : memref<4x36xf32, #tpu.memory_space<vmem>>, vector<1x36xf32>
    %19 = vector.broadcast %18 : vector<1x36xf32> to vector<256x36xf32>
    %20 = arith.addf %17, %19 : vector<256x36xf32>
    %21 = math.sin %20 : vector<256x36xf32>
    %22 = arith.truncf %21 : vector<256x36xf32> to vector<256x36xbf16>
    %23 = arith.truncf %0 : vector<256x3xf32> to vector<256x3xbf16>
    %c0_6 = arith.constant 0 : index
    %c0_7 = arith.constant 0 : index
    %24 = vector.load %arg1[%c0_6, %c0_7] : memref<256x64xbf16, #tpu.memory_space<vmem>>, vector<256x64xbf16>
    %c0_8 = arith.constant 0 : index
    %c0_9 = arith.constant 0 : index
    %25 = vector.load %arg4[%c0_8, %c0_9] : memref<64x192xbf16, #tpu.memory_space<vmem>>, vector<64x192xbf16>
    %cst = arith.constant dense<0.000000e+00> : vector<256x192xf32>
    %26 = tpu.matmul %24, %25, %cst {dimension_numbers = #tpu.dot_dimension_numbers<[1], [0], [0], [1], [0, 0, 1, 1], [], []>} : vector<256x64xbf16>, vector<64x192xbf16>, vector<256x192xf32> -> vector<256x192xf32>
    %c0_10 = arith.constant 0 : index
    %c0_11 = arith.constant 0 : index
    %27 = vector.load %arg5[%c0_10, %c0_11] : memref<1x192xf32, #tpu.memory_space<vmem>>, vector<1x192xf32>
    %28 = vector.broadcast %27 : vector<1x192xf32> to vector<256x192xf32>
    %29 = arith.addf %26, %28 : vector<256x192xf32>
    %c0_12 = arith.constant 0 : index
    %c0_13 = arith.constant 0 : index
    %30 = vector.load %arg6[%c0_12, %c0_13] : memref<3x64xbf16, #tpu.memory_space<vmem>>, vector<3x64xbf16>
    %cst_14 = arith.constant dense<0.000000e+00> : vector<256x64xf32>
    %31 = tpu.matmul %23, %30, %cst_14 {dimension_numbers = #tpu.dot_dimension_numbers<[1], [0], [0], [1], [0, 0, 1, 1], [], []>} : vector<256x3xbf16>, vector<3x64xbf16>, vector<256x64xf32> -> vector<256x64xf32>
    %c0_15 = arith.constant 0 : index
    %c0_16 = arith.constant 0 : index
    %32 = vector.load %arg7[%c0_15, %c0_16] : memref<36x64xbf16, #tpu.memory_space<vmem>>, vector<36x64xbf16>
    %cst_17 = arith.constant dense<0.000000e+00> : vector<256x64xf32>
    %33 = tpu.matmul %22, %32, %cst_17 {dimension_numbers = #tpu.dot_dimension_numbers<[1], [0], [0], [1], [0, 0, 1, 1], [], []>} : vector<256x36xbf16>, vector<36x64xbf16>, vector<256x64xf32> -> vector<256x64xf32>
    %34 = arith.addf %31, %33 : vector<256x64xf32>
    %35 = vector.extract_strided_slice %29 {offsets = [0, 0], sizes = [256, 64], strides = [1, 1]} : vector<256x192xf32> to vector<256x64xf32>
    %36 = arith.addf %35, %34 : vector<256x64xf32>
    %cst_18 = arith.constant 0.000000e+00 : f32
    %37 = vector.broadcast %cst_18 : f32 to vector<256x64xf32>
    %38 = arith.maximumf %36, %37 : vector<256x64xf32>
    %39 = arith.truncf %38 : vector<256x64xf32> to vector<256x64xbf16>
    %c0_19 = arith.constant 0 : index
    %c0_20 = arith.constant 0 : index
    %c0_21 = arith.constant 0 : index
    %40 = vector.load %arg8[%c0_19, %c0_20, %c0_21] : memref<3x64x64xbf16, #tpu.memory_space<vmem>>, vector<1x64x64xbf16>
    %41 = vector.shape_cast %40 : vector<1x64x64xbf16> to vector<64x64xbf16>
    %cst_22 = arith.constant dense<0.000000e+00> : vector<256x64xf32>
    %42 = tpu.matmul %39, %41, %cst_22 {dimension_numbers = #tpu.dot_dimension_numbers<[1], [0], [0], [1], [0, 0, 1, 1], [], []>} : vector<256x64xbf16>, vector<64x64xbf16>, vector<256x64xf32> -> vector<256x64xf32>
    %c0_23 = arith.constant 0 : index
    %c0_24 = arith.constant 0 : index
    %c0_25 = arith.constant 0 : index
    %43 = vector.load %arg9[%c0_23, %c0_24, %c0_25] : memref<3x1x64xf32, #tpu.memory_space<vmem>>, vector<1x1x64xf32>
    %44 = vector.shape_cast %43 : vector<1x1x64xf32> to vector<1x64xf32>
    %45 = vector.broadcast %44 : vector<1x64xf32> to vector<256x64xf32>
    %46 = arith.addf %42, %45 : vector<256x64xf32>
    %cst_26 = arith.constant 0.000000e+00 : f32
    %47 = vector.broadcast %cst_26 : f32 to vector<256x64xf32>
    %48 = arith.maximumf %46, %47 : vector<256x64xf32>
    %49 = arith.truncf %48 : vector<256x64xf32> to vector<256x64xbf16>
    %c0_27 = arith.constant 0 : index
    %c0_28 = arith.constant 0 : index
    %c0_29 = arith.constant 0 : index
    %50 = vector.load %arg10[%c0_27, %c0_28, %c0_29] : memref<3x64x64xbf16, #tpu.memory_space<vmem>>, vector<1x64x64xbf16>
    %51 = vector.shape_cast %50 : vector<1x64x64xbf16> to vector<64x64xbf16>
    %cst_30 = arith.constant dense<0.000000e+00> : vector<256x64xf32>
    %52 = tpu.matmul %49, %51, %cst_30 {dimension_numbers = #tpu.dot_dimension_numbers<[1], [0], [0], [1], [0, 0, 1, 1], [], []>} : vector<256x64xbf16>, vector<64x64xbf16>, vector<256x64xf32> -> vector<256x64xf32>
    %c0_31 = arith.constant 0 : index
    %c0_32 = arith.constant 0 : index
    %c0_33 = arith.constant 0 : index
    %53 = vector.load %arg11[%c0_31, %c0_32, %c0_33] : memref<3x1x64xf32, #tpu.memory_space<vmem>>, vector<1x1x64xf32>
    %54 = vector.shape_cast %53 : vector<1x1x64xf32> to vector<1x64xf32>
    %55 = vector.broadcast %54 : vector<1x64xf32> to vector<256x64xf32>
    %56 = arith.addf %52, %55 : vector<256x64xf32>
    %57 = arith.addf %36, %56 : vector<256x64xf32>
    %58 = vector.extract_strided_slice %29 {offsets = [0, 64], sizes = [256, 64], strides = [1, 1]} : vector<256x192xf32> to vector<256x64xf32>
    %59 = arith.addf %57, %58 : vector<256x64xf32>
    %cst_34 = arith.constant 0.000000e+00 : f32
    %60 = vector.broadcast %cst_34 : f32 to vector<256x64xf32>
    %61 = arith.maximumf %59, %60 : vector<256x64xf32>
    %62 = arith.truncf %61 : vector<256x64xf32> to vector<256x64xbf16>
    %c1_35 = arith.constant 1 : index
    %c0_36 = arith.constant 0 : index
    %c0_37 = arith.constant 0 : index
    %63 = vector.load %arg8[%c1_35, %c0_36, %c0_37] : memref<3x64x64xbf16, #tpu.memory_space<vmem>>, vector<1x64x64xbf16>
    %64 = vector.shape_cast %63 : vector<1x64x64xbf16> to vector<64x64xbf16>
    %cst_38 = arith.constant dense<0.000000e+00> : vector<256x64xf32>
    %65 = tpu.matmul %62, %64, %cst_38 {dimension_numbers = #tpu.dot_dimension_numbers<[1], [0], [0], [1], [0, 0, 1, 1], [], []>} : vector<256x64xbf16>, vector<64x64xbf16>, vector<256x64xf32> -> vector<256x64xf32>
    %c1_39 = arith.constant 1 : index
    %c0_40 = arith.constant 0 : index
    %c0_41 = arith.constant 0 : index
    %66 = vector.load %arg9[%c1_39, %c0_40, %c0_41] : memref<3x1x64xf32, #tpu.memory_space<vmem>>, vector<1x1x64xf32>
    %67 = vector.shape_cast %66 : vector<1x1x64xf32> to vector<1x64xf32>
    %68 = vector.broadcast %67 : vector<1x64xf32> to vector<256x64xf32>
    %69 = arith.addf %65, %68 : vector<256x64xf32>
    %cst_42 = arith.constant 0.000000e+00 : f32
    %70 = vector.broadcast %cst_42 : f32 to vector<256x64xf32>
    %71 = arith.maximumf %69, %70 : vector<256x64xf32>
    %72 = arith.truncf %71 : vector<256x64xf32> to vector<256x64xbf16>
    %c1_43 = arith.constant 1 : index
    %c0_44 = arith.constant 0 : index
    %c0_45 = arith.constant 0 : index
    %73 = vector.load %arg10[%c1_43, %c0_44, %c0_45] : memref<3x64x64xbf16, #tpu.memory_space<vmem>>, vector<1x64x64xbf16>
    %74 = vector.shape_cast %73 : vector<1x64x64xbf16> to vector<64x64xbf16>
    %cst_46 = arith.constant dense<0.000000e+00> : vector<256x64xf32>
    %75 = tpu.matmul %72, %74, %cst_46 {dimension_numbers = #tpu.dot_dimension_numbers<[1], [0], [0], [1], [0, 0, 1, 1], [], []>} : vector<256x64xbf16>, vector<64x64xbf16>, vector<256x64xf32> -> vector<256x64xf32>
    %c1_47 = arith.constant 1 : index
    %c0_48 = arith.constant 0 : index
    %c0_49 = arith.constant 0 : index
    %76 = vector.load %arg11[%c1_47, %c0_48, %c0_49] : memref<3x1x64xf32, #tpu.memory_space<vmem>>, vector<1x1x64xf32>
    %77 = vector.shape_cast %76 : vector<1x1x64xf32> to vector<1x64xf32>
    %78 = vector.broadcast %77 : vector<1x64xf32> to vector<256x64xf32>
    %79 = arith.addf %75, %78 : vector<256x64xf32>
    %80 = arith.addf %59, %79 : vector<256x64xf32>
    %81 = vector.extract_strided_slice %29 {offsets = [0, 128], sizes = [256, 64], strides = [1, 1]} : vector<256x192xf32> to vector<256x64xf32>
    %82 = arith.addf %80, %81 : vector<256x64xf32>
    %cst_50 = arith.constant 0.000000e+00 : f32
    %83 = vector.broadcast %cst_50 : f32 to vector<256x64xf32>
    %84 = arith.maximumf %82, %83 : vector<256x64xf32>
    %85 = arith.truncf %84 : vector<256x64xf32> to vector<256x64xbf16>
    %c2_51 = arith.constant 2 : index
    %c0_52 = arith.constant 0 : index
    %c0_53 = arith.constant 0 : index
    %86 = vector.load %arg8[%c2_51, %c0_52, %c0_53] : memref<3x64x64xbf16, #tpu.memory_space<vmem>>, vector<1x64x64xbf16>
    %87 = vector.shape_cast %86 : vector<1x64x64xbf16> to vector<64x64xbf16>
    %cst_54 = arith.constant dense<0.000000e+00> : vector<256x64xf32>
    %88 = tpu.matmul %85, %87, %cst_54 {dimension_numbers = #tpu.dot_dimension_numbers<[1], [0], [0], [1], [0, 0, 1, 1], [], []>} : vector<256x64xbf16>, vector<64x64xbf16>, vector<256x64xf32> -> vector<256x64xf32>
    %c2_55 = arith.constant 2 : index
    %c0_56 = arith.constant 0 : index
    %c0_57 = arith.constant 0 : index
    %89 = vector.load %arg9[%c2_55, %c0_56, %c0_57] : memref<3x1x64xf32, #tpu.memory_space<vmem>>, vector<1x1x64xf32>
    %90 = vector.shape_cast %89 : vector<1x1x64xf32> to vector<1x64xf32>
    %91 = vector.broadcast %90 : vector<1x64xf32> to vector<256x64xf32>
    %92 = arith.addf %88, %91 : vector<256x64xf32>
    %cst_58 = arith.constant 0.000000e+00 : f32
    %93 = vector.broadcast %cst_58 : f32 to vector<256x64xf32>
    %94 = arith.maximumf %92, %93 : vector<256x64xf32>
    %95 = arith.truncf %94 : vector<256x64xf32> to vector<256x64xbf16>
    %c2_59 = arith.constant 2 : index
    %c0_60 = arith.constant 0 : index
    %c0_61 = arith.constant 0 : index
    %96 = vector.load %arg10[%c2_59, %c0_60, %c0_61] : memref<3x64x64xbf16, #tpu.memory_space<vmem>>, vector<1x64x64xbf16>
    %97 = vector.shape_cast %96 : vector<1x64x64xbf16> to vector<64x64xbf16>
    %cst_62 = arith.constant dense<0.000000e+00> : vector<256x64xf32>
    %98 = tpu.matmul %95, %97, %cst_62 {dimension_numbers = #tpu.dot_dimension_numbers<[1], [0], [0], [1], [0, 0, 1, 1], [], []>} : vector<256x64xbf16>, vector<64x64xbf16>, vector<256x64xf32> -> vector<256x64xf32>
    %c2_63 = arith.constant 2 : index
    %c0_64 = arith.constant 0 : index
    %c0_65 = arith.constant 0 : index
    %99 = vector.load %arg11[%c2_63, %c0_64, %c0_65] : memref<3x1x64xf32, #tpu.memory_space<vmem>>, vector<1x1x64xf32>
    %100 = vector.shape_cast %99 : vector<1x1x64xf32> to vector<1x64xf32>
    %101 = vector.broadcast %100 : vector<1x64xf32> to vector<256x64xf32>
    %102 = arith.addf %98, %101 : vector<256x64xf32>
    %103 = arith.addf %82, %102 : vector<256x64xf32>
    %cst_66 = arith.constant 0.000000e+00 : f32
    %104 = vector.broadcast %cst_66 : f32 to vector<256x64xf32>
    %105 = arith.maximumf %103, %104 : vector<256x64xf32>
    %106 = arith.truncf %105 : vector<256x64xf32> to vector<256x64xbf16>
    %c0_67 = arith.constant 0 : index
    %c0_68 = arith.constant 0 : index
    %107 = vector.load %arg12[%c0_67, %c0_68] : memref<64x32xbf16, #tpu.memory_space<vmem>>, vector<64x32xbf16>
    %cst_69 = arith.constant dense<0.000000e+00> : vector<256x32xf32>
    %108 = tpu.matmul %106, %107, %cst_69 {dimension_numbers = #tpu.dot_dimension_numbers<[1], [0], [0], [1], [0, 0, 1, 1], [], []>} : vector<256x64xbf16>, vector<64x32xbf16>, vector<256x32xf32> -> vector<256x32xf32>
    %c0_70 = arith.constant 0 : index
    %c0_71 = arith.constant 0 : index
    %109 = vector.load %arg13[%c0_70, %c0_71] : memref<1x32xf32, #tpu.memory_space<vmem>>, vector<1x32xf32>
    %110 = vector.broadcast %109 : vector<1x32xf32> to vector<256x32xf32>
    %111 = arith.addf %108, %110 : vector<256x32xf32>
    %112 = tpu.iota {dimensions = array<i32: 1>} : vector<256x32xi32>
    %c3_i32 = arith.constant 3 : i32
    %113 = vector.broadcast %c3_i32 : i32 to vector<256x32xi32>
    %114 = arith.cmpi slt, %112, %113 : vector<256x32xi32>
    %115 = arith.negf %111 : vector<256x32xf32>
    %116 = math.exp %115 : vector<256x32xf32>
    %cst_72 = arith.constant 1.000000e+00 : f32
    %117 = vector.broadcast %cst_72 : f32 to vector<256x32xf32>
    %118 = arith.addf %117, %116 : vector<256x32xf32>
    %119 = arith.divf %117, %118 : vector<256x32xf32>
    %c3_i32_73 = arith.constant 3 : i32
    %120 = vector.broadcast %c3_i32_73 : i32 to vector<256x32xi32>
    %121 = arith.cmpi eq, %112, %120 : vector<256x32xi32>
    %cst_74 = arith.constant 0.000000e+00 : f32
    %122 = vector.broadcast %cst_74 : f32 to vector<256x32xf32>
    %123 = arith.maximumf %111, %122 : vector<256x32xf32>
    %124 = arith.select %121, %123, %111 : vector<256x32xi1>, vector<256x32xf32>
    %125 = arith.select %114, %119, %124 : vector<256x32xi1>, vector<256x32xf32>
    %c0_75 = arith.constant 0 : index
    %c0_76 = arith.constant 0 : index
    %126 = vector.load %arg14[%c0_75, %c0_76] : memref<256x32xf32, #tpu.memory_space<vmem>>, vector<256x32xf32>
    tpu.vector_store %arg14[%c0_75, %c0_76], %125 {strides = array<i32>} : memref<256x32xf32, #tpu.memory_space<vmem>>, vector<256x32xf32>,
    return
  }
  func.func @transform_0(%arg0: i32) -> (i32, i32) {
    %c0_i32 = arith.constant 0 : i32
    %c0_i32_0 = arith.constant 0 : i32
    return %arg0, %c0_i32 : i32, i32
  }
  func.func @transform_1(%arg0: i32) -> (i32, i32) {
    %c0_i32 = arith.constant 0 : i32
    %c0_i32_0 = arith.constant 0 : i32
    return %arg0, %c0_i32 : i32, i32
  }
  func.func @transform_2(%arg0: i32) -> (i32, i32) {
    %c0_i32 = arith.constant 0 : i32
    %c0_i32_0 = arith.constant 0 : i32
    %c0_i32_1 = arith.constant 0 : i32
    return %c0_i32, %c0_i32_0 : i32, i32
  }
  func.func @transform_3(%arg0: i32) -> (i32, i32) {
    %c0_i32 = arith.constant 0 : i32
    %c0_i32_0 = arith.constant 0 : i32
    %c0_i32_1 = arith.constant 0 : i32
    return %c0_i32, %c0_i32_0 : i32, i32
  }
  func.func @transform_4(%arg0: i32) -> (i32, i32) {
    %c0_i32 = arith.constant 0 : i32
    %c0_i32_0 = arith.constant 0 : i32
    %c0_i32_1 = arith.constant 0 : i32
    return %c0_i32, %c0_i32_0 : i32, i32
  }
  func.func @transform_5(%arg0: i32) -> (i32, i32) {
    %c0_i32 = arith.constant 0 : i32
    %c0_i32_0 = arith.constant 0 : i32
    %c0_i32_1 = arith.constant 0 : i32
    return %c0_i32, %c0_i32_0 : i32, i32
  }
  func.func @transform_6(%arg0: i32) -> (i32, i32) {
    %c0_i32 = arith.constant 0 : i32
    %c0_i32_0 = arith.constant 0 : i32
    %c0_i32_1 = arith.constant 0 : i32
    return %c0_i32, %c0_i32_0 : i32, i32
  }
  func.func @transform_7(%arg0: i32) -> (i32, i32, i32) {
    %c0_i32 = arith.constant 0 : i32
    %c0_i32_0 = arith.constant 0 : i32
    %c0_i32_1 = arith.constant 0 : i32
    %c0_i32_2 = arith.constant 0 : i32
    return %c0_i32, %c0_i32_0, %c0_i32_1 : i32, i32, i32
  }
  func.func @transform_8(%arg0: i32) -> (i32, i32, i32) {
    %c0_i32 = arith.constant 0 : i32
    %c0_i32_0 = arith.constant 0 : i32
    %c0_i32_1 = arith.constant 0 : i32
    %c0_i32_2 = arith.constant 0 : i32
    return %c0_i32, %c0_i32_0, %c0_i32_1 : i32, i32, i32
  }
  func.func @transform_9(%arg0: i32) -> (i32, i32, i32) {
    %c0_i32 = arith.constant 0 : i32
    %c0_i32_0 = arith.constant 0 : i32
    %c0_i32_1 = arith.constant 0 : i32
    %c0_i32_2 = arith.constant 0 : i32
    return %c0_i32, %c0_i32_0, %c0_i32_1 : i32, i32, i32
  }
  func.func @transform_10(%arg0: i32) -> (i32, i32, i32) {
    %c0_i32 = arith.constant 0 : i32
    %c0_i32_0 = arith.constant 0 : i32
    %c0_i32_1 = arith.constant 0 : i32
    %c0_i32_2 = arith.constant 0 : i32
    return %c0_i32, %c0_i32_0, %c0_i32_1 : i32, i32, i32
  }
  func.func @transform_11(%arg0: i32) -> (i32, i32) {
    %c0_i32 = arith.constant 0 : i32
    %c0_i32_0 = arith.constant 0 : i32
    %c0_i32_1 = arith.constant 0 : i32
    return %c0_i32, %c0_i32_0 : i32, i32
  }
  func.func @transform_12(%arg0: i32) -> (i32, i32) {
    %c0_i32 = arith.constant 0 : i32
    %c0_i32_0 = arith.constant 0 : i32
    %c0_i32_1 = arith.constant 0 : i32
    return %c0_i32, %c0_i32_0 : i32, i32
  }
  func.func @transform_13(%arg0: i32) -> (i32, i32) {
    %c0_i32 = arith.constant 0 : i32
    %c0_i32_0 = arith.constant 0 : i32
    return %arg0, %c0_i32 : i32, i32
  }
}

</mosaic_0001>

<bundles_post_ra>
// kernel: tpu_custom_call.1
= control target key start
LH: loop header
LB: loop body
LE: loop exit
PB: predicated region body
PF: predicated region fallthrough
CT: control target
= control target key end

     0   :  { %v15391_v0 = vmov 1   ;;  %v15382_v5 = vmov 0   ;;  %v15378_v8 = vmov 2   ;;  %s15362_s1 = inlined_call_operand.vmem [shape: f32[256,3], index: 1, kind: input, shape index: {}]   ;;  %s15363_s2 = inlined_call_operand.vmem [shape: f32[4,36], index: 2, kind: input, shape index: {}]   ;;  %s15364_s6 = inlined_call_operand.vmem [shape: bf16[36,64], index: 6, kind: input, shape index: {}]   ;;  %s15365_s3 = inlined_call_operand.vmem [shape: bf16[64,192], index: 3, kind: input, shape index: {}]   ;;  %s15366_s0 = inlined_call_operand.vmem [shape: bf16[256,64], index: 0, kind: input, shape index: {}]   ;;  %s15367_s5 = inlined_call_operand.vmem [shape: bf16[3,64], index: 5, kind: input, shape index: {}]   ;;  %s15368_s7 = inlined_call_operand.vmem [shape: bf16[3,64,64], index: 7, kind: input, shape index: {}]   ;;  %s15369_s4 = inlined_call_operand.vmem [shape: f32[1,192], index: 4, kind: input, shape index: {}]   ;;  %s15370_s9 = inlined_call_operand.vmem [shape: bf16[3,64,64], index: 9, kind: input, shape index: {}]   ;;  %s15371_s8 = inlined_call_operand.vmem [shape: f32[3,1,64], index: 8, kind: input, shape index: {}]   ;;  %s15372_s10 = inlined_call_operand.vmem [shape: f32[3,1,64], index: 10, kind: input, shape index: {}]   ;;  %s15373_s11 = inlined_call_operand.vmem [shape: bf16[64,32], index: 11, kind: input, shape index: {}]   ;;  %s15374_s12 = inlined_call_operand.vmem [shape: f32[1,32], index: 12, kind: input, shape index: {}]   ;;  %s15375_s13 = inlined_call_operand.vmem [shape: f32[256,32], index: 13, kind: output, shape index: {}]  }
   0x1   :  { %8790 = vset.pattern.permute.xlu0 %v15391_v0  ;;  %8788 = vset.pattern.permute.xlu1 %v15391_v0  ;;  %v59_v1 = vld [vmem:[%s15362_s1 + $0x70] sm:$0xff]  ;;  %v57_v2 = vld [vmem:[%s15362_s1 + $0x60] sm:$0xff]  ;;  %v62_v3 = vld [vmem:[%s15362_s1 + $0x88] sm:$0xff] }
   0x2   :  { %332 = vperm.xlu0 %8790, %v59_v1   ;;  %324 = vperm.xlu1 %8788, %v57_v2   ;;  %v58_v4 = vld [vmem:[%s15362_s1 + $0x68] sm:$0xff]  ;;  %v63_v6 = vld [vmem:[%s15362_s1 + $0x90] sm:$0xff]  ;;  %v60_v7 = vld [vmem:[%s15362_s1 + $0x78] sm:$0xff] }
   0x3   :  { %4318 = vmatprep.mubr.bf16.mxu0 %v15382_v5  ;;  %v61_v9 = vld [vmem:[%s15362_s1 + $0x80] sm:$0xff]  ;;  %v64_v10 = vld [vmem:[%s15362_s1 + $0x98] sm:$0xff]  ;;  %v66_v11 = vld [vmem:[%s15362_s1 + $0xa8] sm:$0xff] }
   0x4   :  { %v69_v12 = vld [vmem:[%s15362_s1 + $0xc0] sm:$0xff]  ;;  %v9321_v13 = vld [vmem:[%s15362_s1 + $0xd8] sm:$0xff]  ;;  %v9328_v14 = vld [vmem:[%s15362_s1 + $0xe8] sm:$0xff] }
   0x5   :  { %v9335_v15 = vld [vmem:[%s15362_s1] sm:$0xff]  ;;  %v9342_v16 = vld [vmem:[%s15362_s1 + $0x18] sm:$0xff]  ;;  %v9348_v17 = vld [vmem:[%s15362_s1 + $0x28] sm:$0xff] }
   0x6   :  { %344 = vperm.xlu0 %8790, %v62_v3   ;;  %328 = vperm.xlu1 %8788, %v58_v4   ;;  %15588 = vst [vmem:[#allocation2_spill] sm:$0xff] %v9342_v16  ;;  %v65_v18 = vld [vmem:[%s15362_s1 + $0xa0] sm:$0xff]  ;;  %v67_v19 = vld [vmem:[%s15362_s1 + $0xb0] sm:$0xff]  ;;  %v68_v20 = vld [vmem:[%s15362_s1 + $0xb8] sm:$0xff] }
   0x7   :  { %v9371_v21 = vld [vmem:[%s15362_s1 + $0xf0] sm:$0xff]  ;;  %v70_v23 = vld [vmem:[%s15362_s1 + $0xc8] sm:$0xff]  ;;  %v9389_v24 = vld [vmem:[%s15362_s1 + $0x40] sm:$0xff] }
   0x8   :  { %v9380_v22 = vld [vmem:[%s15362_s1 + $0x30] sm:$0xff]  ;;  %v9405_v26 = vld [vmem:[%s15362_s1 + $0x8] sm:$0xff]  ;;  %v73_v32 = vld [vmem:[%s15362_s1 + $0xe0] sm:$0xff] }
   0x9   :  { %v71_v25 = vld [vmem:[%s15362_s1 + $0xd0] sm:$0xff]  ;;  %v76_v39 = vld [vmem:[%s15362_s1 + $0xf8] sm:$0xff]  ;;  %v9448_v41 = vld [vmem:[%s15363_s2 + $0x1] ss:$0 sm:$0xff] }
   0xa   :  { %348 = vperm.xlu0 %8790, %v63_v6   ;;  %8789 = vset.pattern.permute.xlu1 %v15382_v5  ;;  %v9412_v27 = vld [vmem:[%s15362_s1 + $0x10] sm:$0xff]  ;;  %v9453_v42 = vld [vmem:[%s15363_s2] ss:$0 sm:$0xff]  ;;  %v9465_v47 = vld [vmem:[%s15363_s2 + $0x2] ss:$0 sm:$0xff] }
   0xb   :  { %155 = vperm.xlu1 %8789, %v60_v7   ;;  %15589 = vst [vmem:[#allocation3_spill] sm:$0xff] %v9412_v27  ;;  %v9471_v51 = vld [vmem:[%s15363_s2 + $0x3] ss:$0 sm:$0xff] }
   0xe   :  { %8796 = vset.pattern.permute.xlu0 %v15378_v8 }
   0xf   :  { %525 = vperm.xlu0 %8796, %v58_v4   ;;  %8791 = vset.pattern.permute.xlu1 %v15391_v0 }
  0x10   :  { %336 = vperm.xlu1 %8791, %v60_v7  }
  0x13   :  { %537 = vperm.xlu0 %8796, %v61_v9  }
  0x14   :  { %8792 = vset.pattern.permute.xlu1 %v15378_v8 }
  0x15   :  { %521 = vperm.xlu1 %8792, %v57_v2  }
  0x17   :  { %549 = vperm.xlu0 %8796, %v64_v10  }
  0x19   :  { %529 = vperm.xlu1 %8792, %v59_v1  }
  0x1b   :  { %557 = vperm.xlu0 %8796, %v66_v11  }
  0x1d   :  { %533 = vperm.xlu1 %8792, %v60_v7  }
  0x1f   :  { %569 = vperm.xlu0 %8796, %v69_v12  }
  0x21   :  { %8793 = vset.pattern.permute.xlu1 %v15382_v5 }
  0x22   :  { %165 = vperm.xlu1 %8793, %v62_v3  }
  0x23   :  { %581 = vperm.xlu0 %8796, %v9321_v13  }
  0x26   :  { %8794 = vset.pattern.permute.xlu1 %v15391_v0 }
  0x27   :  { %589 = vperm.xlu0 %8796, %v9328_v14   ;;  %340 = vperm.xlu1 %8794, %v61_v9  }
  0x2b   :  { %8795 = vset.pattern.permute.xlu1 %v15382_v5  ;;  %473 = vperm.xlu0 %8796, %v9335_v15  }
  0x2c   :  { %170 = vperm.xlu1 %8795, %v63_v6  }
  0x2f   :  { %485 = vperm.xlu0 %8796, %v9342_v16  }
  0x30   :  { %175 = vperm.xlu1 %8795, %v64_v10  }
  0x33   :  { %493 = vperm.xlu0 %8796, %v9348_v17  }
  0x34   :  { %8797 = vset.pattern.permute.xlu1 %v15391_v0 }
  0x35   :  { %352 = vperm.xlu1 %8797, %v64_v10   ;;  %v15384_v10 = vmov 683565275  }
  0x37   :  { %8824 = vset.pattern.permute.xlu0 %v15382_v5 }
  0x38   :  { %140 = vperm.xlu0 %8824, %v57_v2  }
  0x39   :  { %8798 = vset.pattern.permute.xlu1 %v15378_v8 }
  0x3a   :  { %541 = vperm.xlu1 %8798, %v62_v3  }
  0x3c   :  { %145 = vperm.xlu0 %8824, %v58_v4  }
  0x3e   :  { %545 = vperm.xlu1 %8798, %v63_v6  }
  0x40   :  { %150 = vperm.xlu0 %8824, %v59_v1  }
  0x42   :  { %8799 = vset.pattern.permute.xlu1 %v15382_v5 }
  0x43   :  { %180 = vperm.xlu1 %8799, %v65_v18  }
  0x44   :  { %160 = vperm.xlu0 %8824, %v61_v9  }
  0x47   :  { %8800 = vset.pattern.permute.xlu1 %v15391_v0 }
  0x48   :  { %356 = vperm.xlu1 %8800, %v65_v18   ;;  %185 = vperm.xlu0 %8824, %v66_v11  }
  0x4c   :  { %360 = vperm.xlu1 %8800, %v66_v11   ;;  %190 = vperm.xlu0 %8824, %v67_v19  }
  0x50   :  { %8801 = vset.pattern.permute.xlu1 %v15382_v5  ;;  %200 = vperm.xlu0 %8824, %v69_v12  }
  0x51   :  { %195 = vperm.xlu1 %8801, %v68_v20  }
  0x54   :  { %225 = vperm.xlu0 %8824, %v9328_v14  }
  0x55   :  { %8802 = vset.pattern.permute.xlu1 %v15391_v0 }
  0x56   :  { %368 = vperm.xlu1 %8802, %v68_v20  }
  0x58   :  { %230 = vperm.xlu0 %8824, %v9371_v21  }
  0x5a   :  { %8803 = vset.pattern.permute.xlu1 %v15378_v8 }
  0x5b   :  { %553 = vperm.xlu1 %8803, %v65_v18   ;;  %v15386_v18 = vmov 2131351028  }
  0x5c   :  { %80 = vperm.xlu0 %8824, %v9335_v15  }
  0x5f   :  { %561 = vperm.xlu1 %8803, %v67_v19  }
  0x60   :  { %105 = vperm.xlu0 %8824, %v9348_v17  }
  0x63   :  { %565 = vperm.xlu1 %8803, %v68_v20  }
  0x64   :  { %110 = vperm.xlu0 %8824, %v9380_v22  }
  0x67   :  { %8804 = vset.pattern.permute.xlu1 %v15382_v5 }
  0x68   :  { %205 = vperm.xlu1 %8804, %v70_v23   ;;  %120 = vperm.xlu0 %8824, %v9389_v24  }
  0x6c   :  { %8805 = vset.pattern.permute.xlu1 %v15391_v0  ;;  %8825 = vset.pattern.permute.xlu0 %v15391_v0 }
  0x6d   :  { %372 = vperm.xlu1 %8805, %v69_v12   ;;  %364 = vperm.xlu0 %8825, %v67_v19   ;;  %v15380_v12 = vmov 2475754826  }
  0x71   :  { %8806 = vset.pattern.permute.xlu1 %v15382_v5  ;;  %376 = vperm.xlu0 %8825, %v70_v23  }
  0x72   :  { %210 = vperm.xlu1 %8806, %v71_v25  }
  0x75   :  { %380 = vperm.xlu0 %8825, %v71_v25  }
  0x76   :  { %215 = vperm.xlu1 %8806, %v9321_v13  }
  0x79   :  { %396 = vperm.xlu0 %8825, %v9371_v21  }
  0x7a   :  { %8807 = vset.pattern.permute.xlu1 %v15391_v0 }
  0x7b   :  { %384 = vperm.xlu1 %8807, %v9321_v13  }
  0x7d   :  { %280 = vperm.xlu0 %8825, %v9405_v26  }
  0x7f   :  { %8808 = vset.pattern.permute.xlu1 %v15378_v8 }
  0x80   :  { %573 = vperm.xlu1 %8808, %v70_v23  }
  0x81   :  { %v9415_v28 = vpop.permute.xlu1 %324  ;;  %v9417_v29 = vpop.permute.xlu0 %332  ;;  %284 = vperm.xlu0 %8825, %v9412_v27  }
  0x84   :  { %577 = vperm.xlu1 %8808, %v71_v25  }
  0x85   :  { %v9420_v30 = vpop.permute.xlu1 %328  ;;  %v9422_v31 = vpop.permute.xlu0 %344  ;;  %300 = vperm.xlu0 %8825, %v9380_v22  }
  0x88   :  { %8809 = vset.pattern.permute.xlu1 %v15382_v5 }
  0x89   :  { %220 = vperm.xlu1 %8809, %v73_v32   ;;  %v9429_v33 = vpop.permute.xlu0 %348 }
  0x8a   :  { %v156_v34 = vpop.permute.xlu1 %155 }
  0x8b   :  { %v257_v45 = vmul.f32 %v9453_v42, %v156_v34 }
  0x8d   :  { %8810 = vset.pattern.permute.xlu1 %v15391_v0 }
  0x8e   :  { %388 = vperm.xlu1 %8810, %v73_v32   ;;  %v9432_v35 = vpop.permute.xlu0 %525 }
  0x8f   :  { %v337_v36 = vpop.permute.xlu1 %336 }
  0x90   :  { %v422_v44 = vmul.f32 %v9448_v41, %v337_v36 }
  0x92   :  { %392 = vperm.xlu1 %8810, %v9328_v14   ;;  %v9435_v37 = vpop.permute.xlu0 %537  ;;  %v454_v49 = vadd.f32 %v422_v44, %v257_v45  ;;  %v9512_v45 = vld [vmem:[%s15362_s1 + $0x48] sm:$0xff] }
  0x93   :  { %312 = vperm.xlu0 %8825, %v9512_v45  }
  0x94   :  { %v9437_v38 = vpop.permute.xlu1 %521 }
  0x96   :  { %8811 = vset.pattern.permute.xlu1 %v15382_v5  ;;  %v9443_v40 = vpop.permute.xlu0 %549 }
  0x97   :  { %235 = vperm.xlu1 %8811, %v76_v39  }
  0x98   :  { %v9455_v43 = vpop.permute.xlu1 %529 }
  0x9a   :  { %v9459_v46 = vpop.permute.xlu0 %557 }
  0x9b   :  { %8812 = vset.pattern.permute.xlu1 %v15391_v0 }
  0x9c   :  { %400 = vperm.xlu1 %8812, %v76_v39   ;;  %v534_v48 = vpop.permute.xlu1 %533 }
  0x9d   :  { %v619_v50 = vmul.f32 %v9465_v47, %v534_v48 }
  0x9e   :  { %v9477_v54 = vpop.permute.xlu0 %569 }
  0x9f   :  { %v651_v52 = vadd.f32 %v619_v50, %v454_v49 }
  0xa0   :  { %8813 = vset.pattern.permute.xlu1 %v15378_v8 }
  0xa1   :  { %v9475_v53 = vadd.f32 %v9471_v51, %v651_v52  ;;  %585 = vperm.xlu1 %8813, %v73_v32   ;;  %v166_v55 = vpop.permute.xlu1 %165  ;;  %v15416_v32 = vmov 920167782  }
  0xa2   :  { %v9483_v60 = vpop.permute.xlu0 %581 }
  0xa3   :  { %15590 = vst [vmem:[#allocation4_spill] sm:$0xff] %v9475_v53  ;;  %v2268_v56 = vand.u32 2139095040, %v9475_v53  ;;  %v15377_v62 = vand.u32 2147483647, %v9475_v53 }
  0xa5   :  { %v2269_v57 = vshrl.u32 %v2268_v56, 23  ;;  %593 = vperm.xlu1 %8813, %v9371_v21   ;;  %v2272_v4 = vand.u32 8388607, %v15377_v62  ;;  %v15388_v21 = vmov 2102212464  }
  0xa6   :  { %v9481_v58 = vpop.permute.xlu1 %340  ;;  %v9488_v3 = vpop.permute.xlu0 %589 }
  0xa7   :  { %v7723_v59 = vadd.s32 4294967169, %v2269_v57  ;;  %v2273_v48 = vor.u32 8388608, %v2272_v4 }
  0xa9   :  { %v2275_v61 = vadd.s32 1, %v7723_v59  ;;  %597 = vperm.xlu1 %8813, %v76_v39   ;;  %v15403_v39 = vmov 1326507024  }
  0xaa   :  { %v9514_v56 = vpop.permute.xlu0 %473 }
  0xab   :  { %vm2276_vm0 = vcmp.gt.s32.totalorder %v2275_v61, 0  ;;  %v9486_v63 = vpop.permute.xlu1 %170 }
  0xac   :  { %v2277_v1 = vsel %vm2276_vm0, %v2275_v61, 0 }
  0xad   :  { %v2279_v2 = vand.u32 31, %v2277_v1  ;;  %8814 = vset.pattern.permute.xlu1 %v15382_v5  ;;  %v9496_v9 = vshrl.u32 %v2277_v1, 5  ;;  %v424_v1 = vmul.f32 %v9448_v41, %v9422_v31  ;;  %v9535_v31 = vld [vmem:[%s15362_s1 + $0x50] sm:$0xff] }
  0xae   :  { %85 = vperm.xlu1 %8814, %v9405_v26   ;;  %316 = vperm.xlu0 %8825, %v9535_v31  }
  0xaf   :  { %v2280_v6 = vsub.s32 32, %v2279_v2  ;;  %v9494_v7 = vpop.permute.xlu1 %175  ;;  %v2282_v11 = vshll.u32 %v15384_v10, %v2279_v2  ;;  %v2285_v13 = vshll.u32 %v15380_v12, %v2279_v2  ;;  %v2288_v20 = vshll.u32 %v15386_v18, %v2279_v2 }
  0xb0   :  { %v2291_v25 = vshll.u32 %v15388_v21, %v2279_v2  ;;  %v2294_v36 = vshll.u32 %v15416_v32, %v2279_v2  ;;  %vm2297_vm1 = vcmp.lt.s32.totalorder %v9496_v9, 1  ;;  %vm2300_vm2 = vcmp.lt.s32.totalorder %v9496_v9, 4 }
  0xb1   :  { %v2283_v14 = vshrl.u32 %v15380_v12, %v2280_v6  ;;  %v2286_v19 = vshrl.u32 %v15386_v18, %v2280_v6  ;;  %v2289_v23 = vshrl.u32 %v15388_v21, %v2280_v6  ;;  %v2292_v34 = vshrl.u32 %v15416_v32, %v2280_v6 }
  0xb2   :  { %v2295_v44 = vshrl.u32 %v15403_v39, %v2280_v6  ;;  %8815 = vset.pattern.permute.xlu1 %v15391_v0  ;;  %vm2299_vm3 = vcmp.lt.s32.totalorder %v9496_v9, 3  ;;  %vm2298_vm4 = vcmp.lt.s32.totalorder %v9496_v9, 2  ;;  %8830 = vset.pattern.permute.xlu0 %v15378_v8 }
  0xb3   :  { %v2284_v49 = vor.u32 %v2283_v14, %v2282_v11  ;;  %v2287_v50 = vor.u32 %v2286_v19, %v2285_v13  ;;  %v2290_v52 = vor.u32 %v2289_v23, %v2288_v20  ;;  %276 = vperm.xlu1 %8815, %v9335_v15   ;;  %v2293_v57 = vor.u32 %v2292_v34, %v2291_v25 }
  0xb4   :  { %v2296_v59 = vor.u32 %v2295_v44, %v2294_v36  ;;  %v353_v61 = vpop.permute.xlu1 %352  ;;  %v259_v13 = vmul.f32 %v9453_v42, %v166_v55  ;;  %v2313_v20 = vshll.u32 %v2273_v48, 8  ;;  %v9552_v36 = vpop.permute.xlu0 %485  ;;  %505 = vperm.xlu0 %8830, %v9389_v24  }
  0xb5   :  { %v2305_v2 = vsel %vm2297_vm1, %v2284_v49, %v2287_v50  ;;  %v2309_v4 = vsel %vm2297_vm1, %v2287_v50, %v2290_v52  ;;  %v2306_v15 = vsel %vm2300_vm2, %v2293_v57, 920167782 }
  0xb6   :  { %v2310_v11 = vsel %vm2300_vm2, %v2296_v59, 1326507024  ;;  %v2307_v14 = vsel %vm2299_vm3, %v2290_v52, %v2306_v15  ;;  %v456_v59 = vadd.f32 %v424_v1, %v259_v13  ;;  %v426_v1 = vmul.f32 %v9448_v41, %v353_v61 }
  0xb7   :  { %v2311_v19 = vsel %vm2299_vm3, %v2293_v57, %v2310_v11  ;;  %8816 = vset.pattern.permute.xlu1 %v15382_v5  ;;  %v2308_v23 = vsel %vm2298_vm4, %v2305_v2, %v2307_v14  ;;  %v2281_v11 = vshrl.u32 %v15384_v10, %v2280_v6  ;;  %v261_v6 = vmul.f32 %v9453_v42, %v9494_v7 }
  0xb8   :  { %v2312_v55 = vsel %vm2298_vm4, %v2309_v4, %v2311_v19  ;;  %90 = vperm.xlu1 %8816, %v9412_v27   ;;  %v9548_v25 = vmul.u32.u64.low %v2313_v20, %v2308_v23  ;;  %v9549_v34 = vmul.u32.u64.high %v2313_v20, %v2308_v23, %v9548_v25  ;;  %v2302_v4 = vsel %vm2300_vm2, %v2290_v52, 2102212464  ;;  %v9568_v19 = vpop.permute.xlu0 %493 }
  0xb9   :  { %v542_v44 = vpop.permute.xlu1 %541  ;;  %v9555_v48 = vmul.u32.u64.low %v2313_v20, %v2312_v55  ;;  %v9556_v57 = vmul.u32.u64.high %v2313_v20, %v2312_v55, %v9555_v48  ;;  %15592 = vst [vmem:[#allocation6_spill] sm:$0xff] %v9568_v19  ;;  %v2301_v13 = vsel %vm2297_vm1, %v2281_v11, %v2284_v49  ;;  %v2303_v23 = vsel %vm2299_vm3, %v2287_v50, %v2302_v4 }
  0xba   :  { %v621_v2 = vmul.f32 %v9465_v47, %v542_v44  ;;  %v2323_v52 = vadd.s32 1, %v9549_v34  ;;  %v623_v49 = vmul.f32 %v9465_v47, %v9443_v40  ;;  %v2304_v50 = vsel %vm2298_vm4, %v2301_v13, %v2303_v23 }
  0xbb   :  { %vm2322_vm5 = vc.u32 %v9556_v57, %v9548_v25  ;;  %v458_v61 = vadd.f32 %v426_v1, %v261_v6  ;;  %v2320_v4 = vmul.u32 %v2313_v20, %v2304_v50  ;;  %v260_v11 = vmul.f32 %v9453_v42, %v9486_v63 }
  0xbc   :  { %v653_v15 = vadd.f32 %v621_v2, %v456_v59  ;;  %95 = vperm.xlu1 %8816, %v9342_v16   ;;  %v2324_v48 = vsel %vm2322_vm5, %v2323_v52, %v9549_v34  ;;  %v141_v59 = vpop.permute.xlu0 %140  ;;  %v9610_v50 = vmul.f32 %v9448_v41, %v9417_v29 }
  0xbd   :  { %v546_v7 = vpop.permute.xlu1 %545  ;;  %v655_v40 = vadd.f32 %v623_v49, %v458_v61  ;;  %v2325_v1 = vadd.s32 %v2324_v48, %v2320_v4  ;;  %v419_v49 = vmul.f32 %v9448_v41, %v9415_v28  ;;  %v9616_v48 = vmul.f32 %v9465_v47, %v9432_v35 }
  0xbe   :  { %v9565_v14 = vadd.f32 %v9471_v51, %v653_v15  ;;  %v425_v15 = vmul.f32 %v9448_v41, %v9429_v33  ;;  %v622_v13 = vmul.f32 %v9465_v47, %v546_v7  ;;  %v254_v33 = vmul.f32 %v9453_v42, %v141_v59 }
  0xbf   :  { %v9598_v52 = vadd.f32 %v9471_v51, %v655_v40  ;;  %v2326_v6 = vadd.s32 536870912, %v2325_v1  ;;  %v616_v59 = vmul.f32 %v9465_v47, %v9437_v38 }
  0xc0   :  { %15591 = vst [vmem:[#allocation5_spill] sm:$0xff] %v9565_v14  ;;  %8817 = vset.pattern.permute.xlu1 %v15391_v0  ;;  %v2476_v55 = vand.u32 2139095040, %v9565_v14  ;;  %v457_v34 = vadd.f32 %v425_v15, %v260_v11  ;;  %v15376_v23 = vand.u32 2147483647, %v9565_v14  ;;  %v146_v63 = vpop.permute.xlu0 %145  ;;  %v451_v29 = vadd.f32 %v419_v49, %v254_v33 }
  0xc1   :  { %288 = vperm.xlu1 %8817, %v9342_v16   ;;  %15593 = vst [vmem:[#allocation7_spill] sm:$0xff] %v9598_v52  ;;  %v2684_v28 = vand.u32 2139095040, %v9598_v52  ;;  %v255_v15 = vmul.f32 %v9453_v42, %v146_v63 }
  0xc2   :  { %v2477_v44 = vshrl.u32 %v2476_v55, 23  ;;  %v9604_v55 = vld [vmem:[%s15362_s1 + $0x20] sm:$0xff] }
  0xc4   :  { %v7731_v2 = vadd.s32 4294967169, %v2477_v44  ;;  %v420_v44 = vmul.f32 %v9448_v41, %v9420_v30  ;;  %v9626_v30 = vshrl.u32 %v2326_v6, 30 }
  0xc5   :  { %8818 = vset.pattern.permute.xlu1 %v15378_v8 }
  0xc6   :  { %477 = vperm.xlu1 %8818, %v9405_v26   ;;  %v2483_v9 = vadd.s32 1, %v7731_v2  ;;  %v654_v26 = vadd.f32 %v622_v13, %v457_v34  ;;  %v2480_v2 = vand.u32 8388607, %v15376_v23  ;;  %15594 = vst [vmem:[#allocation8_spill] sm:$0xff] %v9626_v30  ;;  %v151_v34 = vpop.permute.xlu0 %150  ;;  %v648_v23 = vadd.f32 %v616_v59, %v451_v29 }
  0xc8   :  { %vm2484_vm6 = vcmp.gt.s32.totalorder %v2483_v9, 0  ;;  %v9631_v38 = vadd.f32 %v9471_v51, %v654_v26  ;;  %v2481_v33 = vor.u32 8388608, %v2480_v2 }
  0xc9   :  { %v2485_v20 = vsel %vm2484_vm6, %v2483_v9, 0 }
  0xca   :  { %481 = vperm.xlu1 %8818, %v9412_v27   ;;  %v2487_v61 = vand.u32 31, %v2485_v20  ;;  %15595 = vst [vmem:[#allocation9_spill] sm:$0xff] %v9631_v38  ;;  %v2486_v63 = vshrl.u32 %v2485_v20, 5  ;;  %v2580_v59 = vand.u32 2139095040, %v9631_v38  ;;  %v2521_v29 = vshll.u32 %v2481_v33, 8 }
  0xcc   :  { %v2488_v7 = vsub.s32 32, %v2487_v61  ;;  %v2490_v35 = vshll.u32 %v15384_v10, %v2487_v61  ;;  %v2493_v4 = vshll.u32 %v15380_v12, %v2487_v61  ;;  %v2496_v9 = vshll.u32 %v15386_v18, %v2487_v61 }
  0xcd   :  { %v2499_v6 = vshll.u32 %v15388_v21, %v2487_v61  ;;  %v452_v10 = vadd.f32 %v420_v44, %v255_v15  ;;  %v2502_v20 = vshll.u32 %v15416_v32, %v2487_v61  ;;  %vm2505_vm7 = vcmp.lt.s32.totalorder %v2486_v63, 1 }
  0xce   :  { %8819 = vset.pattern.permute.xlu1 %v15382_v5  ;;  %v2491_v11 = vshrl.u32 %v15380_v12, %v2488_v7  ;;  %v2494_v40 = vshrl.u32 %v15386_v18, %v2488_v7  ;;  %v2497_v13 = vshrl.u32 %v15388_v21, %v2488_v7  ;;  %v2500_v49 = vshrl.u32 %v15416_v32, %v2488_v7 }
  0xcf   :  { %100 = vperm.xlu1 %8819, %v9604_v55   ;;  %v2328_v12 = vshll.u32 %v9626_v30, 30  ;;  %v256_v18 = vmul.f32 %v9453_v42, %v151_v34  ;;  %v2503_v2 = vshrl.u32 %v15403_v39, %v2488_v7  ;;  %v15390_v21 = vand.u32 2147483647, %v9631_v38 }
  0xd0   :  { %v2492_v62 = vor.u32 %v2491_v11, %v2490_v35  ;;  %v2495_v8 = vor.u32 %v2494_v40, %v2493_v4  ;;  %v2498_v26 = vor.u32 %v2497_v13, %v2496_v9  ;;  %v2501_v5 = vor.u32 %v2500_v49, %v2499_v6 }
  0xd1   :  { %vm2507_vm8 = vcmp.lt.s32.totalorder %v2486_v63, 3  ;;  %vm2508_vm9 = vcmp.lt.s32.totalorder %v2486_v63, 4  ;;  %v2504_v35 = vor.u32 %v2503_v2, %v2502_v20  ;;  %v9648_v11 = vsub.s32 %v2325_v1, %v2328_v12  ;;  %v9661_v1 = vld [vmem:[%s15362_s1 + $0x38] sm:$0xff] }
  0xd2   :  { %v2510_v4 = vsel %vm2508_vm9, %v2498_v26, 2102212464  ;;  %v2513_v44 = vsel %vm2505_vm7, %v2492_v62, %v2495_v8  ;;  %v2514_v15 = vsel %vm2508_vm9, %v2501_v5, 920167782  ;;  %v15596_v40 = vmov 683565275  }
  0xd3   :  { %8820 = vset.pattern.permute.xlu1 %v15391_v0  ;;  %v2489_v9 = vshrl.u32 %v15596_v40, %v2488_v7  ;;  %vm2506_vm10 = vcmp.lt.s32.totalorder %v2486_v63, 2  ;;  %v2515_v61 = vsel %vm2507_vm8, %v2498_v26, %v2514_v15  ;;  %v2517_v34 = vsel %vm2505_vm7, %v2495_v8, %v2498_v26 }
  0xd4   :  { %292 = vperm.xlu1 %8820, %v9604_v55   ;;  %v2516_v13 = vsel %vm2506_vm10, %v2513_v44, %v2515_v61  ;;  %v2518_v6 = vsel %vm2508_vm9, %v2504_v35, 1326507024  ;;  %v2581_v33 = vshrl.u32 %v2580_v59, 23  ;;  %v2685_v49 = vshrl.u32 %v2684_v28, 23  ;;  %v161_v61 = vpop.permute.xlu0 %160 }
  0xd5   :  { %v2509_v20 = vsel %vm2505_vm7, %v2489_v9, %v2492_v62  ;;  %v2511_v2 = vsel %vm2507_vm8, %v2495_v8, %v2510_v4  ;;  %v2519_v12 = vsel %vm2507_vm8, %v2501_v5, %v2518_v6  ;;  %v2331_v62 = vsub.s32 0, %v9648_v11 }
  0xd6   :  { %v2520_v7 = vsel %vm2506_vm10, %v2517_v34, %v2519_v12  ;;  %v9667_v26 = vmul.u32.u64.low %v2521_v29, %v2516_v13  ;;  %v9668_v35 = vmul.u32.u64.high %v2521_v29, %v2516_v13, %v9667_v26  ;;  %v2584_v5 = vand.u32 8388607, %v15390_v21 }
  0xd7   :  { %v9672_v28 = vmul.u32.u64.low %v2521_v29, %v2520_v7  ;;  %v9673_v8 = vmul.u32.u64.high %v2521_v29, %v2520_v7, %v9672_v28  ;;  %v15598_v59 = vmov 0   ;;  %v2512_v4 = vsel %vm2506_vm10, %v2509_v20, %v2511_v2 }
  0xd8   :  { %296 = vperm.xlu1 %8820, %v9348_v17   ;;  %v9664_v17 = vadd.f32 %v9471_v51, %v648_v23  ;;  %v7735_v23 = vadd.s32 4294967169, %v2581_v33  ;;  %v453_v44 = vadd.f32 %v9610_v50, %v256_v18  ;;  %v618_v15 = vmul.f32 %v9465_v47, %v9455_v43 }
  0xd9   :  { %v7739_v9 = vadd.s32 4294967169, %v2685_v49  ;;  %v2531_v34 = vadd.s32 1, %v9668_v35  ;;  %v649_v6 = vadd.f32 %v9616_v48, %v452_v10  ;;  %v9687_v63 = vmin.u32 %v2331_v62, %v9648_v11 }
  0xda   :  { %15597 = vst [vmem:[#allocation10_spill] sm:$0xff] %v9664_v17  ;;  %v1956_v13 = vand.u32 2139095040, %v9664_v17  ;;  %v2587_v12 = vadd.s32 1, %v7735_v23  ;;  %v2528_v33 = vmul.u32 %v2521_v29, %v2512_v4  ;;  %vm2530_vm11 = vc.u32 %v9673_v8, %v9667_v26 }
  0xdb   :  { %v2585_v18 = vor.u32 8388608, %v2584_v5  ;;  %v2532_v50 = vsel %vm2530_vm11, %v2531_v34, %v9668_v35  ;;  %v650_v43 = vadd.f32 %v618_v15, %v453_v44  ;;  %v258_v49 = vmul.f32 %v9453_v42, %v161_v61 }
  0xdc   :  { %8821 = vset.pattern.permute.xlu1 %v15598_v59  ;;  %vm2588_vm12 = vcmp.gt.s32.totalorder %v2587_v12, 0  ;;  %v9694_v20 = vadd.s32 1, %v7739_v9  ;;  %v9696_v10 = vadd.s32 %v2532_v50, %v2528_v33  ;;  %v9701_v29 = vmul.f32 %v9465_v47, %v9435_v37 }
  0xdd   :  { %115 = vperm.xlu1 %8821, %v9661_v1   ;;  %v2589_v48 = vsel %vm2588_vm12, %v2587_v12, 0  ;;  %v423_v2 = vmul.f32 %v9448_v41, %v9481_v58  ;;  %v2333_v35 = vclz %v9687_v63  ;;  %v9706_v62 = vshrl.u32 %v1956_v13, 23 }
  0xde   :  { %v2591_v7 = vand.u32 31, %v2589_v48  ;;  %v2534_v28 = vadd.s32 536870912, %v9696_v10  ;;  %v9710_v5 = vadd.f32 %v9471_v51, %v649_v6  ;;  %v9712_v23 = vshll.u32 %v2585_v18, 8 }
  0xdf   :  { %v9715_v44 = vadd.f32 %v9471_v51, %v650_v43  ;;  %v455_v37 = vadd.f32 %v423_v2, %v258_v49  ;;  %vm2692_vm13 = vcmp.gt.s32.totalorder %v9694_v20, 0  ;;  %v2590_v58 = vshrl.u32 %v2589_v48, 5 }
  0xe0   :  { %15599 = vst [vmem:[#allocation11_spill] sm:$0xff] %v9710_v5  ;;  %v2592_v4 = vsub.s32 32, %v2591_v7  ;;  %v2594_v15 = vshll.u32 %v15596_v40, %v2591_v7  ;;  %v15601_v9 = vmov 2475754826   ;;  %v15602_v13 = vmov 2131351028  }
  0xe1   :  { %8822 = vset.pattern.permute.xlu1 %v15391_v0  ;;  %15600 = vst [vmem:[#allocation12_spill] sm:$0xff] %v9715_v44  ;;  %v2597_v61 = vshll.u32 %v15601_v9, %v2591_v7  ;;  %v2600_v34 = vshll.u32 %v15602_v13, %v2591_v7  ;;  %v15603_v12 = vmov 2   ;;  %v9722_v6 = vshrl.u32 %v2534_v28, 30 }
  0xe2   :  { %304 = vperm.xlu1 %8822, %v9661_v1   ;;  %v2595_v63 = vshrl.u32 %v15601_v9, %v2592_v4  ;;  %v2598_v33 = vshrl.u32 %v15602_v13, %v2592_v4  ;;  %v15605_v18 = vmov 2102212464   ;;  %v2604_v49 = vshrl.u32 %v15416_v32, %v2592_v4 }
  0xe3   :  { %15604 = vst [vmem:[#allocation13_spill] sm:$0xff] %v9722_v6  ;;  %v2601_v50 = vshrl.u32 %v15605_v18, %v2592_v4  ;;  %v2603_v43 = vshll.u32 %v15605_v18, %v2591_v7  ;;  %v2606_v48 = vshll.u32 %v15416_v32, %v2591_v7  ;;  %v2607_v2 = vshrl.u32 %v15403_v39, %v2592_v4 }
  0xe4   :  { %v2596_v21 = vor.u32 %v2595_v63, %v2594_v15  ;;  %v2599_v0 = vor.u32 %v2598_v33, %v2597_v61  ;;  %v2164_v52 = vand.u32 2139095040, %v9715_v44  ;;  %vm2609_vm14 = vcmp.lt.s32.totalorder %v2590_v58, 1 }
  0xe5   :  { %v2602_v28 = vor.u32 %v2601_v50, %v2600_v34  ;;  %v2605_v30 = vor.u32 %v2604_v49, %v2603_v43  ;;  %v2608_v17 = vor.u32 %v2607_v2, %v2606_v48  ;;  %vm2612_vm15 = vcmp.lt.s32.totalorder %v2590_v58, 4 }
  0xe6   :  { %8823 = vset.pattern.permute.xlu1 %v15603_v12  ;;  %v2593_v38 = vshrl.u32 %v15596_v40, %v2592_v4  ;;  %v2617_v14 = vsel %vm2609_vm14, %v2596_v21, %v2599_v0  ;;  %v2536_v7 = vshll.u32 %v9722_v6, 30  ;;  %vm2611_vm0 = vcmp.lt.s32.totalorder %v2590_v58, 3 }
  0xe7   :  { %489 = vperm.xlu1 %8823, %v9604_v55   ;;  %v2614_v55 = vsel %vm2612_vm15, %v2602_v28, 2102212464  ;;  %v2621_v19 = vsel %vm2609_vm14, %v2599_v0, %v2602_v28  ;;  %v2618_v39 = vsel %vm2612_vm15, %v2605_v30, 920167782  ;;  %v2622_v15 = vsel %vm2612_vm15, %v2608_v17, 1326507024 }
  0xe8   :  { %vm2610_vm1 = vcmp.lt.s32.totalorder %v2590_v58, 2  ;;  %v2619_v61 = vsel %vm2611_vm0, %v2602_v28, %v2618_v39  ;;  %v2623_v34 = vsel %vm2611_vm0, %v2605_v30, %v2622_v15  ;;  %v2165_v63 = vshrl.u32 %v2164_v52, 23 }
  0xe9   :  { %v2613_v33 = vsel %vm2609_vm14, %v2593_v38, %v2596_v21  ;;  %v2615_v50 = vsel %vm2611_vm0, %v2599_v0, %v2614_v55  ;;  %v2620_v43 = vsel %vm2610_vm1, %v2617_v14, %v2619_v61  ;;  %v2624_v4 = vsel %vm2610_vm1, %v2621_v19, %v2623_v34 }
  0xea   :  { %v9739_v49 = vmul.u32.u64.low %v9712_v23, %v2624_v4  ;;  %v9740_v48 = vmul.u32.u64.high %v9712_v23, %v2624_v4, %v9739_v49  ;;  %v9750_v39 = vmul.f32 %v9465_v47, %v9459_v46  ;;  %v2060_v21 = vand.u32 2139095040, %v9710_v5 }
  0xeb   :  { %497 = vperm.xlu1 %8823, %v9380_v22   ;;  %v9743_v22 = vmul.u32.u64.low %v9712_v23, %v2620_v43  ;;  %v9744_v2 = vmul.u32.u64.high %v9712_v23, %v2620_v43, %v9743_v22  ;;  %v7719_v14 = vadd.s32 4294967169, %v2165_v63  ;;  %v9757_v19 = vmul.f32 %v9465_v47, %v9477_v54 }
  0xec   :  { %v2693_v52 = vsel %vm2692_vm13, %v9694_v20, 0  ;;  %v9763_v30 = vsub.s32 %v9696_v10, %v2536_v7  ;;  %v2616_v46 = vsel %vm2610_vm1, %v2613_v33, %v2615_v50  ;;  %v7725_v38 = vadd.s32 4294967294, %v2333_v35 }
  0xed   :  { %15606 = vst [vmem:[#allocation14_spill] sm:$0xff] %v9757_v19  ;;  %v2171_v17 = vadd.s32 1, %v7719_v14  ;;  %v652_v28 = vadd.f32 %v9701_v29, %v455_v37  ;;  %v9773_v54 = vmul.f32 %v9465_v47, %v9488_v3  ;;  %v7711_v55 = vadd.s32 4294967169, %v9706_v62  ;;  %v9783_v29 = vpop.permute.xlu1 %180 }
  0xee   :  { %vm2634_vm2 = vc.u32 %v9740_v48, %v9743_v22  ;;  %v2635_v20 = vadd.s32 1, %v9744_v2  ;;  %v9780_v10 = vand.u32 31, %v2693_v52  ;;  %v2632_v35 = vmul.u32 %v9712_v23, %v2616_v46 }
  0xef   :  { %501 = vperm.xlu1 %8823, %v9661_v1   ;;  %v9768_v1 = vmul.f32 %v9465_v47, %v9483_v60  ;;  %15608 = vst [vmem:[#allocation16_spill] sm:$0xff] %v9773_v54  ;;  %v2061_v60 = vshrl.u32 %v2060_v21, 23  ;;  %vm2172_vm3 = vcmp.gt.s32.totalorder %v2171_v17, 0  ;;  %v9788_v3 = vmul.f32 %v9465_v47, %v9514_v56 }
  0xf0   :  { %15609 = vst [vmem:[#allocation17_spill] sm:$0xff] %v9780_v10  ;;  %v2539_v62 = vsub.s32 0, %v9763_v30  ;;  %v2636_v37 = vsel %vm2634_vm2, %v2635_v20, %v9744_v2  ;;  %v2173_v58 = vsel %vm2172_vm3, %v2171_v17, 0  ;;  %vm7726_vm4 = vcmp.lt.s32.totalorder %v7725_v38, 0  ;;  %v56_v17 = vld [vmem:[%s15362_s1 + $0x58] sm:$0xff] }
  0xf1   :  { %15607 = vst [vmem:[#allocation15_spill] sm:$0xff] %v9768_v1  ;;  %15610 = vst [vmem:[#allocation18_spill] sm:$0xff] %v9788_v3  ;;  %v9792_v7 = vadd.s32 %v2636_v37, %v2632_v35  ;;  %v15405_v15 = vand.u32 2147483647, %v9715_v44  ;;  %v9796_v23 = vadd.f32 %v9471_v51, %v652_v28  ;;  %v9800_v61 = vadd.s32 %v9548_v25, %v9556_v57 }
  0xf2   :  { %v9804_v56 = vmul.f32 %v9465_v47, %v9552_v36  ;;  %v9806_v34 = vshrl.u32 %v2693_v52, 5  ;;  %v2175_v63 = vand.u32 31, %v2173_v58  ;;  %v9809_v33 = vsub.s32 32, %v9780_v10  ;;  %517 = vperm.xlu0 %8830, %v56_v17  }
  0xf3   :  { %8826 = vset.pattern.permute.xlu1 %v15598_v59  ;;  %15611 = vst [vmem:[#allocation19_spill] sm:$0xff] %v9796_v23  ;;  %v9811_v50 = vadd.s32 1, %v7711_v55  ;;  %v9813_v43 = vadd.s32 4294967169, %v2061_v60  ;;  %v2638_v4 = vadd.s32 536870912, %v9792_v7  ;;  %v15615_v49 = vmov 1  }
  0xf4   :  { %125 = vperm.xlu1 %8826, %v9512_v45   ;;  %15612 = vst [vmem:[#allocation20_spill] sm:$0xff] %v9804_v56  ;;  %15613 = vst [vmem:[#allocation21_spill] sm:$0xff] %v9806_v34  ;;  %v9817_v25 = vsel %vm7726_vm4, 0, %v7725_v38  ;;  %v9821_v36 = vshll.u32 %v15605_v18, %v9780_v10  ;;  %v9824_v57 = vmin.u32 %v2539_v62, %v9763_v30  ;;  %v2176_v2 = vsub.s32 32, %v2175_v63  ;;  %v9832_v38 = vpop.permute.xlu1 %356 }
  0xf5   :  { %15614 = vst [vmem:[#allocation22_spill] sm:$0xff] %v9809_v33  ;;  %v2168_v21 = vand.u32 8388607, %v15405_v15  ;;  %v2178_v14 = vshll.u32 %v15596_v40, %v2175_v63  ;;  %v2181_v52 = vshll.u32 %v15601_v9, %v2175_v63  ;;  %v2372_v46 = vand.u32 2139095040, %v9796_v23 }
  0xf6   :  { %v2179_v28 = vshrl.u32 %v15601_v9, %v2176_v2  ;;  %v2182_v55 = vshrl.u32 %v15602_v13, %v2176_v2  ;;  %v2185_v20 = vshrl.u32 %v15605_v18, %v2176_v2  ;;  %v9841_v60 = vshrl.u32 %v2638_v4, 30 }
  0xf7   :  { %v2174_v35 = vshrl.u32 %v2173_v58, 5  ;;  %v2187_v62 = vshll.u32 %v15605_v18, %v2175_v63  ;;  %v2188_v37 = vshrl.u32 %v15416_v32, %v2176_v2  ;;  %v9847_v0 = vshll.u32 %v15416_v32, %v9780_v10 }
  0xf8   :  { %8827 = vset.pattern.permute.xlu1 %v15615_v49  ;;  %15616 = vst [vmem:[#allocation23_spill] sm:$0xff] %v9841_v60  ;;  %v2180_v15 = vor.u32 %v2179_v28, %v2178_v14  ;;  %v2183_v27 = vor.u32 %v2182_v55, %v2181_v52  ;;  %v2341_v56 = vsub.s32 4294967266, %v9817_v25  ;;  %v2190_v4 = vshll.u32 %v15416_v32, %v2175_v63  ;;  %v9857_v28 = vpop.permute.xlu1 %360 }
  0xf9   :  { %308 = vperm.xlu1 %8827, %v9389_v24   ;;  %v2184_v24 = vshll.u32 %v15602_v13, %v2175_v63  ;;  %v2189_v3 = vor.u32 %v2188_v37, %v2187_v62  ;;  %v15617_v6 = vmov 1326507024   ;;  %v2541_v5 = vclz %v9824_v57 }
  0xfa   :  { %v2191_v58 = vshrl.u32 %v15617_v6, %v2176_v2  ;;  %v2169_v54 = vor.u32 8388608, %v2168_v21  ;;  %v2373_v44 = vshrl.u32 %v2372_v46, 23  ;;  %v2640_v14 = vshll.u32 %v9841_v60, 30 }
  0xfb   :  { %v2186_v16 = vor.u32 %v2185_v20, %v2184_v24  ;;  %vm2193_vm5 = vcmp.lt.s32.totalorder %v2174_v35, 1  ;;  %vm2196_vm6 = vcmp.lt.s32.totalorder %v2174_v35, 4  ;;  %vm2195_vm7 = vcmp.lt.s32.totalorder %v2174_v35, 3 }
  0xfc   :  { %v2192_v52 = vor.u32 %v2191_v58, %v2190_v4  ;;  %v2201_v63 = vsel %vm2193_vm5, %v2180_v15, %v2183_v27  ;;  %v2202_v24 = vsel %vm2196_vm6, %v2189_v3, 920167782  ;;  %v2177_v20 = vshrl.u32 %v15596_v40, %v2176_v2  ;;  %v9864_v58 = vpop.permute.xlu0 %185 }
  0xfd   :  { %8828 = vset.pattern.permute.xlu1 %v15598_v59  ;;  %v2198_v55 = vsel %vm2196_vm6, %v2186_v16, 2102212464  ;;  %vm2194_vm8 = vcmp.lt.s32.totalorder %v2174_v35, 2  ;;  %v2203_v57 = vsel %vm2195_vm7, %v2186_v16, %v2202_v24  ;;  %v2205_v21 = vsel %vm2193_vm5, %v2183_v27, %v2186_v16 }
  0xfe   :  { %130 = vperm.xlu1 %8828, %v9535_v31   ;;  %v2204_v46 = vsel %vm2194_vm8, %v2201_v63, %v2203_v57  ;;  %v2206_v62 = vsel %vm2196_vm6, %v2192_v52, 1326507024  ;;  %v2209_v37 = vshll.u32 %v2169_v54, 8  ;;  %v7727_v4 = vadd.s32 4294967169, %v2373_v44 }
  0xff   :  { %v9867_v10 = vsub.s32 %v9792_v7, %v2640_v14  ;;  %v2197_v32 = vsel %vm2193_vm5, %v2177_v20, %v2180_v15  ;;  %v2199_v2 = vsel %vm2195_vm7, %v2183_v27, %v2198_v55  ;;  %v2207_v59 = vsel %vm2195_vm7, %v2189_v3, %v2206_v62  ;;  %v9881_v7 = vpop.permute.xlu1 %195 }
 0x100   :  { %v2208_v24 = vsel %vm2194_vm8, %v2205_v21, %v2207_v59  ;;  %v9873_v16 = vmul.u32.u64.low %v2209_v37, %v2204_v46  ;;  %v9874_v60 = vmul.u32.u64.high %v2209_v37, %v2204_v46, %v9873_v16  ;;  %v2379_v52 = vadd.s32 1, %v7727_v4 }
 0x101   :  { %v2337_v44 = vsub.s32 32, %v9817_v25  ;;  %v2342_v54 = vadd.s32 127, %v2341_v56  ;;  %v9878_v63 = vmul.u32.u64.low %v2209_v37, %v2208_v24  ;;  %v9879_v57 = vmul.u32.u64.high %v2209_v37, %v2208_v24, %v9878_v63 }
 0x102   :  { %135 = vperm.xlu1 %8828, %v56_v17   ;;  %15618 = vst [vmem:[#allocation24_spill] sm:$0xff] %v9873_v16  ;;  %v15620_v27 = vmov 920167782   ;;  %vm1964_vm9 = vcmp.gt.s32.totalorder %v9811_v50, 0  ;;  %v9890_v59 = vadd.s32 1, %v9813_v43  ;;  %vm2380_vm10 = vcmp.gt.s32.totalorder %v2379_v52, 0  ;;  %v9901_v43 = vpop.permute.xlu0 %190 }
 0x103   :  { %15619 = vst [vmem:[#allocation25_spill] sm:$0xff] %v9879_v57  ;;  %v9886_v3 = vshrl.u32 %v15620_v27, %v9809_v33  ;;  %v7733_v15 = vadd.s32 4294967294, %v2541_v5  ;;  %v2200_v56 = vsel %vm2194_vm8, %v2197_v32, %v2199_v2  ;;  %v15621_v14 = vand.u32 2147483647, %v9796_v23 }
 0x104   :  { %v2381_v20 = vsel %vm2380_vm10, %v2379_v52, 0  ;;  %v2643_v21 = vsub.s32 0, %v9867_v10  ;;  %v2219_v46 = vadd.s32 1, %v9874_v60  ;;  %v9906_v32 = vshrl.u32 %v9800_v61, %v2337_v44 }
 0x105   :  { %v2376_v55 = vand.u32 8388607, %v15621_v14  ;;  %v2383_v62 = vand.u32 31, %v2381_v20  ;;  %v9911_v35 = vsel %vm1964_vm9, %v9811_v50, 0  ;;  %v2216_v4 = vmul.u32 %v2209_v37, %v2200_v56 }
 0x106   :  { %8829 = vset.pattern.permute.xlu1 %v15615_v49  ;;  %v9897_v49 = vshrl.u32 %v15617_v6, %v9809_v33  ;;  %vm2218_vm11 = vc.u32 %v9879_v57, %v9873_v16  ;;  %v262_v2 = vmul.f32 %v9453_v42, %v9783_v29  ;;  %vm7734_vm12 = vcmp.lt.s32.totalorder %v7733_v15, 0 }
 0x107   :  { %320 = vperm.xlu1 %8829, %v56_v17   ;;  %v2343_v17 = vshll.u32 %v2342_v54, 23  ;;  %v2384_v24 = vsub.s32 32, %v2383_v62  ;;  %v2220_v61 = vsel %vm2218_vm11, %v2219_v46, %v9874_v60  ;;  %v2377_v52 = vor.u32 8388608, %v2376_v55  ;;  %v9921_v54 = vpop.permute.xlu1 %368  ;;  %v9936_v46 = vpop.permute.xlu0 %200 }
 0x108   :  { %v427_v44 = vmul.f32 %v9448_v41, %v9832_v38  ;;  %v7736_v50 = vmin.u32 %v2643_v21, %v9867_v10  ;;  %v9925_v37 = vadd.s32 %v2220_v61, %v2216_v4  ;;  %v2389_v60 = vshll.u32 %v15601_v9, %v2383_v62 }
 0x109   :  { %v2387_v29 = vshrl.u32 %v15601_v9, %v2384_v24  ;;  %v2390_v63 = vshrl.u32 %v15602_v13, %v2384_v24  ;;  %v2392_v56 = vshll.u32 %v15602_v13, %v2383_v62  ;;  %v2393_v38 = vshrl.u32 %v15605_v18, %v2384_v24 }
 0x10a   :  { %v2222_v14 = vadd.s32 536870912, %v9925_v37  ;;  %v2382_v55 = vshrl.u32 %v2381_v20, 5  ;;  %v2396_v21 = vshrl.u32 %v15620_v27, %v2384_v24  ;;  %v9938_v4 = vor.u32 4788187, %v2343_v17 }
 0x10b   :  { %8831 = vset.pattern.permute.xlu1 %v15603_v12  ;;  %v2386_v12 = vshll.u32 %v15596_v40, %v2383_v62  ;;  %v2391_v5 = vor.u32 %v2390_v63, %v2389_v60  ;;  %v2394_v33 = vor.u32 %v2393_v38, %v2392_v56  ;;  %v2398_v1 = vshll.u32 %v15620_v27, %v2383_v62  ;;  %v554_v17 = vpop.permute.xlu1 %553 }
 0x10c   :  { %509 = vperm.xlu1 %8831, %v9512_v45   ;;  %v2395_v45 = vshll.u32 %v15605_v18, %v2383_v62  ;;  %v2399_v16 = vshrl.u32 %v15617_v6, %v2384_v24  ;;  %v459_v57 = vadd.f32 %v427_v44, %v262_v2  ;;  %v9944_v20 = vsel %vm7734_vm12, 0, %v7733_v15  ;;  %v9951_v44 = vpop.permute.xlu0 %225 }
 0x10d   :  { %v2388_v61 = vor.u32 %v2387_v29, %v2386_v12  ;;  %v2645_v19 = vclz %v7736_v50  ;;  %v2385_v18 = vshrl.u32 %v15596_v40, %v2384_v24  ;;  %v2417_v13 = vshll.u32 %v2377_v52, 8 }
 0x10e   :  { %v2397_v23 = vor.u32 %v2396_v21, %v2395_v45  ;;  %v9947_v9 = vshrl.u32 %v2222_v14, 30  ;;  %v2400_v29 = vor.u32 %v2399_v16, %v2398_v1  ;;  %vm2401_vm13 = vcmp.lt.s32.totalorder %v2382_v55, 1  ;;  %v8832_v1 = vld [vmem:[%s15364_s6] sm:$0xff]  }
 0x10f   :  { %vm2404_vm14 = vcmp.lt.s32.totalorder %v2382_v55, 4  ;;  %vm2403_vm15 = vcmp.lt.s32.totalorder %v2382_v55, 3  ;;  %v2409_v63 = vsel %vm2401_vm13, %v2388_v61, %v2391_v5  ;;  %vm2716_vm0 = vcmp.lt.s32.totalorder %v9806_v34, 4  ;;  %8609 = vmatprep.subr.bf16.mxu1 %v8832_v1 }
 0x110   :  { %513 = vperm.xlu1 %8831, %v9535_v31   ;;  %15622 = vst [vmem:[#allocation26_spill] sm:$0xff] %v9947_v9  ;;  %v2406_v31 = vsel %vm2404_vm14, %v2394_v33, 2102212464  ;;  %v2410_v62 = vsel %vm2404_vm14, %v2397_v23, 920167782  ;;  %vm2402_vm1 = vcmp.lt.s32.totalorder %v2382_v55, 2  ;;  %v2413_v2 = vsel %vm2401_vm13, %v2391_v5, %v2394_v33  ;;  %8612 = vmatpush3.bf16.msra.mxu1 %v8832_v1 }
 0x111   :  { %v2411_v15 = vsel %vm2403_vm15, %v2394_v33, %v2410_v62  ;;  %v624_v24 = vmul.f32 %v9465_v47, %v554_v17  ;;  %v2405_v16 = vsel %vm2401_vm13, %v2385_v18, %v2388_v61  ;;  %v2414_v50 = vsel %vm2404_vm14, %v2400_v29, 1326507024 }
 0x112   :  { %v2412_v52 = vsel %vm2402_vm1, %v2409_v63, %v2411_v15  ;;  %v263_v12 = vmul.f32 %v9453_v42, %v9864_v58  ;;  %v2407_v60 = vsel %vm2403_vm15, %v2391_v5, %v2406_v31  ;;  %v2415_v56 = vsel %vm2403_vm15, %v2397_v23, %v2414_v50 }
 0x113   :  { %v9962_v33 = vmul.u32.u64.low %v2417_v13, %v2412_v52  ;;  %v9963_v38 = vmul.u32.u64.high %v2417_v13, %v2412_v52, %v9962_v33  ;;  %v2549_v47 = vsub.s32 4294967266, %v9944_v20  ;;  %v2224_v14 = vshll.u32 %v9947_v9, 30 }
 0x114   :  { %v2416_v18 = vsel %vm2402_vm1, %v2413_v2, %v2415_v56  ;;  %v428_v45 = vmul.f32 %v9448_v41, %v9857_v28  ;;  %v7737_v42 = vadd.s32 4294967294, %v2645_v19  ;;  %v656_v23 = vadd.f32 %v624_v24, %v459_v57 }
 0x115   :  { %v9971_v58 = vmul.u32.u64.low %v2417_v13, %v2416_v18  ;;  %v9972_v5 = vmul.u32.u64.high %v2417_v13, %v2416_v18, %v9971_v58  ;;  %v9976_v21 = vor.u32 %v9886_v3, %v9821_v36  ;;  %v9979_v61 = vshrl.u32 %v9911_v35, 5  ;;  %v9992_v36 = vpop.permute.xlu0 %230 }
 0x116   :  { %v9982_v17 = vand.u32 31, %v9911_v35  ;;  %v2408_v29 = vsel %vm2402_vm1, %v2405_v16, %v2407_v60  ;;  %v15624_v41 = vshll.u32 %v9648_v11, %v9817_v25  ;;  %v2712_v28 = vor.u32 %v9897_v49, %v9847_v0  ;;  %v10002_v25 = vpop.permute.xlu1 %561  ;;  %v8833_v58 = vld [vmem:[%s15365_s3 + $0x4] ss:$8 sps:$4 sm:$0xff]  }
 0x117   :  { %15623 = vst [vmem:[#allocation27_spill] sm:$0xff] %v9976_v21  ;;  %v2427_v57 = vadd.s32 1, %v9963_v38  ;;  %v9995_v3 = vadd.f32 %v9471_v51, %v656_v23  ;;  %v2345_v35 = vand.u32 2147483647, %v9938_v4  ;;  %vm2068_vm2 = vcmp.gt.s32.totalorder %v9890_v59, 0  ;;  %4286 = vmatprep.subr.bf16.mxu0 %v8833_v58 }
 0x118   :  { %v2340_v19 = vor.u32 %v9906_v32, %v15624_v41  ;;  %v10000_v55 = vsub.s32 %v9925_v37, %v2224_v14  ;;  %v460_v11 = vadd.f32 %v428_v45, %v263_v12  ;;  %v2550_v32 = vadd.s32 127, %v2549_v47  ;;  %v10047_v45 = vld [vmem:[%s15363_s2 + $0x1] ss:$0 sm:$0xff]  ;;  %v10060_v41 = vld [vmem:[%s15363_s2 + $0x3] ss:$0 sm:$0xff] }
 0x119   :  { %15625 = vst [vmem:[#allocation28_spill] sm:$0xff] %v9995_v3  ;;  %vm7738_vm3 = vcmp.lt.s32.totalorder %v7737_v42, 0  ;;  %v2424_v0 = vmul.u32 %v2417_v13, %v2408_v29  ;;  %vm2426_vm4 = vc.u32 %v9972_v5, %v9962_v33  ;;  %v10009_v51 = vsel %vm2716_vm0, %v9976_v21, 920167782 }
 0x11a   :  { %15626 = vst [vmem:[#allocation29_spill] sm:$0xff] %v10009_v51  ;;  %v2545_v49 = vsub.s32 32, %v9944_v20  ;;  %v2428_v4 = vsel %vm2426_vm4, %v2427_v57, %v9963_v38  ;;  %v2788_v37 = vand.u32 2139095040, %v9995_v3  ;;  %v2347_v31 = vcvt.s32.f32 %v2340_v19  ;;  %v566_v38 = vpop.permute.xlu1 %565 }
 0x11b   :  { %v2529_v63 = vadd.s32 %v9667_v26, %v9673_v8  ;;  %v2069_v13 = vsel %vm2068_vm2, %v9890_v59, 0  ;;  %v10017_v62 = vadd.s32 %v2428_v4, %v2424_v0  ;;  %vm2267_vm5 = vcmp.lt.s32.totalorder %v9475_v53, 0  ;;  %v10029_v8 = vpop.permute.xlu0 %80  ;;  %v15632_v0 = vld [vmem:[#allocation6_spill] sm:$0xff] }
 0x11c   :  { %v10020_v15 = vsel %vm7738_vm3, 0, %v7737_v42  ;;  %v2227_v2 = vsub.s32 0, %v10000_v55  ;;  %v657_v24 = vadd.f32 %v9750_v39, %v460_v11  ;;  %v2789_v1 = vshrl.u32 %v2788_v37, 23  ;;  %v8835_v39 = vld [vmem:[%s15364_s6 + $0x8] sm:$0xff]   ;;  %v10078_v11 = vld [vmem:[%s15363_s2 + $0x2] ss:$0 sm:$0xff] }
 0x11d   :  { %v2348_v16 = vmul.f32 %v2347_v31, %v2345_v35  ;;  %v10026_v52 = vsel %vm2716_vm0, %v2712_v28, 1326507024  ;;  %v2551_v50 = vshll.u32 %v2550_v32, 23  ;;  %v2430_v26 = vadd.s32 536870912, %v10017_v62  ;;  %8610 = vmatprep.subr.bf16.mxu1 %v8835_v39 }
 0x11e   :  { %15627 = vst [vmem:[#allocation30_spill] sm:$0xff] %v10026_v52  ;;  %v10032_v59 = vsub.s32 32, %v9982_v17  ;;  %v2547_v12 = vshrl.u32 %v2529_v63, %v2545_v49  ;;  %v10034_v60 = vand.u32 31, %v2069_v13  ;;  %v7743_v56 = vadd.s32 4294967169, %v2789_v1  ;;  %8613 = vmatpush3.bf16.msra.mxu1 %v8835_v39 }
 0x11f   :  { %v10039_v47 = vshrl.u32 %v2069_v13, 5  ;;  %v2653_v14 = vsub.s32 4294967266, %v10020_v15  ;;  %v10042_v18 = vshrl.u32 %v2430_v26, 30  ;;  %v430_v42 = vmul.f32 %v10047_v45, %v9921_v54  ;;  %v8836_v54 = vld [vmem:[%s15365_s3] ss:$8 sps:$4 sm:$0xff]  }
 0x120   :  { %15628 = vst [vmem:[#allocation31_spill] sm:$0xff] %v10034_v60  ;;  %v2546_v23 = vshll.u32 %v9763_v30, %v9944_v20  ;;  %v7720_v29 = vmin.u32 %v2227_v2, %v10000_v55  ;;  %v10063_v19 = vadd.f32 %v10060_v41, %v657_v24  ;;  %v2795_v28 = vadd.s32 1, %v7743_v56  ;;  %v10071_v30 = vld [vmem:[%s15363_s2] ss:$0 sm:$0xff]  ;;  %4287 = vmatpush1.bf16.msra.mxu0 %v8836_v54  ;;  %v10093_v24 = vpop.permute.xlu0 %105 }
 0x121   :  { %15629 = vst [vmem:[#allocation32_spill] sm:$0xff] %v10039_v47  ;;  %15630 = vst [vmem:[#allocation33_spill] sm:$0xff] %v10042_v18  ;;  %v2349_v57 = vxor.u32 2147483648, %v2348_v16  ;;  %v2552_v35 = vor.u32 4788187, %v2551_v50  ;;  %v265_v20 = vmul.f32 %v10071_v30, %v9881_v7  ;;  %v627_v32 = vmul.f32 %v10078_v11, %v566_v38 }
 0x122   :  { %15631 = vst [vmem:[#allocation34_spill] sm:$0xff] %v10063_v19  ;;  %v10083_v49 = vmul.f32 %v10078_v11, %v15632_v0  ;;  %v2548_v4 = vor.u32 %v2547_v12, %v2546_v23  ;;  %v10086_v37 = vsub.s32 32, %v10034_v60  ;;  %v2649_v31 = vsub.s32 32, %v10020_v15  ;;  %v8837_v7 = vld [vmem:[%s15365_s3 + $0x14] ss:$8 sps:$4 sm:$0xff]  }
 0x123   :  { %v2654_v63 = vadd.s32 127, %v2653_v14  ;;  %v2432_v13 = vshll.u32 %v10042_v18, 30  ;;  %v462_v2 = vadd.f32 %v430_v42, %v265_v20  ;;  %vm2796_vm6 = vcmp.gt.s32.totalorder %v2795_v28, 0  ;;  %4288 = vmatprep.subr.bf16.mxu0 %v8837_v7 }
 0x124   :  { %15633 = vst [vmem:[#allocation6_spill] sm:$0xff] %v10083_v49  ;;  %15634 = vst [vmem:[#allocation35_spill] sm:$0xff] %v10086_v37  ;;  %v2229_v1 = vclz %v7720_v29  ;;  %v2892_v50 = vand.u32 2139095040, %v10063_v19  ;;  %v15430_v26 = vand.u32 2147483647, %v9995_v3  ;;  %v2797_v12 = vsel %vm2796_vm6, %v2795_v28, 0 }
 0x125   :  { %v10099_v56 = vsel %vm2267_vm5, %v2349_v57, %v2348_v16  ;;  %v2633_v38 = vadd.s32 %v9743_v22, %v9740_v48  ;;  %v2799_v39 = vand.u32 31, %v2797_v12  ;;  %v659_v14 = vadd.f32 %v627_v32, %v462_v2  ;;  %v10116_v22 = vpop.permute.xlu1 %205 }
 0x126   :  { %15635 = vst [vmem:[#allocation36_spill] sm:$0xff] %v10099_v56  ;;  %v2553_v42 = vand.u32 2147483647, %v2552_v35  ;;  %v2555_v58 = vcvt.s32.f32 %v2548_v4  ;;  %v10105_v23 = vmul.f32 %v10071_v30, %v9901_v43  ;;  %v10109_v29 = vmul.f32 %v10071_v30, %v9936_v46 }
 0x127   :  { %v2650_v28 = vshll.u32 %v9867_v10, %v10020_v15  ;;  %v2651_v16 = vshrl.u32 %v2633_v38, %v2649_v31  ;;  %v10114_v54 = vsub.s32 %v10017_v62, %v2432_v13  ;;  %v2800_v48 = vsub.s32 32, %v2799_v39  ;;  %v10128_v62 = vpop.permute.xlu0 %110 }
 0x128   :  { %v2655_v57 = vshll.u32 %v2654_v63, 23  ;;  %v10118_v35 = vadd.s32 4294967294, %v2229_v1  ;;  %v2893_v20 = vshrl.u32 %v2892_v50, 23  ;;  %v2792_v43 = vand.u32 8388607, %v15430_v26 }
 0x129   :  { %v2802_v46 = vshll.u32 %v15596_v40, %v2799_v39  ;;  %v15636_v32 = vmov 2475754826   ;;  %v10126_v15 = vadd.f32 %v10060_v41, %v659_v14  ;;  %v15638_v4 = vmov 2131351028   ;;  %v373_v56 = vpop.permute.xlu1 %372 }
 0x12a   :  { %v2803_v0 = vshrl.u32 %v15636_v32, %v2800_v48  ;;  %v2805_v10 = vshll.u32 %v15636_v32, %v2799_v39  ;;  %v2806_v31 = vshrl.u32 %v15638_v4, %v2800_v48  ;;  %v15639_v7 = vmov 2102212464  }
 0x12b   :  { %15637 = vst [vmem:[#allocation37_spill] sm:$0xff] %v10126_v15  ;;  %v2809_v63 = vshrl.u32 %v15639_v7, %v2800_v48  ;;  %v2811_v13 = vshll.u32 %v15639_v7, %v2799_v39  ;;  %v2812_v2 = vshrl.u32 %v15620_v27, %v2800_v48  ;;  %v2435_v1 = vsub.s32 0, %v10114_v54 }
 0x12c   :  { %v2798_v50 = vshrl.u32 %v2797_v12, 5  ;;  %v2804_v38 = vor.u32 %v2803_v0, %v2802_v46  ;;  %v2808_v26 = vshll.u32 %v15638_v4, %v2799_v39  ;;  %v2807_v49 = vor.u32 %v2806_v31, %v2805_v10 }
 0x12d   :  { %v2813_v19 = vor.u32 %v2812_v2, %v2811_v13  ;;  %v2814_v14 = vshll.u32 %v15620_v27, %v2799_v39  ;;  %v2815_v51 = vshrl.u32 %v15617_v6, %v2800_v48  ;;  %v10138_v21 = vmul.f32 %v2555_v58, %v2553_v42  ;;  %v10143_v39 = vpop.permute.xlu0 %120  ;;  %v10220_v37 = vpop.permute.xlu1 %210 }
 0x12e   :  { %v2652_v52 = vor.u32 %v2651_v16, %v2650_v28  ;;  %v2793_v34 = vor.u32 8388608, %v2792_v43  ;;  %v2810_v18 = vor.u32 %v2809_v63, %v2808_v26  ;;  %v2656_v53 = vor.u32 4788187, %v2655_v57 }
 0x12f   :  { %v7747_v9 = vadd.s32 4294967169, %v2893_v20  ;;  %v2816_v47 = vor.u32 %v2815_v51, %v2814_v14  ;;  %v3100_v12 = vand.u32 2139095040, %v10126_v15  ;;  %vm7722_vm7 = vcmp.lt.s32.totalorder %v10118_v35, 0 }
 0x130   :  { %v7728_v46 = vmin.u32 %v2435_v1, %v10114_v54  ;;  %vm2817_vm8 = vcmp.lt.s32.totalorder %v2798_v50, 1  ;;  %vm2820_vm9 = vcmp.lt.s32.totalorder %v2798_v50, 4  ;;  %vm2819_vm10 = vcmp.lt.s32.totalorder %v2798_v50, 3 }
 0x131   :  { %v2825_v42 = vsel %vm2817_vm8, %v2804_v38, %v2807_v49  ;;  %v2826_v58 = vsel %vm2820_vm9, %v2813_v19, 920167782  ;;  %v431_v26 = vmul.f32 %v10047_v45, %v373_v56  ;;  %vm2818_vm11 = vcmp.lt.s32.totalorder %v2798_v50, 2 }
 0x132   :  { %v2827_v51 = vsel %vm2819_vm10, %v2810_v18, %v2826_v58  ;;  %v2829_v28 = vsel %vm2817_vm8, %v2807_v49, %v2810_v18  ;;  %v2833_v16 = vshll.u32 %v2793_v34, 8  ;;  %v2830_v20 = vsel %vm2820_vm9, %v2816_v47, 1326507024 }
 0x133   :  { %v2828_v57 = vsel %vm2818_vm11, %v2825_v42, %v2827_v51  ;;  %v15443_v43 = vand.u32 2147483647, %v10126_v15  ;;  %v3101_v0 = vshrl.u32 %v3100_v12, 23  ;;  %v2437_v10 = vclz %v7728_v46  ;;  %v365_v12 = vpop.permute.xlu0 %364 }
 0x134   :  { %v2801_v31 = vshrl.u32 %v15596_v40, %v2800_v48  ;;  %v2822_v63 = vsel %vm2820_vm9, %v2810_v18, 2102212464  ;;  %v2831_v56 = vsel %vm2819_vm10, %v2813_v19, %v2830_v20  ;;  %v2657_v47 = vand.u32 2147483647, %v2656_v53 }
 0x135   :  { %v2832_v13 = vsel %vm2818_vm11, %v2829_v28, %v2831_v56  ;;  %v10157_v2 = vmul.u32.u64.low %v2833_v16, %v2828_v57  ;;  %v10158_v1 = vmul.u32.u64.high %v2833_v16, %v2828_v57, %v10157_v2  ;;  %v7755_v34 = vadd.s32 4294967169, %v3101_v0  ;;  %v15640_v0 = vld [vmem:[#allocation14_spill] sm:$0xff] }
 0x136   :  { %v10162_v42 = vmul.u32.u64.low %v2833_v16, %v2832_v13  ;;  %v10163_v58 = vmul.u32.u64.high %v2833_v16, %v2832_v13, %v10162_v42  ;;  %v2821_v48 = vsel %vm2817_vm8, %v2801_v31, %v2804_v38  ;;  %v2823_v18 = vsel %vm2819_vm10, %v2807_v49, %v2822_v63  ;;  %v15641_v38 = vld [vmem:[#allocation25_spill] sm:$0xff]  ;;  %v15642_v31 = vld [vmem:[#allocation24_spill] sm:$0xff] }
 0x137   :  { %v3107_v46 = vadd.s32 1, %v7755_v34  ;;  %v463_v19 = vadd.f32 %v431_v26, %v10109_v29  ;;  %v2659_v51 = vcvt.s32.f32 %v2652_v52  ;;  %v10171_v28 = vsel %vm7722_vm7, 0, %v10118_v35 }
 0x138   :  { %v7729_v57 = vadd.s32 4294967294, %v2437_v10  ;;  %v2899_v20 = vadd.s32 1, %v7747_v9  ;;  %v3104_v53 = vand.u32 8388607, %v15443_v43  ;;  %v429_v49 = vmul.f32 %v10047_v45, %v365_v12 }
 0x139   :  { %vm3108_vm12 = vcmp.gt.s32.totalorder %v3107_v46, 0  ;;  %v10176_v56 = vadd.f32 %v15640_v0, %v463_v19  ;;  %v2217_v29 = vadd.s32 %v15642_v31, %v15641_v38  ;;  %v2824_v52 = vsel %vm2818_vm11, %v2821_v48, %v2823_v18  ;;  %v15643_v19 = vld [vmem:[#allocation5_spill] sm:$0xff] }
 0x13a   :  { %v2843_v26 = vadd.s32 1, %v10158_v1  ;;  %v3109_v35 = vsel %vm3108_vm12, %v3107_v46, 0  ;;  %v10183_v63 = vmul.f32 %v2659_v51, %v2657_v47  ;;  %vm2842_vm13 = vc.u32 %v10163_v58, %v10157_v2  ;;  %v15644_v31 = vld [vmem:[#allocation9_spill] sm:$0xff] }
 0x13b   :  { %v626_v9 = vmul.f32 %v10078_v11, %v10002_v25  ;;  %v3111_v10 = vand.u32 31, %v3109_v35  ;;  %v2233_v13 = vsub.s32 32, %v10171_v28  ;;  %v2237_v34 = vsub.s32 4294967266, %v10171_v28 }
 0x13c   :  { %vm7730_vm14 = vcmp.lt.s32.totalorder %v7729_v57, 0  ;;  %vm2900_vm15 = vcmp.gt.s32.totalorder %v2899_v20, 0  ;;  %v2840_v50 = vmul.u32 %v2833_v16, %v2824_v52  ;;  %v3105_v42 = vor.u32 8388608, %v3104_v53 }
 0x13d   :  { %v10191_v12 = vsub.s32 32, %v3111_v10  ;;  %v461_v47 = vadd.f32 %v429_v49, %v10105_v23  ;;  %v2844_v48 = vsel %vm2842_vm13, %v2843_v26, %v10158_v1  ;;  %v10195_v18 = vshrl.u32 %v3109_v35, 5 }
 0x13e   :  { %v3114_v46 = vshll.u32 %v15596_v40, %v3111_v10  ;;  %v3117_v25 = vshll.u32 %v15636_v32, %v3111_v10  ;;  %vm2475_vm1 = vcmp.lt.s32.totalorder %v15643_v19, 0  ;;  %v3120_v53 = vshll.u32 %v15638_v4, %v3111_v10 }
 0x13f   :  { %v3115_v51 = vshrl.u32 %v15636_v32, %v10191_v12  ;;  %v3118_v16 = vshrl.u32 %v15638_v4, %v10191_v12  ;;  %v3121_v23 = vshrl.u32 %v15639_v7, %v10191_v12  ;;  %v3123_v1 = vshll.u32 %v15639_v7, %v3111_v10 }
 0x140   :  { %v3124_v0 = vshrl.u32 %v15620_v27, %v10191_v12  ;;  %v3126_v49 = vshll.u32 %v15620_v27, %v3111_v10  ;;  %v3127_v38 = vshrl.u32 %v15617_v6, %v10191_v12  ;;  %vm2579_vm2 = vcmp.lt.s32.totalorder %v15644_v31, 0 }
 0x141   :  { %v10214_v52 = vadd.s32 %v2844_v48, %v2840_v50  ;;  %v3116_v26 = vor.u32 %v3115_v51, %v3114_v46  ;;  %v3119_v35 = vor.u32 %v3118_v16, %v3117_v25  ;;  %v3122_v43 = vor.u32 %v3121_v23, %v3120_v53 }
 0x142   :  { %v10217_v14 = vsel %vm7730_vm14, 0, %v7729_v57  ;;  %v3125_v15 = vor.u32 %v3124_v0, %v3123_v1  ;;  %v3128_v60 = vor.u32 %v3127_v38, %v3126_v49  ;;  %vm3129_vm3 = vcmp.lt.s32.totalorder %v10195_v18, 1 }
 0x143   :  { %vm3132_vm4 = vcmp.lt.s32.totalorder %v10195_v18, 4  ;;  %v3137_v10 = vsel %vm3129_vm3, %v3116_v26, %v3119_v35  ;;  %v3141_v50 = vsel %vm3129_vm3, %v3119_v35, %v3122_v43  ;;  %v10227_v48 = vshll.u32 %v3105_v42, 8 }
 0x144   :  { %vm3131_vm6 = vcmp.lt.s32.totalorder %v10195_v18, 3  ;;  %v3138_v57 = vsel %vm3132_vm4, %v3125_v15, 920167782  ;;  %v3142_v46 = vsel %vm3132_vm4, %v3128_v60, 1326507024  ;;  %v658_v25 = vadd.f32 %v626_v9, %v461_v47 }
 0x145   :  { %v2846_v51 = vadd.s32 536870912, %v10214_v52  ;;  %vm3130_vm7 = vcmp.lt.s32.totalorder %v10195_v18, 2  ;;  %v3139_v16 = vsel %vm3131_vm6, %v3122_v43, %v3138_v57  ;;  %v3143_v42 = vsel %vm3131_vm6, %v3125_v15, %v3142_v46 }
 0x146   :  { %v2661_v53 = vxor.u32 2147483648, %v10183_v63  ;;  %v2238_v23 = vadd.s32 127, %v2237_v34  ;;  %v3140_v1 = vsel %vm3130_vm7, %v3137_v10, %v3139_v16  ;;  %v3144_v60 = vsel %vm3130_vm7, %v3141_v50, %v3143_v42 }
 0x147   :  { %v2445_v9 = vsub.s32 4294967266, %v10217_v14  ;;  %v2901_v47 = vsel %vm2900_vm15, %v2899_v20, 0  ;;  %v10248_v0 = vmul.u32.u64.low %v10227_v48, %v3140_v1  ;;  %v10249_v49 = vmul.u32.u64.high %v10227_v48, %v3140_v1, %v10248_v0  ;;  %v216_v20 = vpop.permute.xlu1 %215 }
 0x148   :  { %v15645_v15 = vxor.u32 2147483648, %v10138_v21  ;;  %v10260_v38 = vmul.u32.u64.low %v10227_v48, %v3144_v60  ;;  %v10261_v10 = vmul.u32.u64.high %v10227_v48, %v3144_v60, %v10260_v38  ;;  %v10264_v50 = vadd.f32 %v10060_v41, %v658_v25 }
 0x149   :  { %v2235_v57 = vshrl.u32 %v2217_v29, %v2233_v13  ;;  %v10268_v46 = vmul.f32 %v10071_v30, %v9951_v44  ;;  %v10272_v16 = vmul.f32 %v10071_v30, %v9992_v36  ;;  %v10274_v42 = vshrl.u32 %v2846_v51, 30 }
 0x14a   :  { %v10257_v34 = vsel %vm2475_vm1, %v15645_v15, %v10138_v21  ;;  %v10279_v21 = vsel %vm2579_vm2, %v2661_v53, %v10183_v63  ;;  %v2234_v25 = vshll.u32 %v10000_v55, %v10171_v28  ;;  %v2239_v1 = vshll.u32 %v2238_v23, 23 }
 0x14b   :  { %15646 = vst [vmem:[#allocation14_spill] sm:$0xff] %v10257_v34  ;;  %15647 = vst [vmem:[#allocation25_spill] sm:$0xff] %v10272_v16  ;;  %v10283_v29 = vand.u32 31, %v2901_v47  ;;  %v2441_v44 = vsub.s32 32, %v10217_v14  ;;  %v2446_v13 = vadd.s32 127, %v2445_v9  ;;  %v2996_v51 = vand.u32 2139095040, %v10264_v50  ;;  %v385_v38 = vpop.permute.xlu1 %384 }
 0x14c   :  { %15648 = vst [vmem:[#allocation24_spill] sm:$0xff] %v10274_v42  ;;  %15649 = vst [vmem:[#allocation38_spill] sm:$0xff] %v10279_v21  ;;  %v3134_v36 = vsel %vm3132_vm4, %v3122_v43, 2102212464  ;;  %v10291_v60 = vmul.f32 %v10071_v30, %v10029_v8  ;;  %v10295_v63 = vmul.f32 %v10071_v30, %v10093_v24  ;;  %v3113_v55 = vshrl.u32 %v15596_v40, %v10191_v12 }
 0x14d   :  { %15650 = vst [vmem:[#allocation39_spill] sm:$0xff] %v10283_v29  ;;  %v10301_v28 = vmul.f32 %v10071_v30, %v10128_v62  ;;  %v2236_v53 = vor.u32 %v2235_v57, %v2234_v25  ;;  %v2425_v43 = vadd.s32 %v9962_v33, %v9972_v5  ;;  %v2848_v23 = vshll.u32 %v10274_v42, 30 }
 0x14e   :  { %15651 = vst [vmem:[#allocation40_spill] sm:$0xff] %v10291_v60  ;;  %15652 = vst [vmem:[#allocation41_spill] sm:$0xff] %v10295_v63  ;;  %v2997_v9 = vshrl.u32 %v2996_v51, 23  ;;  %v2240_v8 = vor.u32 4788187, %v2239_v1  ;;  %v10307_v15 = vsub.s32 32, %v10283_v29  ;;  %v3133_v24 = vsel %vm3129_vm3, %v3113_v55, %v3116_v26 }
 0x14f   :  { %15653 = vst [vmem:[#allocation42_spill] sm:$0xff] %v10301_v28  ;;  %v3135_v12 = vsel %vm3131_vm6, %v3119_v35, %v3134_v36  ;;  %v2443_v62 = vshrl.u32 %v2425_v43, %v2441_v44  ;;  %v2447_v63 = vshll.u32 %v2446_v13, 23  ;;  %v3155_v57 = vadd.s32 1, %v10249_v49  ;;  %v377_v13 = vpop.permute.xlu0 %376 }
 0x150   :  { %15654 = vst [vmem:[#allocation43_spill] sm:$0xff] %v10307_v15  ;;  %v7751_v25 = vadd.s32 4294967169, %v2997_v9  ;;  %v2442_v33 = vshll.u32 %v10114_v54, %v10217_v14  ;;  %v2915_v5 = vshll.u32 %v15639_v7, %v10283_v29  ;;  %v10320_v1 = vshll.u32 %v15620_v27, %v10283_v29 }
 0x151   :  { %vm3154_vm8 = vc.u32 %v10261_v10, %v10248_v0  ;;  %v10325_v26 = vsub.s32 %v10214_v52, %v2848_v23  ;;  %v3136_v35 = vsel %vm3130_vm7, %v3133_v24, %v3135_v12  ;;  %v434_v54 = vmul.f32 %v10047_v45, %v385_v38 }
 0x152   :  { %v3003_v44 = vadd.s32 1, %v7751_v25  ;;  %v2241_v14 = vand.u32 2147483647, %v2240_v8  ;;  %v2243_v36 = vcvt.s32.f32 %v2236_v53  ;;  %v2916_v51 = vshrl.u32 %v15620_v27, %v10307_v15 }
 0x153   :  { %v10334_v55 = vshrl.u32 %v15617_v6, %v10307_v15  ;;  %v10336_v43 = vor.u32 %v2443_v62, %v2442_v33  ;;  %v10338_v52 = vor.u32 4788187, %v2447_v63  ;;  %v3156_v18 = vsel %vm3154_vm8, %v3155_v57, %v10249_v49  ;;  %v381_v16 = vpop.permute.xlu0 %380 }
 0x154   :  { %v269_v23 = vmul.f32 %v10071_v30, %v216_v20  ;;  %v3152_v9 = vmul.u32 %v10227_v48, %v3136_v35  ;;  %v10345_v53 = vadd.f32 %v10060_v41, %v10176_v56  ;;  %vm3004_vm9 = vcmp.gt.s32.totalorder %v3003_v44, 0 }
 0x155   :  { %v432_v8 = vmul.f32 %v10047_v45, %v377_v13  ;;  %v2851_v24 = vsub.s32 0, %v10325_v26  ;;  %v15449_v12 = vand.u32 2147483647, %v10264_v50  ;;  %v3005_v38 = vsel %vm3004_vm9, %v3003_v44, 0 }
 0x156   :  { %15655 = vst [vmem:[#allocation44_spill] sm:$0xff] %v10345_v53  ;;  %v466_v63 = vadd.f32 %v434_v54, %v269_v23  ;;  %v10350_v62 = vshrl.u32 %v2901_v47, 5  ;;  %v10352_v49 = vadd.s32 %v3156_v18, %v3152_v9  ;;  %v267_v48 = vmul.f32 %v10071_v30, %v10116_v22 }
 0x157   :  { %v10358_v56 = vmul.f32 %v10071_v30, %v10143_v39  ;;  %v10360_v20 = vmul.f32 %v2243_v36, %v2241_v14  ;;  %v10362_v57 = vor.u32 %v2916_v51, %v2915_v5  ;;  %v3007_v33 = vand.u32 31, %v3005_v38  ;;  %v15659_v14 = vld [vmem:[#allocation15_spill] sm:$0xff]  ;;  %v574_v36 = vpop.permute.xlu1 %573 }
 0x158   :  { %15656 = vst [vmem:[#allocation45_spill] sm:$0xff] %v10350_v62  ;;  %v3204_v44 = vand.u32 2139095040, %v10345_v53  ;;  %v464_v13 = vadd.f32 %v432_v8, %v267_v48  ;;  %v7744_v22 = vmin.u32 %v2851_v24, %v10325_v26  ;;  %v3000_v39 = vand.u32 8388607, %v15449_v12 }
 0x159   :  { %15657 = vst [vmem:[#allocation46_spill] sm:$0xff] %v10358_v56  ;;  %15658 = vst [vmem:[#allocation47_spill] sm:$0xff] %v10362_v57  ;;  %v3008_v54 = vsub.s32 32, %v3007_v33  ;;  %v663_v5 = vadd.f32 %v15659_v14, %v466_v63  ;;  %v3158_v51 = vadd.s32 536870912, %v10352_v49  ;;  %v3006_v18 = vshrl.u32 %v3005_v38, 5 }
 0x15a   :  { %v3010_v23 = vshll.u32 %v15596_v40, %v3007_v33  ;;  %v3013_v9 = vshll.u32 %v15636_v32, %v3007_v33  ;;  %v3016_v24 = vshll.u32 %v15638_v4, %v3007_v33  ;;  %v3205_v12 = vshrl.u32 %v3204_v44, 23 }
 0x15b   :  { %v3011_v35 = vshrl.u32 %v15636_v32, %v3008_v54  ;;  %v3014_v8 = vshrl.u32 %v15638_v4, %v3008_v54  ;;  %v3017_v48 = vshrl.u32 %v15639_v7, %v3008_v54  ;;  %v3019_v47 = vshll.u32 %v15639_v7, %v3007_v33 }
 0x15c   :  { %v3020_v63 = vshrl.u32 %v15620_v27, %v3008_v54  ;;  %v629_v14 = vmul.f32 %v10078_v11, %v574_v36  ;;  %v2853_v38 = vclz %v7744_v22  ;;  %v3001_v15 = vor.u32 8388608, %v3000_v39 }
 0x15d   :  { %v3012_v25 = vor.u32 %v3011_v35, %v3010_v23  ;;  %v3015_v56 = vor.u32 %v3014_v8, %v3013_v9  ;;  %v3018_v53 = vor.u32 %v3017_v48, %v3016_v24  ;;  %v3022_v28 = vshll.u32 %v15620_v27, %v3007_v33  ;;  %v15662_v48 = vld [vmem:[#allocation12_spill] sm:$0xff] }
 0x15e   :  { %v3021_v29 = vor.u32 %v3020_v63, %v3019_v47  ;;  %v3023_v42 = vshrl.u32 %v15617_v6, %v3008_v54  ;;  %vm15496_vm10 = vcmp.lt.s32.totalorder %v10350_v62, 4  ;;  %v10386_v60 = vshrl.u32 %v3158_v51, 30 }
 0x15f   :  { %vm3025_vm11 = vcmp.lt.s32.totalorder %v3006_v18, 1  ;;  %vm3028_vm12 = vcmp.lt.s32.totalorder %v3006_v18, 4  ;;  %v10389_v44 = vadd.f32 %v10060_v41, %v663_v5  ;;  %vm3027_vm13 = vcmp.lt.s32.totalorder %v3006_v18, 3 }
 0x160   :  { %15660 = vst [vmem:[#allocation15_spill] sm:$0xff] %v10386_v60  ;;  %v3024_v36 = vor.u32 %v3023_v42, %v3022_v28  ;;  %v3033_v35 = vsel %vm3025_vm11, %v3012_v25, %v3015_v56  ;;  %v3034_v22 = vsel %vm3028_vm12, %v3021_v29, 920167782  ;;  %v7745_v47 = vadd.s32 4294967294, %v2853_v38 }
 0x161   :  { %15661 = vst [vmem:[#allocation48_spill] sm:$0xff] %v10389_v44  ;;  %v7759_v39 = vadd.s32 4294967169, %v3205_v12  ;;  %v3030_v33 = vsel %vm3028_vm12, %v3018_v53, 2102212464  ;;  %v3035_v23 = vsel %vm3027_vm13, %v3018_v53, %v3034_v22  ;;  %v3009_v51 = vshrl.u32 %v15596_v40, %v3008_v54 }
 0x162   :  { %vm3026_vm14 = vcmp.lt.s32.totalorder %v3006_v18, 2  ;;  %v3037_v9 = vsel %vm3025_vm11, %v3015_v56, %v3018_v53  ;;  %v3041_v8 = vshll.u32 %v3001_v15, 8  ;;  %v3160_v5 = vshll.u32 %v10386_v60, 30 }
 0x163   :  { %v3036_v42 = vsel %vm3026_vm14, %v3033_v35, %v3035_v23  ;;  %v3038_v28 = vsel %vm3028_vm12, %v3024_v36, 1326507024  ;;  %v3516_v24 = vand.u32 2139095040, %v10389_v44  ;;  %vm2163_vm15 = vcmp.lt.s32.totalorder %v15662_v48, 0 }
 0x164   :  { %v3029_v12 = vsel %vm3025_vm11, %v3009_v51, %v3012_v25  ;;  %v3031_v63 = vsel %vm3027_vm13, %v3015_v56, %v3030_v33  ;;  %v3039_v54 = vsel %vm3027_vm13, %v3021_v29, %v3038_v28  ;;  %v661_v38 = vadd.f32 %v629_v14, %v464_v13 }
 0x165   :  { %v3040_v53 = vsel %vm3026_vm14, %v3037_v9, %v3039_v54  ;;  %v10406_v15 = vmul.u32.u64.low %v3041_v8, %v3036_v42  ;;  %v10407_v22 = vmul.u32.u64.high %v3041_v8, %v3036_v42, %v10406_v15  ;;  %v3517_v35 = vshrl.u32 %v3516_v24, 23 }
 0x166   :  { %vm7746_vm3 = vcmp.lt.s32.totalorder %v7745_v47, 0  ;;  %v3211_v36 = vadd.s32 1, %v7759_v39  ;;  %v10410_v23 = vmul.u32.u64.low %v3041_v8, %v3040_v53  ;;  %v10411_v60 = vmul.u32.u64.high %v3041_v8, %v3040_v53, %v10410_v23 }
 0x167   :  { %v10414_v25 = vsub.s32 %v10352_v49, %v3160_v5  ;;  %v3032_v56 = vsel %vm3026_vm14, %v3029_v12, %v3031_v63  ;;  %v15460_v29 = vand.u32 2147483647, %v10389_v44  ;;  %v7771_v13 = vadd.s32 4294967169, %v3517_v35  ;;  %v578_v63 = vpop.permute.xlu1 %577 }
 0x168   :  { %v2245_v14 = vxor.u32 2147483648, %v10360_v20  ;;  %v10422_v33 = vsel %vm15496_vm10, %v10362_v57, 920167782  ;;  %v15664_v39 = vor.u32 %v10334_v55, %v10320_v1  ;;  %v10432_v49 = vadd.f32 %v10060_v41, %v661_v38 }
 0x169   :  { %15663 = vst [vmem:[#allocation12_spill] sm:$0xff] %v10422_v33  ;;  %v15666_v18 = vand.u32 2147483647, %v10338_v52  ;;  %v15667_v9 = vcvt.s32.f32 %v10336_v43  ;;  %v3051_v42 = vadd.s32 1, %v10407_v22  ;;  %v433_v28 = vmul.f32 %v10047_v45, %v381_v16 }
 0x16a   :  { %v10429_v51 = vsel %vm15496_vm10, %v15664_v39, 1326507024  ;;  %v3523_v24 = vadd.s32 1, %v7771_v13  ;;  %v10443_v1 = vsel %vm7746_vm3, 0, %v7745_v47  ;;  %vm3212_vm4 = vcmp.gt.s32.totalorder %v3211_v36, 0 }
 0x16b   :  { %15665 = vst [vmem:[#allocation49_spill] sm:$0xff] %v10429_v51  ;;  %v10438_v5 = vmul.f32 %v15667_v9, %v15666_v18  ;;  %v3048_v55 = vmul.u32 %v3041_v8, %v3032_v56  ;;  %vm3050_vm6 = vc.u32 %v10411_v60, %v10406_v15  ;;  %v3163_v12 = vsub.s32 0, %v10414_v25 }
 0x16c   :  { %v3052_v52 = vsel %vm3050_vm6, %v3051_v42, %v10407_v22  ;;  %v3520_v43 = vand.u32 8388607, %v15460_v29  ;;  %vm3524_vm7 = vcmp.gt.s32.totalorder %v3523_v24, 0  ;;  %v268_v16 = vmul.f32 %v10071_v30, %v10220_v37 }
 0x16d   :  { %v10451_v54 = vadd.s32 %v3052_v52, %v3048_v55  ;;  %v3525_v47 = vsel %vm3524_vm7, %v3523_v24, 0  ;;  %v3308_v8 = vand.u32 2139095040, %v10432_v49  ;;  %v10459_v38 = vsel %vm2163_vm15, %v2245_v14, %v10360_v20  ;;  %v15668_v24 = vld [vmem:[#allocation19_spill] sm:$0xff] }
 0x16e   :  { %v2453_v53 = vxor.u32 2147483648, %v10438_v5  ;;  %v10464_v22 = vadd.s32 %v10157_v2, %v10163_v58  ;;  %v3527_v35 = vand.u32 31, %v3525_v47  ;;  %v2861_v23 = vsub.s32 4294967266, %v10443_v1 }
 0x16f   :  { %v10468_v56 = vsel %vm3212_vm4, %v3211_v36, 0  ;;  %v465_v30 = vadd.f32 %v433_v28, %v268_v16  ;;  %v630_v37 = vmul.f32 %v10078_v11, %v578_v63  ;;  %v10472_v13 = vmin.u32 %v3163_v12, %v10414_v25 }
 0x170   :  { %v3521_v20 = vor.u32 8388608, %v3520_v43  ;;  %v3526_v14 = vshrl.u32 %v3525_v47, 5  ;;  %v3528_v39 = vsub.s32 32, %v3527_v35  ;;  %v3054_v18 = vadd.s32 536870912, %v10451_v54 }
 0x171   :  { %v3530_v2 = vshll.u32 %v15596_v40, %v3527_v35  ;;  %v3533_v58 = vshll.u32 %v15636_v32, %v3527_v35  ;;  %v3309_v9 = vshrl.u32 %v3308_v8, 23  ;;  %v3536_v28 = vshll.u32 %v15638_v4, %v3527_v35 }
 0x172   :  { %v3531_v42 = vshrl.u32 %v15636_v32, %v3528_v39  ;;  %v3534_v36 = vshrl.u32 %v15638_v4, %v3528_v39  ;;  %v3537_v11 = vshrl.u32 %v15639_v7, %v3528_v39  ;;  %vm2371_vm8 = vcmp.lt.s32.totalorder %v15668_v24, 0 }
 0x173   :  { %v3539_v55 = vshll.u32 %v15639_v7, %v3527_v35  ;;  %v3540_v12 = vshrl.u32 %v15620_v27, %v3528_v39  ;;  %v3542_v52 = vshll.u32 %v15620_v27, %v3527_v35  ;;  %v3543_v43 = vshrl.u32 %v15617_v6, %v3528_v39 }
 0x174   :  { %v3532_v63 = vor.u32 %v3531_v42, %v3530_v2  ;;  %v3535_v16 = vor.u32 %v3534_v36, %v3533_v58  ;;  %v3538_v47 = vor.u32 %v3537_v11, %v3536_v28  ;;  %v3561_v8 = vshll.u32 %v3521_v20, 8 }
 0x175   :  { %v10486_v29 = vshrl.u32 %v3054_v18, 30  ;;  %v3541_v33 = vor.u32 %v3540_v12, %v3539_v55  ;;  %v3544_v57 = vor.u32 %v3543_v43, %v3542_v52  ;;  %vm3545_vm9 = vcmp.lt.s32.totalorder %v3526_v14, 1  ;;  %v10515_v12 = vpop.permute.xlu1 %220 }
 0x176   :  { %v3529_v51 = vshrl.u32 %v15596_v40, %v3528_v39  ;;  %vm3547_vm11 = vcmp.lt.s32.totalorder %v3526_v14, 3  ;;  %vm3548_vm12 = vcmp.lt.s32.totalorder %v3526_v14, 4  ;;  %v3553_v62 = vsel %vm3545_vm9, %v3532_v63, %v3535_v16 }
 0x177   :  { %15669 = vst [vmem:[#allocation50_spill] sm:$0xff] %v10486_v29  ;;  %v3550_v44 = vsel %vm3548_vm12, %v3538_v47, 2102212464  ;;  %v3554_v21 = vsel %vm3548_vm12, %v3541_v33, 920167782  ;;  %v3557_v31 = vsel %vm3545_vm9, %v3535_v16, %v3538_v47  ;;  %v7763_v35 = vadd.s32 4294967169, %v3309_v9 }
 0x178   :  { %vm3546_vm13 = vcmp.lt.s32.totalorder %v3526_v14, 2  ;;  %v3555_v34 = vsel %vm3547_vm11, %v3538_v47, %v3554_v21  ;;  %v3558_v2 = vsel %vm3548_vm12, %v3544_v57, 1326507024  ;;  %v15467_v58 = vand.u32 2147483647, %v10432_v49 }
 0x179   :  { %v3549_v20 = vsel %vm3545_vm9, %v3529_v51, %v3532_v63  ;;  %v3551_v18 = vsel %vm3547_vm11, %v3535_v16, %v3550_v44  ;;  %v3556_v42 = vsel %vm3546_vm13, %v3553_v62, %v3555_v34  ;;  %v3559_v36 = vsel %vm3547_vm11, %v3541_v33, %v3558_v2  ;;  %v10500_v21 = vld [vmem:[%s15364_s6 + $0x10] ss:$0 sps:$4 sm:$0x33]  }
 0x17a   :  { %v3056_v28 = vshll.u32 %v10486_v29, 30  ;;  %v3560_v39 = vsel %vm3546_vm13, %v3557_v31, %v3559_v36  ;;  %v10493_v11 = vmul.u32.u64.low %v3561_v8, %v3556_v42  ;;  %v10494_v55 = vmul.u32.u64.high %v3561_v8, %v3556_v42, %v10493_v11 }
 0x17b   :  { %v10502_v57 = vmul.u32.u64.low %v3561_v8, %v3560_v39  ;;  %v10503_v9 = vmul.u32.u64.high %v3561_v8, %v3560_v39, %v10502_v57  ;;  %v3315_v44 = vadd.s32 1, %v7763_v35  ;;  %v662_v51 = vadd.f32 %v630_v37, %v465_v30 }
 0x17c   :  { %v10508_v34 = vsel %vm2371_vm8, %v2453_v53, %v10438_v5  ;;  %v2857_v31 = vsub.s32 32, %v10443_v1  ;;  %v10512_v62 = vand.u32 31, %v10468_v56  ;;  %v3552_v33 = vsel %vm3546_vm13, %v3549_v20, %v3551_v18 }
 0x17d   :  { %15670 = vst [vmem:[#allocation51_spill] sm:$0xff] %v10508_v34  ;;  %v2862_v52 = vadd.s32 127, %v2861_v23  ;;  %v3165_v43 = vclz %v10472_v13  ;;  %vm3316_vm14 = vcmp.gt.s32.totalorder %v3315_v44, 0  ;;  %vm15501_vm3 = vcmask 1041408  }
 0x17e   :  { %15671 = vst [vmem:[#allocation52_spill] sm:$0xff] %v10512_v62  ;;  %v10519_v30 = vsub.s32 %v10451_v54, %v3056_v28  ;;  %v3571_v5 = vadd.s32 1, %v10494_v55  ;;  %v3312_v53 = vand.u32 8388607, %v15467_v58  ;;  %v3317_v37 = vsel %vm3316_vm14, %v3315_v44, 0  ;;  %8648 = vmatprep.subr.msk.bf16.mxu1 %vm15501_vm3, %v10500_v21 }
 0x17f   :  { %v10528_v14 = vadd.s32 %v10248_v0, %v10261_v10  ;;  %v3568_v23 = vmul.u32 %v3561_v8, %v3552_v33  ;;  %vm3570_vm4 = vc.u32 %v10503_v9, %v10493_v11  ;;  %v10533_v54 = vadd.f32 %v10060_v41, %v662_v51 }
 0x180   :  { %v2858_v13 = vshll.u32 %v10325_v26, %v10443_v1  ;;  %v2859_v63 = vshrl.u32 %v10464_v22, %v2857_v31  ;;  %v3572_v16 = vsel %vm3570_vm4, %v3571_v5, %v10494_v55  ;;  %v3319_v47 = vand.u32 31, %v3317_v37  ;;  %v10549_v1 = vpop.permute.xlu1 %388 }
 0x181   :  { %15672 = vst [vmem:[#allocation53_spill] sm:$0xff] %v10533_v54  ;;  %v2863_v35 = vshll.u32 %v2862_v52, 23  ;;  %v10540_v2 = vsub.s32 32, %v10512_v62  ;;  %v10544_v0 = vshll.u32 %v15639_v7, %v10512_v62  ;;  %v3573_v10 = vadd.s32 %v3572_v16, %v3568_v23 }
 0x182   :  { %v10546_v8 = vadd.s32 4294967294, %v3165_v43  ;;  %v3059_v41 = vsub.s32 0, %v10519_v30  ;;  %v3313_v20 = vor.u32 8388608, %v3312_v53  ;;  %v3320_v26 = vsub.s32 32, %v3319_v47 }
 0x183   :  { %15673 = vst [vmem:[#allocation54_spill] sm:$0xff] %v10540_v2  ;;  %v3574_v22 = vadd.s32 536870912, %v3573_v10  ;;  %v3322_v18 = vshll.u32 %v15596_v40, %v3319_v47  ;;  %v3325_v42 = vshll.u32 %v15636_v32, %v3319_v47  ;;  %v3412_v36 = vand.u32 2139095040, %v10533_v54 }
 0x184   :  { %v3323_v28 = vshrl.u32 %v15636_v32, %v3320_v26  ;;  %v3326_v39 = vshrl.u32 %v15638_v4, %v3320_v26  ;;  %v3328_v55 = vshll.u32 %v15638_v4, %v3319_v47  ;;  %v3329_v57 = vshrl.u32 %v15639_v7, %v3320_v26  ;;  %v393_v34 = vpop.permute.xlu1 %392 }
 0x185   :  { %v10558_v44 = vshrl.u32 %v3574_v22, 30  ;;  %v3318_v51 = vshrl.u32 %v3317_v37, 5  ;;  %v3331_v31 = vshll.u32 %v15639_v7, %v3319_v47  ;;  %v3332_v33 = vshrl.u32 %v15620_v27, %v3320_v26 }
 0x186   :  { %v2860_v52 = vor.u32 %v2859_v63, %v2858_v13  ;;  %v3324_v43 = vor.u32 %v3323_v28, %v3322_v18  ;;  %v3327_v5 = vor.u32 %v3326_v39, %v3325_v42  ;;  %v3330_v53 = vor.u32 %v3329_v57, %v3328_v55 }
 0x187   :  { %15674 = vst [vmem:[#allocation55_spill] sm:$0xff] %v10558_v44  ;;  %v2864_v23 = vor.u32 4788187, %v2863_v35  ;;  %vm7758_vm6 = vcmp.lt.s32.totalorder %v10546_v8, 0  ;;  %v3333_v16 = vor.u32 %v3332_v33, %v3331_v31  ;;  %v3353_v58 = vshll.u32 %v3313_v20, 8 }
 0x188   :  { %v7752_v29 = vmin.u32 %v3059_v41, %v10519_v30  ;;  %v3334_v19 = vshll.u32 %v15620_v27, %v3319_v47  ;;  %v3335_v22 = vshrl.u32 %v15617_v6, %v3320_v26  ;;  %v3413_v37 = vshrl.u32 %v3412_v36, 23 }
 0x189   :  { %v3576_v24 = vshll.u32 %v10558_v44, 30  ;;  %vm3337_vm7 = vcmp.lt.s32.totalorder %v3318_v51, 1  ;;  %vm3339_vm9 = vcmp.lt.s32.totalorder %v3318_v51, 3  ;;  %vm3340_vm11 = vcmp.lt.s32.totalorder %v3318_v51, 4  ;;  %v8843_v44 = vld [vmem:[%s15365_s3 + $0x20] ss:$8 sps:$4 sm:$0xff]  }
 0x18a   :  { %v3336_v13 = vor.u32 %v3335_v22, %v3334_v19  ;;  %v3342_v63 = vsel %vm3340_vm11, %v3330_v53, 2102212464  ;;  %v3345_v35 = vsel %vm3337_vm7, %v3324_v43, %v3327_v5  ;;  %v3346_v18 = vsel %vm3340_vm11, %v3333_v16, 920167782 }
 0x18b   :  { %v3321_v20 = vshrl.u32 %v15596_v40, %v3320_v26  ;;  %vm3338_vm12 = vcmp.lt.s32.totalorder %v3318_v51, 2  ;;  %v3347_v41 = vsel %vm3339_vm9, %v3330_v53, %v3346_v18  ;;  %v436_v47 = vmul.f32 %v10047_v45, %v393_v34 }
 0x18c   :  { %v3348_v42 = vsel %vm3338_vm12, %v3345_v35, %v3347_v41  ;;  %v3349_v36 = vsel %vm3337_vm7, %v3327_v5, %v3330_v53  ;;  %v3350_v28 = vsel %vm3340_vm11, %v3336_v13, 1326507024  ;;  %v7767_v39 = vadd.s32 4294967169, %v3413_v37  ;;  %v15675_v41 = vld [vmem:[#allocation16_spill] sm:$0xff] }
 0x18d   :  { %v3061_v55 = vclz %v7752_v29  ;;  %v3341_v19 = vsel %vm3337_vm7, %v3321_v20, %v3324_v43  ;;  %v3343_v57 = vsel %vm3339_vm9, %v3327_v5, %v3342_v63  ;;  %v3351_v31 = vsel %vm3339_vm9, %v3333_v16, %v3350_v28 }
 0x18e   :  { %v10576_v33 = vsub.s32 %v3573_v10, %v3576_v24  ;;  %v3352_v26 = vsel %vm3338_vm12, %v3349_v36, %v3351_v31  ;;  %v10579_v22 = vmul.u32.u64.low %v3353_v58, %v3348_v42  ;;  %v10580_v18 = vmul.u32.u64.high %v3353_v58, %v3348_v42, %v10579_v22 }
 0x18f   :  { %v3228_v45 = vshrl.u32 %v15620_v27, %v10540_v2  ;;  %v10587_v29 = vshll.u32 %v15620_v27, %v10512_v62  ;;  %v10589_v34 = vmul.u32.u64.low %v3353_v58, %v3352_v26  ;;  %v10590_v43 = vmul.u32.u64.high %v3353_v58, %v3352_v26, %v10589_v34 }
 0x190   :  { %v10594_v24 = vshrl.u32 %v15617_v6, %v10540_v2  ;;  %v3344_v10 = vsel %vm3338_vm12, %v3341_v19, %v3343_v57  ;;  %v3419_v5 = vadd.s32 1, %v7767_v39  ;;  %v468_v53 = vadd.f32 %v436_v47, %v10268_v46 }
 0x191   :  { %v2865_v16 = vand.u32 2147483647, %v2864_v23  ;;  %v2867_v37 = vcvt.s32.f32 %v2860_v52  ;;  %v10601_v13 = vsel %vm7758_vm6, 0, %v10546_v8  ;;  %v7753_v63 = vadd.s32 4294967294, %v3061_v55 }
 0x192   :  { %v3579_v35 = vsub.s32 0, %v10576_v33  ;;  %v3363_v20 = vadd.s32 1, %v10580_v18  ;;  %vm3420_vm13 = vcmp.gt.s32.totalorder %v3419_v5, 0  ;;  %v10606_v42 = vadd.f32 %v15675_v41, %v468_v53  ;;  %v8840_v53 = vld [vmem:[%s15365_s3 + $0x10] ss:$8 sps:$4 sm:$0xff]  }
 0x193   :  { %v3360_v51 = vmul.u32 %v3353_v58, %v3344_v10  ;;  %vm3362_vm14 = vc.u32 %v10590_v43, %v10579_v22  ;;  %v15472_v46 = vand.u32 2147483647, %v10533_v54  ;;  %v3421_v52 = vsel %vm3420_vm13, %v3419_v5, 0  ;;  %4289 = vmatpush1.bf16.msra.mxu0 %v8840_v53  ;;  %v8844_v54 = vld [vmem:[%s15365_s3 + $0x34] ss:$8 sps:$4 sm:$0xff]  }
 0x194   :  { %v10612_v23 = vshrl.u32 %v10468_v56, 5  ;;  %v10615_v8 = vor.u32 %v3228_v45, %v10544_v0  ;;  %v3364_v47 = vsel %vm3362_vm14, %v3363_v20, %v10580_v18  ;;  %v3423_v36 = vand.u32 31, %v3421_v52 }
 0x195   :  { %v10618_v28 = vmul.f32 %v2867_v37, %v2865_v16  ;;  %v3169_v39 = vsub.s32 32, %v10601_v13  ;;  %v3365_v55 = vadd.s32 %v3364_v47, %v3360_v51  ;;  %v3173_v19 = vsub.s32 4294967266, %v10601_v13  ;;  %v8841_v16 = vld [vmem:[%s15365_s3 + $0x24] ss:$8 sps:$4 sm:$0xff]  }
 0x196   :  { %15676 = vst [vmem:[#allocation16_spill] sm:$0xff] %v10612_v23  ;;  %15677 = vst [vmem:[#allocation56_spill] sm:$0xff] %v10615_v8  ;;  %vm7754_vm4 = vcmp.lt.s32.totalorder %v7753_v63, 0  ;;  %v10625_v56 = vmin.u32 %v3579_v35, %v10576_v33  ;;  %v3424_v57 = vsub.s32 32, %v3423_v36  ;;  %v3416_v31 = vand.u32 8388607, %v15472_v46  ;;  %4290 = vmatprep.subr.bf16.mxu0 %v8841_v16 }
 0x197   :  { %v3366_v0 = vadd.s32 536870912, %v3365_v55  ;;  %v3426_v26 = vshll.u32 %v15596_v40, %v3423_v36  ;;  %v3429_v18 = vshll.u32 %v15636_v32, %v3423_v36  ;;  %v3432_v10 = vshll.u32 %v15638_v4, %v3423_v36  ;;  %4291 = vmatpush1.bf16.msra.mxu0 %v8843_v44 }
 0x198   :  { %v3427_v45 = vshrl.u32 %v15636_v32, %v3424_v57  ;;  %v3430_v34 = vshrl.u32 %v15638_v4, %v3424_v57  ;;  %v3433_v5 = vshrl.u32 %v15639_v7, %v3424_v57  ;;  %v3422_v35 = vshrl.u32 %v3421_v52, 5  ;;  %4292 = vmatprep.subr.bf16.mxu0 %v8844_v54  ;;  %v10684_v54 = vld [vmem:[%s15363_s2 + $0x3] ss:$0 sm:$0xff] }
 0x199   :  { %v10641_v37 = vshrl.u32 %v3366_v0, 30  ;;  %v3435_v20 = vshll.u32 %v15639_v7, %v3423_v36  ;;  %v3436_v41 = vshrl.u32 %v15620_v27, %v3424_v57  ;;  %v2869_v51 = vxor.u32 2147483648, %v10618_v28  ;;  %15679 = vst [vmem:[#allocation58_spill] sm:$0xff] %v10684_v54 }
 0x19a   :  { %v3428_v47 = vor.u32 %v3427_v45, %v3426_v26  ;;  %v3431_v46 = vor.u32 %v3430_v34, %v3429_v18  ;;  %v3434_v58 = vor.u32 %v3433_v5, %v3432_v10  ;;  %v3171_v62 = vshrl.u32 %v10528_v14, %v3169_v39 }
 0x19b   :  { %15678 = vst [vmem:[#allocation57_spill] sm:$0xff] %v10641_v37  ;;  %v3174_v2 = vadd.s32 127, %v3173_v19  ;;  %v3368_v0 = vshll.u32 %v10641_v37, 30  ;;  %v3437_v52 = vor.u32 %v3436_v41, %v3435_v20  ;;  %vm15495_vm6 = vcmp.lt.s32.totalorder %v10612_v23, 4 }
 0x19c   :  { %v10656_v26 = vsel %vm7754_vm4, 0, %v7753_v63  ;;  %v3417_v18 = vor.u32 8388608, %v3416_v31  ;;  %v3438_v45 = vshll.u32 %v15620_v27, %v3423_v36  ;;  %v3439_v34 = vshrl.u32 %v15617_v6, %v3424_v57  ;;  %v8846_v63 = vld [vmem:[%s15365_s3 + $0x30] ss:$8 sps:$4 sm:$0xff]  }
 0x19d   :  { %vm15500_vm7 = vcmp.lt.s32.totalorder %v9995_v3, 0  ;;  %v3581_v14 = vclz %v10625_v56  ;;  %vm3441_vm9 = vcmp.lt.s32.totalorder %v3422_v35, 1  ;;  %vm3443_vm11 = vcmp.lt.s32.totalorder %v3422_v35, 3  ;;  %4293 = vmatpush1.bf16.msra.mxu0 %v8846_v63 }
 0x19e   :  { %vm3444_vm12 = vcmp.lt.s32.totalorder %v3422_v35, 4  ;;  %v3440_v39 = vor.u32 %v3439_v34, %v3438_v45  ;;  %v3449_v10 = vsel %vm3441_vm9, %v3428_v47, %v3431_v46  ;;  %v10666_v36 = vsub.s32 %v3365_v55, %v3368_v0 }
 0x19f   :  { %v3446_v19 = vsel %vm3444_vm12, %v3434_v58, 2102212464  ;;  %v3450_v5 = vsel %vm3444_vm12, %v3437_v52, 920167782  ;;  %v3425_v31 = vshrl.u32 %v15596_v40, %v3424_v57  ;;  %vm3442_vm13 = vcmp.lt.s32.totalorder %v3422_v35, 2 }
 0x1a0   :  { %v3451_v56 = vsel %vm3443_vm11, %v3434_v58, %v3450_v5  ;;  %v3453_v16 = vsel %vm3441_vm9, %v3431_v46, %v3434_v58  ;;  %v3454_v20 = vsel %vm3444_vm12, %v3440_v39, 1326507024  ;;  %v3457_v41 = vshll.u32 %v3417_v18, 8  ;;  %v9152_v39 = vld [vmem:[%s15364_s6] sm:$0xff]  }
 0x1a1   :  { %v3452_v53 = vsel %vm3442_vm13, %v3449_v10, %v3451_v56  ;;  %v3069_v44 = vsub.s32 4294967266, %v10656_v26  ;;  %v3445_v45 = vsel %vm3441_vm9, %v3425_v31, %v3428_v47  ;;  %v3447_v34 = vsel %vm3443_vm11, %v3431_v46, %v3446_v19  ;;  %8257 = vmatprep.subr.bf16.mxu0 %v9152_v39 }
 0x1a2   :  { %v3455_v55 = vsel %vm3443_vm11, %v3437_v52, %v3454_v20  ;;  %v10677_v0 = vmul.u32.u64.low %v3457_v41, %v3452_v53  ;;  %v10678_v37 = vmul.u32.u64.high %v3457_v41, %v3452_v53, %v10677_v0  ;;  %v10688_v58 = vadd.f32 %v10684_v54, %v10606_v42 }
 0x1a3   :  { %v3456_v57 = vsel %vm3442_vm13, %v3453_v16, %v3455_v55  ;;  %v3170_v46 = vshll.u32 %v10414_v25, %v10601_v13  ;;  %v3371_v47 = vsub.s32 0, %v10666_v36  ;;  %v3175_v19 = vshll.u32 %v3174_v2, 23 }
 0x1a4   :  { %15680 = vst [vmem:[#allocation59_spill] sm:$0xff] %v10688_v58  ;;  %v10693_v52 = vmul.u32.u64.low %v3457_v41, %v3456_v57  ;;  %v10694_v18 = vmul.u32.u64.high %v3457_v41, %v3456_v57, %v10693_v52  ;;  %v7773_v10 = vadd.s32 4294967294, %v3581_v14  ;;  %v3448_v5 = vsel %vm3442_vm13, %v3445_v45, %v3447_v34 }
 0x1a5   :  { %v3724_v42 = vand.u32 2139095040, %v10688_v58  ;;  %v10701_v63 = vor.u32 %v3171_v62, %v3170_v46  ;;  %v10706_v25 = vsel %vm15495_vm6, %v10615_v8, 920167782  ;;  %v15682_v13 = vor.u32 %v10594_v24, %v10587_v29 }
 0x1a6   :  { %15681 = vst [vmem:[#allocation60_spill] sm:$0xff] %v10706_v25  ;;  %v3065_v2 = vsub.s32 32, %v10656_v26  ;;  %v10719_v35 = vsel %vm15500_vm7, %v2869_v51, %v10618_v28  ;;  %v3070_v62 = vadd.s32 127, %v3069_v44  ;;  %v3467_v14 = vadd.s32 1, %v10678_v37 }
 0x1a7   :  { %v10713_v31 = vsel %vm15495_vm6, %v15682_v13, 1326507024  ;;  %15684 = vst [vmem:[#allocation62_spill] sm:$0xff] %v10719_v35  ;;  %v3725_v56 = vshrl.u32 %v3724_v42, 23  ;;  %v3049_v53 = vadd.s32 %v10406_v15, %v10411_v60  ;;  %v7764_v29 = vmin.u32 %v3371_v47, %v10666_v36  ;;  %v10735_v60 = vld [vmem:[%s15363_s2] ss:$0 sm:$0xff] }
 0x1a8   :  { %15683 = vst [vmem:[#allocation61_spill] sm:$0xff] %v10713_v31  ;;  %v3464_v24 = vmul.u32 %v3457_v41, %v3448_v5  ;;  %vm3466_vm14 = vc.u32 %v10694_v18, %v10677_v0  ;;  %v10727_v16 = vor.u32 4788187, %v3175_v19  ;;  %vm7774_vm4 = vcmp.lt.s32.totalorder %v7773_v10, 0  ;;  %v15685_v5 = vld [vmem:[#allocation10_spill] sm:$0xff] }
 0x1a9   :  { %v3468_v20 = vsel %vm3466_vm14, %v3467_v14, %v10678_v37  ;;  %v7779_v28 = vadd.s32 4294967169, %v3725_v56  ;;  %v3067_v44 = vshrl.u32 %v3049_v53, %v3065_v2  ;;  %v15483_v34 = vand.u32 2147483647, %v10688_v58  ;;  %v10744_v37 = vld [vmem:[%s15363_s2 + $0x1] ss:$0 sm:$0xff] }
 0x1aa   :  { %v3469_v45 = vadd.s32 %v3468_v20, %v3464_v24  ;;  %v3071_v55 = vshll.u32 %v3070_v62, 23  ;;  %v10739_v15 = vmul.f32 %v10735_v60, %v10515_v12  ;;  %v10748_v41 = vmul.f32 %v10744_v37, %v10549_v1 }
 0x1ab   :  { %v3731_v57 = vadd.s32 1, %v7779_v28  ;;  %v3066_v46 = vshll.u32 %v10519_v30, %v10656_v26  ;;  %v10752_v47 = vsel %vm7774_vm4, 0, %v7773_v10  ;;  %v3373_v52 = vclz %v7764_v29 }
 0x1ac   :  { %v3470_v39 = vadd.s32 536870912, %v3469_v45  ;;  %v10757_v19 = vadd.s32 %v10493_v11, %v10503_v9  ;;  %v15484_v42 = vand.u32 2147483647, %v15685_v5  ;;  %v3728_v30 = vand.u32 8388607, %v15483_v34 }
 0x1ad   :  { %vm3732_vm9 = vcmp.gt.s32.totalorder %v3731_v57, 0  ;;  %v10760_v13 = vor.u32 %v3067_v44, %v3066_v46  ;;  %v10766_v10 = vor.u32 4788187, %v3071_v55  ;;  %v3585_v2 = vsub.s32 32, %v10752_v47 }
 0x1ae   :  { %v10762_v1 = vshrl.u32 %v3470_v39, 30  ;;  %v3733_v26 = vsel %vm3732_vm9, %v3731_v57, 0  ;;  %v1970_v11 = vshll.u32 %v15596_v40, %v9982_v17  ;;  %v10774_v56 = vadd.s32 4294967294, %v3373_v52 }
 0x1af   :  { %v3735_v62 = vand.u32 31, %v3733_v26  ;;  %v10779_v24 = vand.u32 8388607, %v15484_v42  ;;  %v1971_v20 = vshrl.u32 %v15636_v32, %v10032_v59  ;;  %v1974_v28 = vshrl.u32 %v15638_v4, %v10032_v59 }
 0x1b0   :  { %15686 = vst [vmem:[#allocation10_spill] sm:$0xff] %v10762_v1  ;;  %v3472_v53 = vshll.u32 %v10762_v1, 30  ;;  %v3729_v44 = vor.u32 8388608, %v3728_v30  ;;  %v3734_v55 = vshrl.u32 %v3733_v26, 5  ;;  %vm7766_vm4 = vcmp.lt.s32.totalorder %v10774_v56, 0 }
 0x1b1   :  { %v3736_v29 = vsub.s32 32, %v3735_v62  ;;  %v3738_v57 = vshll.u32 %v15596_v40, %v3735_v62  ;;  %v3741_v46 = vshll.u32 %v15636_v32, %v3735_v62  ;;  %v3744_v51 = vshll.u32 %v15638_v4, %v3735_v62 }
 0x1b2   :  { %v10787_v52 = vsub.s32 %v3469_v45, %v3472_v53  ;;  %v3747_v12 = vshll.u32 %v15639_v7, %v3735_v62  ;;  %v3750_v1 = vshll.u32 %v15620_v27, %v3735_v62  ;;  %v1973_v45 = vshll.u32 %v15636_v32, %v9982_v17 }
 0x1b3   :  { %v3739_v39 = vshrl.u32 %v15636_v32, %v3736_v29  ;;  %v3742_v34 = vshrl.u32 %v15638_v4, %v3736_v29  ;;  %v3745_v42 = vshrl.u32 %v15639_v7, %v3736_v29  ;;  %v3748_v14 = vshrl.u32 %v15620_v27, %v3736_v29 }
 0x1b4   :  { %v3751_v30 = vshrl.u32 %v15617_v6, %v3736_v29  ;;  %v3769_v8 = vshll.u32 %v3729_v44, 8  ;;  %v10799_v31 = vor.u32 %v1971_v20, %v1970_v11  ;;  %v3475_v23 = vsub.s32 0, %v10787_v52 }
 0x1b5   :  { %v3740_v26 = vor.u32 %v3739_v39, %v3738_v57  ;;  %v3743_v9 = vor.u32 %v3742_v34, %v3741_v46  ;;  %v3746_v53 = vor.u32 %v3745_v42, %v3744_v51  ;;  %v3749_v25 = vor.u32 %v3748_v14, %v3747_v12 }
 0x1b6   :  { %v3752_v35 = vor.u32 %v3751_v30, %v3750_v1  ;;  %vm3753_vm11 = vcmp.lt.s32.totalorder %v3734_v55, 1  ;;  %v1975_v3 = vor.u32 %v1974_v28, %v1973_v45  ;;  %vm3756_vm12 = vcmp.lt.s32.totalorder %v3734_v55, 4 }
 0x1b7   :  { %v3761_v58 = vsel %vm3753_vm11, %v3740_v26, %v3743_v9  ;;  %v1976_v34 = vshll.u32 %v15638_v4, %v9982_v17  ;;  %v1980_v62 = vshrl.u32 %v15620_v27, %v10032_v59  ;;  %vm3755_vm13 = vcmp.lt.s32.totalorder %v3734_v55, 3 }
 0x1b8   :  { %v3762_v51 = vsel %vm3756_vm12, %v3749_v25, 920167782  ;;  %v1977_v12 = vshrl.u32 %v15639_v7, %v10032_v59  ;;  %v1979_v42 = vshll.u32 %v15639_v7, %v9982_v17  ;;  %vm3754_vm14 = vcmp.lt.s32.totalorder %v3734_v55, 2 }
 0x1b9   :  { %v3758_v1 = vsel %vm3756_vm12, %v3746_v53, 2102212464  ;;  %v3763_v11 = vsel %vm3755_vm13, %v3746_v53, %v3762_v51  ;;  %v3765_v14 = vsel %vm3753_vm11, %v3743_v9, %v3746_v53  ;;  %v7768_v20 = vmin.u32 %v3475_v23, %v10787_v52 }
 0x1ba   :  { %v3737_v28 = vshrl.u32 %v15596_v40, %v3736_v29  ;;  %v3764_v44 = vsel %vm3754_vm14, %v3761_v58, %v3763_v11  ;;  %v3766_v57 = vsel %vm3756_vm12, %v3752_v35, 1326507024  ;;  %v1981_v45 = vor.u32 %v1980_v62, %v1979_v42 }
 0x1bb   :  { %v3767_v46 = vsel %vm3755_vm13, %v3749_v25, %v3766_v57  ;;  %v10817_v39 = vmul.u32.u64.low %v3769_v8, %v3764_v44  ;;  %v10818_v30 = vmul.u32.u64.high %v3769_v8, %v3764_v44, %v10817_v39  ;;  %v3759_v51 = vsel %vm3755_vm13, %v3743_v9, %v3758_v1 }
 0x1bc   :  { %v3757_v54 = vsel %vm3753_vm11, %v3737_v28, %v3740_v26  ;;  %v3768_v53 = vsel %vm3754_vm14, %v3765_v14, %v3767_v46  ;;  %v1983_v23 = vshrl.u32 %v15617_v6, %v10032_v59  ;;  %v3587_v29 = vshrl.u32 %v10757_v19, %v3585_v2 }
 0x1bd   :  { %v1961_v58 = vor.u32 8388608, %v10779_v24  ;;  %v1978_v25 = vor.u32 %v1977_v12, %v1976_v34  ;;  %v3477_v35 = vclz %v7768_v20  ;;  %v1982_v26 = vshll.u32 %v15620_v27, %v9982_v17 }
 0x1be   :  { %v10829_v11 = vmul.u32.u64.low %v3769_v8, %v3768_v53  ;;  %v10830_v44 = vmul.u32.u64.high %v3769_v8, %v3768_v53, %v10829_v11  ;;  %v3760_v9 = vsel %vm3754_vm14, %v3757_v54, %v3759_v51  ;;  %v3779_v62 = vadd.s32 1, %v10818_v30 }
 0x1bf   :  { %vm1985_vm9 = vcmp.lt.s32.totalorder %v9979_v61, 1  ;;  %vm1988_vm11 = vcmp.lt.s32.totalorder %v9979_v61, 4  ;;  %v1984_v19 = vor.u32 %v1983_v23, %v1982_v26  ;;  %vm1987_vm12 = vcmp.lt.s32.totalorder %v9979_v61, 3 }
 0x1c0   :  { %v1993_v2 = vsel %vm1985_vm9, %v10799_v31, %v1975_v3  ;;  %v1994_v24 = vsel %vm1988_vm11, %v1981_v45, 920167782  ;;  %v15687_v17 = vshll.u32 %v10576_v33, %v10752_v47  ;;  %v15688_v55 = vsub.s32 4294967266, %v10752_v47 }
 0x1c1   :  { %v1969_v12 = vshrl.u32 %v15596_v40, %v10032_v59  ;;  %v1995_v42 = vsel %vm1987_vm12, %v1978_v25, %v1994_v24  ;;  %v3776_v1 = vmul.u32 %v3769_v8, %v3760_v9  ;;  %vm3778_vm13 = vc.u32 %v10830_v44, %v10817_v39  ;;  %v15691_v24 = vld [vmem:[#allocation11_spill] sm:$0xff] }
 0x1c2   :  { %v10847_v54 = vor.u32 %v3587_v29, %v15687_v17  ;;  %v3590_v34 = vadd.s32 127, %v15688_v55  ;;  %vm1986_vm14 = vcmp.lt.s32.totalorder %v9979_v61, 2  ;;  %v1990_v33 = vsel %vm1988_vm11, %v1978_v25, 2102212464 }
 0x1c3   :  { %v3376_v47 = vsel %vm7766_vm4, 0, %v10774_v56  ;;  %v3780_v14 = vsel %vm3778_vm13, %v3779_v62, %v10818_v30  ;;  %v1996_v59 = vsel %vm1986_vm14, %v1993_v2, %v1995_v42  ;;  %v1997_v8 = vsel %vm1985_vm9, %v1975_v3, %v1978_v25 }
 0x1c4   :  { %v7769_v20 = vadd.s32 4294967294, %v3477_v35  ;;  %v10868_v28 = vadd.s32 %v3780_v14, %v3776_v1  ;;  %v1998_v57 = vsel %vm1988_vm11, %v1984_v19, 1326507024  ;;  %v2001_v46 = vshll.u32 %v1961_v58, 8  ;;  %v15694_v14 = vld [vmem:[#allocation31_spill] sm:$0xff] }
 0x1c5   :  { %v3591_v51 = vshll.u32 %v3590_v34, 23  ;;  %v1989_v56 = vsel %vm1985_vm9, %v1969_v12, %v10799_v31  ;;  %v1991_v30 = vsel %vm1987_vm12, %v1975_v3, %v1990_v33  ;;  %v1999_v53 = vsel %vm1987_vm12, %v1981_v45, %v1998_v57 }
 0x1c6   :  { %v3377_v23 = vsub.s32 32, %v3376_v47  ;;  %v2000_v29 = vsel %vm1986_vm14, %v1997_v8, %v1999_v53  ;;  %v10881_v25 = vmul.u32.u64.low %v2001_v46, %v1996_v59  ;;  %v10882_v35 = vmul.u32.u64.high %v2001_v46, %v1996_v59, %v10881_v25 }
 0x1c7   :  { %v15689_v58 = vand.u32 2147483647, %v10727_v16  ;;  %v15690_v11 = vcvt.s32.f32 %v10701_v63  ;;  %v3381_v31 = vsub.s32 4294967266, %v3376_v47  ;;  %v3361_v45 = vadd.s32 %v10579_v22, %v10590_v43 }
 0x1c8   :  { %v10891_v9 = vmul.u32.u64.low %v2001_v46, %v2000_v29  ;;  %v10892_v3 = vmul.u32.u64.high %v2001_v46, %v2000_v29, %v10891_v9  ;;  %vm7770_vm4 = vcmp.lt.s32.totalorder %v7769_v20, 0  ;;  %v3782_v62 = vadd.s32 536870912, %v10868_v28 }
 0x1c9   :  { %v10889_v26 = vmul.f32 %v15690_v11, %v15689_v58  ;;  %v1992_v19 = vsel %vm1986_vm14, %v1989_v56, %v1991_v30  ;;  %v3073_v2 = vand.u32 2147483647, %v10766_v10  ;;  %v3075_v16 = vcvt.s32.f32 %v10760_v13  ;;  %v15693_v10 = vld [vmem:[#allocation35_spill] sm:$0xff] }
 0x1ca   :  { %v3592_v63 = vor.u32 4788187, %v3591_v51  ;;  %v2057_v17 = vand.u32 2147483647, %v15691_v24  ;;  %v3595_v55 = vcvt.s32.f32 %v10847_v54  ;;  %v3378_v34 = vshll.u32 %v10666_v36, %v3376_v47 }
 0x1cb   :  { %v3379_v12 = vshrl.u32 %v3361_v45, %v3377_v23  ;;  %v2011_v22 = vadd.s32 1, %v10882_v35  ;;  %v3382_v43 = vadd.s32 127, %v3381_v31  ;;  %v10905_v42 = vsel %vm7770_vm4, 0, %v7769_v20 }
 0x1cc   :  { %v2008_v1 = vmul.u32 %v2001_v46, %v1992_v19  ;;  %vm2010_vm9 = vc.u32 %v10892_v3, %v10881_v25  ;;  %v10909_v61 = vshrl.u32 %v3782_v62, 30  ;;  %v2075_v33 = vshrl.u32 %v15636_v32, %v15693_v10 }
 0x1cd   :  { %v2012_v13 = vsel %vm2010_vm9, %v2011_v22, %v10882_v35  ;;  %v2078_v36 = vshrl.u32 %v15638_v4, %v15693_v10  ;;  %v2064_v47 = vand.u32 8388607, %v2057_v17  ;;  %v2074_v59 = vshll.u32 %v15596_v40, %v15694_v14 }
 0x1ce   :  { %15692 = vst [vmem:[#allocation11_spill] sm:$0xff] %v10909_v61  ;;  %v2013_v54 = vadd.s32 %v2012_v13, %v2008_v1  ;;  %v2081_v8 = vshrl.u32 %v15639_v7, %v15693_v10  ;;  %v2077_v20 = vshll.u32 %v15636_v32, %v15694_v14  ;;  %v2080_v57 = vshll.u32 %v15638_v4, %v15694_v14  ;;  %v15695_v1 = vld [vmem:[#allocation32_spill] sm:$0xff] }
 0x1cf   :  { %v2083_v46 = vshll.u32 %v15639_v7, %v15694_v14  ;;  %v2084_v51 = vshrl.u32 %v15620_v27, %v15693_v10  ;;  %v3383_v56 = vshll.u32 %v3382_v43, 23  ;;  %v2086_v53 = vshll.u32 %v15620_v27, %v15694_v14 }
 0x1d0   :  { %v2014_v30 = vadd.s32 536870912, %v2013_v54  ;;  %v2087_v23 = vshrl.u32 %v15617_v6, %v15693_v10  ;;  %v2076_v29 = vor.u32 %v2075_v33, %v2074_v59  ;;  %v2079_v35 = vor.u32 %v2078_v36, %v2077_v20 }
 0x1d1   :  { %v2082_v58 = vor.u32 %v2081_v8, %v2080_v57  ;;  %v2085_v11 = vor.u32 %v2084_v51, %v2083_v46  ;;  %v3593_v31 = vand.u32 2147483647, %v3592_v63  ;;  %v3485_v9 = vsub.s32 4294967266, %v10905_v42 }
 0x1d2   :  { %v10935_v45 = vshrl.u32 %v2014_v30, 30  ;;  %v2088_v62 = vor.u32 %v2087_v23, %v2086_v53  ;;  %v3380_v19 = vor.u32 %v3379_v12, %v3378_v34  ;;  %v3784_v22 = vshll.u32 %v10909_v61, 30 }
 0x1d3   :  { %v2065_v43 = vor.u32 8388608, %v2064_v47  ;;  %vm2092_vm11 = vcmp.lt.s32.totalorder %v15695_v1, 4  ;;  %vm2089_vm12 = vcmp.lt.s32.totalorder %v15695_v1, 1  ;;  %vm2091_vm13 = vcmp.lt.s32.totalorder %v15695_v1, 3 }
 0x1d4   :  { %v2016_v13 = vshll.u32 %v10935_v45, 30  ;;  %v2098_v33 = vsel %vm2092_vm11, %v2085_v11, 920167782  ;;  %v3384_v36 = vor.u32 4788187, %v3383_v56  ;;  %v2097_v63 = vsel %vm2089_vm12, %v2076_v29, %v2079_v35 }
 0x1d5   :  { %v2099_v14 = vsel %vm2091_vm13, %v2082_v58, %v2098_v33  ;;  %v2101_v34 = vsel %vm2089_vm12, %v2079_v35, %v2082_v58  ;;  %v3486_v12 = vadd.s32 127, %v3485_v9  ;;  %v2073_v59 = vshrl.u32 %v15596_v40, %v15693_v10 }
 0x1d6   :  { %v10948_v47 = vsub.s32 %v2013_v54, %v2016_v13  ;;  %v2102_v8 = vsel %vm2092_vm11, %v2088_v62, 1326507024  ;;  %v10953_v20 = vsub.s32 %v10868_v28, %v3784_v22  ;;  %vm2090_vm14 = vcmp.lt.s32.totalorder %v15695_v1, 2 }
 0x1d7   :  { %v2094_v57 = vsel %vm2092_vm11, %v2082_v58, 2102212464  ;;  %v2103_v46 = vsel %vm2091_vm13, %v2085_v11, %v2102_v8  ;;  %v2100_v56 = vsel %vm2090_vm14, %v2097_v63, %v2099_v14  ;;  %v2105_v30 = vshll.u32 %v2065_v43, 8  ;;  %v15696_v63 = vld [vmem:[#allocation37_spill] sm:$0xff] }
 0x1d8   :  { %v2019_v51 = vsub.s32 0, %v10948_v47  ;;  %v2104_v54 = vsel %vm2090_vm14, %v2101_v34, %v2103_v46  ;;  %v10963_v10 = vmul.f32 %v3075_v16, %v3073_v2  ;;  %v10965_v53 = vmul.f32 %v3595_v55, %v3593_v31  ;;  %v15700_v46 = vld [vmem:[#allocation26_spill] sm:$0xff] }
 0x1d9   :  { %v3385_v28 = vand.u32 2147483647, %v3384_v36  ;;  %v2093_v23 = vsel %vm2089_vm12, %v2073_v59, %v2076_v29  ;;  %v2095_v11 = vsel %vm2091_vm13, %v2079_v35, %v2094_v57  ;;  %v3487_v22 = vshll.u32 %v3486_v12, 23 }
 0x1da   :  { %v7712_v58 = vmin.u32 %v2019_v51, %v10948_v47  ;;  %v10972_v9 = vmul.u32.u64.low %v2105_v30, %v2104_v54  ;;  %v10973_v62 = vmul.u32.u64.high %v2105_v30, %v2104_v54, %v10972_v9  ;;  %v3787_v13 = vsub.s32 0, %v10953_v20 }
 0x1db   :  { %v10976_v43 = vmul.u32.u64.low %v2105_v30, %v2100_v56  ;;  %v10977_v2 = vmul.u32.u64.high %v2105_v30, %v2100_v56, %v10976_v43  ;;  %v3181_v16 = vxor.u32 2147483648, %v10889_v26  ;;  %v3387_v55 = vcvt.s32.f32 %v3380_v19 }
 0x1dc   :  { %v10983_v29 = vadd.f32 %v10748_v41, %v10739_v15  ;;  %v2021_v31 = vclz %v7712_v58  ;;  %v3077_v35 = vxor.u32 2147483648, %v10963_v10  ;;  %vm1955_vm4 = vcmp.lt.s32.totalorder %v15685_v5, 0 }
 0x1dd   :  { %v2096_v36 = vsel %vm2090_vm14, %v2093_v23, %v2095_v11  ;;  %vm15498_vm9 = vcmp.lt.s32.totalorder %v15696_v63, 0  ;;  %v3388_v14 = vmul.f32 %v3387_v55, %v3385_v28  ;;  %vm2114_vm11 = vc.u32 %v10973_v62, %v10976_v43 }
 0x1de   :  { %v7713_v34 = vadd.s32 4294967294, %v2021_v31  ;;  %v10995_v15 = vsel %vm15501_vm3, %v10500_v21, 0  ;;  %v3481_v41 = vsub.s32 32, %v10905_v42  ;;  %v10998_v19 = vor.u32 4788187, %v3487_v22 }
 0x1df   :  { %v7780_v12 = vmin.u32 %v3787_v13, %v10953_v20  ;;  %v2115_v1 = vadd.s32 1, %v10977_v2  ;;  %8614 = vmatpush3.bf16.msra.mxu1 %v10995_v15  ;;  %v15697_v59 = vand.u32 2147483647, %v15685_v5  ;;  %v2009_v21 = vadd.s32 %v10881_v25, %v10892_v3 }
 0x1e0   :  { %vm7714_vm13 = vcmp.lt.s32.totalorder %v7713_v34, 0  ;;  %v2112_v57 = vmul.u32 %v2105_v30, %v2096_v36  ;;  %v2247_v51 = vsub.s32 4, %v15700_v46  ;;  %vm15497_vm14 = vcmp.lt.s32.totalorder %v10432_v49, 0 }
 0x1e1   :  { %vm11005_vm12 = vcmp.le.f32.partialorder %v15697_v59, 0.7853982  ;;  %v2024_v56 = vsel %vm7714_vm13, 0, %v7713_v34  ;;  %v2039_v54 = vsub.s32 4, %v10935_v45  ;;  %v2116_v28 = vsel %vm2114_vm11, %v2115_v1, %v10977_v2 }
 0x1e2   :  { %v15701_v23 = vand.u32 2147483647, %v15662_v48  ;;  %vm15499_vm10 = vcmp.lt.s32.totalorder %v10264_v50, 0  ;;  %v2025_v25 = vsub.s32 32, %v2024_v56  ;;  %v2029_v3 = vsub.s32 4294967266, %v2024_v56 }
 0x1e3   :  { %v2117_v30 = vadd.s32 %v2116_v28, %v2112_v57  ;;  %v3389_v9 = vxor.u32 2147483648, %v3388_v14  ;;  %v3465_v22 = vadd.s32 %v10677_v0, %v10694_v18  ;;  %v3789_v13 = vclz %v7780_v12  ;;  %v236_v0 = vpop.permute.xlu1 %235  ;;  %v15708_v28 = vld [vmem:[#allocation8_spill] sm:$0xff] }
 0x1e4   :  { %vm11020_vm6 = vcmp.le.f32.partialorder %v15701_v23, 0.7853982  ;;  %v2026_v2 = vshll.u32 %v10948_v47, %v2024_v56  ;;  %v15704_v55 = vand.u32 2147483647, %v10432_v49  ;;  %v15705_v31 = vmov 0 }
 0x1e5   :  { %v2249_v11 = vsel %vm11020_vm6, %v15662_v48, %v10459_v38  ;;  %v2027_v36 = vshrl.u32 %v2009_v21, %v2025_v25  ;;  %v2030_v34 = vadd.s32 127, %v2029_v3  ;;  %v2118_v1 = vadd.s32 536870912, %v2117_v30 }
 0x1e6   :  { %vm11034_vm11 = vcmp.le.f32.partialorder %v15704_v55, 0.7853982  ;;  %v2248_v38 = vsel %vm2163_vm15, %v2247_v51, %v15700_v46  ;;  %v3483_v59 = vshrl.u32 %v3465_v22, %v3481_v41  ;;  %v3489_v57 = vand.u32 2147483647, %v10998_v19  ;;  %v15711_v22 = vld [vmem:[#allocation4_spill] sm:$0xff] }
 0x1e7   :  { %v15706_v31 = vsel %vm11034_vm11, 4294967295, %v15705_v31  ;;  %v2040_v18 = vsel %vm1955_vm4, %v2039_v54, %v10935_v45  ;;  %8891 = vcosq.f32 %v2249_v11  ;;  %v2028_v47 = vor.u32 %v2027_v36, %v2026_v2  ;;  %v15715_v55 = vld [vmem:[#allocation36_spill] sm:$0xff] }
 0x1e8   :  { %15707 = vst [vmem:[#allocation35_spill] sm:$0xff] %v15706_v31  ;;  %v2031_v12 = vshll.u32 %v2030_v34, 23  ;;  %v2119_v56 = vshrl.u32 %v2118_v1, 30  ;;  %8893 = vsinq.f32 %v2249_v11  ;;  %v11048_v21 = vsel %vm15498_vm9, %v3181_v16, %v10889_v26 }
 0x1e9   :  { %v3482_v41 = vshll.u32 %v10787_v52, %v10905_v42  ;;  %v7781_v46 = vadd.s32 4294967294, %v3789_v13  ;;  %v2250_v19 = vsel %vm11020_vm6, 0, %v2248_v38  ;;  %v11055_v51 = vmul.f32 %v10735_v60, %v236_v0 }
 0x1ea   :  { %v2032_v45 = vor.u32 4788187, %v2031_v12  ;;  %v2120_v54 = vshll.u32 %v2119_v56, 30  ;;  %v2351_v23 = vsub.s32 4, %v15708_v28  ;;  %v2042_v3 = vsel %vm11005_vm12, 0, %v2040_v18 }
 0x1eb   :  { %v3484_v25 = vor.u32 %v3483_v59, %v3482_v41  ;;  %vm11062_vm15 = vcmp.le.f32.partialorder %v2057_v17, 0.7853982  ;;  %v2143_v52 = vsub.s32 4, %v2119_v56  ;;  %v3390_v42 = vsel %vm15497_vm14, %v3389_v9, %v3388_v14  ;;  %v15716_v41 = vld [vmem:[#allocation33_spill] sm:$0xff] }
 0x1ec   :  { %v2033_v60 = vand.u32 2147483647, %v2032_v45  ;;  %v2035_v16 = vcvt.s32.f32 %v2028_v47  ;;  %v11068_v58 = vsub.s32 %v2117_v30, %v2120_v54  ;;  %v11075_v11 = vsel %vm15499_vm10, %v3077_v35, %v10963_v10 }
 0x1ed   :  { %vm7782_vm6 = vcmp.lt.s32.totalorder %v7781_v46, 0  ;;  %v2254_v17 = vadd.s32 3, %v2250_v19  ;;  %v15712_v13 = vand.u32 2147483647, %v15711_v22  ;;  %v2352_v30 = vsel %vm2267_vm5, %v2351_v23, %v15708_v28  ;;  %v401_v28 = vpop.permute.xlu1 %400  ;;  %v15717_v23 = vld [vmem:[#allocation19_spill] sm:$0xff] }
 0x1ee   :  { %v2036_v14 = vmul.f32 %v2035_v16, %v2033_v60  ;;  %v2123_v9 = vsub.s32 0, %v11068_v58  ;;  %v11094_v35 = vsel %vm11034_vm11, %v10432_v49, %v3390_v42  ;;  %v3491_v36 = vcvt.s32.f32 %v3484_v25  ;;  %v15721_v60 = vld [vmem:[#allocation51_spill] sm:$0xff] }
 0x1ef   :  { %vm11079_vm13 = vcmp.le.f32.partialorder %v15712_v13, 0.7853982  ;;  %v2046_v34 = vadd.s32 3, %v2042_v3  ;;  %vm2059_vm14 = vcmp.lt.s32.totalorder %v15691_v24, 0  ;;  %v11097_v1 = vsel %vm7782_vm6, 0, %v7781_v46 }
 0x1f0   :  { %v2353_v10 = vsel %vm11079_vm13, %v15711_v22, %v15715_v55  ;;  %v2037_v38 = vxor.u32 2147483648, %v2036_v14  ;;  %v7716_v59 = vmin.u32 %v2123_v9, %v11068_v58  ;;  %v2144_v0 = vsel %vm2059_vm14, %v2143_v52, %v2119_v56 }
 0x1f1   :  { %v8892_v18 = vpop.eup %8891  ;;  %v11102_v47 = vand.u32 3, %v2254_v17  ;;  %v2354_v12 = vsel %vm11079_vm13, 0, %v2352_v30  ;;  %8895 = vcosq.f32 %v2353_v10  ;;  %v2455_v19 = vsub.s32 4, %v15716_v41 }
 0x1f2   :  { %v8894_v45 = vpop.eup %8893  ;;  %v2038_v46 = vsel %vm1955_vm4, %v2037_v38, %v2036_v14  ;;  %v2125_v54 = vclz %v7716_v59  ;;  %8897 = vsinq.f32 %v2353_v10  ;;  %v15718_v25 = vand.u32 2147483647, %v15717_v23  ;;  %v586_v59 = vpop.permute.xlu1 %585 }
 0x1f3   :  { %v2041_v3 = vsel %vm11005_vm12, %v15685_v5, %v2038_v46  ;;  %v11118_v52 = vand.u32 3, %v2046_v34  ;;  %v2146_v42 = vsel %vm11062_vm15, 0, %v2144_v0  ;;  %v11126_v17 = vmul.f32 %v3491_v36, %v3489_v57 }
 0x1f4   :  { %vm11111_vm5 = vcmp.le.f32.partialorder %v15718_v25, 0.7853982  ;;  %8899 = vcosq.f32 %v2041_v3  ;;  %v7717_v13 = vadd.s32 4294967294, %v2125_v54  ;;  %v2358_v2 = vadd.s32 3, %v2354_v12 }
 0x1f5   :  { %v2457_v16 = vsel %vm11111_vm5, %v15717_v23, %v15721_v60  ;;  %8901 = vsinq.f32 %v2041_v3  ;;  %v2258_v14 = vxor.u32 2147483648, %v8894_v45  ;;  %v2261_v9 = vxor.u32 2147483648, %v8892_v18 }
 0x1f6   :  { %v2456_v8 = vsel %vm2371_vm8, %v2455_v19, %v15716_v41  ;;  %v2113_v30 = vadd.s32 %v10976_v43, %v10973_v62  ;;  %vm7718_vm4 = vcmp.lt.s32.totalorder %v7717_v13, 0  ;;  %vm2257_vm12 = vcmp.eq.s32.totalorder %v11102_v47, 0  ;;  %v15722_v62 = vld [vmem:[#allocation5_spill] sm:$0xff] }
 0x1f7   :  { %8903 = vcosq.f32 %v2457_v16  ;;  %v2128_v55 = vsel %vm7718_vm4, 0, %v7717_v13  ;;  %v2150_v57 = vadd.s32 3, %v2146_v42  ;;  %vm2260_vm6 = vcmp.eq.s32.totalorder %v11102_v47, 2  ;;  %v15726_v19 = vld [vmem:[#allocation13_spill] sm:$0xff]  ;;  %v15727_v42 = vld [vmem:[#allocation14_spill] sm:$0xff] }
 0x1f8   :  { %8905 = vsinq.f32 %v2457_v16  ;;  %v2129_v10 = vsub.s32 32, %v2128_v55  ;;  %v2133_v36 = vsub.s32 4294967266, %v2128_v55  ;;  %v11135_v34 = vand.u32 3, %v2358_v2  ;;  %v11157_v16 = vld [vmem:[%s15363_s2 + $0x2] ss:$0 sm:$0xff] }
 0x1f9   :  { %v2458_v38 = vsel %vm11111_vm5, 0, %v2456_v8  ;;  %v2259_v0 = vsel %vm2257_vm12, %v8892_v18, %v2258_v14  ;;  %v2262_v12 = vsel %vm2260_vm6, %v2261_v9, %v8894_v45  ;;  %v15723_v43 = vand.u32 2147483647, %v15722_v62 }
 0x1fa   :  { %v2559_v46 = vsub.s32 4, %v15726_v19  ;;  %v2130_v54 = vshll.u32 %v11068_v58, %v2128_v55  ;;  %v2131_v25 = vshrl.u32 %v2113_v30, %v2129_v10  ;;  %v2134_v3 = vadd.s32 127, %v2133_v36 }
 0x1fb   :  { %vm11141_vm8 = vcmp.le.f32.partialorder %v15723_v43, 0.7853982  ;;  %v8896_v60 = vpop.eup %8895  ;;  %v2462_v18 = vadd.s32 3, %v2458_v38  ;;  %v632_v58 = vmul.f32 %v11157_v16, %v586_v59  ;;  %vm2052_vm13 = vcmp.eq.s32.totalorder %v11118_v52, 2 }
 0x1fc   :  { %v2561_v56 = vsel %vm11141_vm8, %v15722_v62, %v15727_v42  ;;  %v2560_v45 = vsel %vm2475_vm1, %v2559_v46, %v15726_v19  ;;  %v8898_v13 = vpop.eup %8897  ;;  %v2132_v2 = vor.u32 %v2131_v25, %v2130_v54  ;;  %v2135_v14 = vshll.u32 %v2134_v3, 23  ;;  %v15728_v42 = vld [vmem:[#allocation58_spill] sm:$0xff] }
 0x1fd   :  { %8907 = vcosq.f32 %v2561_v56  ;;  %v2562_v9 = vsel %vm11141_vm8, 0, %v2560_v45  ;;  %vm2253_vm1 = vweird.f32 %v15662_v48  ;;  %vm2256_vm5 = vcmp.lt.s32.totalorder %v11102_v47, 2 }
 0x1fe   :  { %8909 = vsinq.f32 %v2561_v56  ;;  %v8900_v30 = vpop.eup %8899  ;;  %vm2049_vm4 = vcmp.eq.s32.totalorder %v11118_v52, 0  ;;  %v2136_v55 = vor.u32 4788187, %v2135_v14  ;;  %v2365_v10 = vxor.u32 2147483648, %v8896_v60 }
 0x1ff   :  { %v438_v36 = vmul.f32 %v10744_v37, %v401_v28  ;;  %v664_v38 = vadd.f32 %v632_v58, %v10983_v29  ;;  %v8902_v59 = vpop.eup %8901  ;;  %v11169_v43 = vand.u32 3, %v2150_v57  ;;  %v2263_v41 = vsel %vm2256_vm5, %v2259_v0, %v2262_v12 }
 0x200   :  { %v2362_v19 = vxor.u32 2147483648, %v8898_v13  ;;  %v2566_v46 = vadd.s32 3, %v2562_v9  ;;  %v2137_v25 = vand.u32 2147483647, %v2136_v55  ;;  %v2139_v3 = vcvt.s32.f32 %v2132_v2 }
 0x201   :  { %v8904_v54 = vpop.eup %8903  ;;  %vm2360_vm12 = vcmp.lt.s32.totalorder %v11135_v34, 2  ;;  %v2463_v47 = vand.u32 3, %v2462_v18  ;;  %v11173_v56 = vadd.f32 %v15728_v42, %v664_v38  ;;  %vm2048_vm6 = vcmp.lt.s32.totalorder %v11118_v52, 2 }
 0x202   :  { %v8906_v45 = vpop.eup %8905  ;;  %v2053_v37 = vxor.u32 2147483648, %v8900_v30  ;;  %vm2361_vm8 = vcmp.eq.s32.totalorder %v11135_v34, 0  ;;  %vm2364_vm9 = vcmp.eq.s32.totalorder %v11135_v34, 2  ;;  %v2469_v29 = vxor.u32 2147483648, %v8904_v54 }
 0x203   :  { %15729 = vst [vmem:[#allocation31_spill] sm:$0xff] %v11173_v56  ;;  %v2140_v28 = vmul.f32 %v2139_v3, %v2137_v25  ;;  %v11180_v57 = vsel %vm2253_vm1, nan, %v2263_v41  ;;  %v2366_v0 = vsel %vm2364_vm9, %v2365_v10, %v8898_v13  ;;  %v2466_v12 = vxor.u32 2147483648, %v8906_v45 }
 0x204   :  { %v2050_v18 = vxor.u32 2147483648, %v8902_v59  ;;  %vm2357_vm5 = vweird.f32 %v15711_v22  ;;  %v2363_v58 = vsel %vm2361_vm8, %v8896_v60, %v2362_v19  ;;  %v2567_v2 = vand.u32 3, %v2566_v46 }
 0x205   :  { %v15502_v14 = vand.u32 2147483647, %v11173_v56  ;;  %vm2045_vm10 = vweird.f32 %v15685_v5  ;;  %v2141_v9 = vxor.u32 2147483648, %v2140_v28  ;;  %vm2465_vm7 = vcmp.eq.s32.totalorder %v2463_v47, 0 }
 0x206   :  { %vm2468_vm3 = vcmp.eq.s32.totalorder %v2463_v47, 2  ;;  %v3620_v55 = vand.u32 2139095040, %v11173_v56  ;;  %v2054_v48 = vsel %vm2052_vm13, %v2053_v37, %v8902_v59  ;;  %vm2464_vm9 = vcmp.lt.s32.totalorder %v2463_v47, 2 }
 0x207   :  { %v8908_v38 = vpop.eup %8907  ;;  %v2467_v13 = vsel %vm2465_vm7, %v8904_v54, %v2466_v12  ;;  %v2470_v10 = vsel %vm2468_vm3, %v2469_v29, %v8906_v45  ;;  %v2142_v60 = vsel %vm2059_vm14, %v2141_v9, %v2140_v28  ;;  %v3624_v25 = vand.u32 8388607, %v15502_v14 }
 0x208   :  { %v8910_v41 = vpop.eup %8909  ;;  %v2573_v19 = vxor.u32 2147483648, %v8908_v38  ;;  %v3621_v46 = vshrl.u32 %v3620_v55, 23  ;;  %v2051_v3 = vsel %vm2049_vm4, %v8900_v30, %v2050_v18  ;;  %v2145_v42 = vsel %vm11062_vm15, %v15691_v24, %v2142_v60  ;;  %v15730_v55 = vld [vmem:[#allocation7_spill] sm:$0xff] }
 0x209   :  { %v2570_v59 = vxor.u32 2147483648, %v8910_v41  ;;  %vm2572_vm13 = vcmp.eq.s32.totalorder %v2567_v2, 2  ;;  %8911 = vcosq.f32 %v2145_v42  ;;  %vm2569_vm3 = vcmp.eq.s32.totalorder %v2567_v2, 0 }
 0x20a   :  { %v2574_v54 = vsel %vm2572_vm13, %v2573_v19, %v8910_v41  ;;  %v7775_v45 = vadd.s32 4294967169, %v3621_v46  ;;  %8913 = vsinq.f32 %v2145_v42  ;;  %v2367_v37 = vsel %vm2360_vm12, %v2363_v58, %v2366_v0 }
 0x20b   :  { %v2471_v29 = vsel %vm2464_vm9, %v2467_v13, %v2470_v10  ;;  %v2571_v28 = vsel %vm2569_vm3, %v8908_v38, %v2570_v59  ;;  %v2055_v30 = vsel %vm2048_vm6, %v2051_v3, %v2054_v48  ;;  %vm2568_vm7 = vcmp.lt.s32.totalorder %v2567_v2, 2  ;;  %v15731_v38 = vld [vmem:[#allocation17_spill] sm:$0xff]  ;;  %v15732_v48 = vld [vmem:[#allocation22_spill] sm:$0xff] }
 0x20c   :  { %v3625_v12 = vor.u32 8388608, %v3624_v25  ;;  %v3627_v26 = vadd.s32 1, %v7775_v45  ;;  %v11203_v18 = vadd.f32 %v438_v36, %v11055_v51  ;;  %vm2461_vm14 = vweird.f32 %v15717_v23 }
 0x20d   :  { %v2575_v9 = vsel %vm2568_vm7, %v2571_v28, %v2574_v54  ;;  %v15503_v41 = vand.u32 2147483647, %v15730_v55  ;;  %vm2156_vm15 = vcmp.eq.s32.totalorder %v11169_v43, 2  ;;  %v11210_v34 = vsel %vm2357_vm5, nan, %v2367_v37  ;;  %v11249_v28 = vpop.permute.xlu1 %593 }
 0x20e   :  { %v11212_v47 = vsel %vm2461_vm14, nan, %v2471_v29  ;;  %vm3628_vm1 = vcmp.gt.s32.totalorder %v3627_v26, 0  ;;  %v11216_v52 = vsel %vm2045_vm10, nan, %v2055_v30  ;;  %vm2153_vm4 = vcmp.eq.s32.totalorder %v11169_v43, 0 }
 0x20f   :  { %vm2565_vm12 = vweird.f32 %v15722_v62  ;;  %v3629_v23 = vsel %vm3628_vm1, %v3627_v26, 0  ;;  %vm2152_vm6 = vcmp.lt.s32.totalorder %v11169_v43, 2  ;;  %v11225_v58 = vshll.u32 %v3625_v12, 8 }
 0x210   :  { %v11223_v22 = vsel %vm2565_vm12, nan, %v2575_v9  ;;  %v3630_v36 = vshrl.u32 %v3629_v23, 5  ;;  %v3631_v0 = vand.u32 31, %v3629_v23  ;;  %vm2149_vm8 = vweird.f32 %v15691_v24 }
 0x211   :  { %v4041_v5 = vpack.c.bf16 %v11223_v22, %v11212_v47  ;;  %v11232_v2 = vand.u32 8388607, %v15503_v41  ;;  %v2698_v62 = vshll.u32 %v15596_v40, %v15731_v38  ;;  %v2699_v13 = vshrl.u32 %v15636_v32, %v15732_v48 }
 0x212   :  { %vm15546_vm10 = vcmask 293888   ;;  %v3632_v10 = vsub.s32 32, %v3631_v0  ;;  %v3634_v60 = vshll.u32 %v15596_v40, %v3631_v0  ;;  %v3637_v19 = vshll.u32 %v15636_v32, %v3631_v0 }
 0x213   :  { %v2702_v46 = vshrl.u32 %v15638_v4, %v15732_v48  ;;  %v3640_v25 = vshll.u32 %v15638_v4, %v3631_v0  ;;  %v3643_v3 = vshll.u32 %v15639_v7, %v3631_v0  ;;  %v3646_v42 = vshll.u32 %v15620_v27, %v3631_v0  ;;  %v8912_v59 = vpop.eup %8911 }
 0x214   :  { %vm3649_vm5 = vcmp.lt.s32.totalorder %v3630_v36, 1  ;;  %v3633_v54 = vshrl.u32 %v15596_v40, %v3632_v10  ;;  %v3635_v45 = vshrl.u32 %v15636_v32, %v3632_v10  ;;  %v3638_v37 = vshrl.u32 %v15638_v4, %v3632_v10  ;;  %v8914_v30 = vpop.eup %8913 }
 0x215   :  { %v3641_v29 = vshrl.u32 %v15639_v7, %v3632_v10  ;;  %v2157_v12 = vxor.u32 2147483648, %v8912_v59  ;;  %v3644_v26 = vshrl.u32 %v15620_v27, %v3632_v10  ;;  %v3647_v9 = vshrl.u32 %v15617_v6, %v3632_v10 }
 0x216   :  { %vm3651_vm9 = vcmp.lt.s32.totalorder %v3630_v36, 3  ;;  %v2154_v47 = vxor.u32 2147483648, %v8914_v30  ;;  %v3636_v23 = vor.u32 %v3635_v45, %v3634_v60  ;;  %v3639_v22 = vor.u32 %v3638_v37, %v3637_v19  ;;  %v598_v45 = vpop.permute.xlu1 %597 }
 0x217   :  { %v3642_v0 = vor.u32 %v3641_v29, %v3640_v25  ;;  %v2158_v14 = vsel %vm2156_vm15, %v2157_v12, %v8914_v30  ;;  %v3645_v41 = vor.u32 %v3644_v26, %v3643_v3  ;;  %v3648_v33 = vor.u32 %v3647_v9, %v3646_v42  ;;  %v15738_v12 = vld [vmem:[#allocation23_spill] sm:$0xff] }
 0x218   :  { %vm3652_vm13 = vcmp.lt.s32.totalorder %v3630_v36, 4  ;;  %v2155_v8 = vsel %vm2153_vm4, %v8912_v59, %v2154_v47  ;;  %v3653_v51 = vsel %vm3649_vm5, %v3633_v54, %v3636_v23  ;;  %v3657_v31 = vsel %vm3649_vm5, %v3636_v23, %v3639_v22 }
 0x219   :  { %v3654_v61 = vsel %vm3652_vm13, %v3642_v0, 2102212464  ;;  %v2159_v10 = vsel %vm2152_vm6, %v2155_v8, %v2158_v14  ;;  %v3658_v19 = vsel %vm3652_vm13, %v3645_v41, 920167782  ;;  %v3661_v25 = vsel %vm3649_vm5, %v3639_v22, %v3642_v0 }
 0x21a   :  { %v3655_v60 = vsel %vm3651_vm9, %v3639_v22, %v3654_v61  ;;  %v2160_v3 = vsel %vm2149_vm8, nan, %v2159_v10  ;;  %vm3650_vm3 = vcmp.lt.s32.totalorder %v3630_v36, 2  ;;  %v3659_v42 = vsel %vm3651_vm9, %v3642_v0, %v3658_v19  ;;  %v15739_v0 = vld [vmem:[#allocation38_spill] sm:$0xff]  ;;  %v15742_v10 = vld [vmem:[#allocation27_spill] sm:$0xff] }
 0x21b   :  { %v3662_v59 = vsel %vm3652_vm13, %v3648_v33, 1326507024  ;;  %v4039_v54 = vpack.c.bf16 %v2160_v3, %v11216_v52  ;;  %v3660_v37 = vsel %vm3650_vm3, %v3657_v31, %v3659_v42  ;;  %v2701_v8 = vshll.u32 %v15636_v32, %v15731_v38  ;;  %v15733_v52 = vld [vmem:[#allocation9_spill] sm:$0xff] }
 0x21c   :  { %v3663_v29 = vsel %vm3651_vm9, %v3645_v41, %v3662_v59  ;;  %v3656_v61 = vsel %vm3650_vm3, %v3653_v51, %v3655_v60  ;;  %v11271_v14 = vmul.u32.u64.low %v11225_v58, %v3660_v37  ;;  %v11272_v30 = vmul.u32.u64.high %v11225_v58, %v3660_v37, %v11271_v14  ;;  %v397_v60 = vpop.permute.xlu0 %396  ;;  %v15743_v3 = vld [vmem:[#allocation29_spill] sm:$0xff]  ;;  %v15744_v37 = vld [vmem:[#allocation48_spill] sm:$0xff] }
 0x21d   :  { %v3664_v43 = vsel %vm3650_vm3, %v3661_v25, %v3663_v29  ;;  %8275 = vmatprep.mubr.msk.bf16.mxu1 %vm15546_vm10, %v4039_v54  ;;  %v15734_v31 = vand.u32 2147483647, %v15733_v52  ;;  %v2700_v36 = vor.u32 %v2699_v13, %v2698_v62  ;;  %v15737_v51 = vpack.c.bf16 %v11210_v34, %v11180_v57  ;;  %v8847_v54 = vld [vmem:[%s15366_s0] sm:$0xff]   ;;  %v9160_v41 = vld [vmem:[%s15364_s6 + $0x10] ss:$0 sps:$4 sm:$0x33]  }
 0x21e   :  { %v11277_v24 = vmul.u32.u64.low %v11225_v58, %v3664_v43  ;;  %v11278_v33 = vmul.u32.u64.high %v11225_v58, %v3664_v43, %v11277_v24  ;;  %v2663_v26 = vsub.s32 4, %v15738_v12  ;;  %v2703_v9 = vor.u32 %v2702_v46, %v2701_v8  ;;  %v15740_v46 = vld [vmem:[#allocation21_spill] sm:$0xff] }
 0x21f   :  { %vm11282_vm7 = vcmp.le.f32.partialorder %v15734_v31, 0.7853982  ;;  %8276 = vmatmul.mubr.msk.bf16.vlgmr.msra.gmra.mrb[0].mxu1 %vm15546_vm10, %v15737_v51  ;;  %v2704_v47 = vshll.u32 %v15638_v4, %v15731_v38  ;;  %v2705_v23 = vshrl.u32 %v15639_v7, %v15732_v48  ;;  %v3672_v22 = vmul.u32 %v11225_v58, %v3656_v61  ;;  %v11341_v31 = vld [vmem:[%s15363_s2 + $0x1] ss:$0 sm:$0xff] }
 0x220   :  { %8279 = vmatprep.mubr.msk.bf16.mxu1 %vm15546_vm10, %v4041_v5  ;;  %v2665_v57 = vsel %vm11282_vm7, %v15733_v52, %v15739_v0  ;;  %v2689_v34 = vor.u32 8388608, %v11232_v2  ;;  %v2697_v62 = vshrl.u32 %v15596_v40, %v15732_v48  ;;  %v3675_v13 = vadd.s32 1, %v11272_v30  ;;  %v11307_v5 = vpop.permute.xlu1 %85  ;;  %v15741_v2 = vld [vmem:[#allocation30_spill] sm:$0xff]  ;;  %v15745_v0 = vld [vmem:[#allocation53_spill] sm:$0xff] }
 0x221   :  { %v2706_v38 = vor.u32 %v2705_v23, %v2704_v47  ;;  %vm2713_vm14 = vcmp.lt.s32.totalorder %v15740_v46, 1  ;;  %vm2715_vm15 = vcmp.lt.s32.totalorder %v15740_v46, 3  ;;  %vm3674_vm1 = vc.u32 %v11278_v33, %v11271_v14 }
 0x222   :  { %vm2714_vm4 = vcmp.lt.s32.totalorder %v15740_v46, 2  ;;  %v2721_v58 = vsel %vm2713_vm14, %v2700_v36, %v2703_v9  ;;  %v2727_v48 = vsel %vm2715_vm15, %v15742_v10, %v15741_v2  ;;  %v3676_v19 = vsel %vm3674_vm1, %v3675_v13, %v11272_v30 }
 0x223   :  { %v2718_v25 = vsel %vm2716_vm0, %v2706_v38, 2102212464  ;;  %v2723_v42 = vsel %vm2715_vm15, %v2706_v38, %v15743_v3  ;;  %v2725_v59 = vsel %vm2713_vm14, %v2703_v9, %v2706_v38  ;;  %vm15537_vm12 = vcmp.lt.s32.totalorder %v15744_v37, 0 }
 0x224   :  { %v3677_v29 = vadd.s32 %v3676_v19, %v3672_v22  ;;  %8915 = vcosq.f32 %v2665_v57  ;;  %v2724_v8 = vsel %vm2714_vm4, %v2721_v58, %v2723_v42  ;;  %v2728_v61 = vsel %vm2714_vm4, %v2725_v59, %v2727_v48  ;;  %v277_v13 = vpop.permute.xlu1 %276  ;;  %v15747_v58 = vld [vmem:[#allocation25_spill] sm:$0xff] }
 0x225   :  { %v2717_v43 = vsel %vm2713_vm14, %v2697_v62, %v2700_v36  ;;  %v2719_v30 = vsel %vm2715_vm15, %v2703_v9, %v2718_v25  ;;  %v2729_v24 = vshll.u32 %v2689_v34, 8  ;;  %v437_v51 = vmul.f32 %v11341_v31, %v397_v60 }
 0x226   :  { %v3678_v47 = vadd.s32 536870912, %v3677_v29  ;;  %vm15565_vm0 = vcmask 523264   ;;  %v634_v23 = vmul.f32 %v11157_v16, %v11249_v28  ;;  %v635_v22 = vmul.f32 %v11157_v16, %v598_v45  ;;  %v9157_v45 = vld [vmem:[%s15364_s6] sm:$0xff]  }
 0x227   :  { %vm15547_vm6 = vcmp.lt.s32.totalorder %v15745_v0, 0  ;;  %v11348_v36 = vmul.u32.u64.low %v2729_v24, %v2728_v61  ;;  %v11349_v62 = vmul.u32.u64.high %v2729_v24, %v2728_v61, %v11348_v36  ;;  %7815 = vmatmul.mubr.msk.bf16.vlgmr.msra.gmra.mrb[0].mxu0 %vm15565_vm0, %v8847_v54  ;;  %8917 = vsinq.f32 %v2665_v57 }
 0x228   :  { %v11351_v9 = vmul.u32.u64.low %v2729_v24, %v2724_v8  ;;  %v11352_v34 = vmul.u32.u64.high %v2729_v24, %v2724_v8, %v11351_v9  ;;  %v11356_v38 = vshrl.u32 %v3678_v47, 30  ;;  %v469_v2 = vadd.f32 %v437_v51, %v15747_v58  ;;  %8258 = vmatpush3.bf16.msra.mxu0 %v9157_v45  ;;  %v8848_v8 = vld [vmem:[%s15366_s0 + $0x8] sm:$0xff]   ;;  %v15756_v36 = vld [vmem:[#allocation40_spill] sm:$0xff] }
 0x229   :  { %v667_v28 = vadd.f32 %v635_v22, %v11203_v18  ;;  %v15748_v16 = vmov 0   ;;  %v3777_v10 = vadd.s32 %v10817_v39, %v10830_v44  ;;  %v3793_v48 = vsub.s32 32, %v11097_v1  ;;  %v9158_v18 = vld [vmem:[%s15364_s6 + $0x8] sm:$0xff]  }
 0x22a   :  { %15746 = vst [vmem:[#allocation32_spill] sm:$0xff] %v11356_v38  ;;  %4328 = vmatprep.mubr.bf16.mxu0 %v15748_v16  ;;  %v2664_v57 = vsel %vm2579_vm2, %v2663_v26, %v15738_v12  ;;  %v2720_v60 = vsel %vm2714_vm4, %v2717_v43, %v2719_v30  ;;  %8259 = vmatprep.subr.bf16.mxu0 %v9158_v18  ;;  %v15749_v19 = vand.u32 2147483647, %v15745_v0  ;;  %v3680_v39 = vshll.u32 %v11356_v38, 30  ;;  %v11385_v12 = vld [vmem:[%s15363_s2 + $0x3] ss:$0 sm:$0xff] }
 0x22b   :  { %v666_v44 = vadd.f32 %v634_v23, %v469_v2  ;;  %v11388_v26 = vadd.f32 %v11385_v12, %v667_v28  ;;  %v407_v46 = vmul.f32 %v11341_v31, %v277_v13  ;;  %v3493_v3 = vxor.u32 2147483648, %v11126_v17 }
 0x22c   :  { %vm11377_vm8 = vcmp.le.f32.partialorder %v15749_v19, 0.7853982  ;;  %v15752_v42 = vsub.s32 4294967266, %v11097_v1  ;;  %vm2738_vm2 = vc.u32 %v11349_v62, %v11351_v9  ;;  %v2739_v54 = vadd.s32 1, %v11352_v34  ;;  %8260 = vmatpush3.bf16.msra.mxu0 %v9158_v18 }
 0x22d   :  { %v11400_v61 = vsub.s32 %v3677_v29, %v3680_v39  ;;  %v2666_v43 = vsel %vm11282_vm7, 0, %v2664_v57  ;;  %v2736_v30 = vmul.u32 %v2729_v24, %v2720_v60  ;;  %v11405_v51 = vadd.f32 %v11385_v12, %v666_v44 }
 0x22e   :  { %v3798_v59 = vadd.s32 127, %v15752_v42  ;;  %v15754_v47 = vxor.u32 2147483648, %v10965_v53  ;;  %v2740_v22 = vsel %vm2738_vm2, %v2739_v54, %v11352_v34  ;;  %v3932_v29 = vand.u32 2139095040, %v11388_v26  ;;  %v8916_v24 = vpop.eup %8915 }
 0x22f   :  { %15753 = vst [vmem:[#allocation37_spill] sm:$0xff] %v11405_v51  ;;  %v439_v13 = vadd.f32 %v407_v46, %v15756_v36  ;;  %vm15757_vm5 = vcmask 1041408   ;;  %8919 = vcosq.f32 %v11094_v35  ;;  %v3795_v58 = vshrl.u32 %v3777_v10, %v3793_v48  ;;  %7816 = vmatmul.mubr.msk.bf16.gmra.mrb[4].mxu0 %vm15565_vm0, %v8848_v8  ;;  %v15758_v46 = vld [vmem:[#allocation18_spill] sm:$0xff] }
 0x230   :  { %v11412_v23 = vsel %vm15537_vm12, %v15754_v47, %v10965_v53  ;;  %8647 = vmatprep.subr.msk.bf16.mxu0 %vm15757_vm5, %v9160_v41  ;;  %v3683_v2 = vsub.s32 0, %v11400_v61  ;;  %v2741_v53 = vadd.s32 %v2740_v22, %v2736_v30  ;;  %v3799_v28 = vshll.u32 %v3798_v59, 23  ;;  %4338 = vmatprep.mubr.bf16.mxu0 %v15748_v16  ;;  %v8849_v30 = vld [vmem:[%s15366_s0 + $0x10] sm:$0xff]  }
 0x231   :  { %15755 = vst [vmem:[#allocation26_spill] sm:$0xff] %v11412_v23  ;;  %v2670_v45 = vadd.s32 3, %v2666_v43  ;;  %v3828_v34 = vand.u32 2139095040, %v11405_v51  ;;  %v3933_v57 = vshrl.u32 %v3932_v29, 23  ;;  %v3494_v60 = vsel %vm15547_vm6, %v3493_v3, %v11126_v17  ;;  %8262 = vmatpush3.bf16.msra.mxu0 %v10995_v15  ;;  %v8918_v59 = vpop.eup %8917 }
 0x232   :  { %v3794_v18 = vshll.u32 %v10953_v20, %v11097_v1  ;;  %v7776_v19 = vmin.u32 %v3683_v2, %v11400_v61  ;;  %v2742_v10 = vadd.s32 536870912, %v2741_v53  ;;  %v15507_v39 = vand.u32 2147483647, %v11388_v26 }
 0x233   :  { %v3829_v48 = vshrl.u32 %v3828_v34, 23  ;;  %v7787_v44 = vadd.s32 4294967169, %v3933_v57  ;;  %v636_v42 = vadd.f32 %v15758_v46, %v439_v13  ;;  %v15508_v20 = vand.u32 2147483647, %v11405_v51 }
 0x234   :  { %v11435_v54 = vor.u32 %v3795_v58, %v3794_v18  ;;  %v3685_v17 = vclz %v7776_v19  ;;  %v2743_v3 = vshrl.u32 %v2742_v10, 30  ;;  %v11441_v1 = vsel %vm11377_vm8, %v15745_v0, %v3494_v60 }
 0x235   :  { %v11443_v8 = vor.u32 4788187, %v3799_v28  ;;  %v2671_v15 = vand.u32 3, %v2670_v45  ;;  %v7783_v43 = vadd.s32 4294967169, %v3829_v48  ;;  %8921 = vsinq.f32 %v11094_v35 }
 0x236   :  { %v2677_v47 = vxor.u32 2147483648, %v8916_v24  ;;  %v2744_v22 = vshll.u32 %v2743_v3, 30  ;;  %v3939_v29 = vadd.s32 1, %v7787_v44  ;;  %v7777_v36 = vadd.s32 4294967294, %v3685_v17 }
 0x237   :  { %v2674_v13 = vxor.u32 2147483648, %v8918_v59  ;;  %v3835_v41 = vadd.s32 1, %v7783_v43  ;;  %v3936_v58 = vand.u32 8388607, %v15507_v39  ;;  %8923 = vcosq.f32 %v11441_v1  ;;  %7817 = vmatmul.mubr.msk.bf16.gmra.mrb[8].mxu0 %vm15565_vm0, %v8849_v30 }
 0x238   :  { %v11453_v28 = vsub.s32 %v2741_v53, %v2744_v22  ;;  %v3832_v45 = vand.u32 8388607, %v15508_v20  ;;  %vm2676_vm9 = vcmp.eq.s32.totalorder %v2671_v15, 2  ;;  %v2767_v34 = vsub.s32 4, %v2743_v3  ;;  %4348 = vmatprep.mubr.bf16.mxu0 %v15748_v16 }
 0x239   :  { %vm3836_vm13 = vcmp.gt.s32.totalorder %v3835_v41, 0  ;;  %v11459_v57 = vpop.eup %8919  ;;  %vm2673_vm3 = vcmp.eq.s32.totalorder %v2671_v15, 0  ;;  %v2678_v60 = vsel %vm2676_vm9, %v2677_v47, %v8918_v59  ;;  %vm3940_vm7 = vcmp.gt.s32.totalorder %v3939_v29, 0 }
 0x23a   :  { %15759 = vst [vmem:[#allocation8_spill] sm:$0xff] %v11459_v57  ;;  %v2747_v18 = vsub.s32 0, %v11453_v28  ;;  %vm7778_vm14 = vcmp.lt.s32.totalorder %v7777_v36, 0  ;;  %v2675_v53 = vsel %vm2673_vm3, %v8916_v24, %v2674_v13  ;;  %v3837_v19 = vsel %vm3836_vm13, %v3835_v41, 0 }
 0x23b   :  { %v3937_v10 = vor.u32 8388608, %v3936_v58  ;;  %v15760_v48 = vand.u32 2147483647, %v15730_v55  ;;  %vm2683_vm1 = vcmp.lt.s32.totalorder %v15730_v55, 0  ;;  %v3833_v59 = vor.u32 8388608, %v3832_v45 }
 0x23c   :  { %v7740_v46 = vmin.u32 %v2747_v18, %v11453_v28  ;;  %vm2672_vm4 = vcmp.lt.s32.totalorder %v2671_v15, 2  ;;  %v2768_v17 = vsel %vm2683_vm1, %v2767_v34, %v2743_v3  ;;  %v3839_v43 = vand.u32 31, %v3837_v19 }
 0x23d   :  { %vm11465_vm15 = vcmp.le.f32.partialorder %v15760_v48, 0.7853982  ;;  %v3941_v30 = vsel %vm3940_vm7, %v3939_v29, 0  ;;  %v11475_v24 = vadd.s32 %v11271_v14, %v11278_v33  ;;  %v11477_v47 = vsel %vm7778_vm14, 0, %v7777_v36 }
 0x23e   :  { %v11479_v22 = vsel %vm2672_vm4, %v2675_v53, %v2678_v60  ;;  %v2749_v13 = vclz %v7740_v46  ;;  %v2737_v41 = vadd.s32 %v11351_v9, %v11349_v62  ;;  %v3840_v58 = vsub.s32 32, %v3839_v43 }
 0x23f   :  { %v11483_v45 = vshll.u32 %v3937_v10, 8  ;;  %v11486_v15 = vadd.f32 %v11385_v12, %v636_v42  ;;  %v11488_v3 = vpop.eup %8921  ;;  %v2770_v14 = vsel %vm11465_vm15, 0, %v2768_v17  ;;  %v11492_v33 = vshll.u32 %v3833_v59, 8 }
 0x240   :  { %15763 = vst [vmem:[#allocation4_spill] sm:$0xff] %v11488_v3  ;;  %v7741_v29 = vadd.s32 4294967294, %v2749_v13  ;;  %v11494_v36 = vshrl.u32 %v3941_v30, 5  ;;  %v3842_v62 = vshll.u32 %v15596_v40, %v3839_v43  ;;  %v3843_v9 = vshrl.u32 %v15636_v32, %v3840_v58  ;;  %v8850_v13 = vld [vmem:[%s15366_s0 + $0x18] sm:$0xff]  }
 0x241   :  { %v3846_v60 = vshrl.u32 %v15638_v4, %v3840_v58  ;;  %v11500_v42 = vpop.eup %8923  ;;  %v3845_v18 = vshll.u32 %v15636_v32, %v3839_v43  ;;  %v3849_v53 = vshrl.u32 %v15639_v7, %v3840_v58  ;;  %v11504_v10 = vand.u32 31, %v3941_v30  ;;  %7818 = vmatmul.mubr.msk.bf16.gmra.mrb[12].mxu0 %vm15565_vm0, %v8850_v13 }
 0x242   :  { %15764 = vst [vmem:[#allocation36_spill] sm:$0xff] %v11500_v42  ;;  %vm7742_vm2 = vcmp.lt.s32.totalorder %v7741_v29, 0  ;;  %v3838_v46 = vshrl.u32 %v3837_v19, 5  ;;  %v3844_v59 = vor.u32 %v3843_v9, %v3842_v62  ;;  %v3848_v17 = vshll.u32 %v15638_v4, %v3839_v43  ;;  %4358 = vmatprep.mubr.bf16.mxu0 %v15748_v16 }
 0x243   :  { %v2752_v48 = vsel %vm7742_vm2, 0, %v7741_v29  ;;  %v3847_v2 = vor.u32 %v3846_v60, %v3845_v18  ;;  %v3851_v35 = vshll.u32 %v15639_v7, %v3839_v43  ;;  %v3852_v38 = vshrl.u32 %v15620_v27, %v3840_v58 }
 0x244   :  { %v2753_v39 = vsub.s32 32, %v2752_v48  ;;  %v2757_v20 = vsub.s32 4294967266, %v2752_v48  ;;  %v3850_v34 = vor.u32 %v3849_v53, %v3848_v17  ;;  %v3854_v30 = vshll.u32 %v15620_v27, %v3839_v43 }
 0x245   :  { %v3855_v29 = vshrl.u32 %v15617_v6, %v3840_v58  ;;  %v2754_v19 = vshll.u32 %v11453_v28, %v2752_v48  ;;  %v3841_v42 = vshrl.u32 %v15596_v40, %v3840_v58  ;;  %v3693_v60 = vsub.s32 4294967266, %v11477_v47 }
 0x246   :  { %v2755_v62 = vshrl.u32 %v2737_v41, %v2753_v39  ;;  %v2758_v9 = vadd.s32 127, %v2757_v20  ;;  %v3853_v18 = vor.u32 %v3852_v38, %v3851_v35  ;;  %vm3857_vm5 = vcmp.lt.s32.totalorder %v3838_v46, 1 }
 0x247   :  { %v3856_v53 = vor.u32 %v3855_v29, %v3854_v30  ;;  %vm3860_vm9 = vcmp.lt.s32.totalorder %v3838_v46, 4  ;;  %v3861_v43 = vsel %vm3857_vm5, %v3841_v42, %v3844_v59  ;;  %vm3859_vm13 = vcmp.lt.s32.totalorder %v3838_v46, 3 }
 0x248   :  { %v2756_v17 = vor.u32 %v2755_v62, %v2754_v19  ;;  %v2759_v57 = vshll.u32 %v2758_v9, 23  ;;  %v3862_v13 = vsel %vm3860_vm9, %v3850_v34, 2102212464  ;;  %v3865_v39 = vsel %vm3857_vm5, %v3844_v59, %v3847_v2 }
 0x249   :  { %v3866_v20 = vsel %vm3860_vm9, %v3853_v18, 920167782  ;;  %vm3858_vm3 = vcmp.lt.s32.totalorder %v3838_v46, 2  ;;  %v3863_v41 = vsel %vm3859_vm13, %v3847_v2, %v3862_v13  ;;  %v3944_v38 = vsub.s32 32, %v11504_v10 }
 0x24a   :  { %v2760_v28 = vor.u32 4788187, %v2759_v57  ;;  %v11525_v35 = vadd.s32 3, %v2770_v14  ;;  %v3864_v58 = vsel %vm3858_vm3, %v3861_v43, %v3863_v41  ;;  %v3867_v48 = vsel %vm3859_vm13, %v3850_v34, %v3866_v20 }
 0x24b   :  { %v3869_v42 = vsel %vm3857_vm5, %v3847_v2, %v3850_v34  ;;  %v2763_v29 = vcvt.s32.f32 %v2756_v17  ;;  %v3868_v59 = vsel %vm3858_vm3, %v3865_v39, %v3867_v48  ;;  %v3870_v19 = vsel %vm3860_vm9, %v3856_v53, 1326507024 }
 0x24c   :  { %v2761_v30 = vand.u32 2147483647, %v2760_v28  ;;  %v3871_v57 = vsel %vm3859_vm13, %v3853_v18, %v3870_v19  ;;  %v11534_v62 = vmul.u32.u64.low %v11492_v33, %v3868_v59  ;;  %v11535_v9 = vmul.u32.u64.high %v11492_v33, %v3868_v59, %v11534_v62 }
 0x24d   :  { %v3946_v14 = vshll.u32 %v15596_v40, %v11504_v10  ;;  %vm3961_vm7 = vcmp.lt.s32.totalorder %v11494_v36, 1  ;;  %v3872_v2 = vsel %vm3858_vm3, %v3869_v42, %v3871_v57  ;;  %v3880_v34 = vmul.u32 %v11492_v33, %v3864_v58 }
 0x24e   :  { %v2764_v43 = vmul.f32 %v2763_v29, %v2761_v30  ;;  %v3947_v17 = vshrl.u32 %v15636_v32, %v3944_v38  ;;  %v11545_v53 = vmul.u32.u64.low %v11492_v33, %v3872_v2  ;;  %v11546_v18 = vmul.u32.u64.high %v11492_v33, %v3872_v2, %v11545_v53 }
 0x24f   :  { %v3949_v13 = vshll.u32 %v15636_v32, %v11504_v10  ;;  %v3950_v39 = vshrl.u32 %v15638_v4, %v3944_v38  ;;  %v3952_v41 = vshll.u32 %v15638_v4, %v11504_v10  ;;  %v3953_v46 = vshrl.u32 %v15639_v7, %v3944_v38 }
 0x250   :  { %v2765_v20 = vxor.u32 2147483648, %v2764_v43  ;;  %v3948_v28 = vor.u32 %v3947_v17, %v3946_v14  ;;  %v3883_v58 = vadd.s32 1, %v11535_v9  ;;  %v3955_v42 = vshll.u32 %v15639_v7, %v11504_v10 }
 0x251   :  { %v3951_v48 = vor.u32 %v3950_v39, %v3949_v13  ;;  %v3956_v33 = vshrl.u32 %v15620_v27, %v3944_v38  ;;  %v3954_v29 = vor.u32 %v3953_v46, %v3952_v41  ;;  %v3958_v59 = vshll.u32 %v15620_v27, %v11504_v10 }
 0x252   :  { %v2766_v30 = vsel %vm2683_vm1, %v2765_v20, %v2764_v43  ;;  %v3959_v19 = vshrl.u32 %v15617_v6, %v3944_v38  ;;  %vm3882_vm14 = vc.u32 %v11546_v18, %v11534_v62  ;;  %v3945_v14 = vshrl.u32 %v15596_v40, %v3944_v38  ;;  %v8851_v43 = vld [vmem:[%s15366_s0 + $0x20] sm:$0xff]  }
 0x253   :  { %v2769_v57 = vsel %vm11465_vm15, %v15730_v55, %v2766_v30  ;;  %v3957_v2 = vor.u32 %v3956_v33, %v3955_v42  ;;  %v3884_v17 = vsel %vm3882_vm14, %v3883_v58, %v11535_v9  ;;  %vm3962_vm1 = vcmp.lt.s32.totalorder %v11494_v36, 2  ;;  %7819 = vmatmul.mubr.msk.bf16.gmra.mrb[16].mxu0 %vm15565_vm0, %v8851_v43 }
 0x254   :  { %8925 = vcosq.f32 %v2769_v57  ;;  %v3960_v10 = vor.u32 %v3959_v19, %v3958_v59  ;;  %v3885_v53 = vadd.s32 %v3884_v17, %v3880_v34  ;;  %vm3963_vm15 = vcmp.lt.s32.totalorder %v11494_v36, 3  ;;  %4368 = vmatprep.mubr.bf16.mxu0 %v15748_v16 }
 0x255   :  { %8927 = vsinq.f32 %v2769_v57  ;;  %vm3964_vm4 = vcmp.lt.s32.totalorder %v11494_v36, 4  ;;  %v3969_v38 = vsel %vm3961_vm7, %v3948_v28, %v3951_v48  ;;  %v3973_v39 = vsel %vm3961_vm7, %v3951_v48, %v3954_v29 }
 0x256   :  { %v3966_v44 = vsel %vm3964_vm4, %v3954_v29, 2102212464  ;;  %v3970_v13 = vsel %vm3964_vm4, %v3957_v2, 920167782  ;;  %v3886_v9 = vadd.s32 536870912, %v3885_v53  ;;  %v3965_v34 = vsel %vm3961_vm7, %v3945_v14, %v3948_v28 }
 0x257   :  { %v3971_v20 = vsel %vm3963_vm15, %v3954_v29, %v3970_v13  ;;  %v3974_v41 = vsel %vm3964_vm4, %v3960_v10, 1326507024  ;;  %v3967_v46 = vsel %vm3963_vm15, %v3951_v48, %v3966_v44  ;;  %v708_v33 = vand.u32 2139095040, %v11486_v15 }
 0x258   :  { %v3972_v58 = vsel %vm3962_vm1, %v3969_v38, %v3971_v20  ;;  %v3975_v42 = vsel %vm3963_vm15, %v3957_v2, %v3974_v41  ;;  %v11587_v30 = vshrl.u32 %v3886_v9, 30  ;;  %v15766_v28 = vsub.s32 32, %v11477_v47 }
 0x259   :  { %v3976_v59 = vsel %vm3962_vm1, %v3973_v39, %v3975_v42  ;;  %v11592_v19 = vmul.u32.u64.low %v11483_v45, %v3972_v58  ;;  %v11593_v57 = vmul.u32.u64.high %v11483_v45, %v3972_v58, %v11592_v19  ;;  %v709_v2 = vshrl.u32 %v708_v33, 23 }
 0x25a   :  { %15765 = vst [vmem:[#allocation33_spill] sm:$0xff] %v11587_v30  ;;  %v3691_v48 = vshrl.u32 %v11475_v24, %v15766_v28  ;;  %v11600_v29 = vmul.u32.u64.low %v11483_v45, %v3976_v59  ;;  %v11601_v14 = vmul.u32.u64.high %v11483_v45, %v3976_v59, %v11600_v29  ;;  %v15767_v43 = vand.u32 2147483647, %v11443_v8 }
 0x25b   :  { %v15768_v17 = vcvt.s32.f32 %v11435_v54  ;;  %v3694_v44 = vadd.s32 127, %v3693_v60  ;;  %v3888_v38 = vshll.u32 %v11587_v30, 30  ;;  %v3968_v13 = vsel %vm3962_vm1, %v3965_v34, %v3967_v46 }
 0x25c   :  { %v3690_v24 = vshll.u32 %v11400_v61, %v11477_v47  ;;  %vm2669_vm2 = vweird.f32 %v15733_v52  ;;  %v2775_v39 = vand.u32 3, %v11525_v35  ;;  %v7663_v8 = vadd.s32 4294967169, %v709_v2 }
 0x25d   :  { %v11607_v10 = vmul.f32 %v15768_v17, %v15767_v43  ;;  %v2680_v54 = vsel %vm2669_vm2, nan, %v11479_v22  ;;  %v11619_v9 = vsub.s32 %v3885_v53, %v3888_v38  ;;  %v3987_v20 = vadd.s32 1, %v11593_v57 }
 0x25e   :  { %v15513_v60 = vand.u32 2147483647, %v11486_v15  ;;  %v8926_v41 = vpop.eup %8925  ;;  %v3692_v58 = vor.u32 %v3691_v48, %v3690_v24  ;;  %v3984_v36 = vmul.u32 %v11483_v45, %v3968_v13  ;;  %vm3986_vm5 = vc.u32 %v11601_v14, %v11592_v19 }
 0x25f   :  { %v715_v61 = vadd.s32 1, %v7663_v8  ;;  %v8928_v52 = vpop.eup %8927  ;;  %v3695_v47 = vshll.u32 %v3694_v44, 23  ;;  %v2781_v35 = vxor.u32 2147483648, %v8926_v41  ;;  %v3891_v34 = vsub.s32 0, %v11619_v9 }
 0x260   :  { %v3988_v22 = vsel %vm3986_vm5, %v3987_v20, %v11593_v57  ;;  %v2778_v53 = vxor.u32 2147483648, %v8928_v52  ;;  %vm2780_vm9 = vcmp.eq.s32.totalorder %v2775_v39, 2  ;;  %vm2777_vm3 = vcmp.eq.s32.totalorder %v2775_v39, 0 }
 0x261   :  { %v3989_v46 = vadd.s32 %v3988_v22, %v3984_v36  ;;  %vm716_vm13 = vcmp.gt.s32.totalorder %v715_v61, 0  ;;  %v2782_v42 = vsel %vm2780_vm9, %v2781_v35, %v8928_v52  ;;  %v7784_v33 = vmin.u32 %v3891_v34, %v11619_v9 }
 0x262   :  { %v717_v45 = vsel %vm716_vm13, %v715_v61, 0  ;;  %vm2776_vm7 = vcmp.lt.s32.totalorder %v2775_v39, 2  ;;  %v2779_v59 = vsel %vm2777_vm3, %v8926_v41, %v2778_v53  ;;  %v3805_v29 = vxor.u32 2147483648, %v11607_v10  ;;  %v281_v41 = vpop.permute.xlu0 %280 }
 0x263   :  { %v3990_v28 = vadd.s32 536870912, %v3989_v46  ;;  %v719_v48 = vand.u32 31, %v717_v45  ;;  %vm2773_vm14 = vweird.f32 %v15730_v55  ;;  %v2783_v2 = vsel %vm2776_vm7, %v2779_v59, %v2782_v42 }
 0x264   :  { %v3893_v43 = vclz %v7784_v33  ;;  %v3696_v57 = vor.u32 4788187, %v3695_v47  ;;  %v2784_v17 = vsel %vm2773_vm14, nan, %v2783_v2  ;;  %v3699_v13 = vcvt.s32.f32 %v3692_v58 }
 0x265   :  { %v11631_v44 = vshrl.u32 %v3990_v28, 30  ;;  %v720_v38 = vsub.s32 32, %v719_v48  ;;  %v4042_v24 = vpack.c.bf16 %v2784_v17, %v2680_v54  ;;  %v712_v39 = vand.u32 8388607, %v15513_v60 }
 0x266   :  { %v7785_v8 = vadd.s32 4294967294, %v3893_v43  ;;  %v722_v36 = vshll.u32 %v15596_v40, %v719_v48  ;;  %v725_v52 = vshll.u32 %v15636_v32, %v719_v48  ;;  %v3697_v47 = vand.u32 2147483647, %v3696_v57  ;;  %v15770_v57 = vld [vmem:[#allocation59_spill] sm:$0xff] }
 0x267   :  { %15769 = vst [vmem:[#allocation19_spill] sm:$0xff] %v11631_v44  ;;  %v3992_v20 = vshll.u32 %v11631_v44, 30  ;;  %v723_v55 = vshrl.u32 %v15636_v32, %v720_v38  ;;  %v726_v61 = vshrl.u32 %v15638_v4, %v720_v38  ;;  %8280 = vmatmul.mubr.msk.bf16.gmra.mrb[4].mxu1 %vm15546_vm10, %v4042_v24  ;;  %v729_v54 = vshrl.u32 %v15639_v7, %v720_v38 }
 0x268   :  { %vm7786_vm1 = vcmp.lt.s32.totalorder %v7785_v8, 0  ;;  %v732_v58 = vshrl.u32 %v15620_v27, %v720_v38  ;;  %v728_v34 = vshll.u32 %v15638_v4, %v719_v48  ;;  %v731_v22 = vshll.u32 %v15639_v7, %v719_v48 }
 0x269   :  { %v11643_v35 = vsub.s32 %v3989_v46, %v3992_v20  ;;  %v11647_v53 = vsel %vm7786_vm1, 0, %v7785_v8  ;;  %v718_v42 = vshrl.u32 %v717_v45, 5  ;;  %v724_v33 = vor.u32 %v723_v55, %v722_v36  ;;  %v285_v20 = vpop.permute.xlu0 %284  ;;  %v15772_v55 = vld [vmem:[#allocation24_spill] sm:$0xff] }
 0x26a   :  { %v727_v59 = vor.u32 %v726_v61, %v725_v52  ;;  %v730_v28 = vor.u32 %v729_v54, %v728_v34  ;;  %v733_v2 = vor.u32 %v732_v58, %v731_v22  ;;  %v734_v43 = vshll.u32 %v15620_v27, %v719_v48 }
 0x26b   :  { %v735_v17 = vshrl.u32 %v15617_v6, %v720_v38  ;;  %8929 = vsinq.f32 %v11441_v1  ;;  %vm15525_vm15 = vcmp.lt.s32.totalorder %v15770_v57, 0  ;;  %v3995_v46 = vsub.s32 0, %v11643_v35 }
 0x26c   :  { %v713_v24 = vor.u32 8388608, %v712_v39  ;;  %v11657_v8 = vsel %vm15525_vm15, %v3805_v29, %v11607_v10  ;;  %v3700_v45 = vmul.f32 %v3699_v13, %v3697_v47  ;;  %v2871_v61 = vsub.s32 4, %v15772_v55 }
 0x26d   :  { %15771 = vst [vmem:[#allocation51_spill] sm:$0xff] %v11657_v8  ;;  %v736_v36 = vor.u32 %v735_v17, %v734_v43  ;;  %v3901_v48 = vsub.s32 4294967266, %v11647_v53  ;;  %v721_v52 = vshrl.u32 %v15596_v40, %v720_v38  ;;  %vm737_vm4 = vcmp.lt.s32.totalorder %v718_v42, 1 }
 0x26e   :  { %vm740_vm2 = vcmp.lt.s32.totalorder %v718_v42, 4  ;;  %vm739_vm5 = vcmp.lt.s32.totalorder %v718_v42, 3  ;;  %v745_v54 = vsel %vm737_vm4, %v724_v33, %v727_v59  ;;  %v7788_v58 = vmin.u32 %v3995_v46, %v11643_v35  ;;  %v301_v46 = vpop.permute.xlu0 %300 }
 0x26f   :  { %v742_v1 = vsel %vm740_vm2, %v730_v28, 2102212464  ;;  %v746_v39 = vsel %vm740_vm2, %v733_v2, 920167782  ;;  %vm738_vm9 = vcmp.lt.s32.totalorder %v718_v42, 2  ;;  %v753_v29 = vshll.u32 %v713_v24, 8  ;;  %v11671_v24 = vpop.permute.xlu1 %90 }
 0x270   :  { %v747_v10 = vsel %vm739_vm5, %v730_v28, %v746_v39  ;;  %v741_v13 = vsel %vm737_vm4, %v721_v52, %v724_v33  ;;  %v749_v34 = vsel %vm737_vm4, %v727_v59, %v730_v28  ;;  %v750_v22 = vsel %vm740_vm2, %v736_v36, 1326507024 }
 0x271   :  { %v748_v47 = vsel %vm738_vm9, %v745_v54, %v747_v10  ;;  %v743_v43 = vsel %vm739_vm5, %v727_v59, %v742_v1  ;;  %v751_v17 = vsel %vm739_vm5, %v733_v2, %v750_v22  ;;  %vm15534_vm13 = vcmp.lt.s32.totalorder %v11173_v56, 0 }
 0x272   :  { %v11664_v60 = vmul.u32.u64.low %v753_v29, %v748_v47  ;;  %v11665_v38 = vmul.u32.u64.high %v753_v29, %v748_v47, %v11664_v60  ;;  %v3897_v44 = vsub.s32 32, %v11647_v53  ;;  %v3902_v30 = vadd.s32 127, %v3901_v48  ;;  %v11691_v47 = vld [vmem:[%s15363_s2] ss:$0 sm:$0xff] }
 0x273   :  { %v752_v39 = vsel %vm738_vm9, %v749_v34, %v751_v17  ;;  %v15773_v33 = vand.u32 2147483647, %v11173_v56  ;;  %v15774_v28 = vmov 0  ;;  %v3701_v59 = vxor.u32 2147483648, %v3700_v45 }
 0x274   :  { %v11679_v2 = vmul.u32.u64.low %v753_v29, %v752_v39  ;;  %v11680_v36 = vmul.u32.u64.high %v753_v29, %v752_v39, %v11679_v2  ;;  %v3881_v52 = vadd.s32 %v11534_v62, %v11546_v18  ;;  %v3997_v1 = vclz %v7788_v58  ;;  %v15778_v62 = vld [vmem:[#allocation28_spill] sm:$0xff] }
 0x275   :  { %vm11675_vm3 = vcmp.le.f32.partialorder %v15773_v33, 0.7853982  ;;  %v408_v48 = vmul.f32 %v11341_v31, %v281_v41  ;;  %v744_v54 = vsel %vm738_vm9, %v741_v13, %v743_v43  ;;  %v11686_v10 = vpop.eup %8929  ;;  %v243_v34 = vmul.f32 %v11691_v47, %v11307_v5  ;;  %v15783_v43 = vld [vmem:[#allocation34_spill] sm:$0xff] }
 0x276   :  { %v15775_v28 = vsel %vm11675_vm3, 4294967295, %v15774_v28  ;;  %15777 = vst [vmem:[#allocation13_spill] sm:$0xff] %v11686_v10  ;;  %v413_v22 = vmul.f32 %v11341_v31, %v301_v46  ;;  %v763_v17 = vadd.s32 1, %v11665_v38  ;;  %vm15779_vm7 = vcmp.lt.s32.totalorder %v15778_v62, 0  ;;  %v15784_v33 = vld [vmem:[#allocation62_spill] sm:$0xff] }
 0x277   :  { %15776 = vst [vmem:[#allocation5_spill] sm:$0xff] %v15775_v28  ;;  %v2872_v18 = vsel %vm15779_vm7, %v2871_v61, %v15772_v55  ;;  %v3899_v41 = vshrl.u32 %v3881_v52, %v3897_v44  ;;  %v3903_v42 = vshll.u32 %v3902_v30, 23  ;;  %v15780_v58 = vand.u32 2147483647, %v15778_v62  ;;  %v96_v52 = vpop.permute.xlu1 %95  ;;  %v15793_v28 = vld [vmem:[#allocation47_spill] sm:$0xff] }
 0x278   :  { %v3702_v5 = vsel %vm15534_vm13, %v3701_v59, %v3700_v45  ;;  %v760_v46 = vmul.u32 %v753_v29, %v744_v54  ;;  %vm762_vm1 = vc.u32 %v11680_v36, %v11664_v60  ;;  %v3898_v44 = vshll.u32 %v11619_v9, %v11647_v53  ;;  %v15785_v59 = vld [vmem:[#allocation42_spill] sm:$0xff] }
 0x279   :  { %vm11702_vm14 = vcmp.le.f32.partialorder %v15780_v58, 0.7853982  ;;  %v7789_v55 = vadd.s32 4294967294, %v3997_v1  ;;  %v764_v61 = vsel %vm762_vm1, %v763_v17, %v11665_v38  ;;  %v11721_v45 = vmul.f32 %v11341_v31, %v285_v20 }
 0x27a   :  { %v2873_v30 = vsel %vm11702_vm14, %v15778_v62, %v15784_v33  ;;  %v2874_v2 = vsel %vm11702_vm14, 0, %v2872_v18  ;;  %v11723_v29 = vadd.f32 %v408_v48, %v243_v34  ;;  %v11726_v54 = vadd.f32 %v413_v22, %v15785_v59  ;;  %v15788_v48 = vld [vmem:[#allocation39_spill] sm:$0xff] }
 0x27b   :  { %v765_v58 = vadd.s32 %v764_v61, %v760_v46  ;;  %v3900_v33 = vor.u32 %v3899_v41, %v3898_v44  ;;  %v3904_v39 = vor.u32 4788187, %v3903_v42  ;;  %8931 = vcosq.f32 %v2873_v30  ;;  %v15789_v22 = vld [vmem:[#allocation43_spill] sm:$0xff] }
 0x27c   :  { %15786 = vst [vmem:[#allocation14_spill] sm:$0xff] %v11726_v54  ;;  %v15787_v9 = vand.u32 2147483647, %v15783_v43  ;;  %v11733_v38 = vsel %vm11675_vm3, %v11173_v56, %v3702_v5  ;;  %8933 = vsinq.f32 %v2873_v30  ;;  %v2878_v20 = vadd.s32 3, %v2874_v2  ;;  %v289_v2 = vpop.permute.xlu1 %288 }
 0x27d   :  { %v766_v1 = vadd.s32 536870912, %v765_v58  ;;  %vm7790_vm4 = vcmp.lt.s32.totalorder %v7789_v55, 0  ;;  %v2906_v34 = vshll.u32 %v15596_v40, %v15788_v48  ;;  %v2907_v17 = vshrl.u32 %v15636_v32, %v15789_v22 }
 0x27e   :  { %v2896_v53 = vand.u32 8388607, %v15787_v9  ;;  %v2909_v18 = vshll.u32 %v15636_v32, %v15788_v48  ;;  %v2910_v42 = vshrl.u32 %v15638_v4, %v15789_v22  ;;  %v2912_v13 = vshll.u32 %v15638_v4, %v15788_v48  ;;  %v15792_v48 = vld [vmem:[#allocation49_spill] sm:$0xff] }
 0x27f   :  { %v11741_v41 = vshrl.u32 %v766_v1, 30  ;;  %v2913_v5 = vshrl.u32 %v15639_v7, %v15789_v22  ;;  %v3905_v46 = vand.u32 2147483647, %v3904_v39  ;;  %v3907_v30 = vcvt.s32.f32 %v3900_v33  ;;  %v15791_v1 = vld [vmem:[#allocation45_spill] sm:$0xff] }
 0x280   :  { %v2897_v44 = vor.u32 8388608, %v2896_v53  ;;  %v2908_v61 = vor.u32 %v2907_v17, %v2906_v34  ;;  %v2911_v9 = vor.u32 %v2910_v42, %v2909_v18  ;;  %vm2923_vm2 = vcmp.lt.s32.totalorder %v15791_v1, 3  ;;  %v15795_v17 = vld [vmem:[#allocation12_spill] sm:$0xff] }
 0x281   :  { %15790 = vst [vmem:[#allocation58_spill] sm:$0xff] %v11741_v41  ;;  %v768_v59 = vshll.u32 %v11741_v41, 30  ;;  %v2914_v8 = vor.u32 %v2913_v5, %v2912_v13  ;;  %v11752_v57 = vsel %vm7790_vm4, 0, %v7789_v55  ;;  %vm2921_vm5 = vcmp.lt.s32.totalorder %v15791_v1, 1 }
 0x282   :  { %vm2922_vm9 = vcmp.lt.s32.totalorder %v15791_v1, 2  ;;  %v2935_v39 = vsel %vm2923_vm2, %v15793_v28, %v15792_v48  ;;  %vm15794_vm7 = vcmp.lt.s32.totalorder %v15791_v1, 4  ;;  %v2929_v34 = vsel %vm2921_vm5, %v2908_v61, %v2911_v9 }
 0x283   :  { %v11760_v33 = vsub.s32 %v765_v58, %v768_v59  ;;  %v2926_v53 = vsel %vm15794_vm7, %v2914_v8, 2102212464  ;;  %v2931_v55 = vsel %vm2923_vm2, %v2914_v8, %v15795_v17  ;;  %v2905_v18 = vshrl.u32 %v15596_v40, %v15789_v22 }
 0x284   :  { %v2932_v42 = vsel %vm2922_vm9, %v2929_v34, %v2931_v55  ;;  %v2933_v28 = vsel %vm2921_vm5, %v2911_v9, %v2914_v8  ;;  %v2937_v58 = vshll.u32 %v2897_v44, 8  ;;  %v3908_v13 = vmul.f32 %v3907_v30, %v3905_v46  ;;  %v478_v46 = vpop.permute.xlu1 %477 }
 0x285   :  { %v4005_v5 = vsub.s32 4294967266, %v11752_v57  ;;  %v771_v59 = vsub.s32 0, %v11760_v33  ;;  %v2936_v48 = vsel %vm2922_vm9, %v2933_v28, %v2935_v39  ;;  %v8932_v41 = vpop.eup %8931  ;;  %vm15533_vm14 = vcmp.lt.s32.totalorder %v11405_v51, 0 }
 0x286   :  { %v2925_v22 = vsel %vm2921_vm5, %v2905_v18, %v2908_v61  ;;  %v2927_v34 = vsel %vm2923_vm2, %v2911_v9, %v2926_v53  ;;  %v11784_v17 = vmul.u32.u64.low %v2937_v58, %v2936_v48  ;;  %v11785_v8 = vmul.u32.u64.high %v2937_v58, %v2936_v48, %v11784_v17  ;;  %v8934_v30 = vpop.eup %8933 }
 0x287   :  { %8935 = vcosq.f32 %v11733_v38  ;;  %v7664_v44 = vmin.u32 %v771_v59, %v11760_v33  ;;  %v11789_v55 = vmul.u32.u64.low %v2937_v58, %v2932_v42  ;;  %v11790_v39 = vmul.u32.u64.high %v2937_v58, %v2932_v42, %v11789_v55 }
 0x288   :  { %v3985_v28 = vadd.s32 %v11592_v19, %v11601_v14  ;;  %v4001_v61 = vsub.s32 32, %v11752_v57  ;;  %v245_v9 = vmul.f32 %v11691_v47, %v96_v52  ;;  %v410_v53 = vmul.f32 %v11341_v31, %v289_v2  ;;  %v11809_v19 = vld [vmem:[%s15363_s2 + $0x2] ss:$0 sm:$0xff] }
 0x289   :  { %v15796_v18 = vand.u32 2147483647, %v11405_v51  ;;  %v15797_v48 = vmov 0  ;;  %v4006_v59 = vadd.s32 127, %v4005_v5  ;;  %v773_v17 = vclz %v7664_v44  ;;  %v15800_v44 = vld [vmem:[#allocation20_spill] sm:$0xff] }
 0x28a   :  { %v2928_v42 = vsel %vm2922_vm9, %v2925_v22, %v2927_v34  ;;  %v605_v14 = vmul.f32 %v11809_v19, %v478_v46  ;;  %v3909_v52 = vxor.u32 2147483648, %v3908_v13  ;;  %v2879_v31 = vand.u32 3, %v2878_v20 }
 0x28b   :  { %vm11800_vm1 = vcmp.le.f32.partialorder %v15796_v18, 0.7853982  ;;  %vm2946_vm4 = vc.u32 %v11785_v8, %v11789_v55  ;;  %v442_v2 = vadd.f32 %v410_v53, %v245_v9  ;;  %v2882_v18 = vxor.u32 2147483648, %v8934_v30 }
 0x28c   :  { %v15798_v48 = vsel %vm11800_vm1, 4294967295, %v15797_v48  ;;  %v2885_v56 = vxor.u32 2147483648, %v8932_v41  ;;  %v2947_v5 = vadd.s32 1, %v11790_v39  ;;  %v637_v1 = vadd.f32 %v605_v14, %v11723_v29 }
 0x28d   :  { %15799 = vst [vmem:[#allocation7_spill] sm:$0xff] %v15798_v48  ;;  %8937 = vsinq.f32 %v11733_v38  ;;  %v7665_v22 = vadd.s32 4294967294, %v773_v17  ;;  %v2944_v34 = vmul.u32 %v2937_v58, %v2928_v42  ;;  %v639_v54 = vadd.f32 %v15800_v44, %v442_v2 }
 0x28e   :  { %v4002_v46 = vshll.u32 %v11643_v35, %v11752_v57  ;;  %v4003_v20 = vshrl.u32 %v3985_v28, %v4001_v61  ;;  %v4007_v10 = vshll.u32 %v4006_v59, 23  ;;  %vm2877_vm2 = vweird.f32 %v15778_v62 }
 0x28f   :  { %v2948_v9 = vsel %vm2946_vm4, %v2947_v5, %v11790_v39  ;;  %vm2881_vm5 = vcmp.eq.s32.totalorder %v2879_v31, 0  ;;  %vm2884_vm9 = vcmp.eq.s32.totalorder %v2879_v31, 2  ;;  %v11823_v29 = vadd.f32 %v11385_v12, %v639_v54 }
 0x290   :  { %v2949_v53 = vadd.s32 %v2948_v9, %v2944_v34  ;;  %v3910_v38 = vsel %vm15533_vm14, %v3909_v52, %v3908_v13  ;;  %v2883_v58 = vsel %vm2881_vm5, %v8932_v41, %v2882_v18  ;;  %v2886_v17 = vsel %vm2884_vm9, %v2885_v56, %v8934_v30 }
 0x291   :  { %15801 = vst [vmem:[#allocation17_spill] sm:$0xff] %v11823_v29  ;;  %v11828_v42 = vadd.f32 %v11385_v12, %v637_v1  ;;  %vm7666_vm7 = vcmp.lt.s32.totalorder %v7665_v22, 0  ;;  %v15527_v57 = vand.u32 2147483647, %v11823_v29  ;;  %v1020_v39 = vand.u32 2139095040, %v11823_v29  ;;  %v11832_v28 = vpop.eup %8935 }
 0x292   :  { %v2950_v35 = vadd.s32 536870912, %v2949_v53  ;;  %15803 = vst [vmem:[#allocation9_spill] sm:$0xff] %v11832_v28  ;;  %v4004_v61 = vor.u32 %v4003_v20, %v4002_v46  ;;  %v4008_v59 = vor.u32 4788187, %v4007_v10  ;;  %vm2880_vm4 = vcmp.lt.s32.totalorder %v2879_v31, 2  ;;  %v15807_v31 = vld [vmem:[#allocation50_spill] sm:$0xff] }
 0x293   :  { %15802 = vst [vmem:[#allocation22_spill] sm:$0xff] %v11828_v42  ;;  %vm2891_vm15 = vcmp.lt.s32.totalorder %v15783_v43, 0  ;;  %v11838_v56 = vsel %vm11800_vm1, %v11405_v51, %v3910_v38  ;;  %v11842_v12 = vadd.s32 %v11664_v60, %v11680_v36  ;;  %v1021_v41 = vshrl.u32 %v1020_v39, 23 }
 0x294   :  { %v2951_v54 = vshrl.u32 %v2950_v35, 30  ;;  %v11844_v13 = vsel %vm7666_vm7, 0, %v7665_v22  ;;  %v2887_v30 = vsel %vm2880_vm4, %v2883_v58, %v2886_v17  ;;  %v15804_v14 = vand.u32 2147483647, %v15783_v43 }
 0x295   :  { %v812_v52 = vand.u32 2139095040, %v11828_v42  ;;  %v3079_v2 = vsub.s32 4, %v15807_v31  ;;  %v7675_v5 = vadd.s32 4294967169, %v1021_v41  ;;  %v1024_v60 = vand.u32 8388607, %v15527_v57 }
 0x296   :  { %vm11848_vm5 = vcmp.le.f32.partialorder %v15804_v14, 0.7853982  ;;  %v2952_v18 = vshll.u32 %v2951_v54, 30  ;;  %v15526_v36 = vand.u32 2147483647, %v11828_v42  ;;  %v4011_v22 = vcvt.s32.f32 %v4004_v61 }
 0x297   :  { %v4009_v1 = vand.u32 2147483647, %v4008_v59  ;;  %v2975_v34 = vsub.s32 4, %v2951_v54  ;;  %v813_v44 = vshrl.u32 %v812_v52, 23  ;;  %v11857_v46 = vpop.eup %8937  ;;  %v11861_v20 = vsel %vm2877_vm2, nan, %v2887_v30 }
 0x298   :  { %15808 = vst [vmem:[#allocation23_spill] sm:$0xff] %v11857_v46  ;;  %v11863_v9 = vsub.s32 %v2949_v53, %v2952_v18  ;;  %v1027_v38 = vadd.s32 1, %v7675_v5  ;;  %v15809_v58 = vand.u32 2147483647, %v10264_v50  ;;  %v781_v35 = vsub.s32 4294967266, %v11844_v13 }
 0x299   :  { %v7667_v39 = vadd.s32 4294967169, %v813_v44  ;;  %vm15812_vm7 = vcmp.lt.s32.totalorder %v10264_v50, 0  ;;  %v1025_v59 = vor.u32 8388608, %v1024_v60  ;;  %v11884_v41 = vand.u32 8388607, %v15526_v36 }
 0x29a   :  { %vm11867_vm9 = vcmp.le.f32.partialorder %v15809_v58, 0.7853982  ;;  %v11875_v61 = vsel %vm15812_vm7, %v3079_v2, %v15807_v31  ;;  %v2955_v53 = vsub.s32 0, %v11863_v9  ;;  %vm1028_vm2 = vcmp.gt.s32.totalorder %v1027_v38, 0 }
 0x29b   :  { %v3081_v62 = vsel %vm11867_vm9, %v10264_v50, %v11075_v11  ;;  %v11886_v30 = vmul.f32 %v4011_v22, %v4009_v1  ;;  %v11890_v14 = vsel %vm2891_vm15, %v2975_v34, %v2951_v54  ;;  %v1029_v52 = vsel %vm1028_vm2, %v1027_v38, 0  ;;  %v8852_v11 = vld [vmem:[%s15366_s0 + $0x28] sm:$0xff]  }
 0x29c   :  { %v11892_v31 = vadd.s32 1, %v7667_v39  ;;  %v7748_v2 = vmin.u32 %v2955_v53, %v11863_v9  ;;  %v11900_v18 = vmul.f32 %v11691_v47, %v11671_v24  ;;  %v1031_v5 = vand.u32 31, %v1029_v52  ;;  %7820 = vmatmul.mubr.msk.bf16.gmra.mrb[20].mxu0 %vm15565_vm0, %v8852_v11 }
 0x29d   :  { %8939 = vcosq.f32 %v3081_v62  ;;  %v11902_v60 = vadd.s32 127, %v781_v35  ;;  %v2945_v54 = vadd.s32 %v11789_v55, %v11785_v8  ;;  %v2978_v24 = vsel %vm11848_vm5, 0, %v11890_v14  ;;  %4378 = vmatprep.mubr.bf16.mxu0 %v15748_v16 }
 0x29e   :  { %8941 = vsinq.f32 %v3081_v62  ;;  %v2957_v22 = vclz %v7748_v2  ;;  %v11913_v47 = vshll.u32 %v1025_v59, 8  ;;  %v1030_v44 = vshrl.u32 %v1029_v52, 5  ;;  %v8853_v52 = vld [vmem:[%s15366_s0 + $0x30] sm:$0xff]  }
 0x29f   :  { %v1032_v8 = vsub.s32 32, %v1031_v5  ;;  %v1034_v55 = vshll.u32 %v15596_v40, %v1031_v5  ;;  %vm820_vm4 = vcmp.gt.s32.totalorder %v11892_v31, 0  ;;  %v1037_v58 = vshll.u32 %v15636_v32, %v1031_v5 }
 0x2a0   :  { %v7749_v38 = vadd.s32 4294967294, %v2957_v22  ;;  %v1040_v35 = vshll.u32 %v15638_v4, %v1031_v5  ;;  %v1043_v39 = vshll.u32 %v15639_v7, %v1031_v5  ;;  %v1046_v14 = vshll.u32 %v15620_v27, %v1031_v5 }
 0x2a1   :  { %v1035_v62 = vshrl.u32 %v15636_v32, %v1032_v8  ;;  %v1038_v53 = vshrl.u32 %v15638_v4, %v1032_v8  ;;  %v1041_v59 = vshrl.u32 %v15639_v7, %v1032_v8  ;;  %v1033_v11 = vshrl.u32 %v15596_v40, %v1032_v8 }
 0x2a2   :  { %vm7750_vm7 = vcmp.lt.s32.totalorder %v7749_v38, 0  ;;  %v1044_v2 = vshrl.u32 %v15620_v27, %v1032_v8  ;;  %v1047_v22 = vshrl.u32 %v15617_v6, %v1032_v8  ;;  %vm1049_vm2 = vcmp.lt.s32.totalorder %v1030_v44, 1 }
 0x2a3   :  { %v2960_v36 = vsel %vm7750_vm7, 0, %v7749_v38  ;;  %v1036_v57 = vor.u32 %v1035_v62, %v1034_v55  ;;  %v1039_v34 = vor.u32 %v1038_v53, %v1037_v58  ;;  %v1042_v1 = vor.u32 %v1041_v59, %v1040_v35 }
 0x2a4   :  { %v2961_v48 = vsub.s32 32, %v2960_v36  ;;  %v2965_v51 = vsub.s32 4294967266, %v2960_v36  ;;  %v1045_v28 = vor.u32 %v1044_v2, %v1043_v39  ;;  %v2962_v5 = vshll.u32 %v11863_v9, %v2960_v36  ;;  %7821 = vmatmul.mubr.msk.bf16.gmra.mrb[24].mxu0 %vm15565_vm0, %v8853_v52 }
 0x2a5   :  { %v1048_v46 = vor.u32 %v1047_v22, %v1046_v14  ;;  %vm1050_vm14 = vcmp.lt.s32.totalorder %v1030_v44, 2  ;;  %vm1052_vm13 = vcmp.lt.s32.totalorder %v1030_v44, 4  ;;  %vm1051_vm12 = vcmp.lt.s32.totalorder %v1030_v44, 3  ;;  %4388 = vmatprep.mubr.bf16.mxu0 %v15748_v16 }
 0x2a6   :  { %v2963_v23 = vshrl.u32 %v2945_v54, %v2961_v48  ;;  %v2966_v37 = vadd.s32 127, %v2965_v51  ;;  %v1054_v8 = vsel %vm1052_vm13, %v1042_v1, 2102212464  ;;  %v1053_v38 = vsel %vm1049_vm2, %v1033_v11, %v1036_v57 }
 0x2a7   :  { %v11934_v3 = vpop.eup %8939  ;;  %v1055_v36 = vsel %vm1051_vm12, %v1039_v34, %v1054_v8  ;;  %v1057_v9 = vsel %vm1049_vm2, %v1036_v57, %v1039_v34  ;;  %v1058_v58 = vsel %vm1052_vm13, %v1045_v28, 920167782  ;;  %v1061_v51 = vsel %vm1049_vm2, %v1039_v34, %v1042_v1 }
 0x2a8   :  { %v11938_v55 = vpop.eup %8941  ;;  %v2964_v35 = vor.u32 %v2963_v23, %v2962_v5  ;;  %v2967_v39 = vshll.u32 %v2966_v37, 23  ;;  %v1059_v48 = vsel %vm1051_vm12, %v1042_v1, %v1058_v58  ;;  %v2982_v54 = vadd.s32 3, %v2978_v24 }
 0x2a9   :  { %v1060_v62 = vsel %vm1050_vm14, %v1057_v9, %v1059_v48  ;;  %v1062_v53 = vsel %vm1052_vm13, %v1048_v46, 1326507024  ;;  %v821_v59 = vsel %vm820_vm4, %v11892_v31, 0  ;;  %v1056_v57 = vsel %vm1050_vm14, %v1053_v38, %v1055_v36 }
 0x2aa   :  { %v2968_v14 = vor.u32 4788187, %v2967_v39  ;;  %v1063_v52 = vsel %vm1051_vm12, %v1045_v28, %v1062_v53  ;;  %v11953_v23 = vshrl.u32 %v821_v59, 5  ;;  %v823_v34 = vand.u32 31, %v821_v59 }
 0x2ab   :  { %v1064_v37 = vsel %vm1050_vm14, %v1061_v51, %v1063_v52  ;;  %v11957_v1 = vmul.u32.u64.low %v11913_v47, %v1060_v62  ;;  %v11958_v24 = vmul.u32.u64.high %v11913_v47, %v1060_v62, %v11957_v1  ;;  %v2971_v11 = vcvt.s32.f32 %v2964_v35 }
 0x2ac   :  { %v2969_v46 = vand.u32 2147483647, %v2968_v14  ;;  %v11962_v2 = vmul.u32.u64.low %v11913_v47, %v1064_v37  ;;  %v11963_v31 = vmul.u32.u64.high %v11913_v47, %v1064_v37, %v11962_v2  ;;  %v1072_v22 = vmul.u32 %v11913_v47, %v1056_v57 }
 0x2ad   :  { %v824_v5 = vsub.s32 32, %v823_v34  ;;  %vm841_vm12 = vcmp.lt.s32.totalorder %v11953_v23, 1  ;;  %v15813_v28 = vsel %vm11867_vm9, 0, %v11875_v61  ;;  %v826_v38 = vshll.u32 %v15596_v40, %v823_v34 }
 0x2ae   :  { %v3086_v44 = vadd.s32 3, %v15813_v28  ;;  %v2972_v8 = vmul.f32 %v2971_v11, %v2969_v46  ;;  %v829_v36 = vshll.u32 %v15636_v32, %v823_v34  ;;  %v832_v9 = vshll.u32 %v15638_v4, %v823_v34 }
 0x2af   :  { %v1075_v58 = vadd.s32 1, %v11958_v24  ;;  %v827_v35 = vshrl.u32 %v15636_v32, %v824_v5  ;;  %v830_v47 = vshrl.u32 %v15638_v4, %v824_v5  ;;  %v835_v39 = vshll.u32 %v15639_v7, %v823_v34 }
 0x2b0   :  { %v2973_v48 = vxor.u32 2147483648, %v2972_v8  ;;  %vm1074_vm13 = vc.u32 %v11963_v31, %v11957_v1  ;;  %v833_v17 = vshrl.u32 %v15639_v7, %v824_v5  ;;  %v838_v61 = vshll.u32 %v15620_v27, %v823_v34 }
 0x2b1   :  { %v1076_v51 = vsel %vm1074_vm13, %v1075_v58, %v11958_v24  ;;  %v828_v62 = vor.u32 %v827_v35, %v826_v38  ;;  %v831_v53 = vor.u32 %v830_v47, %v829_v36  ;;  %v836_v59 = vshrl.u32 %v15620_v27, %v824_v5 }
 0x2b2   :  { %v2974_v14 = vsel %vm2891_vm15, %v2973_v48, %v2972_v8  ;;  %v1077_v57 = vadd.s32 %v1076_v51, %v1072_v22  ;;  %v834_v52 = vor.u32 %v833_v17, %v832_v9  ;;  %v839_v37 = vshrl.u32 %v15617_v6, %v824_v5  ;;  %v482_v9 = vpop.permute.xlu1 %481 }
 0x2b3   :  { %v2977_v46 = vsel %vm11848_vm5, %v15783_v43, %v2974_v14  ;;  %v837_v11 = vor.u32 %v836_v59, %v835_v39  ;;  %vm842_vm14 = vcmp.lt.s32.totalorder %v11953_v23, 2  ;;  %vm843_vm9 = vcmp.lt.s32.totalorder %v11953_v23, 3 }
 0x2b4   :  { %8943 = vcosq.f32 %v2977_v46  ;;  %v1078_v24 = vadd.s32 536870912, %v1077_v57  ;;  %v840_v34 = vor.u32 %v839_v37, %v838_v61  ;;  %vm844_vm4 = vcmp.lt.s32.totalorder %v11953_v23, 4 }
 0x2b5   :  { %8945 = vsinq.f32 %v2977_v46  ;;  %v846_v2 = vsel %vm844_vm4, %v834_v52, 2102212464  ;;  %v849_v22 = vsel %vm841_vm12, %v828_v62, %v831_v53  ;;  %v850_v28 = vsel %vm844_vm4, %v837_v11, 920167782 }
 0x2b6   :  { %v11995_v8 = vshrl.u32 %v1078_v24, 30  ;;  %v825_v10 = vshrl.u32 %v15596_v40, %v824_v5  ;;  %v851_v38 = vsel %vm843_vm9, %v834_v52, %v850_v28  ;;  %v853_v36 = vsel %vm841_vm12, %v831_v53, %v834_v52  ;;  %v12039_v28 = vpop.permute.xlu1 %100 }
 0x2b7   :  { %v2983_v58 = vand.u32 3, %v2982_v54  ;;  %v852_v35 = vsel %vm842_vm14, %v849_v22, %v851_v38  ;;  %v854_v47 = vsel %vm844_vm4, %v840_v34, 1326507024  ;;  %v15814_v39 = vor.u32 8388608, %v11884_v41 }
 0x2b8   :  { %v1080_v17 = vshll.u32 %v11995_v8, 30  ;;  %v845_v5 = vsel %vm841_vm12, %v825_v10, %v828_v62  ;;  %v847_v61 = vsel %vm843_vm9, %v831_v53, %v846_v2  ;;  %v855_v51 = vsel %vm843_vm9, %v837_v11, %v854_v47  ;;  %v8854_v2 = vld [vmem:[%s15366_s0 + $0x38] sm:$0xff]  }
 0x2b9   :  { %v857_v48 = vshll.u32 %v15814_v39, 8  ;;  %v4013_v54 = vxor.u32 2147483648, %v11886_v30  ;;  %v856_v59 = vsel %vm842_vm14, %v853_v36, %v855_v51  ;;  %v441_v41 = vadd.f32 %v11721_v45, %v11900_v18  ;;  %7822 = vmatmul.mubr.msk.bf16.gmra.mrb[28].mxu0 %vm15565_vm0, %v8854_v2 }
 0x2ba   :  { %v12022_v37 = vsub.s32 %v1077_v57, %v1080_v17  ;;  %v777_v53 = vsub.s32 32, %v11844_v13  ;;  %v783_v11 = vshll.u32 %v11902_v60, 23  ;;  %v848_v24 = vsel %vm842_vm14, %v845_v5, %v847_v61  ;;  %v15815_v57 = vld [vmem:[#allocation15_spill] sm:$0xff]  ;;  %4398 = vmatprep.mubr.bf16.mxu0 %v15748_v16 }
 0x2bb   :  { %v12016_v14 = vmul.u32.u64.low %v857_v48, %v852_v35  ;;  %v12017_v52 = vmul.u32.u64.high %v857_v48, %v852_v35, %v12016_v14  ;;  %v12024_v62 = vmul.u32.u64.low %v857_v48, %v856_v59  ;;  %v12025_v46 = vmul.u32.u64.high %v857_v48, %v856_v59, %v12024_v62 }
 0x2bc   :  { %v12031_v34 = vand.u32 3, %v3086_v44  ;;  %vm2984_vm15 = vcmp.lt.s32.totalorder %v2983_v58, 2  ;;  %v1083_v45 = vsub.s32 0, %v12022_v37  ;;  %v3090_v18 = vxor.u32 2147483648, %v11938_v55 }
 0x2bd   :  { %v3183_v22 = vsub.s32 4, %v15815_v57  ;;  %vm15545_vm5 = vcmp.lt.s32.totalorder %v11388_v26, 0  ;;  %vm2985_vm7 = vcmp.eq.s32.totalorder %v2983_v58, 0  ;;  %vm2988_vm2 = vcmp.eq.s32.totalorder %v2983_v58, 2 }
 0x2be   :  { %v867_v60 = vadd.s32 1, %v12017_v52  ;;  %v15816_v23 = vand.u32 2147483647, %v15696_v63  ;;  %v8944_v10 = vpop.eup %8943  ;;  %v7676_v38 = vmin.u32 %v1083_v45, %v12022_v37  ;;  %v864_v36 = vmul.u32 %v857_v48, %v848_v24 }
 0x2bf   :  { %vm866_vm13 = vc.u32 %v12025_v46, %v12016_v14  ;;  %v8946_v47 = vpop.eup %8945  ;;  %v2989_v39 = vxor.u32 2147483648, %v8944_v10  ;;  %vm3089_vm14 = vcmp.eq.s32.totalorder %v12031_v34, 0  ;;  %vm15819_vm9 = vcmp.lt.s32.totalorder %v15696_v63, 0 }
 0x2c0   :  { %vm12045_vm12 = vcmp.le.f32.partialorder %v15816_v23, 0.7853982  ;;  %v868_v17 = vsel %vm866_vm13, %v867_v60, %v12017_v52  ;;  %v3184_v48 = vsel %vm15819_vm9, %v3183_v22, %v15815_v57  ;;  %v2986_v5 = vxor.u32 2147483648, %v8946_v47  ;;  %v8855_v52 = vld [vmem:[%s15366_s0 + $0x40] sm:$0xff]   ;;  %v12072_v22 = vpop.permute.xlu1 %292 }
 0x2c1   :  { %v3185_v35 = vsel %vm12045_vm12, %v15696_v63, %v11048_v21  ;;  %v1085_v61 = vclz %v7676_v38  ;;  %v869_v51 = vadd.s32 %v868_v17, %v864_v36  ;;  %v3093_v59 = vxor.u32 2147483648, %v11934_v3  ;;  %7823 = vmatmul.mubr.msk.bf16.gmra.mrb[32].mxu0 %vm15565_vm0, %v8855_v52 }
 0x2c2   :  { %v2990_v62 = vsel %vm2988_vm2, %v2989_v39, %v8946_v47  ;;  %v3186_v21 = vsel %vm12045_vm12, 0, %v3184_v48  ;;  %8947 = vcosq.f32 %v3185_v35  ;;  %v606_v24 = vmul.f32 %v11809_v19, %v482_v9  ;;  %4408 = vmatprep.mubr.bf16.mxu0 %v15748_v16 }
 0x2c3   :  { %v2987_v2 = vsel %vm2985_vm7, %v8944_v10, %v2986_v5  ;;  %v7677_v45 = vadd.s32 4294967294, %v1085_v61  ;;  %v870_v57 = vadd.s32 536870912, %v869_v51  ;;  %8949 = vsinq.f32 %v3185_v35 }
 0x2c4   :  { %vm2981_vm4 = vweird.f32 %v15783_v43  ;;  %v2991_v60 = vsel %vm2984_vm15, %v2987_v2, %v2990_v62  ;;  %v3091_v23 = vsel %vm3089_vm14, %v11934_v3, %v3090_v18  ;;  %v638_v19 = vadd.f32 %v606_v24, %v441_v41  ;;  %v12087_v43 = vld [vmem:[%s15363_s2 + $0x3] ss:$0 sm:$0xff] }
 0x2c5   :  { %v2992_v9 = vsel %vm2981_vm4, nan, %v2991_v60  ;;  %vm7678_vm2 = vcmp.lt.s32.totalorder %v7677_v45, 0  ;;  %v12079_v44 = vshrl.u32 %v870_v57, 30  ;;  %vm3092_vm7 = vcmp.eq.s32.totalorder %v12031_v34, 2 }
 0x2c6   :  { %v4043_v10 = vpack.c.bf16 %v2992_v9, %v11861_v20  ;;  %v3094_v38 = vsel %vm3092_vm7, %v3093_v59, %v11938_v55  ;;  %v3190_v36 = vadd.s32 3, %v3186_v21  ;;  %v12090_v58 = vadd.f32 %v12087_v43, %v638_v19 }
 0x2c7   :  { %15820 = vst [vmem:[#allocation38_spill] sm:$0xff] %v12079_v44  ;;  %v4014_v3 = vsel %vm15545_vm5, %v4013_v54, %v11886_v30  ;;  %v779_v20 = vshrl.u32 %v11842_v12, %v777_v53  ;;  %v12099_v55 = vor.u32 4788187, %v783_v11  ;;  %v872_v41 = vshll.u32 %v12079_v44, 30  ;;  %v297_v11 = vpop.permute.xlu1 %296 }
 0x2c8   :  { %8951 = vcosq.f32 %v11838_v56  ;;  %v15821_v18 = vand.u32 2147483647, %v11388_v26  ;;  %8283 = vmatprep.mubr.msk.bf16.mxu1 %vm15546_vm10, %v4043_v10  ;;  %v12112_v30 = vsel %vm7678_vm2, 0, %v7677_v45  ;;  %vm3088_vm12 = vcmp.lt.s32.totalorder %v12031_v34, 2 }
 0x2c9   :  { %8953 = vsinq.f32 %v11838_v56  ;;  %v778_v12 = vshll.u32 %v11760_v33, %v11844_v13  ;;  %v12118_v54 = vsub.s32 %v869_v51, %v872_v41  ;;  %v3095_v53 = vsel %vm3088_vm12, %v3091_v23, %v3094_v38  ;;  %v15825_v38 = vld [vmem:[#allocation6_spill] sm:$0xff] }
 0x2ca   :  { %vm12106_vm15 = vcmp.le.f32.partialorder %v15821_v18, 0.7853982  ;;  %vm3085_vm13 = vweird.f32 %v10264_v50  ;;  %v3191_v39 = vand.u32 3, %v3190_v36  ;;  %v916_v17 = vand.u32 2139095040, %v12090_v58  ;;  %v12133_v50 = vld [vmem:[%s15363_s2 + $0x1] ss:$0 sm:$0xff] }
 0x2cb   :  { %v4017_v47 = vsel %vm12106_vm15, %v11388_v26, %v4014_v3  ;;  %v780_v48 = vor.u32 %v779_v20, %v778_v12  ;;  %v785_v34 = vand.u32 2147483647, %v12099_v55  ;;  %v1093_v56 = vsub.s32 4294967266, %v12112_v30 }
 0x2cc   :  { %v875_v33 = vsub.s32 0, %v12118_v54  ;;  %v8948_v13 = vpop.eup %8947  ;;  %v1073_v5 = vadd.s32 %v11957_v1, %v11963_v31  ;;  %v3096_v61 = vsel %vm3085_vm13, nan, %v3095_v53  ;;  %v917_v51 = vshrl.u32 %v916_v17, 23  ;;  %v15824_v31 = vld [vmem:[#allocation41_spill] sm:$0xff] }
 0x2cd   :  { %v412_v59 = vmul.f32 %v12133_v50, %v297_v11  ;;  %v8950_v62 = vpop.eup %8949  ;;  %v1089_v21 = vsub.s32 32, %v12112_v30  ;;  %v3197_v52 = vxor.u32 2147483648, %v8948_v13  ;;  %v15540_v2 = vand.u32 2147483647, %v12090_v58 }
 0x2ce   :  { %v7668_v24 = vmin.u32 %v875_v33, %v12118_v54  ;;  %v3194_v45 = vxor.u32 2147483648, %v8950_v62  ;;  %vm3196_vm14 = vcmp.eq.s32.totalorder %v3191_v39, 2  ;;  %v7671_v1 = vadd.s32 4294967169, %v917_v51 }
 0x2cf   :  { %v444_v57 = vadd.f32 %v412_v59, %v15824_v31  ;;  %v1094_v60 = vadd.s32 127, %v1093_v56  ;;  %vm3193_vm9 = vcmp.eq.s32.totalorder %v3191_v39, 0  ;;  %v3198_v19 = vsel %vm3196_vm14, %v3197_v52, %v8950_v62 }
 0x2d0   :  { %v877_v23 = vclz %v7668_v24  ;;  %vm3192_vm4 = vcmp.lt.s32.totalorder %v3191_v39, 2  ;;  %v3195_v9 = vsel %vm3193_vm9, %v8948_v13, %v3194_v45  ;;  %v923_v10 = vadd.s32 1, %v7671_v1 }
 0x2d1   :  { %v641_v36 = vadd.f32 %v15825_v38, %v444_v57  ;;  %vm3189_vm2 = vweird.f32 %v15696_v63  ;;  %v3199_v20 = vsel %vm3192_vm4, %v3195_v9, %v3198_v19  ;;  %v920_v55 = vand.u32 8388607, %v15540_v2 }
 0x2d2   :  { %v7669_v3 = vadd.s32 4294967294, %v877_v23  ;;  %v12144_v41 = vpop.eup %8951  ;;  %v1091_v18 = vshrl.u32 %v1073_v5, %v1089_v21  ;;  %v1103_v12 = vsub.s32 4, %v11995_v8  ;;  %v3200_v53 = vsel %vm3189_vm2, nan, %v3199_v20 }
 0x2d3   :  { %vm924_vm7 = vcmp.gt.s32.totalorder %v923_v10, 0  ;;  %v12147_v11 = vpop.eup %8953  ;;  %v1095_v39 = vshll.u32 %v1094_v60, 23  ;;  %v4044_v17 = vpack.c.bf16 %v3200_v53, %v3096_v61  ;;  %8955 = vcosq.f32 %v4017_v47 }
 0x2d4   :  { %vm7670_vm12 = vcmp.lt.s32.totalorder %v7669_v3, 0  ;;  %v925_v56 = vsel %vm924_vm7, %v923_v10, 0  ;;  %v787_v33 = vcvt.s32.f32 %v780_v48  ;;  %8957 = vsinq.f32 %v4017_v47 }
 0x2d5   :  { %v12149_v63 = vsel %vm7670_vm12, 0, %v7669_v3  ;;  %v927_v13 = vand.u32 31, %v925_v56  ;;  %vm1019_vm13 = vcmp.lt.s32.totalorder %v11823_v29, 0  ;;  %v1090_v5 = vshll.u32 %v12022_v37, %v12112_v30  ;;  %8284 = vmatmul.mubr.msk.bf16.gmra.mrb[8].mxu1 %vm15546_vm10, %v4044_v17  ;;  %v15826_v30 = vld [vmem:[#allocation44_spill] sm:$0xff] }
 0x2d6   :  { %v921_v51 = vor.u32 8388608, %v920_v55  ;;  %v12155_v59 = vmul.f32 %v787_v33, %v785_v34  ;;  %v12160_v61 = vsel %vm1019_vm13, %v1103_v12, %v11995_v8  ;;  %v865_v48 = vadd.s32 %v12016_v14, %v12025_v46 }
 0x2d7   :  { %v928_v62 = vsub.s32 32, %v927_v13  ;;  %v12164_v47 = vor.u32 %v1091_v18, %v1090_v5  ;;  %v12166_v21 = vor.u32 4788187, %v1095_v39  ;;  %v885_v37 = vsub.s32 4294967266, %v12149_v63 }
 0x2d8   :  { %v15539_v24 = vand.u32 2147483647, %v15826_v30  ;;  %v930_v34 = vshll.u32 %v15596_v40, %v927_v13  ;;  %v933_v45 = vshll.u32 %v15636_v32, %v927_v13  ;;  %v926_v1 = vshrl.u32 %v925_v56, 5 }
 0x2d9   :  { %v931_v52 = vshrl.u32 %v15636_v32, %v928_v62  ;;  %v934_v8 = vshrl.u32 %v15638_v4, %v928_v62  ;;  %v936_v14 = vshll.u32 %v15638_v4, %v927_v13  ;;  %v937_v46 = vshrl.u32 %v15639_v7, %v928_v62 }
 0x2da   :  { %v961_v31 = vshll.u32 %v921_v51, 8  ;;  %v939_v23 = vshll.u32 %v15639_v7, %v927_v13  ;;  %v940_v19 = vshrl.u32 %v15620_v27, %v928_v62  ;;  %v886_v9 = vadd.s32 127, %v885_v37 }
 0x2db   :  { %v932_v57 = vor.u32 %v931_v52, %v930_v34  ;;  %v935_v60 = vor.u32 %v934_v8, %v933_v45  ;;  %v938_v10 = vor.u32 %v937_v46, %v936_v14  ;;  %v942_v38 = vshll.u32 %v15620_v27, %v927_v13 }
 0x2dc   :  { %v943_v3 = vshrl.u32 %v15617_v6, %v928_v62  ;;  %v881_v20 = vsub.s32 32, %v12149_v63  ;;  %v929_v55 = vshrl.u32 %v15596_v40, %v928_v62  ;;  %v941_v18 = vor.u32 %v940_v19, %v939_v23 }
 0x2dd   :  { %v12183_v12 = vadd.f32 %v12087_v43, %v641_v36  ;;  %vm945_vm14 = vcmp.lt.s32.totalorder %v926_v1, 1  ;;  %vm947_vm9 = vcmp.lt.s32.totalorder %v926_v1, 3  ;;  %vm948_vm4 = vcmp.lt.s32.totalorder %v926_v1, 4  ;;  %v12185_v39 = vpop.eup %8955 }
 0x2de   :  { %v944_v53 = vor.u32 %v943_v3, %v942_v38  ;;  %v950_v17 = vsel %vm948_vm4, %v938_v10, 2102212464  ;;  %v953_v56 = vsel %vm945_vm14, %v932_v57, %v935_v60  ;;  %v954_v33 = vsel %vm948_vm4, %v941_v18, 920167782  ;;  %v12187_v5 = vpop.eup %8957 }
 0x2df   :  { %15827 = vst [vmem:[#allocation21_spill] sm:$0xff] %v12183_v12  ;;  %v957_v13 = vsel %vm945_vm14, %v935_v60, %v938_v10  ;;  %v887_v51 = vshll.u32 %v886_v9, 23  ;;  %vm946_vm2 = vcmp.lt.s32.totalorder %v926_v1, 2  ;;  %v955_v37 = vsel %vm947_vm9, %v938_v10, %v954_v33 }
 0x2e0   :  { %v958_v62 = vsel %vm948_vm4, %v944_v53, 1326507024  ;;  %v949_v34 = vsel %vm945_vm14, %v929_v55, %v932_v57  ;;  %v951_v52 = vsel %vm947_vm9, %v935_v60, %v950_v17  ;;  %v956_v36 = vsel %vm946_vm2, %v953_v56, %v955_v37 }
 0x2e1   :  { %v959_v45 = vsel %vm947_vm9, %v941_v18, %v958_v62  ;;  %v12191_v14 = vmul.u32.u64.low %v961_v31, %v956_v36  ;;  %v12192_v46 = vmul.u32.u64.high %v961_v31, %v956_v36, %v12191_v14  ;;  %v15538_v23 = vand.u32 2147483647, %v12183_v12 }
 0x2e2   :  { %v960_v8 = vsel %vm946_vm2, %v957_v13, %v959_v45  ;;  %v883_v19 = vshrl.u32 %v865_v48, %v881_v20  ;;  %v1228_v9 = vand.u32 2139095040, %v12183_v12  ;;  %v15828_v57 = vand.u32 2147483647, %v11823_v29 }
 0x2e3   :  { %v12195_v38 = vmul.u32.u64.low %v961_v31, %v960_v8  ;;  %v12196_v3 = vmul.u32.u64.high %v961_v31, %v960_v8, %v12195_v38  ;;  %v1097_v55 = vand.u32 2147483647, %v12166_v21  ;;  %v952_v18 = vsel %vm946_vm2, %v949_v34, %v951_v52 }
 0x2e4   :  { %vm12202_vm7 = vcmp.le.f32.partialorder %v15828_v57, 0.7853982  ;;  %v882_v20 = vshll.u32 %v12118_v54, %v12149_v63  ;;  %v888_v53 = vor.u32 4788187, %v887_v51  ;;  %v1229_v17 = vshrl.u32 %v1228_v9, 23  ;;  %v15831_v63 = vld [vmem:[#allocation54_spill] sm:$0xff] }
 0x2e5   :  { %v1099_v56 = vcvt.s32.f32 %v12164_v47  ;;  %v971_v33 = vadd.s32 1, %v12192_v46  ;;  %v1232_v13 = vand.u32 8388607, %v15538_v23  ;;  %v3208_v21 = vand.u32 8388607, %v15539_v24 }
 0x2e6   :  { %v884_v1 = vor.u32 %v883_v19, %v882_v20  ;;  %v968_v37 = vmul.u32 %v961_v31, %v952_v18  ;;  %vm970_vm12 = vc.u32 %v12196_v3, %v12191_v14  ;;  %v7683_v62 = vadd.s32 4294967169, %v1229_v17  ;;  %v15832_v19 = vld [vmem:[#allocation52_spill] sm:$0xff] }
 0x2e7   :  { %v12220_v34 = vmul.f32 %v1099_v56, %v1097_v55  ;;  %v972_v54 = vsel %vm970_vm12, %v971_v33, %v12192_v46  ;;  %v3217_v47 = vshrl.u32 %v15596_v40, %v15831_v63  ;;  %v3219_v51 = vshrl.u32 %v15636_v32, %v15831_v63 }
 0x2e8   :  { %v889_v52 = vand.u32 2147483647, %v888_v53  ;;  %v973_v36 = vadd.s32 %v972_v54, %v968_v37  ;;  %v1235_v45 = vadd.s32 1, %v7683_v62  ;;  %v3225_v8 = vshrl.u32 %v15639_v7, %v15831_v63 }
 0x2e9   :  { %v1233_v31 = vor.u32 8388608, %v1232_v13  ;;  %v3218_v38 = vshll.u32 %v15596_v40, %v15832_v19  ;;  %v3222_v9 = vshrl.u32 %v15638_v4, %v15831_v63  ;;  %v3224_v46 = vshll.u32 %v15638_v4, %v15832_v19 }
 0x2ea   :  { %v891_v57 = vcvt.s32.f32 %v884_v1  ;;  %v974_v55 = vadd.s32 536870912, %v973_v36  ;;  %vm1236_vm14 = vcmp.gt.s32.totalorder %v1235_v45, 0  ;;  %v3209_v18 = vor.u32 8388608, %v3208_v21  ;;  %v15833_v21 = vld [vmem:[#allocation16_spill] sm:$0xff] }
 0x2eb   :  { %v1237_v20 = vsel %vm1236_vm14, %v1235_v45, 0  ;;  %v3220_v53 = vor.u32 %v3219_v51, %v3218_v38  ;;  %v3221_v17 = vshll.u32 %v15636_v32, %v15832_v19  ;;  %v3226_v56 = vor.u32 %v3225_v8, %v3224_v46 }
 0x2ec   :  { %v12238_v13 = vmul.f32 %v891_v57, %v889_v52  ;;  %v12240_v37 = vshrl.u32 %v974_v55, 30  ;;  %v1239_v62 = vand.u32 31, %v1237_v20  ;;  %v12243_v54 = vadd.s32 %v12191_v14, %v12196_v3  ;;  %v8856_v3 = vld [vmem:[%s15366_s0 + $0x48] sm:$0xff]  }
 0x2ed   :  { %v12245_v1 = vshll.u32 %v1233_v31, 8  ;;  %v3223_v63 = vor.u32 %v3222_v9, %v3221_v17  ;;  %vm3233_vm9 = vcmp.lt.s32.totalorder %v15833_v21, 1  ;;  %vm3235_vm4 = vcmp.lt.s32.totalorder %v15833_v21, 3  ;;  %7824 = vmatmul.mubr.msk.bf16.gmra.mrb[36].mxu0 %vm15565_vm0, %v8856_v3 }
 0x2ee   :  { %v976_v51 = vshll.u32 %v12240_v37, 30  ;;  %v1240_v45 = vsub.s32 32, %v1239_v62  ;;  %v12250_v8 = vshll.u32 %v3209_v18, 8  ;;  %v1238_v52 = vshrl.u32 %v1237_v20, 5  ;;  %4418 = vmatprep.mubr.bf16.mxu0 %v15748_v16 }
 0x2ef   :  { %v1242_v19 = vshll.u32 %v15596_v40, %v1239_v62  ;;  %v12255_v38 = vsel %vm3233_vm9, %v3217_v47, %v3220_v53  ;;  %vm15834_vm2 = vcmp.lt.s32.totalorder %v15833_v21, 4  ;;  %v1245_v46 = vshll.u32 %v15636_v32, %v1239_v62 }
 0x2f0   :  { %v3238_v14 = vsel %vm15834_vm2, %v3226_v56, 2102212464  ;;  %v12262_v31 = vsub.s32 %v973_v36, %v976_v51  ;;  %v1243_v9 = vshrl.u32 %v15636_v32, %v1240_v45  ;;  %v1248_v57 = vshll.u32 %v15638_v4, %v1239_v62 }
 0x2f1   :  { %v1246_v55 = vshrl.u32 %v15638_v4, %v1240_v45  ;;  %v1249_v47 = vshrl.u32 %v15639_v7, %v1240_v45  ;;  %v1251_v18 = vshll.u32 %v15639_v7, %v1239_v62  ;;  %v1252_v20 = vshrl.u32 %v15620_v27, %v1240_v45 }
 0x2f2   :  { %v979_v17 = vsub.s32 0, %v12262_v31  ;;  %v1244_v36 = vor.u32 %v1243_v9, %v1242_v19  ;;  %v1254_v51 = vshll.u32 %v15620_v27, %v1239_v62  ;;  %v1255_v23 = vshrl.u32 %v15617_v6, %v1240_v45  ;;  %v15835_v9 = vld [vmem:[#allocation61_spill] sm:$0xff]  ;;  %v15836_v62 = vld [vmem:[#allocation56_spill] sm:$0xff] }
 0x2f3   :  { %vm3234_vm12 = vcmp.lt.s32.totalorder %v15833_v21, 2  ;;  %v1247_v24 = vor.u32 %v1246_v55, %v1245_v46  ;;  %v1250_v48 = vor.u32 %v1249_v47, %v1248_v57  ;;  %v1253_v10 = vor.u32 %v1252_v20, %v1251_v18  ;;  %v15837_v46 = vld [vmem:[#allocation60_spill] sm:$0xff] }
 0x2f4   :  { %v3241_v33 = vsel %vm3233_vm9, %v3220_v53, %v3223_v63  ;;  %v7672_v2 = vmin.u32 %v979_v17, %v12262_v31  ;;  %v1256_v3 = vor.u32 %v1255_v23, %v1254_v51  ;;  %v3239_v19 = vsel %vm3235_vm4, %v3223_v63, %v3238_v14 }
 0x2f5   :  { %v3247_v44 = vsel %vm3235_vm4, %v15836_v62, %v15835_v9  ;;  %v1241_v12 = vshrl.u32 %v15596_v40, %v1240_v45  ;;  %vm1257_vm14 = vcmp.lt.s32.totalorder %v1238_v52, 1  ;;  %v3243_v57 = vsel %vm3235_vm4, %v3226_v56, %v15837_v46 }
 0x2f6   :  { %v3245_v53 = vsel %vm3233_vm9, %v3223_v63, %v3226_v56  ;;  %v981_v55 = vclz %v7672_v2  ;;  %vm1259_vm2 = vcmp.lt.s32.totalorder %v1238_v52, 3  ;;  %vm1260_vm5 = vcmp.lt.s32.totalorder %v1238_v52, 4 }
 0x2f7   :  { %v1265_v23 = vsel %vm1257_vm14, %v1244_v36, %v1247_v24  ;;  %v1262_v14 = vsel %vm1260_vm5, %v1250_v48, 2102212464  ;;  %v1266_v47 = vsel %vm1260_vm5, %v1253_v10, 920167782  ;;  %v1269_v18 = vsel %vm1257_vm14, %v1247_v24, %v1250_v48 }
 0x2f8   :  { %v1270_v20 = vsel %vm1260_vm5, %v1256_v3, 1326507024  ;;  %v7673_v17 = vadd.s32 4294967294, %v981_v55  ;;  %vm1258_vm10 = vcmp.lt.s32.totalorder %v1238_v52, 2  ;;  %v1267_v45 = vsel %vm1259_vm2, %v1250_v48, %v1266_v47  ;;  %v8857_v47 = vld [vmem:[%s15366_s0 + $0x50] sm:$0xff]  }
 0x2f9   :  { %v1271_v51 = vsel %vm1259_vm2, %v1253_v10, %v1270_v20  ;;  %vm915_vm6 = vcmp.lt.s32.totalorder %v12090_v58, 0  ;;  %v1261_v9 = vsel %vm1257_vm14, %v1241_v12, %v1244_v36  ;;  %v1263_v62 = vsel %vm1259_vm2, %v1247_v24, %v1262_v14  ;;  %7825 = vmatmul.mubr.msk.bf16.gmra.mrb[40].mxu0 %vm15565_vm0, %v8857_v47 }
 0x2fa   :  { %v1268_v2 = vsel %vm1258_vm10, %v1265_v23, %v1267_v45  ;;  %v1272_v56 = vsel %vm1258_vm10, %v1269_v18, %v1271_v51  ;;  %vm15550_vm9 = vcmp.lt.s32.totalorder %v11828_v42, 0  ;;  %vm7674_vm4 = vcmp.lt.s32.totalorder %v7673_v17, 0  ;;  %4428 = vmatprep.mubr.bf16.mxu0 %v15748_v16 }
 0x2fb   :  { %v999_v63 = vsub.s32 4, %v12240_v37  ;;  %v12301_v3 = vmul.u32.u64.low %v12245_v1, %v1272_v56  ;;  %v12302_v46 = vmul.u32.u64.high %v12245_v1, %v1272_v56, %v12301_v3  ;;  %v984_v48 = vsel %vm7674_vm4, 0, %v7673_v17 }
 0x2fc   :  { %v12305_v10 = vmul.u32.u64.low %v12245_v1, %v1268_v2  ;;  %v12306_v55 = vmul.u32.u64.high %v12245_v1, %v1268_v2, %v12305_v10  ;;  %v3244_v24 = vsel %vm3234_vm12, %v3241_v33, %v3243_v57  ;;  %v985_v12 = vsub.s32 32, %v984_v48  ;;  %v15842_v2 = vld [vmem:[#allocation57_spill] sm:$0xff] }
 0x2fd   :  { %v989_v36 = vsub.s32 4294967266, %v984_v48  ;;  %v1264_v23 = vsel %vm1258_vm10, %v1261_v9, %v1263_v62  ;;  %v3248_v14 = vsel %vm3234_vm12, %v3245_v53, %v3247_v44  ;;  %vm707_vm5 = vcmp.lt.s32.totalorder %v11486_v15, 0 }
 0x2fe   :  { %v12318_v18 = vmul.u32.u64.low %v12250_v8, %v3248_v14  ;;  %v12319_v20 = vmul.u32.u64.high %v12250_v8, %v3248_v14, %v12318_v18  ;;  %v12322_v17 = vmul.u32.u64.low %v12250_v8, %v3244_v24  ;;  %v12323_v45 = vmul.u32.u64.high %v12250_v8, %v3244_v24, %v12322_v17 }
 0x2ff   :  { %v15838_v33 = vand.u32 2147483647, %v11828_v42  ;;  %v15839_v52 = vmov 0  ;;  %v986_v44 = vshll.u32 %v12262_v31, %v984_v48  ;;  %v987_v57 = vshrl.u32 %v12243_v54, %v985_v12  ;;  %v15848_v18 = vld [vmem:[#allocation10_spill] sm:$0xff] }
 0x300   :  { %v990_v53 = vadd.s32 127, %v989_v36  ;;  %vm1282_vm14 = vc.u32 %v12302_v46, %v12305_v10  ;;  %v893_v51 = vxor.u32 2147483648, %v12238_v13  ;;  %v1283_v9 = vadd.s32 1, %v12306_v55 }
 0x301   :  { %vm12329_vm10 = vcmp.le.f32.partialorder %v15838_v33, 0.7853982  ;;  %v3240_v62 = vsel %vm3234_vm12, %v12255_v38, %v3239_v19  ;;  %v3391_v56 = vsub.s32 4, %v15842_v2  ;;  %v15843_v54 = vand.u32 2147483647, %v12090_v58 }
 0x302   :  { %v15840_v52 = vsel %vm12329_vm10, 4294967295, %v15839_v52  ;;  %v988_v3 = vor.u32 %v987_v57, %v986_v44  ;;  %v991_v48 = vshll.u32 %v990_v53, 23  ;;  %v1280_v24 = vmul.u32 %v12245_v1, %v1264_v23 }
 0x303   :  { %15841 = vst [vmem:[#allocation30_spill] sm:$0xff] %v15840_v52  ;;  %vm12347_vm2 = vcmp.le.f32.partialorder %v15843_v54, 0.7853982  ;;  %v15846_v12 = vxor.u32 2147483648, %v12220_v34  ;;  %v1284_v38 = vsel %vm1282_vm14, %v1283_v9, %v12306_v55  ;;  %vm3258_vm12 = vc.u32 %v12319_v20, %v12322_v17  ;;  %v12387_v54 = vpop.permute.xlu1 %115  ;;  %v15874_v52 = vld [vmem:[#allocation14_spill] sm:$0xff] }
 0x304   :  { %v3259_v19 = vadd.s32 1, %v12323_v45  ;;  %v992_v36 = vor.u32 4788187, %v991_v48  ;;  %v1000_v14 = vsel %vm915_vm6, %v999_v63, %v12240_v37  ;;  %v1285_v47 = vadd.s32 %v1284_v38, %v1280_v24 }
 0x305   :  { %v1102_v21 = vsel %vm1019_vm13, %v15846_v12, %v12220_v34  ;;  %v3256_v1 = vmul.u32 %v12250_v8, %v3240_v62  ;;  %v894_v23 = vsel %vm15550_vm9, %v893_v51, %v12238_v13  ;;  %vm15847_vm13 = vcmp.lt.s32.totalorder %v10432_v49, 0 }
 0x306   :  { %v3260_v34 = vsel %vm3258_vm12, %v3259_v19, %v12323_v45  ;;  %v3392_v55 = vsel %vm15847_vm13, %v3391_v56, %v15842_v2  ;;  %v3495_v33 = vsub.s32 4, %v15848_v18  ;;  %v993_v44 = vand.u32 2147483647, %v992_v36 }
 0x307   :  { %v995_v57 = vcvt.s32.f32 %v988_v3  ;;  %v1286_v53 = vadd.s32 536870912, %v1285_v47  ;;  %v3261_v9 = vadd.s32 %v3260_v34, %v3256_v1  ;;  %v1105_v37 = vsel %vm12202_vm7, %v11823_v29, %v1102_v21  ;;  %v12408_v21 = vld [vmem:[%s15363_s2] ss:$0 sm:$0xff] }
 0x308   :  { %v1002_v8 = vsel %vm12347_vm2, 0, %v1000_v14  ;;  %v411_v13 = vmul.f32 %v12133_v50, %v12072_v22  ;;  %vm15849_vm4 = vcmp.lt.s32.totalorder %v15745_v0, 0  ;;  %v3394_v56 = vsel %vm11034_vm11, 0, %v3392_v55  ;;  %v8858_v55 = vld [vmem:[%s15366_s0 + $0x58] sm:$0xff]  }
 0x309   :  { %v3496_v63 = vsel %vm15849_vm4, %v3495_v33, %v15848_v18  ;;  %v996_v45 = vmul.f32 %v995_v57, %v993_v44  ;;  %v12383_v51 = vshrl.u32 %v1286_v53, 30  ;;  %v3262_v62 = vadd.s32 536870912, %v3261_v9  ;;  %v15858_v18 = vld [vmem:[#allocation48_spill] sm:$0xff]  ;;  %v15862_v57 = vld [vmem:[#allocation55_spill] sm:$0xff]  ;;  %7826 = vmatmul.mubr.msk.bf16.gmra.mrb[44].mxu0 %vm15565_vm0, %v8858_v55 }
 0x30a   :  { %v15852_v3 = vxor.u32 2147483648, %v12155_v59  ;;  %v15854_v22 = vsel %vm12202_vm7, 0, %v12160_v61  ;;  %v897_v12 = vsel %vm12329_vm10, %v11828_v42, %v894_v23  ;;  %v246_v38 = vmul.f32 %v12408_v21, %v12039_v28  ;;  %4438 = vmatprep.mubr.bf16.mxu0 %v15748_v16 }
 0x30b   :  { %15850 = vst [vmem:[#allocation27_spill] sm:$0xff] %v12383_v51  ;;  %v12400_v24 = vadd.s32 3, %v15854_v22  ;;  %v1288_v19 = vshll.u32 %v12383_v51, 30  ;;  %v3263_v60 = vshrl.u32 %v3262_v62, 30  ;;  %v3498_v61 = vsel %vm11377_vm8, 0, %v3496_v63  ;;  %v12438_v63 = vpop.permute.xlu1 %304 }
 0x30c   :  { %v12394_v48 = vsel %vm707_vm5, %v15852_v3, %v12155_v59  ;;  %v997_v59 = vxor.u32 2147483648, %v996_v45  ;;  %8959 = vcosq.f32 %v1105_v37  ;;  %v1006_v36 = vadd.s32 3, %v1002_v8 }
 0x30d   :  { %15853 = vst [vmem:[#allocation29_spill] sm:$0xff] %v12394_v48  ;;  %v12415_v14 = vadd.f32 %v411_v13, %v246_v38  ;;  %v3398_v1 = vadd.s32 3, %v3394_v56  ;;  %8961 = vsinq.f32 %v1105_v37  ;;  %v12417_v23 = vsub.s32 %v1285_v47, %v1288_v19  ;;  %v15863_v56 = vld [vmem:[#allocation26_spill] sm:$0xff]  ;;  %v15864_v38 = vld [vmem:[#allocation4_spill] sm:$0xff] }
 0x30e   :  { %v15855_v34 = vand.u32 2147483647, %v15826_v30  ;;  %vm3203_vm7 = vcmp.lt.s32.totalorder %v15826_v30, 0  ;;  %v3264_v28 = vshll.u32 %v3263_v60, 30  ;;  %8963 = vcosq.f32 %v897_v12  ;;  %v15865_v19 = vld [vmem:[#allocation8_spill] sm:$0xff] }
 0x30f   :  { %v3502_v25 = vadd.s32 3, %v3498_v61  ;;  %v15859_v33 = vand.u32 2147483647, %v15858_v18  ;;  %v3599_v47 = vsub.s32 4, %v15862_v57  ;;  %v998_v53 = vsel %vm915_vm6, %v997_v59, %v996_v45 }
 0x310   :  { %vm12421_vm11 = vcmp.le.f32.partialorder %v15855_v34, 0.7853982  ;;  %v1291_v37 = vsub.s32 0, %v12417_v23  ;;  %v12436_v8 = vsub.s32 %v3261_v9, %v3264_v28  ;;  %v3287_v13 = vsub.s32 4, %v3263_v60  ;;  %v15867_v28 = vld [vmem:[#allocation13_spill] sm:$0xff] }
 0x311   :  { %vm12428_vm8 = vcmp.le.f32.partialorder %v15859_v33, 0.7853982  ;;  %8965 = vsinq.f32 %v897_v12  ;;  %v12440_v62 = vand.u32 3, %v1006_v36  ;;  %v3399_v2 = vand.u32 3, %v3398_v1 }
 0x312   :  { %v3601_v3 = vsel %vm12428_vm8, %v15858_v18, %v15863_v56  ;;  %v12448_v22 = vadd.s32 %v12305_v10, %v12302_v46  ;;  %v7684_v45 = vmin.u32 %v1291_v37, %v12417_v23  ;;  %v3267_v9 = vsub.s32 0, %v12436_v8  ;;  %v15868_v37 = vld [vmem:[#allocation36_spill] sm:$0xff] }
 0x313   :  { %v3402_v59 = vxor.u32 2147483648, %v15864_v38  ;;  %v1001_v12 = vsel %vm12347_vm2, %v12090_v58, %v998_v53  ;;  %v3405_v61 = vxor.u32 2147483648, %v15865_v19  ;;  %v3503_v36 = vand.u32 3, %v3502_v25 }
 0x314   :  { %vm15866_vm6 = vcmp.lt.s32.totalorder %v15858_v18, 0  ;;  %v1293_v34 = vclz %v7684_v45  ;;  %v7760_v46 = vmin.u32 %v3267_v9, %v12436_v8  ;;  %v3288_v10 = vsel %vm3203_vm7, %v3287_v13, %v3263_v60  ;;  %v313_v13 = vpop.permute.xlu0 %312 }
 0x315   :  { %v3600_v1 = vsel %vm15866_vm6, %v3599_v47, %v15862_v57  ;;  %8967 = vcosq.f32 %v3601_v3  ;;  %vm3401_vm14 = vcmp.eq.s32.totalorder %v3399_v2, 0  ;;  %v3506_v33 = vxor.u32 2147483648, %v15867_v28  ;;  %v490_v57 = vpop.permute.xlu1 %489 }
 0x316   :  { %v3509_v31 = vxor.u32 2147483648, %v15868_v37  ;;  %8969 = vsinq.f32 %v3601_v3  ;;  %v7685_v53 = vadd.s32 4294967294, %v1293_v34  ;;  %v3269_v25 = vclz %v7760_v46  ;;  %v12467_v47 = vpop.eup %8959 }
 0x317   :  { %8971 = vcosq.f32 %v1001_v12  ;;  %v3602_v56 = vsel %vm12428_vm8, 0, %v3600_v1  ;;  %15869 = vst [vmem:[#allocation53_spill] sm:$0xff] %v12467_v47  ;;  %v3290_v45 = vsel %vm12421_vm11, 0, %v3288_v10  ;;  %vm3397_vm2 = vweird.f32 %v10432_v49  ;;  %v12473_v9 = vpop.eup %8961 }
 0x318   :  { %v3403_v60 = vsel %vm3401_vm14, %v15865_v19, %v3402_v59  ;;  %vm3404_vm12 = vcmp.eq.s32.totalorder %v3399_v2, 2  ;;  %15870 = vst [vmem:[#allocation25_spill] sm:$0xff] %v12473_v9  ;;  %v7761_v3 = vadd.s32 4294967294, %v3269_v25  ;;  %vm3505_vm13 = vcmp.eq.s32.totalorder %v3503_v36, 0  ;;  %v12476_v44 = vpop.eup %8963 }
 0x319   :  { %v3406_v34 = vsel %vm3404_vm12, %v3405_v61, %v15864_v38  ;;  %vm3508_vm4 = vcmp.eq.s32.totalorder %v3503_v36, 2  ;;  %15871 = vst [vmem:[#allocation40_spill] sm:$0xff] %v12476_v44  ;;  %vm3400_vm8 = vcmp.lt.s32.totalorder %v3399_v2, 2  ;;  %v3507_v1 = vsel %vm3505_vm13, %v15868_v37, %v3506_v33  ;;  %v12485_v38 = vld [vmem:[%s15363_s2 + $0x2] ss:$0 sm:$0xff]  ;;  %v498_v33 = vpop.permute.xlu1 %497 }
 0x31a   :  { %v3510_v46 = vsel %vm3508_vm4, %v3509_v31, %v15867_v28  ;;  %v3606_v10 = vadd.s32 3, %v3602_v56  ;;  %8973 = vsinq.f32 %v1001_v12  ;;  %vm7686_vm6 = vcmp.lt.s32.totalorder %v7685_v53, 0 }
 0x31b   :  { %vm7762_vm14 = vcmp.lt.s32.totalorder %v7761_v3, 0  ;;  %v3294_v59 = vadd.s32 3, %v3290_v45  ;;  %v12480_v19 = vpop.eup %8965  ;;  %v3407_v25 = vsel %vm3400_vm8, %v3403_v60, %v3406_v34  ;;  %vm3504_vm9 = vcmp.lt.s32.totalorder %v3503_v36, 2  ;;  %v317_v36 = vpop.permute.xlu0 %316 }
 0x31c   :  { %15872 = vst [vmem:[#allocation18_spill] sm:$0xff] %v12480_v19  ;;  %v3272_v51 = vsel %vm7762_vm14, 0, %v7761_v3  ;;  %v608_v2 = vmul.f32 %v12485_v38, %v490_v57  ;;  %v3257_v61 = vadd.s32 %v12322_v17, %v12319_v20  ;;  %vm3501_vm12 = vweird.f32 %v15745_v0 }
 0x31d   :  { %v3273_v28 = vsub.s32 32, %v3272_v51  ;;  %v3511_v12 = vsel %vm3504_vm9, %v3507_v1, %v3510_v46  ;;  %v12491_v37 = vsel %vm7686_vm6, 0, %v7685_v53  ;;  %v3277_v31 = vsub.s32 4294967266, %v3272_v51 }
 0x31e   :  { %v3607_v56 = vand.u32 3, %v3606_v10  ;;  %v640_v45 = vadd.f32 %v608_v2, %v12415_v14  ;;  %v12494_v34 = vand.u32 3, %v3294_v59  ;;  %v12498_v57 = vsel %vm3397_vm2, nan, %v3407_v25 }
 0x31f   :  { %v8968_v60 = vpop.eup %8967  ;;  %v3275_v3 = vshrl.u32 %v3257_v61, %v3273_v28  ;;  %v249_v20 = vmul.f32 %v12408_v21, %v12387_v54  ;;  %v3274_v53 = vshll.u32 %v12436_v8, %v3272_v51  ;;  %v3278_v1 = vadd.s32 127, %v3277_v31  ;;  %v502_v28 = vpop.permute.xlu1 %501 }
 0x320   :  { %v8970_v17 = vpop.eup %8969  ;;  %v12505_v46 = vsel %vm3501_vm12, nan, %v3511_v12  ;;  %v12508_v14 = vadd.f32 %v12087_v43, %v640_v45  ;;  %v1301_v59 = vsub.s32 4294967266, %v12491_v37  ;;  %v12512_v49 = vmul.f32 %v12133_v50, %v313_v13 }
 0x321   :  { %v8972_v10 = vpop.eup %8971  ;;  %v414_v54 = vmul.f32 %v12133_v50, %v12438_v63  ;;  %v12517_v25 = vmul.f32 %v12133_v50, %v317_v36  ;;  %vm1012_vm9 = vcmp.eq.s32.totalorder %v12440_v62, 2  ;;  %v3276_v0 = vor.u32 %v3275_v3, %v3274_v53 }
 0x322   :  { %v3279_v51 = vshll.u32 %v3278_v1, 23  ;;  %vm3608_vm2 = vcmp.lt.s32.totalorder %v3607_v56, 2  ;;  %vm1009_vm13 = vcmp.eq.s32.totalorder %v12440_v62, 0  ;;  %vm3609_vm4 = vcmp.eq.s32.totalorder %v3607_v56, 0 }
 0x323   :  { %v3610_v2 = vxor.u32 2147483648, %v8970_v17  ;;  %v3613_v61 = vxor.u32 2147483648, %v8968_v60  ;;  %v1124_v13 = vand.u32 2139095040, %v12508_v14  ;;  %v1013_v12 = vxor.u32 2147483648, %v8972_v10 }
 0x324   :  { %v1297_v63 = vsub.s32 32, %v12491_v37  ;;  %v3280_v50 = vor.u32 4788187, %v3279_v51  ;;  %vm3605_vm8 = vweird.f32 %v15858_v18  ;;  %vm3612_vm6 = vcmp.eq.s32.totalorder %v3607_v56, 2  ;;  %v8974_v31 = vpop.eup %8973 }
 0x325   :  { %v1302_v36 = vadd.s32 127, %v1301_v59  ;;  %v446_v45 = vadd.f32 %v414_v54, %v249_v20  ;;  %v1125_v3 = vshrl.u32 %v1124_v13, 23  ;;  %v610_v53 = vmul.f32 %v12485_v38, %v498_v33 }
 0x326   :  { %v3281_v1 = vand.u32 2147483647, %v3280_v50  ;;  %v3283_v8 = vcvt.s32.f32 %v3276_v0  ;;  %v15873_v47 = vand.u32 2147483647, %v12508_v14  ;;  %v611_v29 = vmul.f32 %v12485_v38, %v502_v28 }
 0x327   :  { %v3611_v44 = vsel %vm3609_vm4, %v8968_v60, %v3610_v2  ;;  %v3614_v19 = vsel %vm3612_vm6, %v3613_v61, %v8970_v17  ;;  %v7679_v51 = vadd.s32 4294967169, %v1125_v3  ;;  %v642_v42 = vadd.f32 %v610_v53, %v15874_v52 }
 0x328   :  { %v1128_v9 = vand.u32 8388607, %v15873_v47  ;;  %v1010_v48 = vxor.u32 2147483648, %v8974_v31  ;;  %v1299_v59 = vshrl.u32 %v12448_v22, %v1297_v63  ;;  %v3284_v20 = vmul.f32 %v3283_v8, %v3281_v1 }
 0x329   :  { %v643_v54 = vadd.f32 %v611_v29, %v446_v45  ;;  %v1298_v33 = vshll.u32 %v12417_v23, %v12491_v37  ;;  %v1303_v0 = vshll.u32 %v1302_v36, 23  ;;  %v1131_v13 = vadd.s32 1, %v7679_v51 }
 0x32a   :  { %v12535_v47 = vadd.f32 %v12087_v43, %v642_v42  ;;  %v3285_v28 = vxor.u32 2147483648, %v3284_v20  ;;  %v3615_v60 = vsel %vm3608_vm2, %v3611_v44, %v3614_v19  ;;  %v1129_v17 = vor.u32 8388608, %v1128_v9 }
 0x32b   :  { %v12539_v2 = vadd.f32 %v12087_v43, %v643_v54  ;;  %v12543_v52 = vsel %vm1012_vm9, %v1013_v12, %v8974_v31  ;;  %vm1132_vm14 = vcmp.gt.s32.totalorder %v1131_v13, 0  ;;  %v12549_v42 = vsel %vm1009_vm13, %v8972_v10, %v1010_v48 }
 0x32c   :  { %v15561_v29 = vand.u32 2147483647, %v12535_v47  ;;  %v1332_v23 = vand.u32 2139095040, %v12535_v47  ;;  %v12551_v22 = vor.u32 %v1299_v59, %v1298_v33  ;;  %v3286_v9 = vsel %vm3203_vm7, %v3285_v28, %v3284_v20 }
 0x32d   :  { %15875 = vst [vmem:[#allocation24_spill] sm:$0xff] %v12539_v2  ;;  %v1133_v43 = vsel %vm1132_vm14, %v1131_v13, 0  ;;  %v12555_v44 = vor.u32 4788187, %v1303_v0  ;;  %v3289_v19 = vsel %vm12421_vm11, %v15826_v30, %v3286_v9  ;;  %v12562_v37 = vsel %vm3605_vm8, nan, %v3615_v60 }
 0x32e   :  { %v1135_v56 = vand.u32 31, %v1133_v43  ;;  %8975 = vcosq.f32 %v3289_v19  ;;  %v1134_v48 = vshrl.u32 %v1133_v43, 5  ;;  %v12564_v10 = vshll.u32 %v1129_v17, 8 }
 0x32f   :  { %v15560_v8 = vand.u32 2147483647, %v12539_v2  ;;  %8977 = vsinq.f32 %v3289_v19  ;;  %v1333_v12 = vshrl.u32 %v1332_v23, 23  ;;  %v12569_v63 = vand.u32 8388607, %v15561_v29  ;;  %v8859_v19 = vld [vmem:[%s15366_s0 + $0x60] sm:$0xff]  }
 0x330   :  { %v1136_v61 = vsub.s32 32, %v1135_v56  ;;  %v1138_v18 = vshll.u32 %v15596_v40, %v1135_v56  ;;  %v1141_v50 = vshll.u32 %v15636_v32, %v1135_v56  ;;  %v1144_v31 = vshll.u32 %v15638_v4, %v1135_v56  ;;  %7827 = vmatmul.mubr.msk.bf16.gmra.mrb[48].mxu0 %vm15565_vm0, %v8859_v19 }
 0x331   :  { %v1147_v36 = vshll.u32 %v15639_v7, %v1135_v56  ;;  %v1150_v1 = vshll.u32 %v15620_v27, %v1135_v56  ;;  %vm3300_vm11 = vcmp.eq.s32.totalorder %v12494_v34, 2  ;;  %vm1153_vm7 = vcmp.lt.s32.totalorder %v1134_v48, 1  ;;  %4448 = vmatprep.mubr.bf16.mxu0 %v15748_v16 }
 0x332   :  { %v1139_v45 = vshrl.u32 %v15636_v32, %v1136_v61  ;;  %v1142_v3 = vshrl.u32 %v15638_v4, %v1136_v61  ;;  %v1145_v53 = vshrl.u32 %v15639_v7, %v1136_v61  ;;  %v1137_v51 = vshrl.u32 %v15596_v40, %v1136_v61 }
 0x333   :  { %v1148_v59 = vshrl.u32 %v15620_v27, %v1136_v61  ;;  %v1151_v20 = vshrl.u32 %v15617_v6, %v1136_v61  ;;  %vm3297_vm12 = vcmp.eq.s32.totalorder %v12494_v34, 0  ;;  %vm1155_vm9 = vcmp.lt.s32.totalorder %v1134_v48, 3 }
 0x334   :  { %v1140_v54 = vor.u32 %v1139_v45, %v1138_v18  ;;  %v1143_v33 = vor.u32 %v1142_v3, %v1141_v50  ;;  %v1146_v0 = vor.u32 %v1145_v53, %v1144_v31  ;;  %vm3296_vm2 = vcmp.lt.s32.totalorder %v12494_v34, 2 }
 0x335   :  { %v1149_v13 = vor.u32 %v1148_v59, %v1147_v36  ;;  %v1152_v28 = vor.u32 %v1151_v20, %v1150_v1  ;;  %vm1156_vm13 = vcmp.lt.s32.totalorder %v1134_v48, 4  ;;  %v7687_v60 = vadd.s32 4294967169, %v1333_v12 }
 0x336   :  { %vm3293_vm4 = vweird.f32 %v15826_v30  ;;  %v1157_v17 = vsel %vm1153_vm7, %v1137_v51, %v1140_v54  ;;  %v1158_v23 = vsel %vm1156_vm13, %v1146_v0, 2102212464  ;;  %v1161_v9 = vsel %vm1153_vm7, %v1140_v54, %v1143_v33 }
 0x337   :  { %v1165_v43 = vsel %vm1153_vm7, %v1143_v33, %v1146_v0  ;;  %v1159_v56 = vsel %vm1155_vm9, %v1143_v33, %v1158_v23  ;;  %v1162_v61 = vsel %vm1156_vm13, %v1149_v13, 920167782  ;;  %v1166_v55 = vsel %vm1156_vm13, %v1152_v28, 1326507024 }
 0x338   :  { %v1339_v18 = vadd.s32 1, %v7687_v60  ;;  %vm1154_vm8 = vcmp.lt.s32.totalorder %v1134_v48, 2  ;;  %v1163_v12 = vsel %vm1155_vm9, %v1146_v0, %v1162_v61  ;;  %v1167_v50 = vsel %vm1155_vm9, %v1149_v13, %v1166_v55  ;;  %v8976_v36 = vpop.eup %8975 }
 0x339   :  { %v1337_v31 = vor.u32 8388608, %v12569_v63  ;;  %v1160_v45 = vsel %vm1154_vm8, %v1157_v17, %v1159_v56  ;;  %v1164_v3 = vsel %vm1154_vm8, %v1161_v9, %v1163_v12  ;;  %v1168_v53 = vsel %vm1154_vm8, %v1165_v43, %v1167_v50  ;;  %v8978_v1 = vpop.eup %8977  ;;  %v15876_v17 = vld [vmem:[#allocation32_spill] sm:$0xff] }
 0x33a   :  { %vm1340_vm6 = vcmp.gt.s32.totalorder %v1339_v18, 0  ;;  %v3301_v51 = vxor.u32 2147483648, %v8976_v36  ;;  %v12602_v59 = vmul.u32.u64.low %v12564_v10, %v1168_v53  ;;  %v12603_v20 = vmul.u32.u64.high %v12564_v10, %v1168_v53, %v12602_v59 }
 0x33b   :  { %v1341_v54 = vsel %vm1340_vm6, %v1339_v18, 0  ;;  %v3298_v33 = vxor.u32 2147483648, %v8978_v1  ;;  %v12607_v48 = vmul.u32.u64.low %v12564_v10, %v1164_v3  ;;  %v12608_v0 = vmul.u32.u64.high %v12564_v10, %v1164_v3, %v12607_v48 }
 0x33c   :  { %v12611_v63 = vshrl.u32 %v1341_v54, 5  ;;  %v3302_v13 = vsel %vm3300_vm11, %v3301_v51, %v8978_v1  ;;  %v4046_v28 = vpack.c.bf16 %v12562_v37, %v12505_v46  ;;  %v1343_v60 = vand.u32 31, %v1341_v54 }
 0x33d   :  { %v3703_v23 = vsub.s32 4, %v15876_v17  ;;  %v3299_v9 = vsel %vm3297_vm12, %v8976_v36, %v3298_v33  ;;  %v1176_v43 = vmul.u32 %v12564_v10, %v1160_v45  ;;  %v12622_v19 = vshll.u32 %v1337_v31, 8 }
 0x33e   :  { %v1436_v56 = vand.u32 2139095040, %v12539_v2  ;;  %v3303_v61 = vsel %vm3296_vm2, %v3299_v9, %v3302_v13  ;;  %vm1178_vm14 = vc.u32 %v12603_v20, %v12607_v48  ;;  %v1344_v55 = vsub.s32 32, %v1343_v60 }
 0x33f   :  { %v12631_v46 = vand.u32 8388607, %v15560_v8  ;;  %v3304_v37 = vsel %vm3293_vm4, nan, %v3303_v61  ;;  %v1179_v10 = vadd.s32 1, %v12608_v0  ;;  %v1346_v18 = vshll.u32 %v15596_v40, %v1343_v60 }
 0x340   :  { %vm1361_vm11 = vcmp.lt.s32.totalorder %v12611_v63, 1  ;;  %v4045_v34 = vpack.c.bf16 %v12498_v57, %v3304_v37  ;;  %v1347_v12 = vshrl.u32 %v15636_v32, %v1344_v55  ;;  %v1349_v50 = vshll.u32 %v15636_v32, %v1343_v60 }
 0x341   :  { %v1350_v31 = vshrl.u32 %v15638_v4, %v1344_v55  ;;  %v1180_v36 = vsel %vm1178_vm14, %v1179_v10, %v12608_v0  ;;  %v1352_v45 = vshll.u32 %v15638_v4, %v1343_v60  ;;  %v1353_v30 = vshrl.u32 %v15639_v7, %v1344_v55 }
 0x342   :  { %v1355_v3 = vshll.u32 %v15639_v7, %v1343_v60  ;;  %vm15877_vm7 = vcmask 293888   ;;  %v1181_v53 = vadd.s32 %v1180_v36, %v1176_v43  ;;  %v1348_v1 = vor.u32 %v1347_v12, %v1346_v18 }
 0x343   :  { %8287 = vmatprep.mubr.msk.bf16.mxu1 %vm15877_vm7, %v4045_v34  ;;  %v1351_v51 = vor.u32 %v1350_v31, %v1349_v50  ;;  %v1356_v57 = vshrl.u32 %v15620_v27, %v1344_v55  ;;  %vm15878_vm12 = vmmov %vm15877_vm7  ;;  %v1354_v59 = vor.u32 %v1353_v30, %v1352_v45  ;;  %v1358_v54 = vshll.u32 %v15620_v27, %v1343_v60 }
 0x344   :  { %8288 = vmatmul.mubr.msk.bf16.gmra.mrb[12].mxu1 %vm15878_vm12, %v4046_v28  ;;  %v1359_v33 = vshrl.u32 %v15617_v6, %v1344_v55  ;;  %vm1362_vm9 = vcmp.lt.s32.totalorder %v12611_v63, 2  ;;  %v1182_v0 = vadd.s32 536870912, %v1181_v53  ;;  %v1345_v13 = vshrl.u32 %v15596_v40, %v1344_v55 }
 0x345   :  { %v1357_v9 = vor.u32 %v1356_v57, %v1355_v3  ;;  %vm1364_vm2 = vcmp.lt.s32.totalorder %v12611_v63, 4  ;;  %v1369_v37 = vsel %vm1361_vm11, %v1348_v1, %v1351_v51  ;;  %v1437_v10 = vshrl.u32 %v1436_v56, 23 }
 0x346   :  { %v1360_v43 = vor.u32 %v1359_v33, %v1358_v54  ;;  %v1366_v61 = vsel %vm1364_vm2, %v1354_v59, 2102212464  ;;  %v12656_v28 = vshrl.u32 %v1182_v0, 30  ;;  %vm1363_vm13 = vcmp.lt.s32.totalorder %v12611_v63, 3 }
 0x347   :  { %v1370_v60 = vsel %vm1364_vm2, %v1357_v9, 920167782  ;;  %v1373_v18 = vsel %vm1361_vm11, %v1351_v51, %v1354_v59  ;;  %v1365_v55 = vsel %vm1361_vm11, %v1345_v13, %v1348_v1  ;;  %v7691_v50 = vadd.s32 4294967169, %v1437_v10  ;;  %v126_v1 = vpop.permute.xlu1 %125 }
 0x348   :  { %v1371_v34 = vsel %vm1363_vm13, %v1354_v59, %v1370_v60  ;;  %v1374_v12 = vsel %vm1364_vm2, %v1360_v43, 1326507024  ;;  %v1184_v31 = vshll.u32 %v12656_v28, 30  ;;  %v1367_v36 = vsel %vm1363_vm13, %v1351_v51, %v1366_v61  ;;  %v15879_v43 = vld [vmem:[#allocation31_spill] sm:$0xff] }
 0x349   :  { %v1372_v56 = vsel %vm1362_vm9, %v1369_v37, %v1371_v34  ;;  %v1375_v45 = vsel %vm1363_vm13, %v1357_v9, %v1374_v12  ;;  %v1443_v54 = vadd.s32 1, %v7691_v50  ;;  %v1441_v51 = vor.u32 8388608, %v12631_v46 }
 0x34a   :  { %v1376_v30 = vsel %vm1362_vm9, %v1373_v18, %v1375_v45  ;;  %v12669_v3 = vmul.u32.u64.low %v12622_v19, %v1372_v56  ;;  %v12670_v57 = vmul.u32.u64.high %v12622_v19, %v1372_v56, %v12669_v3  ;;  %v12673_v59 = vsub.s32 %v1181_v53, %v1184_v31 }
 0x34b   :  { %v12676_v33 = vmul.u32.u64.low %v12622_v19, %v1376_v30  ;;  %v12677_v0 = vmul.u32.u64.high %v12622_v19, %v1376_v30, %v12676_v33  ;;  %v1368_v9 = vsel %vm1362_vm9, %v1365_v55, %v1367_v36  ;;  %vm1444_vm4 = vcmp.gt.s32.totalorder %v1443_v54, 0 }
 0x34c   :  { %vm15880_vm8 = vcmp.lt.s32.totalorder %v15879_v43, 0  ;;  %v1187_v37 = vsub.s32 0, %v12673_v59  ;;  %v1445_v10 = vsel %vm1444_vm4, %v1443_v54, 0  ;;  %v12691_v60 = vmul.f32 %v12408_v21, %v126_v1 }
 0x34d   :  { %v3704_v61 = vsel %vm15880_vm8, %v3703_v23, %v15876_v17  ;;  %v1177_v46 = vadd.s32 %v12607_v48, %v12603_v20  ;;  %v1387_v63 = vadd.s32 1, %v12670_v57  ;;  %v1447_v18 = vand.u32 31, %v1445_v10  ;;  %v15882_v48 = vld [vmem:[#allocation23_spill] sm:$0xff] }
 0x34e   :  { %v3706_v34 = vsel %vm11675_vm3, 0, %v3704_v61  ;;  %v7680_v12 = vmin.u32 %v1187_v37, %v12673_v59  ;;  %v1384_v17 = vmul.u32 %v12622_v19, %v1368_v9  ;;  %vm1386_vm6 = vc.u32 %v12677_v0, %v12669_v3 }
 0x34f   :  { %v12702_v23 = vshll.u32 %v1441_v51, 8  ;;  %v1388_v50 = vsel %vm1386_vm6, %v1387_v63, %v12670_v57  ;;  %v12705_v31 = vshrl.u32 %v1445_v10, 5  ;;  %v1448_v20 = vsub.s32 32, %v1447_v18 }
 0x350   :  { %v3714_v36 = vxor.u32 2147483648, %v15882_v48  ;;  %v1189_v56 = vclz %v7680_v12  ;;  %v1389_v45 = vadd.s32 %v1388_v50, %v1384_v17  ;;  %v1450_v30 = vshll.u32 %v15596_v40, %v1447_v18  ;;  %v8860_v12 = vld [vmem:[%s15366_s0 + $0x68] sm:$0xff]  }
 0x351   :  { %v3710_v54 = vadd.s32 3, %v3706_v34  ;;  %v1451_v1 = vshrl.u32 %v15636_v32, %v1448_v20  ;;  %v1453_v19 = vshll.u32 %v15636_v32, %v1447_v18  ;;  %v1454_v33 = vshrl.u32 %v15638_v4, %v1448_v20  ;;  %7828 = vmatmul.mubr.msk.bf16.gmra.mrb[52].mxu0 %vm15565_vm0, %v8860_v12 }
 0x352   :  { %v1457_v51 = vshrl.u32 %v15639_v7, %v1448_v20  ;;  %v7681_v9 = vadd.s32 4294967294, %v1189_v56  ;;  %v1390_v57 = vadd.s32 536870912, %v1389_v45  ;;  %v1456_v61 = vshll.u32 %v15638_v4, %v1447_v18  ;;  %4458 = vmatprep.mubr.bf16.mxu0 %v15748_v16 }
 0x353   :  { %v1460_v37 = vshrl.u32 %v15620_v27, %v1448_v20  ;;  %v1452_v10 = vor.u32 %v1451_v1, %v1450_v30  ;;  %v1459_v63 = vshll.u32 %v15639_v7, %v1447_v18  ;;  %v1462_v55 = vshll.u32 %v15620_v27, %v1447_v18 }
 0x354   :  { %v1463_v34 = vshrl.u32 %v15617_v6, %v1448_v20  ;;  %vm7682_vm3 = vcmp.lt.s32.totalorder %v7681_v9, 0  ;;  %v12721_v17 = vshrl.u32 %v1390_v57, 30  ;;  %v1449_v50 = vshrl.u32 %v15596_v40, %v1448_v20 }
 0x355   :  { %v1458_v56 = vor.u32 %v1457_v51, %v1456_v61  ;;  %v1192_v8 = vsel %vm7682_vm3, 0, %v7681_v9  ;;  %v1455_v29 = vor.u32 %v1454_v33, %v1453_v19  ;;  %v1461_v13 = vor.u32 %v1460_v37, %v1459_v63 }
 0x356   :  { %15883 = vst [vmem:[#allocation28_spill] sm:$0xff] %v12721_v17  ;;  %v1464_v30 = vor.u32 %v1463_v34, %v1462_v55  ;;  %v1193_v1 = vsub.s32 32, %v1192_v8  ;;  %v1197_v18 = vsub.s32 4294967266, %v1192_v8  ;;  %v1392_v53 = vshll.u32 %v12721_v17, 30 }
 0x357   :  { %vm1465_vm14 = vcmp.lt.s32.totalorder %v12705_v31, 1  ;;  %v1194_v57 = vshll.u32 %v12673_v59, %v1192_v8  ;;  %vm1467_vm11 = vcmp.lt.s32.totalorder %v12705_v31, 3  ;;  %vm1468_vm7 = vcmp.lt.s32.totalorder %v12705_v31, 4 }
 0x358   :  { %v1469_v20 = vsel %vm1465_vm14, %v1449_v50, %v1452_v10  ;;  %v1195_v19 = vshrl.u32 %v1177_v46, %v1193_v1  ;;  %v1198_v33 = vadd.s32 127, %v1197_v18  ;;  %v12733_v51 = vsub.s32 %v1389_v45, %v1392_v53 }
 0x359   :  { %v1470_v9 = vsel %vm1468_vm7, %v1458_v56, 2102212464  ;;  %v1473_v37 = vsel %vm1465_vm14, %v1452_v10, %v1455_v29  ;;  %v1474_v63 = vsel %vm1468_vm7, %v1461_v13, 920167782  ;;  %v1478_v8 = vsel %vm1468_vm7, %v1464_v30, 1326507024 }
 0x35a   :  { %v1471_v61 = vsel %vm1467_vm11, %v1455_v29, %v1470_v9  ;;  %v1196_v59 = vor.u32 %v1195_v19, %v1194_v57  ;;  %v1199_v55 = vshll.u32 %v1198_v33, 23  ;;  %v1395_v34 = vsub.s32 0, %v12733_v51  ;;  %v8861_v10 = vld [vmem:[%s15366_s0 + $0x70] sm:$0xff]   ;;  %v309_v57 = vpop.permute.xlu1 %308 }
 0x35b   :  { %v1477_v12 = vsel %vm1465_vm14, %v1455_v29, %v1458_v56  ;;  %vm1466_vm12 = vcmp.lt.s32.totalorder %v12705_v31, 2  ;;  %v1475_v53 = vsel %vm1467_vm11, %v1458_v56, %v1474_v63  ;;  %v1479_v46 = vsel %vm1467_vm11, %v1461_v13, %v1478_v8  ;;  %7829 = vmatmul.mubr.msk.bf16.gmra.mrb[56].mxu0 %vm15565_vm0, %v8861_v10  ;;  %v15885_v8 = vld [vmem:[#allocation59_spill] sm:$0xff] }
 0x35c   :  { %v3711_v45 = vand.u32 3, %v3710_v54  ;;  %v1200_v50 = vor.u32 4788187, %v1199_v55  ;;  %v7688_v30 = vmin.u32 %v1395_v34, %v12733_v51  ;;  %v1472_v1 = vsel %vm1466_vm12, %v1469_v20, %v1471_v61  ;;  %4468 = vmatprep.mubr.bf16.mxu0 %v15748_v16  ;;  %v12765_v20 = vld [vmem:[%s15363_s2 + $0x1] ss:$0 sm:$0xff]  ;;  %v15889_v34 = vld [vmem:[#allocation11_spill] sm:$0xff] }
 0x35d   :  { %v1476_v18 = vsel %vm1466_vm12, %v1473_v37, %v1475_v53  ;;  %v1203_v29 = vcvt.s32.f32 %v1196_v59  ;;  %v1480_v19 = vsel %vm1466_vm12, %v1477_v12, %v1479_v46  ;;  %vm1123_vm9 = vcmp.lt.s32.totalorder %v12508_v14, 0  ;;  %v15884_v37 = vld [vmem:[#allocation9_spill] sm:$0xff]  ;;  %v15890_v10 = vld [vmem:[#allocation51_spill] sm:$0xff] }
 0x35e   :  { %v12752_v33 = vmul.u32.u64.low %v12702_v23, %v1476_v18  ;;  %v12753_v9 = vmul.u32.u64.high %v12702_v23, %v1476_v18, %v12752_v33  ;;  %v1201_v13 = vand.u32 2147483647, %v1200_v50  ;;  %v1397_v31 = vclz %v7688_v30 }
 0x35f   :  { %v12758_v54 = vmul.u32.u64.low %v12702_v23, %v1480_v19  ;;  %v12759_v56 = vmul.u32.u64.high %v12702_v23, %v1480_v19, %v12758_v54  ;;  %v415_v61 = vmul.f32 %v12765_v20, %v309_v57  ;;  %v3717_v63 = vxor.u32 2147483648, %v15884_v37 }
 0x360   :  { %v15886_v59 = vand.u32 2147483647, %v15885_v8  ;;  %v3807_v12 = vsub.s32 4, %v15889_v34  ;;  %v1204_v53 = vmul.f32 %v1203_v29, %v1201_v13  ;;  %v7689_v46 = vadd.s32 4294967294, %v1397_v31  ;;  %v8862_v54 = vld [vmem:[%s15366_s0 + $0x78] sm:$0xff]  }
 0x361   :  { %v1488_v16 = vmul.u32 %v12702_v23, %v1472_v1  ;;  %v15891_v30 = vand.u32 2147483647, %v12508_v14  ;;  %v1491_v57 = vadd.s32 1, %v12753_v9  ;;  %vm3713_vm4 = vcmp.eq.s32.totalorder %v3711_v45, 0 }
 0x362   :  { %vm12771_vm2 = vcmp.le.f32.partialorder %v15886_v59, 0.7853982  ;;  %vm15894_vm8 = vcmp.lt.s32.totalorder %v15885_v8, 0  ;;  %vm7690_vm6 = vcmp.lt.s32.totalorder %v7689_v46, 0  ;;  %vm1490_vm3 = vc.u32 %v12759_v56, %v12752_v33 }
 0x363   :  { %v3809_v50 = vsel %vm12771_vm2, %v15885_v8, %v15890_v10  ;;  %vm12783_vm13 = vcmp.le.f32.partialorder %v15891_v30, 0.7853982  ;;  %v3808_v29 = vsel %vm15894_vm8, %v3807_v12, %v15889_v34  ;;  %v3715_v23 = vsel %vm3713_vm4, %v15884_v37, %v3714_v36  ;;  %v506_v36 = vpop.permute.xlu0 %505  ;;  %v15895_v30 = vld [vmem:[#allocation46_spill] sm:$0xff]  ;;  %7830 = vmatmul.mubr.msk.bf16.gmra.mrb[60].mxu0 %vm15565_vm0, %v8862_v54 }
 0x364   :  { %8979 = vcosq.f32 %v3809_v50  ;;  %vm3716_vm14 = vcmp.eq.s32.totalorder %v3711_v45, 2  ;;  %v1205_v1 = vxor.u32 2147483648, %v1204_v53  ;;  %v1400_v19 = vsel %vm7690_vm6, 0, %v7689_v46 }
 0x365   :  { %v1492_v13 = vsel %vm1490_vm3, %v1491_v57, %v12753_v9  ;;  %v3718_v31 = vsel %vm3716_vm14, %v3717_v63, %v15882_v48  ;;  %v1385_v59 = vadd.s32 %v12669_v3, %v12677_v0  ;;  %v1401_v34 = vsub.s32 32, %v1400_v19 }
 0x366   :  { %v1405_v12 = vsub.s32 4294967266, %v1400_v19  ;;  %v3810_v10 = vsel %vm12771_vm2, 0, %v3808_v29  ;;  %v1493_v37 = vadd.s32 %v1492_v13, %v1488_v16  ;;  %v447_v46 = vadd.f32 %v415_v61, %v15895_v30  ;;  %v15898_v13 = vld [vmem:[#allocation33_spill] sm:$0xff] }
 0x367   :  { %vm3712_vm11 = vcmp.lt.s32.totalorder %v3711_v45, 2  ;;  %8981 = vsinq.f32 %v3809_v50  ;;  %v1402_v48 = vshll.u32 %v12733_v51, %v1400_v19  ;;  %v1403_v9 = vshrl.u32 %v1385_v59, %v1401_v34  ;;  %v131_v34 = vpop.permute.xlu1 %130 }
 0x368   :  { %v1406_v63 = vadd.s32 127, %v1405_v12  ;;  %v3719_v57 = vsel %vm3712_vm11, %v3715_v23, %v3718_v31  ;;  %v1206_v3 = vsel %vm1123_vm9, %v1205_v1, %v1204_v53  ;;  %v1494_v0 = vadd.s32 536870912, %v1493_v37 }
 0x369   :  { %v3814_v17 = vadd.s32 3, %v3810_v10  ;;  %v612_v55 = vmul.f32 %v12485_v38, %v506_v36  ;;  %v15896_v16 = vand.u32 2147483647, %v12555_v44  ;;  %v15897_v61 = vcvt.s32.f32 %v12551_v22 }
 0x36a   :  { %v1404_v50 = vor.u32 %v1403_v9, %v1402_v48  ;;  %v1407_v29 = vshll.u32 %v1406_v63, 23  ;;  %v3911_v51 = vsub.s32 4, %v15898_v13  ;;  %v12817_v19 = vshrl.u32 %v1494_v0, 30 }
 0x36b   :  { %v12814_v45 = vmul.f32 %v15897_v61, %v15896_v16  ;;  %v12821_v23 = vadd.f32 %v12512_v49, %v12691_v60  ;;  %vm3709_vm7 = vweird.f32 %v15879_v43  ;;  %v644_v53 = vadd.f32 %v612_v55, %v447_v46  ;;  %v12836_v43 = vld [vmem:[%s15363_s2 + $0x3] ss:$0 sm:$0xff] }
 0x36c   :  { %v1209_v44 = vsel %vm12783_vm13, %v12508_v14, %v1206_v3  ;;  %v1408_v22 = vor.u32 4788187, %v1407_v29  ;;  %v12828_v1 = vadd.s32 %v12752_v33, %v12759_v56  ;;  %v3720_v31 = vsel %vm3709_vm7, nan, %v3719_v57  ;;  %v15899_v33 = vld [vmem:[#allocation37_spill] sm:$0xff]  ;;  %v15997_v57 = vld [vmem:[#allocation24_spill] sm:$0xff] }
 0x36d   :  { %vm15579_vm12 = vcmp.lt.s32.totalorder %v12535_v47, 0  ;;  %v1496_v59 = vshll.u32 %v12817_v19, 30  ;;  %vm3813_vm2 = vweird.f32 %v15885_v8  ;;  %v3815_v49 = vand.u32 3, %v3814_v17 }
 0x36e   :  { %v8980_v54 = vpop.eup %8979  ;;  %v12839_v60 = vadd.f32 %v12836_v43, %v644_v53  ;;  %vm15900_vm4 = vcmp.lt.s32.totalorder %v15899_v33, 0  ;;  %v1409_v12 = vand.u32 2147483647, %v1408_v22  ;;  %v1411_v10 = vcvt.s32.f32 %v1404_v50  ;;  %v15905_v50 = vld [vmem:[#allocation19_spill] sm:$0xff] }
 0x36f   :  { %v3912_v56 = vsel %vm15900_vm4, %v3911_v51, %v15898_v13  ;;  %v3821_v36 = vxor.u32 2147483648, %v8980_v54  ;;  %8983 = vcosq.f32 %v1209_v44  ;;  %v12846_v17 = vsub.s32 %v1493_v37, %v1496_v59 }
 0x370   :  { %v3914_v46 = vsel %vm11800_vm1, 0, %v3912_v56  ;;  %v15564_v48 = vand.u32 2147483647, %v12839_v60  ;;  %v1540_v9 = vand.u32 2139095040, %v12839_v60  ;;  %8985 = vsinq.f32 %v1209_v44 }
 0x371   :  { %v15902_v63 = vand.u32 2147483647, %v12535_v47  ;;  %v1412_v3 = vmul.f32 %v1411_v10, %v1409_v12  ;;  %v252_v0 = vmul.f32 %v12408_v21, %v131_v34  ;;  %v3918_v55 = vadd.s32 3, %v3914_v46  ;;  %v8982_v16 = vpop.eup %8981 }
 0x372   :  { %v1499_v61 = vsub.s32 0, %v12846_v17  ;;  %vm3820_vm1 = vcmp.eq.s32.totalorder %v3815_v49, 2  ;;  %v1541_v37 = vshrl.u32 %v1540_v9, 23  ;;  %v4015_v29 = vsub.s32 4, %v15905_v50 }
 0x373   :  { %vm12852_vm8 = vcmp.le.f32.partialorder %v15902_v63, 0.7853982  ;;  %v1413_v13 = vxor.u32 2147483648, %v1412_v3  ;;  %v3818_v51 = vxor.u32 2147483648, %v8982_v16  ;;  %v3822_v53 = vsel %vm3820_vm1, %v3821_v36, %v8982_v16 }
 0x374   :  { %v1544_v44 = vand.u32 8388607, %v15564_v48  ;;  %v7692_v22 = vmin.u32 %v1499_v61, %v12846_v17  ;;  %vm3817_vm6 = vcmp.eq.s32.totalorder %v3815_v49, 0  ;;  %v7695_v59 = vadd.s32 4294967169, %v1541_v37 }
 0x375   :  { %v3919_v56 = vand.u32 3, %v3918_v55  ;;  %vm3816_vm3 = vcmp.lt.s32.totalorder %v3815_v49, 2  ;;  %v3819_v21 = vsel %vm3817_vm6, %v8980_v54, %v3818_v51  ;;  %v12863_v34 = vadd.f32 %v12517_v25, %v252_v0  ;;  %v12892_v51 = vpop.permute.xlu1 %135 }
 0x376   :  { %v3922_v12 = vxor.u32 2147483648, %v12147_v11  ;;  %v1501_v10 = vclz %v7692_v22  ;;  %v3823_v30 = vsel %vm3816_vm3, %v3819_v21, %v3822_v53  ;;  %v1547_v46 = vadd.s32 1, %v7695_v59 }
 0x377   :  { %v3925_v36 = vxor.u32 2147483648, %v12144_v41  ;;  %v1414_v9 = vsel %vm15579_vm12, %v1413_v13, %v1412_v3  ;;  %v3824_v63 = vsel %vm3813_vm2, nan, %v3823_v30  ;;  %v1545_v16 = vor.u32 8388608, %v1544_v44 }
 0x378   :  { %vm15906_vm14 = vcmp.lt.s32.totalorder %v11388_v26, 0  ;;  %v7693_v25 = vadd.s32 4294967294, %v1501_v10  ;;  %v4047_v49 = vpack.c.bf16 %v3824_v63, %v3720_v31  ;;  %vm1548_vm11 = vcmp.gt.s32.totalorder %v1547_v46, 0 }
 0x379   :  { %v4016_v54 = vsel %vm15906_vm14, %v4015_v29, %v15905_v50  ;;  %vm3921_vm7 = vcmp.eq.s32.totalorder %v3919_v56, 0  ;;  %v1549_v0 = vsel %vm1548_vm11, %v1547_v46, 0  ;;  %vm3920_vm4 = vcmp.lt.s32.totalorder %v3919_v56, 2  ;;  %v12875_v61 = vpop.eup %8983 }
 0x37a   :  { %v3923_v55 = vsel %vm3921_vm7, %v12144_v41, %v3922_v12  ;;  %vm3924_vm1 = vcmp.eq.s32.totalorder %v3919_v56, 2  ;;  %v12880_v8 = vsel %vm12852_vm8, %v12535_v47, %v1414_v9  ;;  %vm7694_vm2 = vcmp.lt.s32.totalorder %v7693_v25, 0  ;;  %v12884_v37 = vpop.eup %8985 }
 0x37b   :  { %vm15907_vm6 = vcmask 293888   ;;  %v1551_v3 = vand.u32 31, %v1549_v0  ;;  %v3926_v31 = vsel %vm3924_vm1, %v3925_v36, %v12147_v11  ;;  %v1504_v50 = vsel %vm7694_vm2, 0, %v7693_v25 }
 0x37c   :  { %8291 = vmatprep.mubr.msk.bf16.mxu1 %vm15907_vm6, %v4047_v49  ;;  %v12886_v29 = vshrl.u32 %v1549_v0, 5  ;;  %v12888_v41 = vshll.u32 %v1545_v16, 8  ;;  %v4018_v13 = vsel %vm12106_vm15, 0, %v4016_v54  ;;  %v1505_v53 = vsub.s32 32, %v1504_v50 }
 0x37d   :  { %v1509_v44 = vsub.s32 4294967266, %v1504_v50  ;;  %v1552_v22 = vsub.s32 32, %v1551_v3  ;;  %v3927_v59 = vsel %vm3920_vm4, %v3923_v55, %v3926_v31  ;;  %v1506_v21 = vshll.u32 %v12846_v17, %v1504_v50  ;;  %v12908_v50 = vpop.permute.xlu1 %320 }
 0x37e   :  { %v1554_v11 = vshll.u32 %v15596_v40, %v1551_v3  ;;  %v1557_v12 = vshll.u32 %v15636_v32, %v1551_v3  ;;  %v1560_v10 = vshll.u32 %v15638_v4, %v1551_v3  ;;  %v1507_v30 = vshrl.u32 %v12828_v1, %v1505_v53 }
 0x37f   :  { %v1510_v46 = vadd.s32 127, %v1509_v44  ;;  %v1555_v35 = vshrl.u32 %v15636_v32, %v1552_v22  ;;  %v1563_v36 = vshll.u32 %v15639_v7, %v1551_v3  ;;  %v1558_v9 = vshrl.u32 %v15638_v4, %v1552_v22 }
 0x380   :  { %v1561_v56 = vshrl.u32 %v15639_v7, %v1552_v22  ;;  %v1564_v63 = vshrl.u32 %v15620_v27, %v1552_v22  ;;  %v1566_v17 = vshll.u32 %v15620_v27, %v1551_v3  ;;  %v1508_v16 = vor.u32 %v1507_v30, %v1506_v21 }
 0x381   :  { %v1511_v54 = vshll.u32 %v1510_v46, 23  ;;  %v1556_v25 = vor.u32 %v1555_v35, %v1554_v11  ;;  %v1567_v49 = vshrl.u32 %v15617_v6, %v1552_v22  ;;  %vm3917_vm15 = vweird.f32 %v15899_v33  ;;  %v9169_v33 = vld [vmem:[%s15363_s2] ss:$0 sm:$0xff] }
 0x382   :  { %v1559_v1 = vor.u32 %v1558_v9, %v1557_v12  ;;  %v1562_v0 = vor.u32 %v1561_v56, %v1560_v10  ;;  %v1565_v55 = vor.u32 %v1564_v63, %v1563_v36  ;;  %v4022_v31 = vadd.s32 3, %v4018_v13 }
 0x383   :  { %v1512_v53 = vor.u32 4788187, %v1511_v54  ;;  %v1553_v44 = vshrl.u32 %v15596_v40, %v1552_v22  ;;  %v1568_v48 = vor.u32 %v1567_v49, %v1566_v17  ;;  %vm1569_vm3 = vcmp.lt.s32.totalorder %v12886_v29, 1  ;;  %v510_v49 = vpop.permute.xlu1 %509 }
 0x384   :  { %v1515_v3 = vcvt.s32.f32 %v1508_v16  ;;  %vm1571_vm14 = vcmp.lt.s32.totalorder %v12886_v29, 3  ;;  %vm1572_vm11 = vcmp.lt.s32.totalorder %v12886_v29, 4  ;;  %v1577_v21 = vsel %vm1569_vm3, %v1556_v25, %v1559_v1 }
 0x385   :  { %vm15578_vm7 = vcmp.lt.s32.totalorder %v12539_v2, 0  ;;  %v1513_v11 = vand.u32 2147483647, %v1512_v53  ;;  %v1574_v12 = vsel %vm1572_vm11, %v1562_v0, 2102212464  ;;  %v1581_v13 = vsel %vm1569_vm3, %v1559_v1, %v1562_v0 }
 0x386   :  { %v1578_v10 = vsel %vm1572_vm11, %v1565_v55, 920167782  ;;  %vm1570_vm4 = vcmp.lt.s32.totalorder %v12886_v29, 2  ;;  %v1573_v30 = vsel %vm1569_vm3, %v1553_v44, %v1556_v25  ;;  %v1582_v22 = vsel %vm1572_vm11, %v1568_v48, 1326507024 }
 0x387   :  { %v1579_v46 = vsel %vm1571_vm14, %v1562_v0, %v1578_v10  ;;  %v1516_v35 = vmul.f32 %v1515_v3, %v1513_v11  ;;  %v1575_v36 = vsel %vm1571_vm14, %v1559_v1, %v1574_v12  ;;  %v1583_v56 = vsel %vm1571_vm14, %v1565_v55, %v1582_v22 }
 0x388   :  { %v1580_v9 = vsel %vm1570_vm4, %v1577_v21, %v1579_v46  ;;  %v1584_v63 = vsel %vm1570_vm4, %v1581_v13, %v1583_v56  ;;  %v4026_v54 = vxor.u32 2147483648, %v12187_v5  ;;  %vm1008_vm1 = vcmp.lt.s32.totalorder %v12440_v62, 2  ;;  %v4479_v13 = vld [vmem:[%s15367_s5] sm:$0x3] }
 0x389   :  { %v12921_v17 = vmul.u32.u64.low %v12888_v41, %v1580_v9  ;;  %v12922_v16 = vmul.u32.u64.high %v12888_v41, %v1580_v9, %v12921_v17  ;;  %v15908_v48 = vand.u32 2147483647, %v12539_v2  ;;  %v15909_v25 = vmov 0  ;;  %v514_v9 = vpop.permute.xlu1 %513 }
 0x38a   :  { %v12934_v1 = vmul.u32.u64.low %v12888_v41, %v1584_v63  ;;  %v12935_v0 = vmul.u32.u64.high %v12888_v41, %v1584_v63, %v12934_v1  ;;  %vm4021_vm6 = vweird.f32 %v11388_v26  ;;  %v4023_v55 = vand.u32 3, %v4022_v31  ;;  %v9170_v26 = vld [vmem:[%s15362_s1] sm:$0xff] }
 0x38b   :  { %vm12929_vm2 = vcmp.le.f32.partialorder %v15908_v48, 0.7853982  ;;  %v1517_v53 = vxor.u32 2147483648, %v1516_v35  ;;  %v1576_v44 = vsel %vm1570_vm4, %v1573_v30, %v1575_v36  ;;  %v3928_v3 = vsel %vm3917_vm15, nan, %v3927_v59  ;;  %v518_v30 = vpop.permute.xlu0 %517 }
 0x38c   :  { %v15910_v25 = vsel %vm12929_vm2, 4294967295, %v15909_v25  ;;  %v4029_v21 = vxor.u32 2147483648, %v12185_v39  ;;  %vm4025_vm3 = vcmp.eq.s32.totalorder %v4023_v55, 0  ;;  %vm4028_vm14 = vcmp.eq.s32.totalorder %v4023_v55, 2 }
 0x38d   :  { %15911 = vst [vmem:[#allocation34_spill] sm:$0xff] %v15910_v25  ;;  %vm4763_vm11 = vcmask 1040384   ;;  %v1595_v11 = vadd.s32 1, %v12922_v16  ;;  %vm4024_vm0 = vcmp.lt.s32.totalorder %v4023_v55, 2  ;;  %v4027_v12 = vsel %vm4025_vm3, %v12185_v39, %v4026_v54  ;;  %v12956_v39 = vpop.f32.mrb[0].mxu0  ;;  %v9171_v55 = vld [vmem:[%s15362_s1 + $0x8] sm:$0xff] }
 0x38e   :  { %v4030_v10 = vsel %vm4028_vm14, %v4029_v21, %v12187_v5  ;;  %v1592_v31 = vmul.u32 %v12888_v41, %v1576_v44  ;;  %vm1594_vm4 = vc.u32 %v12935_v0, %v12921_v17  ;;  %v253_v59 = vmul.f32 %v9169_v33, %v12892_v51  ;;  %15912 = vst [vmem:[#allocation62_spill] sm:$0xff] %v12956_v39  ;;  %v12964_v51 = vpop.f32.mrb[1].mxu0 }
 0x38f   :  { %v4031_v29 = vsel %vm4024_vm0, %v4027_v12, %v4030_v10  ;;  %v1518_v5 = vsel %vm15578_vm7, %v1517_v53, %v1516_v35  ;;  %v1596_v41 = vsel %vm1594_vm4, %v1595_v11, %v12922_v16  ;;  %v9209_v22 = vmov 65535   ;;  %15913 = vst [vmem:[#allocation42_spill] sm:$0xff] %v12964_v51  ;;  %v12969_v1 = vpop.f32.mrb[2].mxu0 }
 0x390   :  { %v4032_v46 = vsel %vm4021_vm6, nan, %v4031_v29  ;;  %v4764_v36 = vsel %vm4763_vm11, 4294967295, %v9209_v22  ;;  %v1597_v56 = vadd.s32 %v1596_v41, %v1592_v31  ;;  %vm15914_vm0 = vcmask 1041408   ;;  %15915 = vst [vmem:[#allocation39_spill] sm:$0xff] %v12969_v1  ;;  %v12978_v44 = vpop.f32.mrb[3].mxu0  ;;  %v9172_v41 = vld [vmem:[%s15362_s1 + $0x28] sm:$0xff] }
 0x391   :  { %v4048_v63 = vpack.c.bf16 %v4032_v46, %v3928_v3  ;;  %v4765_v54 = vsel %vm15914_vm0, %v4764_v36, 0  ;;  %v418_v48 = vmul.f32 %v12765_v20, %v12908_v50  ;;  %v615_v16 = vmul.f32 %v12485_v38, %v518_v30  ;;  %15916 = vst [vmem:[#allocation43_spill] sm:$0xff] %v12978_v44  ;;  %v12983_v11 = vpop.f32.mrb[4].mxu0  ;;  %v9173_v46 = vld [vmem:[%s15362_s1 + $0x20] sm:$0xff] }
 0x392   :  { %v4767_v35 = vand.u32 %v4765_v54, %v4479_v13  ;;  %v4049_v53 = vpack.c.bf16 %v9171_v55, %v9170_v26  ;;  %vm4714_vm15 = vcmask 23552   ;;  %v1598_v3 = vadd.s32 536870912, %v1597_v56  ;;  %15918 = vst [vmem:[#allocation45_spill] sm:$0xff] %v12983_v11 }
 0x393   :  { %vm15917_vm6 = vcmask 293888   ;;  %v450_v20 = vadd.f32 %v418_v48, %v253_v59  ;;  %v613_v50 = vmul.f32 %v12485_v38, %v510_v49  ;;  %v614_v21 = vmul.f32 %v12485_v38, %v514_v9  ;;  %v12995_v49 = vpop.f32.mrb[5].mxu0  ;;  %v15922_v59 = vld [vmem:[#allocation21_spill] sm:$0xff] }
 0x394   :  { %8292 = vmatmul.mubr.msk.bf16.gmra.mrb[16].mxu1 %vm15917_vm6, %v4048_v63  ;;  %v1015_v12 = vsel %vm1008_vm1, %v12549_v42, %v12543_v52  ;;  %v1309_v10 = vxor.u32 2147483648, %v12814_v45  ;;  %8987 = vcosq.f32 %v12880_v8  ;;  %v1521_v31 = vsel %vm12929_vm2, %v12539_v2, %v1518_v5  ;;  %8295 = vmatprep.subr.bf16.mxu1 %v4767_v35  ;;  %15919 = vst [vmem:[#allocation49_spill] sm:$0xff] %v12995_v49  ;;  %v13001_v42 = vpop.f32.mrb[6].mxu0 }
 0x395   :  { %8297 = vmatprep.mubr.msk.bf16.mxu1 %vm4714_vm15, %v4049_v53  ;;  %v12997_v38 = vshrl.u32 %v1598_v3, 30  ;;  %8296 = vmatpush3.bf16.msra.mxu1 %v4767_v35  ;;  %v647_v29 = vadd.f32 %v615_v16, %v450_v20  ;;  %v645_v62 = vadd.f32 %v613_v50, %v12821_v23  ;;  %v646_v52 = vadd.f32 %v614_v21, %v12863_v34  ;;  %v13009_v13 = vpop.f32.mrb[7].mxu0  ;;  %v15927_v16 = vld [vmem:[#allocation58_spill] sm:$0xff] }
 0x396   :  { %15921 = vst [vmem:[#allocation12_spill] sm:$0xff] %v13001_v42  ;;  %v13004_v33 = vand.u32 3, %v12400_v24  ;;  %vm1005_vm1 = vweird.f32 %v12090_v58  ;;  %vm15580_vm3 = vcmp.lt.s32.totalorder %v15922_v59, 0  ;;  %8989 = vsinq.f32 %v12880_v8  ;;  %15923 = vst [vmem:[#allocation20_spill] sm:$0xff] %v13009_v13  ;;  %v13021_v24 = vpop.f32.mrb[8].mxu0 }
 0x397   :  { %15920 = vst [vmem:[#allocation47_spill] sm:$0xff] %v12997_v38  ;;  %v1600_v30 = vshll.u32 %v12997_v38, 30  ;;  %v13013_v5 = vadd.f32 %v12836_v43, %v647_v29  ;;  %v13016_v23 = vadd.f32 %v12836_v43, %v645_v62  ;;  %v13019_v34 = vadd.f32 %v12836_v43, %v646_v52  ;;  %15924 = vst [vmem:[#allocation50_spill] sm:$0xff] %v13021_v24  ;;  %v13036_v22 = vpop.f32.mrb[9].mxu0 }
 0x398   :  { %v13023_v58 = vsel %vm1005_vm1, nan, %v1015_v12  ;;  %v13028_v8 = vsel %vm15580_vm3, %v1309_v10, %v12814_v45  ;;  %8991 = vcosq.f32 %v1521_v31  ;;  %v4051_v43 = vpack.c.bf16 %v9172_v41, %v9173_v46  ;;  %15925 = vst [vmem:[#allocation15_spill] sm:$0xff] %v13036_v22  ;;  %v13046_v54 = vpop.f32.mrb[10].mxu0  ;;  %v9174_v12 = vld [vmem:[%s15362_s1 + $0x30] sm:$0xff]  ;;  %v9175_v10 = vld [vmem:[%s15362_s1 + $0x38] sm:$0xff] }
 0x399   :  { %v13040_v36 = vadd.s32 %v12921_v17, %v12935_v0  ;;  %v13042_v9 = vsub.s32 %v1597_v56, %v1600_v30  ;;  %v15568_v45 = vand.u32 2147483647, %v13013_v5  ;;  %v1852_v63 = vand.u32 2139095040, %v13013_v5  ;;  %15926 = vst [vmem:[#allocation41_spill] sm:$0xff] %v13046_v54  ;;  %v15928_v0 = vld [vmem:[#allocation2_spill] sm:$0xff]  ;;  %v15929_v56 = vld [vmem:[#allocation3_spill] sm:$0xff] }
 0x39a   :  { %8993 = vsinq.f32 %v1521_v31  ;;  %v15567_v48 = vand.u32 2147483647, %v13016_v23  ;;  %v1644_v35 = vand.u32 2139095040, %v13016_v23  ;;  %v791_v26 = vsub.s32 4, %v15927_v16  ;;  %v15934_v46 = vld [vmem:[#allocation29_spill] sm:$0xff] }
 0x39b   :  { %v1603_v55 = vsub.s32 0, %v13042_v9  ;;  %v1853_v53 = vshrl.u32 %v1852_v63, 23  ;;  %v1856_v17 = vand.u32 8388607, %v15568_v45  ;;  %v15930_v3 = vpack.c.bf16 %v15928_v0, %v15929_v56  ;;  %v13079_v63 = vpop.f32.mrb[11].mxu0 }
 0x39c   :  { %v15566_v20 = vand.u32 2147483647, %v13019_v34  ;;  %v1645_v50 = vshrl.u32 %v1644_v35, 23  ;;  %v1648_v21 = vand.u32 8388607, %v15567_v48  ;;  %v4052_v31 = vpack.c.bf16 %v9175_v10, %v9174_v12  ;;  %15935 = vst [vmem:[#allocation6_spill] sm:$0xff] %v13079_v63 }
 0x39d   :  { %8298 = vmatmul.mubr.msk.bf16.vlgmr.msra.gmra.mrb[20].mxu1 %vm4714_vm15, %v15930_v3  ;;  %v15931_v29 = vand.u32 2147483647, %v11486_v15  ;;  %v7696_v52 = vmin.u32 %v1603_v55, %v13042_v9  ;;  %v7707_v30 = vadd.s32 4294967169, %v1853_v53  ;;  %v1857_v41 = vor.u32 8388608, %v1856_v17  ;;  %v13089_v55 = vpop.f32.mrb[12].mxu0 }
 0x39e   :  { %8301 = vmatprep.mubr.msk.bf16.mxu1 %vm4714_vm15, %v4051_v43  ;;  %v13081_v35 = vpop.eup %8987  ;;  %v7699_v0 = vadd.s32 4294967169, %v1645_v50  ;;  %v1649_v56 = vor.u32 8388608, %v1648_v21  ;;  %v1748_v3 = vand.u32 2139095040, %v13019_v34  ;;  %v13087_v12 = vsel %vm707_vm5, %v791_v26, %v15927_v16  ;;  %15937 = vst [vmem:[#allocation54_spill] sm:$0xff] %v13089_v55  ;;  %v9176_v50 = vld [vmem:[%s15362_s1 + $0x40] sm:$0xff]  ;;  %v9177_v21 = vld [vmem:[%s15362_s1 + $0x48] sm:$0xff] }
 0x39f   :  { %vm13070_vm14 = vcmp.le.f32.partialorder %v15931_v29, 0.7853982  ;;  %15936 = vst [vmem:[#allocation44_spill] sm:$0xff] %v13081_v35  ;;  %v1605_v53 = vclz %v7696_v52  ;;  %v1859_v17 = vadd.s32 1, %v7707_v30  ;;  %v13093_v10 = vand.u32 8388607, %v15566_v20 }
 0x3a0   :  { %v793_v43 = vsel %vm13070_vm14, %v11486_v15, %v15934_v46  ;;  %v4053_v29 = vpack.c.bf16 %v9177_v21, %v9176_v50  ;;  %v13101_v46 = vpop.f32.mrb[13].mxu0  ;;  %v13103_v16 = vpop.eup %8989  ;;  %v1651_v26 = vadd.s32 1, %v7699_v0  ;;  %v13108_v52 = vld [vmem:[%s15362_s1 + $0x50] sm:$0xff]  ;;  %v13113_v30 = vld [vmem:[%s15362_s1 + $0x58] sm:$0xff]  ;;  %v15939_v50 = vld [vmem:[#allocation38_spill] sm:$0xff]  ;;  %v13120_v0 = vshll.u32 %v1857_v41, 8 }
 0x3a1   :  { %15938 = vst [vmem:[#allocation52_spill] sm:$0xff] %v13101_v46  ;;  %8995 = vcosq.f32 %v793_v43  ;;  %v13118_v48 = vpop.f32.mrb[14].mxu0  ;;  %v7697_v45 = vadd.s32 4294967294, %v1605_v53  ;;  %vm1860_vm5 = vcmp.gt.s32.totalorder %v1859_v17, 0  ;;  %v13129_v20 = vshll.u32 %v1649_v56, 8 }
 0x3a2   :  { %15940 = vst [vmem:[#allocation16_spill] sm:$0xff] %v13118_v48  ;;  %v13125_v54 = vpop.f32.mrb[15].mxu0  ;;  %v13127_v24 = vpop.eup %8991  ;;  %v1861_v46 = vsel %vm1860_vm5, %v1859_v17, 0  ;;  %vm1652_vm11 = vcmp.gt.s32.totalorder %v1651_v26, 0  ;;  %v13131_v63 = vshrl.u32 %v1748_v3, 23  ;;  %8997 = vsinq.f32 %v793_v43 }
 0x3a3   :  { %15941 = vst [vmem:[#allocation61_spill] sm:$0xff] %v13125_v54  ;;  %15942 = vst [vmem:[#allocation56_spill] sm:$0xff] %v13127_v24  ;;  %v13133_v21 = vpop.f32.mrb[16].mxu0  ;;  %vm7698_vm4 = vcmp.lt.s32.totalorder %v7697_v45, 0  ;;  %v1863_v53 = vand.u32 31, %v1861_v46  ;;  %v13135_v41 = vsel %vm1652_vm11, %v1651_v26, 0 }
 0x3a4   :  { %15943 = vst [vmem:[#allocation60_spill] sm:$0xff] %v13133_v21  ;;  %v13139_v55 = vpop.f32.mrb[17].mxu0  ;;  %v13141_v54 = vpop.eup %8993  ;;  %v1608_v17 = vsel %vm7698_vm4, 0, %v7697_v45  ;;  %v13143_v22 = vshrl.u32 %v1861_v46, 5  ;;  %v13146_v56 = vand.u32 31, %v13135_v41  ;;  %vm15577_vm11 = vcmp.lt.s32.totalorder %v12839_v60, 0 }
 0x3a5   :  { %8302 = vmatmul.mubr.msk.bf16.gmra.mrb[24].mxu1 %vm4714_vm15, %v4052_v31  ;;  %15944 = vst [vmem:[#allocation57_spill] sm:$0xff] %v13139_v55  ;;  %15945 = vst [vmem:[#allocation10_spill] sm:$0xff] %v13141_v54  ;;  %v13149_v3 = vpop.f32.mrb[18].mxu0  ;;  %v1609_v26 = vsub.s32 32, %v1608_v17  ;;  %v1610_v48 = vshll.u32 %v13042_v9, %v1608_v17  ;;  %v1613_v21 = vsub.s32 4294967266, %v1608_v17  ;;  %v1864_v31 = vsub.s32 32, %v1863_v53 }
 0x3a6   :  { %8305 = vmatprep.mubr.msk.bf16.mxu1 %vm4714_vm15, %v4053_v29  ;;  %15946 = vst [vmem:[#allocation35_spill] sm:$0xff] %v13149_v3  ;;  %v13152_v13 = vpop.f32.mrb[19].mxu0  ;;  %v1866_v55 = vshll.u32 %v15596_v40, %v1863_v53  ;;  %v1869_v45 = vshll.u32 %v15636_v32, %v1863_v53  ;;  %v1872_v46 = vshll.u32 %v15638_v4, %v1863_v53  ;;  %vm1881_vm0 = vcmp.lt.s32.totalorder %v13143_v22, 1 }
 0x3a7   :  { %15947 = vst [vmem:[#allocation48_spill] sm:$0xff] %v13152_v13  ;;  %v1875_v42 = vshll.u32 %v15639_v7, %v1863_v53  ;;  %v13158_v49 = vpop.f32.mrb[20].mxu0  ;;  %v1611_v43 = vshrl.u32 %v13040_v36, %v1609_v26  ;;  %v1614_v29 = vadd.s32 127, %v1613_v21  ;;  %v1865_v3 = vshrl.u32 %v15596_v40, %v1864_v31 }
 0x3a8   :  { %15948 = vst [vmem:[#allocation55_spill] sm:$0xff] %v13158_v49  ;;  %v1867_v9 = vshrl.u32 %v15636_v32, %v1864_v31  ;;  %v13163_v17 = vpop.f32.mrb[21].mxu0  ;;  %v1870_v13 = vshrl.u32 %v15638_v4, %v1864_v31  ;;  %v1873_v44 = vshrl.u32 %v15639_v7, %v1864_v31  ;;  %v1876_v51 = vshrl.u32 %v15620_v27, %v1864_v31 }
 0x3a9   :  { %15949 = vst [vmem:[#allocation26_spill] sm:$0xff] %v13163_v17  ;;  %v1878_v11 = vshll.u32 %v15620_v27, %v1863_v53  ;;  %v13169_v1 = vpop.f32.mrb[22].mxu0  ;;  %v1612_v49 = vor.u32 %v1611_v43, %v1610_v48  ;;  %v1615_v39 = vshll.u32 %v1614_v29, 23  ;;  %v1879_v21 = vshrl.u32 %v15617_v6, %v1864_v31 }
 0x3aa   :  { %15950 = vst [vmem:[#allocation4_spill] sm:$0xff] %v13169_v1  ;;  %v1868_v36 = vor.u32 %v1867_v9, %v1866_v55  ;;  %v13172_v26 = vpop.f32.mrb[23].mxu0  ;;  %v1871_v17 = vor.u32 %v1870_v13, %v1869_v45  ;;  %v1874_v54 = vor.u32 %v1873_v44, %v1872_v46  ;;  %v1877_v25 = vor.u32 %v1876_v51, %v1875_v42 }
 0x3ab   :  { %v13174_v24 = vpop.eup %8995  ;;  %v13177_v38 = vpop.f32.mrb[24].mxu0  ;;  %v1616_v2 = vor.u32 4788187, %v1615_v39  ;;  %v1619_v53 = vcvt.s32.f32 %v1612_v49  ;;  %v1880_v35 = vor.u32 %v1879_v21, %v1878_v11  ;;  %vm1882_vm6 = vcmp.lt.s32.totalorder %v13143_v22, 2 }
 0x3ac   :  { %15951 = vst [vmem:[#allocation8_spill] sm:$0xff] %v13177_v38  ;;  %v15952_v48 = vpack.c.bf16 %v13113_v30, %v13108_v52  ;;  %v13184_v55 = vpop.f32.mrb[25].mxu0  ;;  %vm1883_vm1 = vcmp.lt.s32.totalorder %v13143_v22, 3  ;;  %vm1884_vm5 = vcmp.lt.s32.totalorder %v13143_v22, 4  ;;  %v1885_v51 = vsel %vm1881_vm0, %v1865_v3, %v1868_v36  ;;  %v13197_v52 = vpop.eup %8997 }
 0x3ad   :  { %v1889_v39 = vsel %vm1881_vm0, %v1868_v36, %v1871_v17  ;;  %v13192_v44 = vpop.f32.mrb[26].mxu0  ;;  %v1617_v11 = vand.u32 2147483647, %v1616_v2  ;;  %v1886_v49 = vsel %vm1884_vm5, %v1874_v54, 2102212464  ;;  %v1893_v13 = vsel %vm1881_vm0, %v1871_v17, %v1874_v54 }
 0x3ae   :  { %8306 = vmatmul.mubr.msk.bf16.gmra.mrb[28].mxu1 %vm4714_vm15, %v15952_v48  ;;  %15953 = vst [vmem:[#allocation13_spill] sm:$0xff] %v13192_v44  ;;  %v1890_v42 = vsel %vm1884_vm5, %v1877_v25, 920167782  ;;  %v1887_v30 = vsel %vm1883_vm1, %v1871_v17, %v1886_v49  ;;  %v1894_v31 = vsel %vm1884_vm5, %v1880_v35, 1326507024  ;;  %v1656_v45 = vsub.s32 32, %v13146_v56 }
 0x3af   :  { %v1891_v3 = vsel %vm1883_vm1, %v1874_v54, %v1890_v42  ;;  %v13204_v46 = vpop.f32.mrb[27].mxu0  ;;  %v1620_v43 = vmul.f32 %v1619_v53, %v1617_v11  ;;  %v1895_v29 = vsel %vm1883_vm1, %v1877_v25, %v1894_v31  ;;  %v15954_v9 = vsel %vm13070_vm14, 0, %v13087_v12 }
 0x3b0   :  { %v1892_v2 = vsel %vm1882_vm6, %v1889_v39, %v1891_v3  ;;  %v13214_v17 = vadd.s32 3, %v15954_v9  ;;  %v13216_v36 = vpop.f32.mrb[28].mxu0  ;;  %v1896_v54 = vsel %vm1882_vm6, %v1893_v13, %v1895_v29  ;;  %v7703_v53 = vadd.s32 4294967169, %v13131_v63 }
 0x3b1   :  { %15955 = vst [vmem:[#allocation36_spill] sm:$0xff] %v13216_v36  ;;  %v13221_v35 = vmul.u32.u64.low %v13120_v0, %v1892_v2  ;;  %v13222_v21 = vmul.u32.u64.high %v13120_v0, %v1892_v2, %v13221_v35  ;;  %v13226_v48 = vpop.f32.mrb[29].mxu0  ;;  %v1888_v25 = vsel %vm1882_vm6, %v1885_v51, %v1887_v30  ;;  %v15957_v39 = vor.u32 8388608, %v13093_v10 }
 0x3b2   :  { %15956 = vst [vmem:[#allocation14_spill] sm:$0xff] %v13226_v48  ;;  %v13231_v62 = vmul.u32.u64.low %v13120_v0, %v1896_v54  ;;  %v13232_v12 = vmul.u32.u64.high %v13120_v0, %v1896_v54, %v13231_v62  ;;  %v13238_v49 = vpop.f32.mrb[30].mxu0  ;;  %v1621_v42 = vxor.u32 2147483648, %v1620_v43  ;;  %v1658_v13 = vshll.u32 %v15596_v40, %v13146_v56 }
 0x3b3   :  { %v13236_v11 = vshll.u32 %v15957_v39, 8  ;;  %15958 = vst [vmem:[#allocation32_spill] sm:$0xff] %v13238_v49  ;;  %v1659_v63 = vshrl.u32 %v15636_v32, %v1656_v45  ;;  %v1662_v3 = vshrl.u32 %v15638_v4, %v1656_v45  ;;  %v13244_v22 = vpop.f32.mrb[31].mxu0  ;;  %v1654_v51 = vshrl.u32 %v13135_v41, 5 }
 0x3b4   :  { %15959 = vst [vmem:[#allocation31_spill] sm:$0xff] %v13244_v22  ;;  %v1661_v30 = vshll.u32 %v15636_v32, %v13146_v56  ;;  %v1664_v10 = vshll.u32 %v15638_v4, %v13146_v56  ;;  %v1665_v31 = vshrl.u32 %v15639_v7, %v1656_v45  ;;  %v13252_v2 = vpop.f32.mrb[32].mxu0  ;;  %v1904_v29 = vmul.u32 %v13120_v0, %v1888_v25 }
 0x3b5   :  { %15960 = vst [vmem:[#allocation5_spill] sm:$0xff] %v13252_v2  ;;  %v1907_v9 = vadd.s32 1, %v13222_v21  ;;  %v1660_v54 = vor.u32 %v1659_v63, %v1658_v13  ;;  %v1755_v62 = vadd.s32 1, %v7703_v53  ;;  %v13256_v39 = vpop.f32.mrb[33].mxu0  ;;  %v15962_v41 = vand.u32 2147483647, %v12839_v60 }
 0x3b6   :  { %15961 = vst [vmem:[#allocation23_spill] sm:$0xff] %v13256_v39  ;;  %vm1906_vm4 = vc.u32 %v13232_v12, %v13221_v35  ;;  %v1657_v36 = vshrl.u32 %v15596_v40, %v1656_v45  ;;  %v1663_v2 = vor.u32 %v1662_v3, %v1661_v30  ;;  %v1666_v44 = vor.u32 %v1665_v31, %v1664_v10  ;;  %v13267_v0 = vpop.f32.mrb[34].mxu0 }
 0x3b7   :  { %vm13260_vm14 = vcmp.le.f32.partialorder %v15962_v41, 0.7853982  ;;  %15965 = vst [vmem:[#allocation9_spill] sm:$0xff] %v13267_v0  ;;  %v1622_v53 = vsel %vm15577_vm11, %v1621_v42, %v1620_v43  ;;  %v1908_v25 = vsel %vm1906_vm4, %v1907_v9, %v13222_v21  ;;  %v1667_v13 = vshll.u32 %v15639_v7, %v13146_v56  ;;  %v13275_v41 = vpop.f32.mrb[35].mxu0 }
 0x3b8   :  { %v1668_v63 = vshrl.u32 %v15620_v27, %v1656_v45  ;;  %15966 = vst [vmem:[#allocation59_spill] sm:$0xff] %v13275_v41  ;;  %v1909_v38 = vadd.s32 %v1908_v25, %v1904_v29  ;;  %v1670_v1 = vshll.u32 %v15620_v27, %v13146_v56  ;;  %v1671_v3 = vshrl.u32 %v15617_v6, %v1656_v45 }
 0x3b9   :  { %vm1673_vm0 = vcmp.lt.s32.totalorder %v1654_v51, 1  ;;  %vm1675_vm6 = vcmp.lt.s32.totalorder %v1654_v51, 3  ;;  %vm1676_vm1 = vcmp.lt.s32.totalorder %v1654_v51, 4  ;;  %vm1756_vm5 = vcmp.gt.s32.totalorder %v1755_v62, 0 }
 0x3ba   :  { %v1669_v30 = vor.u32 %v1668_v63, %v1667_v13  ;;  %v1677_v43 = vsel %vm1673_vm0, %v1657_v36, %v1660_v54  ;;  %v1910_v42 = vadd.s32 536870912, %v1909_v38  ;;  %v1672_v21 = vor.u32 %v1671_v3, %v1670_v1 }
 0x3bb   :  { %v1678_v10 = vsel %vm1676_vm1, %v1666_v44, 2102212464  ;;  %v1681_v31 = vsel %vm1673_vm0, %v1660_v54, %v1663_v2  ;;  %v1685_v39 = vsel %vm1673_vm0, %v1663_v2, %v1666_v44  ;;  %vm1674_vm4 = vcmp.lt.s32.totalorder %v1654_v51, 2 }
 0x3bc   :  { %v1679_v9 = vsel %vm1675_vm6, %v1663_v2, %v1678_v10  ;;  %v1682_v0 = vsel %vm1676_vm1, %v1669_v30, 920167782  ;;  %v13281_v29 = vshrl.u32 %v1910_v42, 30  ;;  %v1686_v45 = vsel %vm1676_vm1, %v1672_v21, 1326507024 }
 0x3bd   :  { %v1683_v56 = vsel %vm1675_vm6, %v1666_v44, %v1682_v0  ;;  %v1680_v25 = vsel %vm1674_vm4, %v1677_v43, %v1679_v9  ;;  %v1687_v63 = vsel %vm1675_vm6, %v1669_v30, %v1686_v45  ;;  %v1757_v36 = vsel %vm1756_vm5, %v1755_v62, 0 }
 0x3be   :  { %v1684_v13 = vsel %vm1674_vm4, %v1681_v31, %v1683_v56  ;;  %v1912_v1 = vshll.u32 %v13281_v29, 30  ;;  %v1688_v3 = vsel %vm1674_vm4, %v1685_v39, %v1687_v63  ;;  %v13294_v2 = vsel %vm13260_vm14, %v12839_v60, %v1622_v53 }
 0x3bf   :  { %v13287_v54 = vmul.u32.u64.low %v13129_v20, %v1684_v13  ;;  %v13288_v10 = vmul.u32.u64.high %v13129_v20, %v1684_v13, %v13287_v54  ;;  %v13297_v44 = vmul.u32.u64.low %v13129_v20, %v1688_v3  ;;  %v13298_v0 = vmul.u32.u64.high %v13129_v20, %v1688_v3, %v13297_v44 }
 0x3c0   :  { %v1759_v51 = vand.u32 31, %v1757_v36  ;;  %v1905_v62 = vadd.s32 %v13221_v35, %v13232_v12  ;;  %v13302_v30 = vsub.s32 %v1909_v38, %v1912_v1  ;;  %v1696_v39 = vmul.u32 %v13129_v20, %v1680_v25 }
 0x3c1   :  { %v13305_v43 = vshrl.u32 %v1757_v36, 5  ;;  %v13308_v21 = vand.u32 3, %v13214_v17  ;;  %v1699_v56 = vadd.s32 1, %v13288_v10  ;;  %vm1698_vm0 = vc.u32 %v13298_v0, %v13287_v54 }
 0x3c2   :  { %v1760_v42 = vsub.s32 32, %v1759_v51  ;;  %v1915_v9 = vsub.s32 0, %v13302_v30  ;;  %v1762_v35 = vshll.u32 %v15596_v40, %v1759_v51  ;;  %v1765_v38 = vshll.u32 %v15636_v32, %v1759_v51 }
 0x3c3   :  { %v1768_v17 = vshll.u32 %v15638_v4, %v1759_v51  ;;  %v1771_v12 = vshll.u32 %v15639_v7, %v1759_v51  ;;  %v1700_v25 = vsel %vm1698_vm0, %v1699_v56, %v13288_v10  ;;  %v1774_v41 = vshll.u32 %v15620_v27, %v1759_v51 }
 0x3c4   :  { %v1763_v20 = vshrl.u32 %v15636_v32, %v1760_v42  ;;  %v7708_v45 = vmin.u32 %v1915_v9, %v13302_v30  ;;  %v1766_v13 = vshrl.u32 %v15638_v4, %v1760_v42  ;;  %v1769_v63 = vshrl.u32 %v15639_v7, %v1760_v42 }
 0x3c5   :  { %v1701_v36 = vadd.s32 %v1700_v25, %v1696_v39  ;;  %v1772_v3 = vshrl.u32 %v15620_v27, %v1760_v42  ;;  %v1775_v44 = vshrl.u32 %v15617_v6, %v1760_v42  ;;  %v1761_v9 = vshrl.u32 %v15596_v40, %v1760_v42 }
 0x3c6   :  { %v1764_v1 = vor.u32 %v1763_v20, %v1762_v35  ;;  %v1917_v31 = vclz %v7708_v45  ;;  %v1767_v32 = vor.u32 %v1766_v13, %v1765_v38  ;;  %v1770_v53 = vor.u32 %v1769_v63, %v1768_v17 }
 0x3c7   :  { %v1702_v22 = vadd.s32 536870912, %v1701_v36  ;;  %v1773_v48 = vor.u32 %v1772_v3, %v1771_v12  ;;  %vm1777_vm6 = vcmp.lt.s32.totalorder %v13305_v43, 1  ;;  %v1776_v10 = vor.u32 %v1775_v44, %v1774_v41 }
 0x3c8   :  { %v7709_v4 = vadd.s32 4294967294, %v1917_v31  ;;  %vm1779_vm1 = vcmp.lt.s32.totalorder %v13305_v43, 3  ;;  %vm1780_vm5 = vcmp.lt.s32.totalorder %v13305_v43, 4  ;;  %v1785_v27 = vsel %vm1777_vm6, %v1764_v1, %v1767_v32 }
 0x3c9   :  { %v13332_v7 = vshrl.u32 %v1702_v22, 30  ;;  %v1782_v6 = vsel %vm1780_vm5, %v1770_v53, 2102212464  ;;  %v1786_v40 = vsel %vm1780_vm5, %v1773_v48, 920167782  ;;  %vm1778_vm0 = vcmp.lt.s32.totalorder %v13305_v43, 2 }
 0x3ca   :  { %vm7710_vm4 = vcmp.lt.s32.totalorder %v7709_v4, 0  ;;  %v1781_v41 = vsel %vm1777_vm6, %v1761_v9, %v1764_v1  ;;  %v1787_v51 = vsel %vm1779_vm1, %v1770_v53, %v1786_v40  ;;  %v1789_v31 = vsel %vm1777_vm6, %v1767_v32, %v1770_v53 }
 0x3cb   :  { %v1920_v22 = vsel %vm7710_vm4, 0, %v7709_v4  ;;  %v1704_v39 = vshll.u32 %v13332_v7, 30  ;;  %v1788_v42 = vsel %vm1778_vm0, %v1785_v27, %v1787_v51  ;;  %v1783_v38 = vsel %vm1779_vm1, %v1767_v32, %v1782_v6  ;;  %v13379_v4 = vpop.f32.mrb[36].mxu0 }
 0x3cc   :  { %v1921_v56 = vsub.s32 32, %v1920_v22  ;;  %v1925_v35 = vsub.s32 4294967266, %v1920_v22  ;;  %v1790_v20 = vsel %vm1780_vm5, %v1776_v10, 1326507024  ;;  %v1922_v13 = vshll.u32 %v13302_v30, %v1920_v22  ;;  %v13392_v22 = vpop.f32.mrb[37].mxu0 }
 0x3cd   :  { %v13354_v17 = vsub.s32 %v1701_v36, %v1704_v39  ;;  %v1791_v12 = vsel %vm1779_vm1, %v1773_v48, %v1790_v20  ;;  %v13359_v45 = vmul.u32.u64.low %v13236_v11, %v1788_v42  ;;  %v13360_v25 = vmul.u32.u64.high %v13236_v11, %v1788_v42, %v13359_v45 }
 0x3ce   :  { %v1923_v53 = vshrl.u32 %v1905_v62, %v1921_v56  ;;  %v1926_v63 = vadd.s32 127, %v1925_v35  ;;  %v1792_v1 = vsel %vm1778_vm0, %v1789_v31, %v1791_v12  ;;  %8999 = vcosq.f32 %v13294_v2  ;;  %v13397_v31 = vpop.f32.mrb[38].mxu0 }
 0x3cf   :  { %v1707_v3 = vsub.s32 0, %v13354_v17  ;;  %v13368_v36 = vmul.u32.u64.low %v13236_v11, %v1792_v1  ;;  %v13369_v44 = vmul.u32.u64.high %v13236_v11, %v1792_v1, %v13368_v36  ;;  %vm797_vm6 = vweird.f32 %v11486_v15  ;;  %v13402_v20 = vpop.f32.mrb[39].mxu0 }
 0x3d0   :  { %9001 = vsinq.f32 %v13294_v2  ;;  %v1924_v48 = vor.u32 %v1923_v53, %v1922_v13  ;;  %v1927_v32 = vshll.u32 %v1926_v63, 23  ;;  %v1784_v62 = vsel %vm1778_vm0, %v1781_v41, %v1783_v38  ;;  %v15970_v41 = vld [vmem:[#allocation22_spill] sm:$0xff]  ;;  %v9181_v63 = vld [vmem:[%s15362_s1 + $0x68] sm:$0xff]  ;;  %v9183_v36 = vld [vmem:[%s15362_s1 + $0x78] sm:$0xff] }
 0x3d1   :  { %v7700_v30 = vmin.u32 %v1707_v3, %v13354_v17  ;;  %v1803_v9 = vadd.s32 1, %v13360_v25  ;;  %vm801_vm1 = vcmp.eq.s32.totalorder %v13308_v21, 0  ;;  %vm804_vm5 = vcmp.eq.s32.totalorder %v13308_v21, 2  ;;  %v9182_v3 = vld [vmem:[%s15362_s1 + $0x70] sm:$0xff] }
 0x3d2   :  { %v1928_v10 = vor.u32 4788187, %v1927_v32  ;;  %v15967_v6 = vxor.u32 2147483648, %v13197_v52  ;;  %v15968_v27 = vxor.u32 2147483648, %v13174_v24  ;;  %v15969_v40 = vsub.s32 4, %v15939_v50 }
 0x3d3   :  { %vm15971_vm4 = vcmp.lt.s32.totalorder %v15970_v41, 0  ;;  %v1709_v39 = vclz %v7700_v30  ;;  %v1800_v42 = vmul.u32 %v13236_v11, %v1784_v62  ;;  %vm1802_vm0 = vc.u32 %v13369_v44, %v13359_v45 }
 0x3d4   :  { %v803_v2 = vsel %vm801_vm1, %v13174_v24, %v15967_v6  ;;  %v806_v43 = vsel %vm804_vm5, %v15968_v27, %v13197_v52  ;;  %v896_v51 = vsel %vm15971_vm4, %v15969_v40, %v15939_v50  ;;  %vm800_vm11 = vcmp.lt.s32.totalorder %v13308_v21, 2  ;;  %v15974_v6 = vld [vmem:[#allocation40_spill] sm:$0xff] }
 0x3d5   :  { %v1929_v56 = vand.u32 2147483647, %v1928_v10  ;;  %v1931_v24 = vcvt.s32.f32 %v1924_v48  ;;  %v1804_v52 = vsel %vm1802_vm0, %v1803_v9, %v13360_v25  ;;  %v898_v38 = vsel %vm12329_vm10, 0, %v896_v51  ;;  %v9180_v25 = vld [vmem:[%s15362_s1 + $0x60] sm:$0xff] }
 0x3d6   :  { %v7701_v50 = vadd.s32 4294967294, %v1709_v39  ;;  %v1805_v12 = vadd.s32 %v1804_v52, %v1800_v42  ;;  %v807_v13 = vsel %vm800_vm11, %v803_v2, %v806_v43  ;;  %v902_v53 = vadd.s32 3, %v898_v38  ;;  %v15973_v9 = vld [vmem:[#allocation18_spill] sm:$0xff]  ;;  %v15975_v43 = vld [vmem:[#allocation17_spill] sm:$0xff] }
 0x3d7   :  { %vm1851_vm1 = vcmp.lt.s32.totalorder %v13013_v5, 0  ;;  %v1932_v11 = vmul.f32 %v1931_v24, %v1929_v56  ;;  %v1697_v21 = vadd.s32 %v13287_v54, %v13298_v0  ;;  %vm901_vm5 = vweird.f32 %v15970_v41  ;;  %v15979_v39 = vld [vmem:[#allocation25_spill] sm:$0xff]  ;;  %v9188_v41 = vld [vmem:[%s15362_s1 + $0xa8] sm:$0xff] }
 0x3d8   :  { %v4055_v1 = vpack.c.bf16 %v9181_v63, %v9180_v25  ;;  %v4056_v54 = vpack.c.bf16 %v9183_v36, %v9182_v3  ;;  %vm7702_vm10 = vcmp.lt.s32.totalorder %v7701_v50, 0  ;;  %v13421_v0 = vadd.s32 %v13359_v45, %v13369_v44  ;;  %v13428_v27 = vpop.eup %8999 }
 0x3d9   :  { %v1806_v48 = vadd.s32 536870912, %v1805_v12  ;;  %v903_v32 = vand.u32 3, %v902_v53  ;;  %v1712_v62 = vsel %vm7702_vm10, 0, %v7701_v50  ;;  %v808_v30 = vsel %vm797_vm6, nan, %v807_v13 }
 0x3da   :  { %v906_v10 = vxor.u32 2147483648, %v15973_v9  ;;  %v909_v2 = vxor.u32 2147483648, %v15974_v6  ;;  %8309 = vmatprep.mubr.msk.bf16.mxu1 %vm4714_vm15, %v4055_v1  ;;  %vm1109_vm11 = vweird.f32 %v15975_v43  ;;  %v15976_v40 = vand.u32 2147483647, %v13013_v5  ;;  %v13441_v56 = vpop.eup %9001  ;;  %v9192_v43 = vld [vmem:[%s15362_s1 + $0xc0] sm:$0xff] }
 0x3db   :  { %v1713_v44 = vsub.s32 32, %v1712_v62  ;;  %v1717_v51 = vsub.s32 4294967266, %v1712_v62  ;;  %v13437_v15 = vshrl.u32 %v1806_v48, 30  ;;  %8310 = vmatmul.mubr.msk.bf16.gmra.mrb[0].mxu1 %vm4714_vm15, %v4056_v54  ;;  %v1114_v42 = vxor.u32 2147483648, %v15979_v39  ;;  %v9184_v54 = vld [vmem:[%s15362_s1 + $0x88] sm:$0xff]  ;;  %v9185_v48 = vld [vmem:[%s15362_s1 + $0x80] sm:$0xff] }
 0x3dc   :  { %vm13433_vm4 = vcmp.le.f32.partialorder %v15976_v40, 0.7853982  ;;  %v1933_v24 = vxor.u32 2147483648, %v1932_v11  ;;  %v1714_v52 = vshll.u32 %v13354_v17, %v1712_v62  ;;  %vm905_vm6 = vcmp.eq.s32.totalorder %v903_v32, 0  ;;  %v15980_v17 = vld [vmem:[#allocation53_spill] sm:$0xff] }
 0x3dd   :  { %vm1113_vm0 = vcmp.eq.s32.totalorder %v13004_v33, 0  ;;  %v1715_v35 = vshrl.u32 %v1697_v21, %v1713_v44  ;;  %v1718_v38 = vadd.s32 127, %v1717_v51  ;;  %v1808_v50 = vshll.u32 %v13437_v15, 30  ;;  %v9187_v62 = vld [vmem:[%s15362_s1 + $0x98] sm:$0xff] }
 0x3de   :  { %vm908_vm10 = vcmp.eq.s32.totalorder %v903_v32, 2  ;;  %vm904_vm7 = vcmp.lt.s32.totalorder %v903_v32, 2  ;;  %v907_v13 = vsel %vm905_vm6, %v15974_v6, %v906_v10  ;;  %vm1116_vm12 = vcmp.eq.s32.totalorder %v13004_v33, 2  ;;  %v13466_v10 = vpop.f32.mrb[40].mxu0 }
 0x3df   :  { %v910_v53 = vsel %vm908_vm10, %v909_v2, %v15973_v9  ;;  %v1716_v25 = vor.u32 %v1715_v35, %v1714_v52  ;;  %v1719_v63 = vshll.u32 %v1718_v38, 23  ;;  %v13449_v1 = vsub.s32 %v1805_v12, %v1808_v50  ;;  %v9186_v12 = vld [vmem:[%s15362_s1 + $0x90] sm:$0xff]  ;;  %v13473_v51 = vpop.f32.mrb[41].mxu0 }
 0x3e0   :  { %v1115_v3 = vsel %vm1113_vm0, %v15980_v17, %v1114_v42  ;;  %vm1643_vm3 = vcmp.lt.s32.totalorder %v13016_v23, 0  ;;  %v911_v21 = vsel %vm904_vm7, %v907_v13, %v910_v53  ;;  %v1117_v36 = vxor.u32 2147483648, %v15980_v17  ;;  %v13492_v50 = vpop.f32.mrb[42].mxu0 }
 0x3e1   :  { %v4057_v32 = vpack.c.bf16 %v9184_v54, %v9185_v48  ;;  %v4058_v9 = vpack.c.bf16 %v9187_v62, %v9186_v12  ;;  %v1934_v6 = vsel %vm1851_vm1, %v1933_v24, %v1932_v11  ;;  %v1720_v2 = vor.u32 4788187, %v1719_v63  ;;  %v9189_v24 = vld [vmem:[%s15362_s1 + $0xa0] sm:$0xff]  ;;  %v9193_v12 = vld [vmem:[%s15362_s1 + $0xc8] sm:$0xff] }
 0x3e2   :  { %v1811_v40 = vsub.s32 0, %v13449_v1  ;;  %v912_v44 = vsel %vm901_vm5, nan, %v911_v21  ;;  %v15981_v42 = vand.u32 2147483647, %v13016_v23  ;;  %vm1112_vm6 = vcmp.lt.s32.totalorder %v13004_v33, 2  ;;  %v13496_v33 = vpop.f32.mrb[43].mxu0 }
 0x3e3   :  { %v4033_v35 = vpack.c.bf16 %v912_v44, %v808_v30  ;;  %v1118_v11 = vsel %vm1116_vm12, %v1117_v36, %v15979_v39  ;;  %8313 = vmatprep.mubr.msk.bf16.mxu1 %vm4714_vm15, %v4057_v32  ;;  %v4059_v38 = vpack.c.bf16 %v9188_v41, %v9189_v24  ;;  %v1721_v30 = vand.u32 2147483647, %v1720_v2 }
 0x3e4   :  { %vm13477_vm7 = vcmp.le.f32.partialorder %v15981_v42, 0.7853982  ;;  %v1723_v13 = vcvt.s32.f32 %v1716_v25  ;;  %v7704_v53 = vmin.u32 %v1811_v40, %v13449_v1  ;;  %v1119_v63 = vsel %vm1112_vm6, %v1115_v3, %v1118_v11  ;;  %8314 = vmatmul.mubr.msk.bf16.gmra.mrb[4].mxu1 %vm4714_vm15, %v4058_v9  ;;  %v9190_v25 = vld [vmem:[%s15362_s1 + $0xb0] sm:$0xff]  ;;  %v9191_v3 = vld [vmem:[%s15362_s1 + $0xb8] sm:$0xff] }
 0x3e5   :  { %v1937_v39 = vsel %vm13433_vm4, %v13013_v5, %v1934_v6  ;;  %vm15984_vm12 = vcmask 293888   ;;  %v1120_v17 = vsel %vm1109_vm11, nan, %v1119_v63  ;;  %8317 = vmatprep.mubr.msk.bf16.mxu1 %vm4714_vm15, %v4059_v38  ;;  %v4060_v21 = vpack.c.bf16 %v9191_v3, %v9190_v25  ;;  %v9198_v40 = vld [vmem:[%s15362_s1 + $0xf0] sm:$0xff] }
 0x3e6   :  { %8263 = vmatprep.mubr.msk.bf16.mxu0 %vm15984_vm12, %v4033_v35  ;;  %v1207_v36 = vsub.s32 4, %v12656_v28  ;;  %v1724_v54 = vmul.f32 %v1723_v13, %v1721_v30  ;;  %v1813_v48 = vclz %v7704_v53  ;;  %v4034_v32 = vpack.c.bf16 %v1120_v17, %v13023_v58  ;;  %v15988_v58 = vld [vmem:[#allocation27_spill] sm:$0xff]  ;;  %vm15989_vm11 = vmmov %vm15984_vm12 }
 0x3e7   :  { %v4061_v62 = vpack.c.bf16 %v9193_v12, %v9192_v43  ;;  %v1218_v6 = vxor.u32 2147483648, %v12884_v37  ;;  %v15985_v2 = vand.u32 2147483647, %v15922_v59  ;;  %v1311_v44 = vsub.s32 4, %v15988_v58 }
 0x3e8   :  { %v1208_v9 = vsel %vm1123_vm9, %v1207_v36, %v12656_v28  ;;  %v1725_v42 = vxor.u32 2147483648, %v1724_v54  ;;  %v7705_v35 = vadd.s32 4294967294, %v1813_v48  ;;  %8264 = vmatmul.mubr.msk.bf16.vlgmr.msra.gmra.mrb[64].mxu0 %vm15989_vm11, %v4034_v32  ;;  %v1221_v24 = vxor.u32 2147483648, %v12875_v61  ;;  %v9194_v32 = vld [vmem:[%s15362_s1 + $0xd8] sm:$0xff] }
 0x3e9   :  { %vm13525_vm5 = vcmp.le.f32.partialorder %v15985_v2, 0.7853982  ;;  %v1210_v11 = vsel %vm12783_vm13, 0, %v1208_v9  ;;  %vm15990_vm9 = vcmp.lt.s32.totalorder %v15922_v59, 0  ;;  %vm1213_vm12 = vweird.f32 %v12508_v14  ;;  %v9197_v14 = vld [vmem:[%s15362_s1 + $0xe0] sm:$0xff] }
 0x3ea   :  { %v1313_v28 = vsel %vm13525_vm5, %v15922_v59, %v13028_v8  ;;  %v1214_v41 = vadd.s32 3, %v1210_v11  ;;  %v1312_v38 = vsel %vm15990_vm9, %v1311_v44, %v15988_v58  ;;  %v1726_v30 = vsel %vm1643_vm3, %v1725_v42, %v1724_v54  ;;  %v9199_v58 = vld [vmem:[%s15362_s1 + $0xf8] sm:$0xff] }
 0x3eb   :  { %9003 = vcosq.f32 %v1313_v28  ;;  %vm7706_vm0 = vcmp.lt.s32.totalorder %v7705_v35, 0  ;;  %v1314_v18 = vsel %vm13525_vm5, 0, %v1312_v38  ;;  %v1729_v63 = vsel %vm13477_vm7, %v13016_v23, %v1726_v30 }
 0x3ec   :  { %9005 = vsinq.f32 %v1313_v28  ;;  %v1816_v13 = vsel %vm7706_vm0, 0, %v7705_v35  ;;  %v1215_v53 = vand.u32 3, %v1214_v41  ;;  %v1318_v8 = vadd.s32 3, %v1314_v18  ;;  %8318 = vmatmul.mubr.msk.bf16.gmra.mrb[8].mxu1 %vm4714_vm15, %v4060_v21  ;;  %v8863_v35 = vld [vmem:[%s15368_s7] sm:$0xff]  }
 0x3ed   :  { %9007 = vcosq.f32 %v1937_v39  ;;  %v1817_v17 = vsub.s32 32, %v1816_v13  ;;  %v1821_v25 = vsub.s32 4294967266, %v1816_v13  ;;  %v1818_v3 = vshll.u32 %v13449_v1, %v1816_v13  ;;  %8321 = vmatprep.mubr.msk.bf16.mxu1 %vm4714_vm15, %v4061_v62  ;;  %v9195_v1 = vld [vmem:[%s15362_s1 + $0xd0] sm:$0xff]  ;;  %8329 = vmatprep.subr.bf16.mxu1 %v8863_v35 }
 0x3ee   :  { %9009 = vsinq.f32 %v1937_v39  ;;  %vm1216_vm13 = vcmp.lt.s32.totalorder %v1215_v53, 2  ;;  %vm1217_vm10 = vcmp.eq.s32.totalorder %v1215_v53, 0  ;;  %vm1220_vm6 = vcmp.eq.s32.totalorder %v1215_v53, 2  ;;  %8330 = vmatpush3.bf16.msra.mxu1 %v8863_v35 }
 0x3ef   :  { %v1819_v36 = vshrl.u32 %v13421_v0, %v1817_v17  ;;  %v1822_v54 = vadd.s32 127, %v1821_v25  ;;  %v1219_v39 = vsel %vm1217_vm10, %v12875_v61, %v1218_v6  ;;  %v1222_v48 = vsel %vm1220_vm6, %v1221_v24, %v12884_v37  ;;  %v15991_v61 = vld [vmem:[#allocation28_spill] sm:$0xff]  ;;  %v9196_v6 = vld [vmem:[%s15362_s1 + $0xe8] sm:$0xff] }
 0x3f0   :  { %v4062_v21 = vpack.c.bf16 %v9194_v32, %v9195_v1  ;;  %v1223_v43 = vsel %vm1216_vm13, %v1219_v39, %v1222_v48  ;;  %v1319_v12 = vand.u32 3, %v1318_v8  ;;  %9011 = vcosq.f32 %v1729_v63  ;;  %v15999_v39 = vld [vmem:[#allocation47_spill] sm:$0xff] }
 0x3f1   :  { %v1820_v0 = vor.u32 %v1819_v36, %v1818_v3  ;;  %v1823_v62 = vshll.u32 %v1822_v54, 23  ;;  %vm1317_vm5 = vweird.f32 %v15922_v59  ;;  %v1415_v37 = vsub.s32 4, %v15991_v61  ;;  %v15996_v3 = vld [vmem:[#allocation44_spill] sm:$0xff] }
 0x3f2   :  { %9013 = vsinq.f32 %v1729_v63  ;;  %vm1747_vm11 = vcmp.lt.s32.totalorder %v13019_v34, 0  ;;  %v1224_v9 = vsel %vm1213_vm12, nan, %v1223_v43  ;;  %v4063_v2 = vpack.c.bf16 %v9196_v6, %v9197_v14  ;;  %v16001_v6 = vld [vmem:[#allocation10_spill] sm:$0xff] }
 0x3f3   :  { %v4064_v44 = vpack.c.bf16 %v9199_v58, %v9198_v40  ;;  %v15992_v42 = vand.u32 2147483647, %v13019_v34  ;;  %v1824_v11 = vor.u32 4788187, %v1823_v62  ;;  %vm1320_vm0 = vcmp.lt.s32.totalorder %v1319_v12, 2  ;;  %v16003_v58 = vld [vmem:[#allocation56_spill] sm:$0xff] }
 0x3f4   :  { %vm1321_vm13 = vcmp.eq.s32.totalorder %v1319_v12, 0  ;;  %vm15995_vm10 = vcmp.lt.s32.totalorder %v12535_v47, 0  ;;  %v1827_v24 = vcvt.s32.f32 %v1820_v0  ;;  %vm1324_vm6 = vcmp.eq.s32.totalorder %v1319_v12, 2  ;;  %8322 = vmatmul.mubr.msk.bf16.gmra.mrb[12].mxu1 %vm4714_vm15, %v4062_v21 }
 0x3f5   :  { %vm13578_vm9 = vcmp.le.f32.partialorder %v15992_v42, 0.7853982  ;;  %v1416_v28 = vsel %vm15995_vm10, %v1415_v37, %v15991_v61  ;;  %v9004_v41 = vpop.eup %9003  ;;  %v1519_v30 = vsub.s32 4, %v12817_v19  ;;  %v1825_v13 = vand.u32 2147483647, %v1824_v11  ;;  %8325 = vmatprep.mubr.msk.bf16.mxu1 %vm4714_vm15, %v4063_v2 }
 0x3f6   :  { %v1418_v38 = vsel %vm12852_vm8, 0, %v1416_v28  ;;  %v9006_v18 = vpop.eup %9005  ;;  %v1325_v53 = vxor.u32 2147483648, %v9004_v41  ;;  %v1426_v63 = vxor.u32 2147483648, %v13103_v16  ;;  %v1429_v36 = vxor.u32 2147483648, %v15996_v3 }
 0x3f7   :  { %v1422_v8 = vadd.s32 3, %v1418_v38  ;;  %v13590_v17 = vpop.eup %9007  ;;  %v1322_v25 = vxor.u32 2147483648, %v9006_v18  ;;  %vm15998_vm8 = vcmp.lt.s32.totalorder %v15997_v57, 0  ;;  %v1623_v48 = vsub.s32 4, %v15999_v39 }
 0x3f8   :  { %v1520_v54 = vsel %vm15998_vm8, %v1519_v30, %v12817_v19  ;;  %v13598_v32 = vpop.eup %9009  ;;  %v1828_v1 = vmul.f32 %v1827_v24, %v1825_v13  ;;  %v1326_v21 = vsel %vm1324_vm6, %v1325_v53, %v9006_v18  ;;  %vm1421_vm12 = vweird.f32 %v12535_v47 }
 0x3f9   :  { %v1423_v43 = vand.u32 3, %v1422_v8  ;;  %v1522_v62 = vsel %vm12929_vm2, 0, %v1520_v54  ;;  %v1323_v61 = vsel %vm1321_vm13, %v9004_v41, %v1322_v25  ;;  %v1530_v14 = vxor.u32 2147483648, %v16001_v6 }
 0x3fa   :  { %v1526_v37 = vadd.s32 3, %v1522_v62  ;;  %vm16002_vm10 = vcmp.lt.s32.totalorder %v12839_v60, 0  ;;  %v1829_v2 = vxor.u32 2147483648, %v1828_v1  ;;  %v1327_v40 = vsel %vm1320_vm0, %v1323_v61, %v1326_v21  ;;  %v13614_v24 = vpop.eup %9011 }
 0x3fb   :  { %v1624_v19 = vsel %vm16002_vm10, %v1623_v48, %v15999_v39  ;;  %vm1425_vm8 = vcmp.eq.s32.totalorder %v1423_v43, 0  ;;  %v1533_v42 = vxor.u32 2147483648, %v16003_v58  ;;  %v1328_v11 = vsel %vm1317_vm5, nan, %v1327_v40 }
 0x3fc   :  { %v1427_v28 = vsel %vm1425_vm8, %v15996_v3, %v1426_v63  ;;  %vm1428_vm2 = vcmp.eq.s32.totalorder %v1423_v43, 2  ;;  %v1527_v41 = vand.u32 3, %v1526_v37  ;;  %v1830_v38 = vsel %vm1747_vm11, %v1829_v2, %v1828_v1  ;;  %v9014_v13 = vpop.eup %9013  ;;  %8326 = vmatmul.mubr.msk.bf16.gmra.mrb[16].mxu1 %vm4714_vm15, %v4064_v44 }
 0x3fd   :  { %v4035_v30 = vpack.c.bf16 %v1328_v11, %v1224_v9  ;;  %v1430_v18 = vsel %vm1428_vm2, %v1429_v36, %v13103_v16  ;;  %v1626_v12 = vsel %vm13260_vm14, 0, %v1624_v19  ;;  %v1833_v59 = vsel %vm13578_vm9, %v13019_v34, %v1830_v38 }
 0x3fe   :  { %vm1424_vm5 = vcmp.lt.s32.totalorder %v1423_v43, 2  ;;  %vm1525_vm0 = vweird.f32 %v15997_v57  ;;  %vm1529_vm13 = vcmp.eq.s32.totalorder %v1527_v41, 0  ;;  %9015 = vcosq.f32 %v1833_v59 }
 0x3ff   :  { %vm16004_vm6 = vcmask 293888   ;;  %v1431_v9 = vsel %vm1424_vm5, %v1427_v28, %v1430_v18  ;;  %v1531_v16 = vsel %vm1529_vm13, %v16003_v58, %v1530_v14  ;;  %vm1532_vm10 = vcmp.eq.s32.totalorder %v1527_v41, 2 }
 0x400   :  { %8267 = vmatprep.mubr.msk.bf16.mxu0 %vm16004_vm6, %v4035_v30  ;;  %9017 = vsinq.f32 %v1833_v59  ;;  %vm1528_vm14 = vcmp.lt.s32.totalorder %v1527_v41, 2  ;;  %v1534_v49 = vsel %vm1532_vm10, %v1533_v42, %v16001_v6  ;;  %v1630_v53 = vadd.s32 3, %v1626_v12  ;;  %v4105_v30 = vld [vmem:[%s15369_s4] sm:$0x3]  ;;  %s9210_s4 = smov 64  }
 0x401   :  { %v1535_v8 = vsel %vm1528_vm14, %v1531_v16, %v1534_v49  ;;  %v1634_v63 = vxor.u32 2147483648, %v13441_v56  ;;  %v1637_v25 = vxor.u32 2147483648, %v13428_v27  ;;  %v1727_v3 = vsub.s32 4, %v13332_v7 }
 0x402   :  { %v1432_v36 = vsel %vm1421_vm12, nan, %v1431_v9  ;;  %v1536_v44 = vsel %vm1525_vm0, nan, %v1535_v8  ;;  %vm1629_vm15 = vweird.f32 %v12839_v60  ;;  %v1631_v54 = vand.u32 3, %v1630_v53  ;;  %vm16005_vm12 = vmmov %vm16004_vm6 }
 0x403   :  { %v4036_v39 = vpack.c.bf16 %v1536_v44, %v1432_v36  ;;  %v1728_v48 = vsel %vm1643_vm3, %v1727_v3, %v13332_v7  ;;  %v1738_v1 = vxor.u32 2147483648, %v9014_v13  ;;  %v1831_v21 = vsub.s32 4, %v13437_v15  ;;  %v16006_v36 = vld [vmem:[#allocation62_spill] sm:$0xff] }
 0x404   :  { %vm1632_vm8 = vcmp.lt.s32.totalorder %v1631_v54, 2  ;;  %vm1633_vm2 = vcmp.eq.s32.totalorder %v1631_v54, 0  ;;  %vm1636_vm5 = vcmp.eq.s32.totalorder %v1631_v54, 2  ;;  %v1730_v47 = vsel %vm13477_vm7, 0, %v1728_v48  ;;  %v16007_v54 = vld [vmem:[#allocation39_spill] sm:$0xff]  ;;  %v16008_v48 = vld [vmem:[#allocation45_spill] sm:$0xff] }
 0x405   :  { %8268 = vmatmul.mubr.msk.bf16.gmra.mrb[68].mxu0 %vm16005_vm12, %v4036_v39  ;;  %v1635_v57 = vsel %vm1633_vm2, %v13428_v27, %v1634_v63  ;;  %v1638_v43 = vsel %vm1636_vm5, %v1637_v25, %v13441_v56  ;;  %v1734_v0 = vadd.s32 3, %v1730_v47  ;;  %v1832_v7 = vsel %vm1747_vm11, %v1831_v21, %v13437_v15  ;;  %v16011_v47 = vld [vmem:[#allocation43_spill] sm:$0xff]  ;;  %vm16022_vm2 = vmmov %vm16004_vm6 }
 0x406   :  { %v1639_v62 = vsel %vm1632_vm8, %v1635_v57, %v1638_v43  ;;  %v1741_v61 = vxor.u32 2147483648, %v13614_v24  ;;  %v1834_v37 = vsel %vm13578_vm9, 0, %v1832_v7  ;;  %v1935_v52 = vsub.s32 4, %v13281_v29  ;;  %v16013_v43 = vld [vmem:[#allocation49_spill] sm:$0xff] }
 0x407   :  { %v1640_v6 = vsel %vm1629_vm15, nan, %v1639_v62  ;;  %v1735_v14 = vand.u32 3, %v1734_v0  ;;  %v1838_v27 = vadd.s32 3, %v1834_v37  ;;  %v1946_v56 = vxor.u32 2147483648, %v13598_v32 }
 0x408   :  { %vm1733_vm3 = vweird.f32 %v13016_v23  ;;  %v1936_v15 = vsel %vm1851_vm1, %v1935_v52, %v13281_v29  ;;  %v1949_v19 = vxor.u32 2147483648, %v13590_v17  ;;  %v15581_v2 = vlaneseq  ;;  %v9016_v40 = vpop.eup %9015  ;;  %v16016_v52 = vld [vmem:[#allocation20_spill] sm:$0xff] }
 0x409   :  { %vm1736_vm7 = vcmp.lt.s32.totalorder %v1735_v14, 2  ;;  %vm1737_vm11 = vcmp.eq.s32.totalorder %v1735_v14, 0  ;;  %vm1740_vm9 = vcmp.eq.s32.totalorder %v1735_v14, 2  ;;  %v1839_v60 = vand.u32 3, %v1838_v27  ;;  %v16018_v27 = vld [vmem:[#allocation15_spill] sm:$0xff] }
 0x40a   :  { %v9018_v58 = vpop.eup %9017  ;;  %v1739_v42 = vsel %vm1737_vm11, %v13614_v24, %v1738_v1  ;;  %v1742_v11 = vsel %vm1740_vm9, %v1741_v61, %v9014_v13  ;;  %v1845_v28 = vxor.u32 2147483648, %v9016_v40  ;;  %v1938_v29 = vsel %vm13433_vm4, 0, %v1936_v15  ;;  %v16015_v61 = vld [vmem:[#allocation12_spill] sm:$0xff]  ;;  %v16020_v15 = vld [vmem:[#allocation6_spill] sm:$0xff] }
 0x40b   :  { %v1743_v41 = vsel %vm1736_vm7, %v1739_v42, %v1742_v11  ;;  %vm1840_vm1 = vcmp.lt.s32.totalorder %v1839_v60, 2  ;;  %vm1841_vm0 = vcmp.eq.s32.totalorder %v1839_v60, 0  ;;  %v1842_v38 = vxor.u32 2147483648, %v9018_v58  ;;  %v16027_v11 = vld [vmem:[#allocation57_spill] sm:$0xff] }
 0x40c   :  { %v1744_v18 = vsel %vm1733_vm3, nan, %v1743_v41  ;;  %vm1844_vm13 = vcmp.eq.s32.totalorder %v1839_v60, 2  ;;  %v1942_v24 = vadd.s32 3, %v1938_v29  ;;  %v4108_v12 = vshrl.u32 %v15581_v2, 7  ;;  %v16029_v29 = vld [vmem:[#allocation48_spill] sm:$0xff] }
 0x40d   :  { %v4037_v13 = vpack.c.bf16 %v1744_v18, %v1640_v6  ;;  %vm1837_vm4 = vweird.f32 %v13019_v34  ;;  %v1843_v45 = vsel %vm1841_vm0, %v9016_v40, %v1842_v38  ;;  %v1846_v59 = vsel %vm1844_vm13, %v1845_v28, %v9018_v58  ;;  %v16023_v40 = vld [vmem:[#allocation52_spill] sm:$0xff]  ;;  %v16025_v58 = vld [vmem:[#allocation61_spill] sm:$0xff]  ;;  %v16031_v38 = vld [vmem:[#allocation50_spill] sm:$0xff] }
 0x40e   :  { %v1847_v9 = vsel %vm1840_vm1, %v1843_v45, %v1846_v59  ;;  %v1943_v16 = vand.u32 3, %v1942_v24  ;;  %v4109_v49 = vsub.s32 0, %v4108_v12  ;;  %v4113_v53 = vsub.s32 1, %v4108_v12  ;;  %v16032_v18 = vld [vmem:[#allocation41_spill] sm:$0xff]  ;;  %v16033_v12 = vld [vmem:[#allocation26_spill] sm:$0xff] }
 0x40f   :  { %8271 = vmatprep.mubr.msk.bf16.mxu0 %vm16004_vm6, %v4037_v13  ;;  %v1848_v8 = vsel %vm1837_vm4, nan, %v1847_v9  ;;  %vm1941_vm8 = vweird.f32 %v13013_v5  ;;  %v13694_v5 = vpop.f32.mrb[44].mxu0  ;;  %vm16078_vm5 = vcmask 523264  }
 0x410   :  { %vm1944_vm10 = vcmp.lt.s32.totalorder %v1943_v16, 2  ;;  %vm1945_vm14 = vcmp.eq.s32.totalorder %v1943_v16, 0  ;;  %vm1948_vm15 = vcmp.eq.s32.totalorder %v1943_v16, 2  ;;  %v13675_v23 = vrot.slane %v4105_v30, %v4109_v49  ;;  %v4432_v7 = vpop.f32.mrb[45].mxu0  ;;  %v16038_v16 = vld [vmem:[#allocation14_spill] sm:$0xff]  ;;  %vm16079_vm12 = vmmov %vm16078_vm5 }
 0x411   :  { %v1947_v63 = vsel %vm1945_vm14, %v13590_v17, %v1946_v56  ;;  %v1950_v34 = vsel %vm1948_vm15, %v1949_v19, %v13598_v32  ;;  %v13680_v25 = vrot.slane %v4105_v30, %v4113_v53  ;;  %v16009_v32 = vld [vmem:[#allocation42_spill] sm:$0xff]  ;;  %v13720_v14 = vpop.f32.mrb[46].mxu0  ;;  %vm16082_vm3 = vmmov %vm16078_vm5 }
 0x412   :  { %v1951_v3 = vsel %vm1944_vm10, %v1947_v63, %v1950_v34  ;;  %v13684_v44 = vadd.f32 %v16006_v36, %v13675_v23  ;;  %v13688_v39 = vadd.f32 %v16007_v54, %v13675_v23  ;;  %v13692_v1 = vadd.f32 %v16008_v48, %v13675_v23  ;;  %v4436_v35 = vpop.f32.mrb[47].mxu0  ;;  %v16046_v48 = vld [vmem:[#allocation59_spill] sm:$0xff]  ;;  %vm16083_vm7 = vmmov %vm16082_vm3 }
 0x413   :  { %v1952_v17 = vsel %vm1941_vm8, nan, %v1951_v3  ;;  %v13698_v21 = vadd.f32 %v16009_v32, %v13680_v25  ;;  %v13702_v57 = vadd.f32 %v16011_v47, %v13680_v25  ;;  %v13706_v0 = vadd.f32 %v16013_v43, %v13680_v25  ;;  %v4440_v53 = vpop.f32.mrb[48].mxu0  ;;  %vm16084_vm11 = vmmov %vm16082_vm3 }
 0x414   :  { %v4038_v62 = vpack.c.bf16 %v1952_v17, %v1848_v8  ;;  %5620 = vrot.lane.b32.xlu0 %v13688_v39, %s9210_s4  ;;  %5618 = vrot.lane.b32.xlu1 %v13684_v44, %s9210_s4  ;;  %v13714_v37 = vadd.f32 %v16015_v61, %v13675_v23  ;;  %v13718_v6 = vadd.f32 %v16016_v52, %v13680_v25  ;;  %v16040_v8 = vld [vmem:[#allocation54_spill] sm:$0xff]  ;;  %v4442_v36 = vpop.f32.mrb[49].mxu0  ;;  %vm16085_vm9 = vmmov %vm16082_vm3 }
 0x415   :  { %16010 = vst [vmem:[#allocation11_spill] sm:$0xff] %v13698_v21  ;;  %16012 = vst [vmem:[#allocation51_spill] sm:$0xff] %v13702_v57  ;;  %v13724_v56 = vadd.f32 %v16018_v27, %v13680_v25  ;;  %v13728_v19 = vadd.f32 %v16020_v15, %v13680_v25  ;;  %v13733_v60 = vadd.f32 %v16023_v40, %v13680_v25  ;;  %v4444_v47 = vpop.f32.mrb[50].mxu0 }
 0x416   :  { %16014 = vst [vmem:[#allocation46_spill] sm:$0xff] %v13706_v0  ;;  %16017 = vst [vmem:[#allocation33_spill] sm:$0xff] %v13718_v6  ;;  %8272 = vmatmul.mubr.msk.bf16.gmra.mrb[72].mxu0 %vm16022_vm2, %v4038_v62  ;;  %v13737_v42 = vadd.f32 %v16025_v58, %v13680_v25  ;;  %v13741_v28 = vadd.f32 %v16027_v11, %v13680_v25  ;;  %v13745_v41 = vadd.f32 %v16029_v29, %v13680_v25  ;;  %v4446_v61 = vpop.f32.mrb[51].mxu0  ;;  %v16059_v11 = vld [vmem:[#allocation4_spill] sm:$0xff] }
 0x417   :  { %16019 = vst [vmem:[#allocation37_spill] sm:$0xff] %v13724_v56  ;;  %16021 = vst [vmem:[#allocation7_spill] sm:$0xff] %v13728_v19  ;;  %v13753_v30 = vadd.f32 %v16031_v38, %v13675_v23  ;;  %v13757_v24 = vadd.f32 %v16032_v18, %v13675_v23  ;;  %v13761_v13 = vadd.f32 %v16033_v12, %v13680_v25  ;;  %v16060_v38 = vld [vmem:[#allocation8_spill] sm:$0xff]  ;;  %v16061_v12 = vld [vmem:[#allocation13_spill] sm:$0xff] }
 0x418   :  { %16024 = vst [vmem:[#allocation19_spill] sm:$0xff] %v13733_v60  ;;  %16026 = vst [vmem:[#allocation21_spill] sm:$0xff] %v13737_v42  ;;  %5624 = vrot.lane.b32.xlu0 %v13714_v37, %s9210_s4  ;;  %5622 = vrot.lane.b32.xlu1 %v13692_v1, %s9210_s4  ;;  %v13765_v45 = vadd.f32 %v13172_v26, %v13680_v25  ;;  %v13769_v59 = vadd.f32 %v13184_v55, %v13680_v25  ;;  %v16041_v26 = vld [vmem:[#allocation31_spill] sm:$0xff] }
 0x419   :  { %16028 = vst [vmem:[#allocation58_spill] sm:$0xff] %v13741_v28  ;;  %16030 = vst [vmem:[#allocation2_spill] sm:$0xff] %v13745_v41  ;;  %v13773_v9 = vadd.f32 %v13204_v46, %v13680_v25  ;;  %v13777_v49 = vadd.f32 %v16038_v16, %v13680_v25  ;;  %v13781_v63 = vadd.f32 %v16040_v8, %v13675_v23  ;;  %v16043_v55 = vld [vmem:[#allocation23_spill] sm:$0xff]  ;;  %v16045_v46 = vld [vmem:[#allocation16_spill] sm:$0xff] }
 0x41a   :  { %16034 = vst [vmem:[#allocation3_spill] sm:$0xff] %v13761_v13  ;;  %16035 = vst [vmem:[#allocation29_spill] sm:$0xff] %v13765_v45  ;;  %v13785_v34 = vadd.f32 %v16041_v26, %v13680_v25  ;;  %v13789_v3 = vadd.f32 %v16043_v55, %v13680_v25  ;;  %v13797_v54 = vadd.f32 %v16045_v46, %v13675_v23  ;;  %v16062_v8 = vld [vmem:[#allocation36_spill] sm:$0xff]  ;;  %v16064_v46 = vld [vmem:[#allocation5_spill] sm:$0xff] }
 0x41b   :  { %16036 = vst [vmem:[#allocation38_spill] sm:$0xff] %v13769_v59  ;;  %16037 = vst [vmem:[#allocation22_spill] sm:$0xff] %v13773_v9  ;;  %v13801_v17 = vadd.f32 %v16046_v48, %v13680_v25  ;;  %v13805_v32 = vadd.f32 %v13392_v22, %v13680_v25  ;;  %v13809_v43 = vadd.f32 %v13402_v20, %v13680_v25  ;;  %v16055_v20 = vld [vmem:[#allocation60_spill] sm:$0xff] }
 0x41c   :  { %16039 = vst [vmem:[#allocation30_spill] sm:$0xff] %v13777_v49  ;;  %16042 = vst [vmem:[#allocation18_spill] sm:$0xff] %v13785_v34  ;;  %5628 = vrot.lane.b32.xlu0 %v13757_v24, %s9210_s4  ;;  %5626 = vrot.lane.b32.xlu1 %v13753_v30, %s9210_s4  ;;  %v13813_v62 = vadd.f32 %v13473_v51, %v13680_v25  ;;  %v13817_v52 = vadd.f32 %v13496_v33, %v13680_v25  ;;  %v16056_v51 = vld [vmem:[#allocation35_spill] sm:$0xff]  ;;  %v16063_v55 = vld [vmem:[#allocation32_spill] sm:$0xff] }
 0x41d   :  { %16044 = vst [vmem:[#allocation40_spill] sm:$0xff] %v13789_v3  ;;  %16047 = vst [vmem:[#allocation17_spill] sm:$0xff] %v13801_v17  ;;  %v13820_v27 = vadd.f32 %v4432_v7, %v13680_v25  ;;  %v13823_v22 = vadd.f32 %v4436_v35, %v13680_v25  ;;  %v13826_v15 = vadd.f32 %v4442_v36, %v13680_v25  ;;  %v16058_v35 = vld [vmem:[#allocation55_spill] sm:$0xff] }
 0x41e   :  { %16048 = vst [vmem:[#allocation25_spill] sm:$0xff] %v13805_v32  ;;  %16049 = vst [vmem:[#allocation53_spill] sm:$0xff] %v13809_v43  ;;  %v13830_v40 = vadd.f32 %v16055_v20, %v13675_v23  ;;  %v13838_v33 = vadd.f32 %v16056_v51, %v13675_v23  ;;  %v13841_v7 = vadd.f32 %v4446_v61, %v13680_v25  ;;  %v16065_v61 = vld [vmem:[#allocation9_spill] sm:$0xff]  ;;  %v8868_v43 = vld [vmem:[%s15370_s9 + $0x8] sm:$0xff]  }
 0x41f   :  { %16050 = vst [vmem:[#allocation27_spill] sm:$0xff] %v13813_v62  ;;  %16051 = vst [vmem:[#allocation28_spill] sm:$0xff] %v13817_v52  ;;  %v13845_v58 = vadd.f32 %v16058_v35, %v13675_v23  ;;  %v13849_v29 = vadd.f32 %v16059_v11, %v13675_v23  ;;  %v13857_v18 = vadd.f32 %v16060_v38, %v13675_v23  ;;  %v8865_v52 = vld [vmem:[%s15368_s7 + $0x10] sm:$0xff]  }
 0x420   :  { %16052 = vst [vmem:[#allocation44_spill] sm:$0xff] %v13820_v27  ;;  %16053 = vst [vmem:[#allocation24_spill] sm:$0xff] %v13823_v22  ;;  %5632 = vrot.lane.b32.xlu0 %v13797_v54, %s9210_s4  ;;  %5630 = vrot.lane.b32.xlu1 %v13781_v63, %s9210_s4  ;;  %v13861_v16 = vadd.f32 %v16061_v12, %v13675_v23  ;;  %v13869_v26 = vadd.f32 %v16062_v8, %v13675_v23 }
 0x421   :  { %16054 = vst [vmem:[#allocation47_spill] sm:$0xff] %v13826_v15  ;;  %16057 = vst [vmem:[#allocation34_spill] sm:$0xff] %v13841_v7  ;;  %v13873_v36 = vadd.f32 %v16063_v55, %v13675_v23  ;;  %v13881_v48 = vadd.f32 %v16064_v46, %v13675_v23  ;;  %v13885_v20 = vadd.f32 %v16065_v61, %v13675_v23 }
 0x422   :  { %v13893_v51 = vadd.f32 %v13379_v4, %v13675_v23  ;;  %v13897_v35 = vadd.f32 %v13397_v31, %v13675_v23  ;;  %v13908_v4 = vadd.f32 %v13466_v10, %v13675_v23  ;;  %v13912_v31 = vadd.f32 %v13492_v50, %v13675_v23  ;;  %vm16086_vm1 = vmmov %vm16082_vm3 }
 0x423   :  { %v13923_v61 = vadd.f32 %v13694_v5, %v13675_v23  ;;  %v13927_v10 = vadd.f32 %v13720_v14, %v13675_v23  ;;  %v13937_v7 = vadd.f32 %v4440_v53, %v13675_v23  ;;  %v13940_v5 = vadd.f32 %v4444_v47, %v13675_v23  ;;  %vm16087_vm0 = vmmov %vm16086_vm1 }
 0x424   :  { %5636 = vrot.lane.b32.xlu0 %v13838_v33, %s9210_s4  ;;  %5634 = vrot.lane.b32.xlu1 %v13830_v40, %s9210_s4  ;;  %v4450_v11 = vpop.f32.mrb[52].mxu0  ;;  %vm16088_vm13 = vmmov %vm16087_vm0 }
 0x425   :  { %v4452_v38 = vpop.f32.mrb[53].mxu0  ;;  %v13957_v47 = vadd.f32 %v4450_v11, %v13675_v23  ;;  %v8866_v11 = vld [vmem:[%s15368_s7 + $0x18] sm:$0xff]   ;;  %vm16089_vm4 = vmmov %vm16087_vm0 }
 0x426   :  { %v13904_v12 = vadd.f32 %v4452_v38, %v13680_v25  ;;  %v4454_v8 = vpop.f32.mrb[54].mxu0  ;;  %vm16090_vm6 = vmmov %vm16087_vm0 }
 0x427   :  { %v4456_v55 = vpop.f32.mrb[55].mxu0  ;;  %vm16091_vm10 = vmmov %vm16087_vm0 }
 0x428   :  { %5640 = vrot.lane.b32.xlu0 %v13849_v29, %s9210_s4  ;;  %5638 = vrot.lane.b32.xlu1 %v13845_v58, %s9210_s4  ;;  %16066 = vst [vmem:[#allocation10_spill] sm:$0xff] %v13904_v12  ;;  %v13919_v46 = vadd.f32 %v4456_v55, %v13680_v25  ;;  %vm16092_vm14 = vmmov %vm16087_vm0 }
 0x429   :  { %vm16097_vm15 = vmmov %vm16087_vm0 }
 0x42a   :  { %16067 = vst [vmem:[#allocation56_spill] sm:$0xff] %v13919_v46  ;;  %vm16098_vm8 = vmmov %vm16087_vm0 }
 0x42b   :  { %vm16099_vm2 = vmmov %vm16087_vm0 }
 0x42c   :  { %5644 = vrot.lane.b32.xlu0 %v13861_v16, %s9210_s4  ;;  %5642 = vrot.lane.b32.xlu1 %v13857_v18, %s9210_s4 }
 0x42e   :  { %v4460_v50 = vpop.f32.mrb[56].mxu0 }
 0x42f   :  { %v4462_v38 = vpop.f32.mrb[57].mxu0 }
 0x430   :  { %5648 = vrot.lane.b32.xlu0 %v13873_v36, %s9210_s4  ;;  %5646 = vrot.lane.b32.xlu1 %v13869_v26, %s9210_s4  ;;  %v13934_v2 = vadd.f32 %v4462_v38, %v13680_v25  ;;  %v4464_v55 = vpop.f32.mrb[58].mxu0  ;;  %v8864_v38 = vld [vmem:[%s15368_s7 + $0x8] sm:$0xff]  }
 0x431   :  { %v4466_v14 = vpop.f32.mrb[59].mxu0  ;;  %8331 = vmatprep.subr.bf16.mxu1 %v8864_v38 }
 0x432   :  { %16068 = vst [vmem:[#allocation62_spill] sm:$0xff] %v13934_v2  ;;  %v13947_v46 = vadd.f32 %v4466_v14, %v13680_v25  ;;  %v13960_v2 = vadd.f32 %v4454_v8, %v13675_v23  ;;  %8332 = vmatpush3.bf16.msra.mxu1 %v8864_v38  ;;  %v13979_v8 = vadd.f32 %v4464_v55, %v13675_v23 }
 0x433   :  { %8333 = vmatprep.subr.bf16.mxu1 %v8865_v52  ;;  %v13982_v38 = vadd.f32 %v4460_v50, %v13675_v23 }
 0x434   :  { %5652 = vrot.lane.b32.xlu0 %v13885_v20, %s9210_s4  ;;  %5650 = vrot.lane.b32.xlu1 %v13881_v48, %s9210_s4  ;;  %16069 = vst [vmem:[#allocation39_spill] sm:$0xff] %v13947_v46 }
 0x436   :  { %v4470_v53 = vpop.f32.mrb[60].mxu0  ;;  %8334 = vmatpush3.bf16.msra.mxu1 %v8865_v52 }
 0x437   :  { %v4472_v15 = vpop.f32.mrb[61].mxu0  ;;  %8335 = vmatprep.subr.bf16.mxu1 %v8866_v11 }
 0x438   :  { %5656 = vrot.lane.b32.xlu0 %v13897_v35, %s9210_s4  ;;  %5654 = vrot.lane.b32.xlu1 %v13893_v51, %s9210_s4  ;;  %v13963_v14 = vadd.f32 %v4472_v15, %v13680_v25  ;;  %v4474_v46 = vpop.f32.mrb[62].mxu0 }
 0x439   :  { %v4476_v12 = vpop.f32.mrb[63].mxu0 }
 0x43a   :  { %16070 = vst [vmem:[#allocation45_spill] sm:$0xff] %v13963_v14  ;;  %v13976_v15 = vadd.f32 %v4476_v12, %v13680_v25  ;;  %v13989_v14 = vadd.f32 %v4474_v46, %v13675_v23  ;;  %v13992_v25 = vadd.f32 %v4470_v53, %v13675_v23  ;;  %8336 = vmatpush3.bf16.msra.mxu1 %v8866_v11  ;;  %v8867_v11 = vld [vmem:[%s15370_s9] sm:$0xff]  }
 0x43b   :  { %8369 = vmatprep.subr.bf16.mxu0 %v8867_v11 }
 0x43c   :  { %5660 = vrot.lane.b32.xlu0 %v13912_v31, %s9210_s4  ;;  %5658 = vrot.lane.b32.xlu1 %v13908_v4, %s9210_s4  ;;  %16071 = vst [vmem:[#allocation42_spill] sm:$0xff] %v13976_v15  ;;  %16072 = vst [vmem:[#allocation43_spill] sm:$0xff] %v13989_v14 }
 0x43d   :  { %16073 = vst [vmem:[#allocation49_spill] sm:$0xff] %v13992_v25  ;;  %8370 = vmatpush3.bf16.msra.mxu0 %v8867_v11 }
 0x43e   :  { %8371 = vmatprep.subr.bf16.mxu0 %v8868_v43 }
 0x440   :  { %5664 = vrot.lane.b32.xlu0 %v13927_v10, %s9210_s4  ;;  %5662 = vrot.lane.b32.xlu1 %v13923_v61, %s9210_s4 }
 0x441   :  { %8372 = vmatpush3.bf16.msra.mxu0 %v8868_v43 }
 0x444   :  { %5668 = vrot.lane.b32.xlu0 %v13940_v5, %s9210_s4  ;;  %5666 = vrot.lane.b32.xlu1 %v13937_v7, %s9210_s4 }
 0x448   :  { %5672 = vrot.lane.b32.xlu0 %v13960_v2, %s9210_s4  ;;  %5670 = vrot.lane.b32.xlu1 %v13957_v47, %s9210_s4 }
 0x44c   :  { %5676 = vrot.lane.b32.xlu0 %v13979_v8, %s9210_s4  ;;  %5674 = vrot.lane.b32.xlu1 %v13982_v38, %s9210_s4 }
 0x450   :  { %5680 = vrot.lane.b32.xlu0 %v13989_v14, %s9210_s4  ;;  %5678 = vrot.lane.b32.xlu1 %v13992_v25, %s9210_s4 }
 0x470   :  { %v8299_v52 = vpop.f32.mrb[20].mxu1 }
 0x471   :  { %v4803_v12 = vpop.f32.mrb[21].mxu1 }
 0x472   :  { %v8300_v50 = vpop.f32.mrb[22].mxu1 }
 0x473   :  { %v4806_v55 = vpop.f32.mrb[23].mxu1 }
 0x478   :  { %v8303_v15 = vpop.f32.mrb[24].mxu1 }
 0x479   :  { %v4819_v22 = vpop.f32.mrb[25].mxu1 }
 0x47a   :  { %v8304_v62 = vpop.f32.mrb[26].mxu1 }
 0x47b   :  { %v4822_v27 = vpop.f32.mrb[27].mxu1 }
 0x481   :  { %v13998_v46 = vpop.f32.mrb[28].mxu1 }
 0x482   :  { %v14000_v17 = vpop.f32.mrb[29].mxu1 }
 0x483   :  { %v14002_v23 = vpop.f32.mrb[30].mxu1 }
 0x484   :  { %v14004_v53 = vpop.f32.mrb[31].mxu1 }
 0x4ae   :  { %v14012_v3 = vpop.f32.mrb[0].mxu1 }
 0x4af   :  { %v14014_v32 = vpop.f32.mrb[1].mxu1 }
 0x4b0   :  { %v14016_v9 = vpop.f32.mrb[2].mxu1 }
 0x4b1   :  { %v14018_v34 = vpop.f32.mrb[3].mxu1 }
 0x4b7   :  { %v14020_v59 = vpop.f32.mrb[4].mxu1 }
 0x4b8   :  { %v14022_v49 = vpop.f32.mrb[5].mxu1 }
 0x4b9   :  { %v14024_v41 = vpop.f32.mrb[6].mxu1 }
 0x4ba   :  { %v14026_v45 = vpop.f32.mrb[7].mxu1 }
 0x4bb   :  { %v8265_v28 = vpop.f32.mrb[64].mxu0 }
 0x4bc   :  { %v4812_v11 = vadd.f32 %v8299_v52, %v8265_v28  ;;  %v4587_v13 = vpop.f32.mrb[65].mxu0 }
 0x4bd   :  { %v4804_v43 = vadd.f32 %v4803_v12, %v4587_v13  ;;  %v8266_v19 = vpop.f32.mrb[66].mxu0 }
 0x4be   :  { %v4815_v42 = vadd.f32 %v8300_v50, %v8266_v19  ;;  %v4590_v56 = vpop.f32.mrb[67].mxu0  ;;  %v14034_v21 = vadd.f32 %v4812_v11, %v13692_v1 }
 0x4bf   :  { %v14029_v60 = vadd.f32 %v4804_v43, %v13684_v44  ;;  %v4807_v57 = vadd.f32 %v4806_v55, %v4590_v56  ;;  %v14031_v6 = vpop.f32.mrb[8].mxu1 }
 0x4c0   :  { %16075 = vst [vmem:[#allocation20_spill] sm:$0xff] %v14034_v21  ;;  %v14037_v0 = vadd.f32 %v4815_v42, %v13714_v37  ;;  %v14039_v25 = vpop.f32.mrb[9].mxu1  ;;  %v4964_v1 = vmax.f32 %v14034_v21, 0.0 }
 0x4c1   :  { %16074 = vst [vmem:[#allocation12_spill] sm:$0xff] %v14029_v60  ;;  %v14042_v28 = vadd.f32 %v4807_v57, %v13688_v39  ;;  %v14044_v13 = vpop.f32.mrb[10].mxu1  ;;  %v4962_v56 = vmax.f32 %v14029_v60, 0.0 }
 0x4c2   :  { %16076 = vst [vmem:[#allocation15_spill] sm:$0xff] %v14037_v0  ;;  %v4965_v19 = vmax.f32 %v14037_v0, 0.0  ;;  %v14047_v44 = vpop.f32.mrb[11].mxu1 }
 0x4c3   :  { %16077 = vst [vmem:[#allocation6_spill] sm:$0xff] %v14042_v28  ;;  %v4963_v52 = vmax.f32 %v14042_v28, 0.0 }
 0x4c4   :  { %v4995_v37 = vpack.c.bf16 %v4965_v19, %v4964_v1 }
 0x4c5   :  { %v4994_v12 = vpack.c.bf16 %v4963_v52, %v4962_v56 }
 0x4c7   :  { %8337 = vmatprep.mubr.msk.bf16.mxu1 %vm16078_vm5, %v4994_v12  ;;  %v14053_v42 = vpop.f32.mrb[12].mxu1  ;;  %vm16100_vm5 = vmmov %vm16087_vm0 }
 0x4c8   :  { %8338 = vmatmul.mubr.msk.bf16.vlgmr.msra.gmra.mrb[32].mxu1 %vm16079_vm12, %v4995_v37  ;;  %v14056_v39 = vpop.f32.mrb[13].mxu1  ;;  %vm16101_vm12 = vmmov %vm16087_vm0 }
 0x4c9   :  { %v14058_v57 = vpop.f32.mrb[14].mxu1 }
 0x4ca   :  { %v14060_v50 = vpop.f32.mrb[15].mxu1 }
 0x4cf   :  { %v14062_v55 = vpop.f32.mrb[16].mxu1 }
 0x4d0   :  { %16080 = vst [vmem:[#allocation52_spill] sm:$0xff] %v14062_v55  ;;  %v14064_v11 = vpop.f32.mrb[17].mxu1 }
 0x4d1   :  { %v14066_v43 = vpop.f32.mrb[18].mxu1 }
 0x4d2   :  { %16081 = vst [vmem:[#allocation61_spill] sm:$0xff] %v14066_v43  ;;  %v14068_v56 = vpop.f32.mrb[19].mxu1 }
 0x4d8   :  { %v8269_v19 = vpop.f32.mrb[68].mxu0 }
 0x4d9   :  { %v4828_v52 = vadd.f32 %v8303_v15, %v8269_v19  ;;  %v4603_v1 = vpop.f32.mrb[69].mxu0 }
 0x4da   :  { %v4820_v12 = vadd.f32 %v4819_v22, %v4603_v1  ;;  %v8270_v28 = vpop.f32.mrb[70].mxu0  ;;  %v14093_v1 = vadd.f32 %v14018_v34, %v13861_v16 }
 0x4db   :  { %v4831_v37 = vadd.f32 %v8304_v62, %v8270_v28  ;;  %v4606_v0 = vpop.f32.mrb[71].mxu0  ;;  %v14074_v14 = vadd.f32 %v4828_v52, %v13781_v63 }
 0x4dc   :  { %v14071_v60 = vadd.f32 %v4820_v12, %v13753_v30  ;;  %v4823_v21 = vadd.f32 %v4822_v27, %v4606_v0 }
 0x4dd   :  { %v14077_v55 = vadd.f32 %v4831_v37, %v13797_v54  ;;  %v4968_v28 = vmax.f32 %v14074_v14, 0.0 }
 0x4de   :  { %v14080_v43 = vadd.f32 %v4823_v21, %v13757_v24  ;;  %v4966_v22 = vmax.f32 %v14071_v60, 0.0 }
 0x4df   :  { %v4969_v15 = vmax.f32 %v14077_v55, 0.0 }
 0x4e0   :  { %v4967_v62 = vmax.f32 %v14080_v43, 0.0 }
 0x4e1   :  { %v4997_v19 = vpack.c.bf16 %v4969_v15, %v4968_v28  ;;  %v14129_v28 = vadd.f32 %v14012_v3, %v13869_v26  ;;  %v14143_v3 = vadd.f32 %v14024_v41, %v13897_v35 }
 0x4e2   :  { %v4996_v30 = vpack.c.bf16 %v4967_v62, %v4966_v22  ;;  %v14124_v62 = vadd.f32 %v14026_v45, %v13885_v20 }
 0x4e3   :  { %v4976_v45 = vmax.f32 %v14129_v28, 0.0  ;;  %v4981_v41 = vmax.f32 %v14143_v3, 0.0 }
 0x4e4   :  { %8341 = vmatprep.mubr.msk.bf16.mxu1 %vm16082_vm3, %v4996_v30  ;;  %v14134_v30 = vadd.f32 %v14022_v49, %v13881_v48  ;;  %v14147_v49 = vadd.f32 %v14047_v44, %v13912_v31  ;;  %v14151_v48 = vadd.f32 %v14020_v59, %v13893_v51  ;;  %v14165_v59 = vadd.f32 %v14044_v13, %v13927_v10  ;;  %vm16102_vm3 = vmmov %vm16087_vm0 }
 0x4e5   :  { %8342 = vmatmul.mubr.msk.bf16.gmra.mrb[36].mxu1 %vm16083_vm7, %v4997_v19  ;;  %vm16103_vm7 = vmmov %vm16087_vm0 }
 0x4e6   :  { %v4978_v20 = vmax.f32 %v14134_v30, 0.0  ;;  %v4983_v35 = vmax.f32 %v14147_v49, 0.0  ;;  %v4985_v10 = vmax.f32 %v14165_v59, 0.0 }
 0x4e9   :  { %v8273_v0 = vpop.f32.mrb[72].mxu0 }
 0x4ea   :  { %v4844_v63 = vadd.f32 %v13998_v46, %v8273_v0  ;;  %v4619_v54 = vpop.f32.mrb[73].mxu0  ;;  %v14156_v0 = vadd.f32 %v14039_v25, %v13908_v4  ;;  %v14169_v4 = vadd.f32 %v14060_v50, %v13940_v5  ;;  %v14173_v25 = vadd.f32 %v14031_v6, %v13923_v61 }
 0x4eb   :  { %v4836_v21 = vadd.f32 %v14000_v17, %v4619_v54  ;;  %v8274_v24 = vpop.f32.mrb[74].mxu0  ;;  %v14107_v17 = vadd.f32 %v14014_v32, %v13857_v18  ;;  %v14120_v32 = vadd.f32 %v14016_v9, %v13873_v36  ;;  %v4979_v36 = vmax.f32 %v14124_v62, 0.0 }
 0x4ec   :  { %v4847_v27 = vadd.f32 %v14002_v23, %v8274_v24  ;;  %v4622_v52 = vpop.f32.mrb[75].mxu0  ;;  %v14100_v15 = vadd.f32 %v4844_v63, %v13845_v58  ;;  %v4980_v63 = vmax.f32 %v14151_v48, 0.0  ;;  %v4982_v31 = vmax.f32 %v14156_v0, 0.0 }
 0x4ed   :  { %v14096_v12 = vadd.f32 %v4836_v21, %v13830_v40  ;;  %v4839_v37 = vadd.f32 %v14004_v53, %v4622_v52  ;;  %v4975_v40 = vmax.f32 %v14093_v1, 0.0  ;;  %v4977_v9 = vmax.f32 %v14120_v32, 0.0  ;;  %v16093_v52 = vld [vmem:[#allocation43_spill] sm:$0xff] }
 0x4ee   :  { %v14103_v46 = vadd.f32 %v4847_v27, %v13849_v29  ;;  %v4972_v58 = vmax.f32 %v14100_v15, 0.0  ;;  %v4974_v29 = vmax.f32 %v14107_v17, 0.0  ;;  %v5002_v26 = vpack.c.bf16 %v4979_v36, %v4978_v20 }
 0x4ef   :  { %v14110_v23 = vadd.f32 %v4839_v37, %v13838_v33  ;;  %v4970_v16 = vmax.f32 %v14096_v12, 0.0  ;;  %v5001_v19 = vpack.c.bf16 %v4977_v9, %v4976_v45  ;;  %v5003_v44 = vpack.c.bf16 %v4981_v41, %v4980_v63 }
 0x4f0   :  { %v4973_v34 = vmax.f32 %v14103_v46, 0.0  ;;  %v5000_v33 = vpack.c.bf16 %v4975_v40, %v4974_v29  ;;  %v5004_v51 = vpack.c.bf16 %v4983_v35, %v4982_v31  ;;  %v14178_v54 = vadd.f32 %v14056_v39, %v13937_v7  ;;  %v16096_v40 = vld [vmem:[#allocation52_spill] sm:$0xff]  ;;  %v8870_v29 = vld [vmem:[%s15370_s9 + $0x18] sm:$0xff]  }
 0x4f1   :  { %v4971_v53 = vmax.f32 %v14110_v23, 0.0  ;;  %v4987_v13 = vmax.f32 %v14169_v4, 0.0  ;;  %v4984_v21 = vmax.f32 %v14173_v25, 0.0  ;;  %v14187_v6 = vadd.f32 %v14058_v57, %v13960_v2 }
 0x4f2   :  { %v4999_v18 = vpack.c.bf16 %v4973_v34, %v4972_v58  ;;  %v4986_v5 = vmax.f32 %v14178_v54, 0.0  ;;  %v14191_v7 = vadd.f32 %v14068_v56, %v13979_v8  ;;  %v14195_v39 = vadd.f32 %v14053_v42, %v13957_v47  ;;  %v16094_v47 = vld [vmem:[#allocation61_spill] sm:$0xff]  ;;  %v8869_v58 = vld [vmem:[%s15370_s9 + $0x10] sm:$0xff]  }
 0x4f3   :  { %v4998_v22 = vpack.c.bf16 %v4971_v53, %v4970_v16  ;;  %v5005_v50 = vpack.c.bf16 %v4985_v10, %v4984_v21  ;;  %v14200_v24 = vadd.f32 %v14064_v11, %v13982_v38  ;;  %v4989_v2 = vmax.f32 %v14187_v6, 0.0  ;;  %v16095_v34 = vld [vmem:[#allocation49_spill] sm:$0xff]  ;;  %8373 = vmatprep.subr.bf16.mxu0 %v8869_v58 }
 0x4f4   :  { %v5006_v61 = vpack.c.bf16 %v4987_v13, %v4986_v5  ;;  %v4991_v57 = vmax.f32 %v14191_v7, 0.0  ;;  %v4988_v27 = vmax.f32 %v14195_v39, 0.0  ;;  %v14209_v42 = vadd.f32 %v16094_v47, %v16093_v52  ;;  %8374 = vmatpush3.bf16.msra.mxu0 %v8869_v58 }
 0x4f5   :  { %8345 = vmatprep.mubr.msk.bf16.mxu1 %vm16084_vm11, %v4998_v22  ;;  %v4990_v8 = vmax.f32 %v14200_v24, 0.0  ;;  %v14213_v38 = vadd.f32 %v16096_v40, %v16095_v34  ;;  %8375 = vmatprep.subr.bf16.mxu0 %v8870_v29  ;;  %v8871_v22 = vld [vmem:[%s15368_s7 + $0x20] sm:$0xff]   ;;  %vm16104_vm11 = vmmov %vm16087_vm0 }
 0x4f6   :  { %8346 = vmatmul.mubr.msk.bf16.gmra.mrb[40].mxu1 %vm16085_vm9, %v4999_v18  ;;  %v5007_v56 = vpack.c.bf16 %v4989_v2, %v4988_v27  ;;  %v4993_v11 = vmax.f32 %v14209_v42, 0.0  ;;  %8409 = vmatprep.subr.bf16.mxu1 %v8871_v22  ;;  %v14232_v18 = vld [vmem:[%s15371_s8] ss:$0 sm:$0xff]  ;;  %vm16105_vm9 = vmmov %vm16087_vm0 }
 0x4f7   :  { %8349 = vmatprep.mubr.msk.bf16.mxu1 %vm16086_vm1, %v5000_v33  ;;  %v5008_v37 = vpack.c.bf16 %v4991_v57, %v4990_v8  ;;  %v4992_v16 = vmax.f32 %v14213_v38, 0.0  ;;  %8410 = vmatpush3.bf16.msra.mxu1 %v8871_v22  ;;  %vm16106_vm1 = vmmov %vm16087_vm0 }
 0x4f8   :  { %8376 = vmatpush3.bf16.msra.mxu0 %v8870_v29 }
 0x4f9   :  { %v5009_v53 = vpack.c.bf16 %v4993_v11, %v4992_v16 }
 0x4fe   :  { %8350 = vmatmul.mubr.msk.bf16.gmra.mrb[44].mxu1 %vm16087_vm0, %v5001_v19 }
 0x4ff   :  { %8353 = vmatprep.mubr.msk.bf16.mxu1 %vm16088_vm13, %v5002_v26  ;;  %vm16107_vm13 = vmmov %vm16087_vm0 }
 0x506   :  { %8354 = vmatmul.mubr.msk.bf16.gmra.mrb[48].mxu1 %vm16089_vm4, %v5003_v44  ;;  %vm16108_vm4 = vmmov %vm16087_vm0 }
 0x507   :  { %8357 = vmatprep.mubr.msk.bf16.mxu1 %vm16090_vm6, %v5004_v51  ;;  %vm16109_vm6 = vmmov %vm16087_vm0 }
 0x50e   :  { %8358 = vmatmul.mubr.msk.bf16.gmra.mrb[52].mxu1 %vm16091_vm10, %v5005_v50  ;;  %vm16110_vm10 = vmmov %vm16087_vm0 }
 0x50f   :  { %8361 = vmatprep.mubr.msk.bf16.mxu1 %vm16092_vm14, %v5006_v61  ;;  %vm16111_vm14 = vmmov %vm16087_vm0 }
 0x516   :  { %8362 = vmatmul.mubr.msk.bf16.gmra.mrb[56].mxu1 %vm16097_vm15, %v5007_v56  ;;  %vm16112_vm15 = vmmov %vm16087_vm0 }
 0x517   :  { %8365 = vmatprep.mubr.msk.bf16.mxu1 %vm16098_vm8, %v5008_v37  ;;  %vm16113_vm8 = vmmov %vm16087_vm0 }
 0x51e   :  { %8366 = vmatmul.mubr.msk.bf16.gmra.mrb[60].mxu1 %vm16099_vm2, %v5009_v53  ;;  %vm16114_vm2 = vmmov %vm16087_vm0 }
 0x59b   :  { %v8339_v33 = vpop.f32.mrb[32].mxu1 }
 0x59c   :  { %v5140_v9 = vadd.f32 %v8339_v33, %v14232_v18  ;;  %v5131_v36 = vpop.f32.mrb[33].mxu1 }
 0x59d   :  { %v5132_v45 = vadd.f32 %v14232_v18, %v5131_v36  ;;  %v8340_v20 = vpop.f32.mrb[34].mxu1 }
 0x59e   :  { %v5143_v19 = vadd.f32 %v8340_v20, %v14232_v18  ;;  %v5134_v26 = vpop.f32.mrb[35].mxu1  ;;  %v5260_v35 = vmax.f32 %v5140_v9, 0.0 }
 0x59f   :  { %v5135_v41 = vadd.f32 %v14232_v18, %v5134_v26  ;;  %v5258_v31 = vmax.f32 %v5132_v45, 0.0 }
 0x5a0   :  { %v5261_v63 = vmax.f32 %v5143_v19, 0.0 }
 0x5a1   :  { %v5259_v44 = vmax.f32 %v5135_v41, 0.0 }
 0x5a2   :  { %v5291_v51 = vpack.c.bf16 %v5261_v63, %v5260_v35 }
 0x5a3   :  { %v5290_v10 = vpack.c.bf16 %v5259_v44, %v5258_v31 }
 0x5a5   :  { %8377 = vmatprep.mubr.msk.bf16.mxu0 %vm16100_vm5, %v5290_v10  ;;  %vm16119_vm5 = vmmov %vm16087_vm0 }
 0x5a6   :  { %8378 = vmatmul.mubr.msk.bf16.vlgmr.msra.gmra.mrb[76].mxu0 %vm16101_vm12, %v5291_v51  ;;  %vm16120_vm12 = vmmov %vm16087_vm0 }
 0x5b8   :  { %v8343_v13 = vpop.f32.mrb[36].mxu1 }
 0x5b9   :  { %v5156_v21 = vadd.f32 %v8343_v13, %v14232_v18  ;;  %v5147_v5 = vpop.f32.mrb[37].mxu1 }
 0x5ba   :  { %v5148_v50 = vadd.f32 %v14232_v18, %v5147_v5  ;;  %v8344_v61 = vpop.f32.mrb[38].mxu1 }
 0x5bb   :  { %v5159_v2 = vadd.f32 %v8344_v61, %v14232_v18  ;;  %v5150_v57 = vpop.f32.mrb[39].mxu1  ;;  %v5264_v8 = vmax.f32 %v5156_v21, 0.0 }
 0x5bc   :  { %v5151_v27 = vadd.f32 %v14232_v18, %v5150_v57  ;;  %v5262_v52 = vmax.f32 %v5148_v50, 0.0 }
 0x5bd   :  { %v5265_v56 = vmax.f32 %v5159_v2, 0.0 }
 0x5be   :  { %v5263_v47 = vmax.f32 %v5151_v27, 0.0 }
 0x5bf   :  { %v5293_v37 = vpack.c.bf16 %v5265_v56, %v5264_v8 }
 0x5c0   :  { %v5292_v34 = vpack.c.bf16 %v5263_v47, %v5262_v52 }
 0x5c2   :  { %8381 = vmatprep.mubr.msk.bf16.mxu0 %vm16102_vm3, %v5292_v34  ;;  %vm16121_vm3 = vmmov %vm16087_vm0 }
 0x5c3   :  { %8382 = vmatmul.mubr.msk.bf16.gmra.mrb[80].mxu0 %vm16103_vm7, %v5293_v37  ;;  %vm16122_vm7 = vmmov %vm16087_vm0 }
 0x5c9   :  { %v8347_v40 = vpop.f32.mrb[40].mxu1 }
 0x5ca   :  { %v5172_v11 = vadd.f32 %v8347_v40, %v14232_v18  ;;  %v5163_v16 = vpop.f32.mrb[41].mxu1 }
 0x5cb   :  { %v5164_v53 = vadd.f32 %v14232_v18, %v5163_v16  ;;  %v8348_v58 = vpop.f32.mrb[42].mxu1 }
 0x5cc   :  { %v5175_v29 = vadd.f32 %v8348_v58, %v14232_v18  ;;  %v5166_v22 = vpop.f32.mrb[43].mxu1  ;;  %v5268_v9 = vmax.f32 %v5172_v11, 0.0 }
 0x5cd   :  { %v5167_v33 = vadd.f32 %v14232_v18, %v5166_v22  ;;  %v5266_v45 = vmax.f32 %v5164_v53, 0.0 }
 0x5ce   :  { %v5269_v36 = vmax.f32 %v5175_v29, 0.0 }
 0x5cf   :  { %v5267_v20 = vmax.f32 %v5167_v33, 0.0 }
 0x5d0   :  { %v5295_v19 = vpack.c.bf16 %v5269_v36, %v5268_v9 }
 0x5d1   :  { %v5294_v26 = vpack.c.bf16 %v5267_v20, %v5266_v45  ;;  %v8351_v41 = vpop.f32.mrb[44].mxu1 }
 0x5d2   :  { %v5188_v35 = vadd.f32 %v8351_v41, %v14232_v18  ;;  %v5179_v63 = vpop.f32.mrb[45].mxu1 }
 0x5d3   :  { %v5180_v31 = vadd.f32 %v14232_v18, %v5179_v63  ;;  %v8352_v44 = vpop.f32.mrb[46].mxu1  ;;  %8385 = vmatprep.mubr.msk.bf16.mxu0 %vm16104_vm11, %v5294_v26  ;;  %vm16123_vm11 = vmmov %vm16087_vm0 }
 0x5d4   :  { %v5191_v51 = vadd.f32 %v8352_v44, %v14232_v18  ;;  %v5182_v10 = vpop.f32.mrb[47].mxu1  ;;  %8386 = vmatmul.mubr.msk.bf16.gmra.mrb[84].mxu0 %vm16105_vm9, %v5295_v19  ;;  %v5272_v21 = vmax.f32 %v5188_v35, 0.0  ;;  %vm16124_vm9 = vmmov %vm16087_vm0 }
 0x5d5   :  { %v5183_v13 = vadd.f32 %v14232_v18, %v5182_v10  ;;  %v5270_v50 = vmax.f32 %v5180_v31, 0.0 }
 0x5d6   :  { %v5273_v5 = vmax.f32 %v5191_v51, 0.0 }
 0x5d7   :  { %v5271_v61 = vmax.f32 %v5183_v13, 0.0 }
 0x5d8   :  { %v5297_v2 = vpack.c.bf16 %v5273_v5, %v5272_v21 }
 0x5d9   :  { %v5296_v57 = vpack.c.bf16 %v5271_v61, %v5270_v50  ;;  %v8355_v27 = vpop.f32.mrb[48].mxu1 }
 0x5da   :  { %v5204_v8 = vadd.f32 %v8355_v27, %v14232_v18  ;;  %v5195_v56 = vpop.f32.mrb[49].mxu1 }
 0x5db   :  { %v5196_v52 = vadd.f32 %v14232_v18, %v5195_v56  ;;  %v8356_v47 = vpop.f32.mrb[50].mxu1  ;;  %8389 = vmatprep.mubr.msk.bf16.mxu0 %vm16106_vm1, %v5296_v57  ;;  %vm16125_vm1 = vmmov %vm16087_vm0 }
 0x5dc   :  { %v5207_v37 = vadd.f32 %v8356_v47, %v14232_v18  ;;  %v5198_v34 = vpop.f32.mrb[51].mxu1  ;;  %8390 = vmatmul.mubr.msk.bf16.gmra.mrb[88].mxu0 %vm16087_vm0, %v5297_v2  ;;  %v5276_v11 = vmax.f32 %v5204_v8, 0.0 }
 0x5dd   :  { %v5199_v40 = vadd.f32 %v14232_v18, %v5198_v34  ;;  %v5274_v53 = vmax.f32 %v5196_v52, 0.0 }
 0x5de   :  { %v5277_v16 = vmax.f32 %v5207_v37, 0.0 }
 0x5df   :  { %v5275_v58 = vmax.f32 %v5199_v40, 0.0 }
 0x5e0   :  { %v5299_v29 = vpack.c.bf16 %v5277_v16, %v5276_v11 }
 0x5e1   :  { %v5298_v22 = vpack.c.bf16 %v5275_v58, %v5274_v53  ;;  %v8359_v33 = vpop.f32.mrb[52].mxu1 }
 0x5e2   :  { %v5220_v9 = vadd.f32 %v8359_v33, %v14232_v18  ;;  %v5211_v36 = vpop.f32.mrb[53].mxu1 }
 0x5e3   :  { %v5212_v45 = vadd.f32 %v14232_v18, %v5211_v36  ;;  %v8360_v20 = vpop.f32.mrb[54].mxu1  ;;  %8393 = vmatprep.mubr.msk.bf16.mxu0 %vm16107_vm13, %v5298_v22  ;;  %vm16126_vm13 = vmmov %vm16087_vm0 }
 0x5e4   :  { %v5223_v19 = vadd.f32 %v8360_v20, %v14232_v18  ;;  %v5214_v26 = vpop.f32.mrb[55].mxu1  ;;  %8394 = vmatmul.mubr.msk.bf16.gmra.mrb[92].mxu0 %vm16108_vm4, %v5299_v29  ;;  %v5280_v35 = vmax.f32 %v5220_v9, 0.0  ;;  %vm16127_vm4 = vmmov %vm16087_vm0 }
 0x5e5   :  { %v5215_v41 = vadd.f32 %v14232_v18, %v5214_v26  ;;  %v5278_v31 = vmax.f32 %v5212_v45, 0.0 }
 0x5e6   :  { %v5281_v63 = vmax.f32 %v5223_v19, 0.0 }
 0x5e7   :  { %v5279_v44 = vmax.f32 %v5215_v41, 0.0  ;;  %v8872_v41 = vld [vmem:[%s15368_s7 + $0x28] sm:$0xff]  }
 0x5e8   :  { %v5301_v51 = vpack.c.bf16 %v5281_v63, %v5280_v35  ;;  %v8873_v35 = vld [vmem:[%s15368_s7 + $0x30] sm:$0xff]   ;;  %8411 = vmatprep.subr.bf16.mxu1 %v8872_v41  ;;  %v8875_v63 = vld [vmem:[%s15370_s9 + $0x20] sm:$0xff]  }
 0x5e9   :  { %v5300_v10 = vpack.c.bf16 %v5279_v44, %v5278_v31  ;;  %v8363_v13 = vpop.f32.mrb[56].mxu1  ;;  %8412 = vmatpush3.bf16.msra.mxu1 %v8872_v41  ;;  %v8876_v31 = vld [vmem:[%s15370_s9 + $0x28] sm:$0xff]   ;;  %8449 = vmatprep.subr.bf16.mxu0 %v8875_v63  ;;  %v14300_v44 = vld [vmem:[%s15372_s10] ss:$0 sm:$0xff] }
 0x5ea   :  { %v5236_v21 = vadd.f32 %v8363_v13, %v14232_v18  ;;  %v5227_v5 = vpop.f32.mrb[57].mxu1  ;;  %8413 = vmatprep.subr.bf16.mxu1 %v8873_v35  ;;  %8450 = vmatpush3.bf16.msra.mxu0 %v8875_v63 }
 0x5eb   :  { %v5228_v50 = vadd.f32 %v14232_v18, %v5227_v5  ;;  %v8364_v61 = vpop.f32.mrb[58].mxu1  ;;  %8397 = vmatprep.mubr.msk.bf16.mxu0 %vm16109_vm6, %v5300_v10  ;;  %8451 = vmatprep.subr.bf16.mxu0 %v8876_v31  ;;  %v5621_v10 = vpop.permute.xlu0 %5620  ;;  %vm16128_vm6 = vmmov %vm16087_vm0 }
 0x5ec   :  { %v5239_v2 = vadd.f32 %v8364_v61, %v14232_v18  ;;  %v5230_v57 = vpop.f32.mrb[59].mxu1  ;;  %8398 = vmatmul.mubr.msk.bf16.gmra.mrb[96].mxu0 %vm16110_vm10, %v5301_v51  ;;  %v5284_v8 = vmax.f32 %v5236_v21, 0.0  ;;  %v5619_v5 = vpop.permute.xlu1 %5618  ;;  %vm16129_vm10 = vmmov %vm16087_vm0 }
 0x5ed   :  { %v5231_v27 = vadd.f32 %v14232_v18, %v5230_v57  ;;  %v5282_v52 = vmax.f32 %v5228_v50, 0.0  ;;  %8414 = vmatpush3.bf16.msra.mxu1 %v8873_v35 }
 0x5ee   :  { %v5285_v56 = vmax.f32 %v5239_v2, 0.0  ;;  %8452 = vmatpush3.bf16.msra.mxu0 %v8876_v31  ;;  %v16115_v2 = vld [vmem:[#allocation20_spill] sm:$0xff] }
 0x5ef   :  { %v5283_v47 = vmax.f32 %v5231_v27, 0.0 }
 0x5f0   :  { %v5303_v37 = vpack.c.bf16 %v5285_v56, %v5284_v8  ;;  %v16116_v56 = vld [vmem:[#allocation12_spill] sm:$0xff] }
 0x5f1   :  { %v5302_v34 = vpack.c.bf16 %v5283_v47, %v5282_v52  ;;  %v8367_v40 = vpop.f32.mrb[60].mxu1 }
 0x5f2   :  { %v5252_v11 = vadd.f32 %v8367_v40, %v14232_v18  ;;  %v5243_v16 = vpop.f32.mrb[61].mxu1  ;;  %v5625_v40 = vpop.permute.xlu0 %5624 }
 0x5f3   :  { %v5244_v53 = vadd.f32 %v14232_v18, %v5243_v16  ;;  %v8368_v58 = vpop.f32.mrb[62].mxu1  ;;  %8401 = vmatprep.mubr.msk.bf16.mxu0 %vm16111_vm14, %v5302_v34  ;;  %vm16130_vm14 = vmmov %vm16087_vm0 }
 0x5f4   :  { %v5255_v29 = vadd.f32 %v8368_v58, %v14232_v18  ;;  %v5246_v22 = vpop.f32.mrb[63].mxu1  ;;  %8402 = vmatmul.mubr.msk.bf16.gmra.mrb[100].mxu0 %vm16112_vm15, %v5303_v37  ;;  %v5288_v9 = vmax.f32 %v5252_v11, 0.0  ;;  %v16117_v37 = vld [vmem:[#allocation15_spill] sm:$0xff]  ;;  %v5623_v11 = vpop.permute.xlu1 %5622  ;;  %vm16131_vm15 = vmmov %vm16087_vm0 }
 0x5f5   :  { %v5247_v33 = vadd.f32 %v14232_v18, %v5246_v22  ;;  %v5286_v45 = vmax.f32 %v5244_v53, 0.0  ;;  %v8874_v18 = vld [vmem:[%s15368_s7 + $0x38] sm:$0xff]   ;;  %v16118_v53 = vld [vmem:[#allocation6_spill] sm:$0xff] }
 0x5f6   :  { %v5289_v36 = vmax.f32 %v5255_v29, 0.0  ;;  %8415 = vmatprep.subr.bf16.mxu1 %v8874_v18  ;;  %v5629_v35 = vpop.permute.xlu0 %5628 }
 0x5f7   :  { %v5287_v20 = vmax.f32 %v5247_v33, 0.0  ;;  %8416 = vmatpush3.bf16.msra.mxu1 %v8874_v18 }
 0x5f8   :  { %v5305_v19 = vpack.c.bf16 %v5289_v36, %v5288_v9  ;;  %v5627_v31 = vpop.permute.xlu1 %5626 }
 0x5f9   :  { %v5304_v26 = vpack.c.bf16 %v5287_v20, %v5286_v45 }
 0x5fb   :  { %8405 = vmatprep.mubr.msk.bf16.mxu0 %vm16113_vm8, %v5304_v26  ;;  %vm16132_vm8 = vmmov %vm16087_vm0 }
 0x5fc   :  { %8406 = vmatmul.mubr.msk.bf16.gmra.mrb[104].mxu0 %vm16114_vm2, %v5305_v19  ;;  %vm16133_vm2 = vmmov %vm16087_vm0 }
 0x679   :  { %v8379_v51 = vpop.f32.mrb[76].mxu0 }
 0x67a   :  { %v5436_v13 = vadd.f32 %v8379_v51, %v14300_v44  ;;  %v5427_v21 = vpop.f32.mrb[77].mxu0 }
 0x67b   :  { %v5428_v50 = vadd.f32 %v14300_v44, %v5427_v21  ;;  %v8380_v61 = vpop.f32.mrb[78].mxu0 }
 0x67c   :  { %v5556_v57 = vadd.f32 %v5436_v13, %v16115_v2  ;;  %v5439_v27 = vadd.f32 %v8380_v61, %v14300_v44  ;;  %v5430_v8 = vpop.f32.mrb[79].mxu0 }
 0x67d   :  { %v5554_v52 = vadd.f32 %v5428_v50, %v16116_v56  ;;  %v5431_v47 = vadd.f32 %v14300_v44, %v5430_v8 }
 0x67e   :  { %v5557_v34 = vadd.f32 %v5439_v27, %v16117_v37  ;;  %v14312_v29 = vadd.f32 %v5623_v11, %v5556_v57  ;;  %v5633_v57 = vpop.permute.xlu0 %5632  ;;  %v5631_v27 = vpop.permute.xlu1 %5630 }
 0x67f   :  { %v14309_v16 = vadd.f32 %v5619_v5, %v5554_v52  ;;  %v5555_v58 = vadd.f32 %v5431_v47, %v16118_v53 }
 0x680   :  { %v14314_v22 = vadd.f32 %v5625_v40, %v5557_v34  ;;  %v5748_v20 = vmax.f32 %v14312_v29, 0.0 }
 0x681   :  { %v14316_v33 = vadd.f32 %v5621_v10, %v5555_v58  ;;  %v5746_v36 = vmax.f32 %v14309_v16, 0.0 }
 0x682   :  { %v5749_v9 = vmax.f32 %v14314_v22, 0.0  ;;  %v5637_v53 = vpop.permute.xlu0 %5636 }
 0x683   :  { %v5747_v45 = vmax.f32 %v14316_v33, 0.0 }
 0x684   :  { %v5779_v26 = vpack.c.bf16 %v5749_v9, %v5748_v20 }
 0x685   :  { %v5778_v19 = vpack.c.bf16 %v5747_v45, %v5746_v36  ;;  %v5635_v36 = vpop.permute.xlu1 %5634 }
 0x687   :  { %8417 = vmatprep.mubr.msk.bf16.mxu1 %vm16119_vm5, %v5778_v19  ;;  %vm16134_vm5 = vmmov %vm16087_vm0 }
 0x688   :  { %8418 = vmatmul.mubr.msk.bf16.vlgmr.msra.gmra.mrb[64].mxu1 %vm16120_vm12, %v5779_v26  ;;  %vm16135_vm12 = vmmov %vm16087_vm0 }
 0x696   :  { %v8383_v41 = vpop.f32.mrb[80].mxu0 }
 0x697   :  { %v5452_v18 = vadd.f32 %v8383_v41, %v14300_v44  ;;  %v5443_v63 = vpop.f32.mrb[81].mxu0 }
 0x698   :  { %v5444_v51 = vadd.f32 %v14300_v44, %v5443_v63  ;;  %v8384_v10 = vpop.f32.mrb[82].mxu0  ;;  %v5641_v63 = vpop.permute.xlu0 %5640 }
 0x699   :  { %v5560_v13 = vadd.f32 %v5452_v18, %v14074_v14  ;;  %v5455_v21 = vadd.f32 %v8384_v10, %v14300_v44  ;;  %v5446_v5 = vpop.f32.mrb[83].mxu0 }
 0x69a   :  { %v5558_v50 = vadd.f32 %v5444_v51, %v14071_v60  ;;  %v5447_v61 = vadd.f32 %v14300_v44, %v5446_v5  ;;  %v5639_v51 = vpop.permute.xlu1 %5638 }
 0x69b   :  { %v5561_v2 = vadd.f32 %v5455_v21, %v14077_v55  ;;  %v14334_v52 = vadd.f32 %v5631_v27, %v5560_v13 }
 0x69c   :  { %v14331_v8 = vadd.f32 %v5627_v31, %v5558_v50  ;;  %v5559_v56 = vadd.f32 %v5447_v61, %v14080_v43  ;;  %v5645_v61 = vpop.permute.xlu0 %5644 }
 0x69d   :  { %v14336_v47 = vadd.f32 %v5633_v57, %v5561_v2  ;;  %v5752_v55 = vmax.f32 %v14334_v52, 0.0 }
 0x69e   :  { %v14338_v14 = vadd.f32 %v5629_v35, %v5559_v56  ;;  %v5750_v60 = vmax.f32 %v14331_v8, 0.0  ;;  %v5643_v27 = vpop.permute.xlu1 %5642 }
 0x69f   :  { %v5753_v37 = vmax.f32 %v14336_v47, 0.0 }
 0x6a0   :  { %v5751_v34 = vmax.f32 %v14338_v14, 0.0 }
 0x6a1   :  { %v5781_v11 = vpack.c.bf16 %v5753_v37, %v5752_v55 }
 0x6a2   :  { %v5780_v40 = vpack.c.bf16 %v5751_v34, %v5750_v60 }
 0x6a4   :  { %8421 = vmatprep.mubr.msk.bf16.mxu1 %vm16121_vm3, %v5780_v40  ;;  %vm16136_vm3 = vmmov %vm16087_vm0 }
 0x6a5   :  { %8422 = vmatmul.mubr.msk.bf16.gmra.mrb[68].mxu1 %vm16122_vm7, %v5781_v11  ;;  %vm16137_vm7 = vmmov %vm16087_vm0 }
 0x6a7   :  { %v8387_v43 = vpop.f32.mrb[84].mxu0 }
 0x6a8   :  { %v5468_v58 = vadd.f32 %v8387_v43, %v14300_v44  ;;  %v5459_v9 = vpop.f32.mrb[85].mxu0 }
 0x6a9   :  { %v5460_v45 = vadd.f32 %v14300_v44, %v5459_v9  ;;  %v8388_v20 = vpop.f32.mrb[86].mxu0 }
 0x6aa   :  { %v5564_v19 = vadd.f32 %v5468_v58, %v14100_v15  ;;  %v5471_v26 = vadd.f32 %v8388_v20, %v14300_v44  ;;  %v5462_v41 = vpop.f32.mrb[87].mxu0  ;;  %v5649_v58 = vpop.permute.xlu0 %5648 }
 0x6ab   :  { %v5562_v35 = vadd.f32 %v5460_v45, %v14096_v12  ;;  %v5463_v18 = vadd.f32 %v14300_v44, %v5462_v41  ;;  %v5647_v45 = vpop.permute.xlu1 %5646 }
 0x6ac   :  { %v5565_v31 = vadd.f32 %v5471_v26, %v14103_v46  ;;  %v14356_v21 = vadd.f32 %v5639_v51, %v5564_v19 }
 0x6ad   :  { %v14353_v10 = vadd.f32 %v5635_v36, %v5562_v35  ;;  %v5563_v13 = vadd.f32 %v5463_v18, %v14110_v23 }
 0x6ae   :  { %v14358_v5 = vadd.f32 %v5641_v63, %v5565_v31  ;;  %v5756_v60 = vmax.f32 %v14356_v21, 0.0  ;;  %v5653_v35 = vpop.permute.xlu0 %5652 }
 0x6af   :  { %v14360_v15 = vadd.f32 %v5637_v53, %v5563_v13  ;;  %v8391_v50 = vpop.f32.mrb[88].mxu0  ;;  %v5754_v46 = vmax.f32 %v14353_v10, 0.0  ;;  %v5651_v31 = vpop.permute.xlu1 %5650 }
 0x6b0   :  { %v5757_v12 = vmax.f32 %v14358_v5, 0.0  ;;  %v5484_v2 = vadd.f32 %v8391_v50, %v14300_v44  ;;  %v5475_v57 = vpop.f32.mrb[89].mxu0 }
 0x6b1   :  { %v5755_v56 = vmax.f32 %v14360_v15, 0.0  ;;  %v5476_v23 = vadd.f32 %v14300_v44, %v5475_v57  ;;  %v8392_v37 = vpop.f32.mrb[90].mxu0 }
 0x6b2   :  { %v5568_v34 = vadd.f32 %v5484_v2, %v14129_v28  ;;  %v5487_v55 = vadd.f32 %v8392_v37, %v14300_v44  ;;  %v5478_v40 = vpop.f32.mrb[91].mxu0  ;;  %v5783_v36 = vpack.c.bf16 %v5757_v12, %v5756_v60 }
 0x6b3   :  { %v5566_v11 = vadd.f32 %v5476_v23, %v14107_v17  ;;  %v5479_v43 = vadd.f32 %v14300_v44, %v5478_v40  ;;  %v5782_v53 = vpack.c.bf16 %v5755_v56, %v5754_v46  ;;  %v5657_v23 = vpop.permute.xlu0 %5656 }
 0x6b4   :  { %v5569_v9 = vadd.f32 %v5487_v55, %v14120_v32  ;;  %v14377_v28 = vadd.f32 %v5647_v45, %v5568_v34  ;;  %v5655_v34 = vpop.permute.xlu1 %5654 }
 0x6b5   :  { %v14373_v20 = vadd.f32 %v5643_v27, %v5566_v11  ;;  %v5567_v19 = vadd.f32 %v5479_v43, %v14093_v1  ;;  %8425 = vmatprep.mubr.msk.bf16.mxu1 %vm16123_vm11, %v5782_v53  ;;  %vm16138_vm11 = vmmov %vm16087_vm0 }
 0x6b6   :  { %v14379_v26 = vadd.f32 %v5649_v58, %v5569_v9  ;;  %8426 = vmatmul.mubr.msk.bf16.gmra.mrb[72].mxu1 %vm16124_vm9, %v5783_v36  ;;  %v5760_v12 = vmax.f32 %v14377_v28, 0.0  ;;  %vm16139_vm9 = vmmov %vm16087_vm0 }
 0x6b7   :  { %v14382_v17 = vadd.f32 %v5645_v61, %v5567_v19  ;;  %v8395_v41 = vpop.f32.mrb[92].mxu0  ;;  %v5758_v1 = vmax.f32 %v14373_v20, 0.0  ;;  %v5661_v53 = vpop.permute.xlu0 %5660 }
 0x6b8   :  { %v5761_v32 = vmax.f32 %v14379_v26, 0.0  ;;  %v5500_v18 = vadd.f32 %v8395_v41, %v14300_v44  ;;  %v5491_v63 = vpop.f32.mrb[93].mxu0  ;;  %v5659_v36 = vpop.permute.xlu1 %5658 }
 0x6b9   :  { %v5759_v51 = vmax.f32 %v14382_v17, 0.0  ;;  %v5492_v13 = vadd.f32 %v14300_v44, %v5491_v63  ;;  %v8396_v50 = vpop.f32.mrb[94].mxu0 }
 0x6ba   :  { %v5572_v61 = vadd.f32 %v5500_v18, %v14151_v48  ;;  %v5503_v2 = vadd.f32 %v8396_v50, %v14300_v44  ;;  %v5494_v57 = vpop.f32.mrb[95].mxu0  ;;  %v5785_v60 = vpack.c.bf16 %v5761_v32, %v5760_v12 }
 0x6bb   :  { %v5570_v27 = vadd.f32 %v5492_v13, %v14134_v30  ;;  %v5495_v46 = vadd.f32 %v14300_v44, %v5494_v57  ;;  %v5784_v56 = vpack.c.bf16 %v5759_v51, %v5758_v1  ;;  %v5665_v13 = vpop.permute.xlu0 %5664 }
 0x6bc   :  { %v5573_v37 = vadd.f32 %v5503_v2, %v14143_v3  ;;  %v14399_v48 = vadd.f32 %v5655_v34, %v5572_v61  ;;  %v5663_v61 = vpop.permute.xlu1 %5662 }
 0x6bd   :  { %v14395_v55 = vadd.f32 %v5651_v31, %v5570_v27  ;;  %v5571_v40 = vadd.f32 %v5495_v46, %v14124_v62  ;;  %8429 = vmatprep.mubr.msk.bf16.mxu1 %vm16125_vm1, %v5784_v56  ;;  %vm16140_vm1 = vmmov %vm16087_vm0 }
 0x6be   :  { %v14401_v11 = vadd.f32 %v5657_v23, %v5573_v37  ;;  %8430 = vmatmul.mubr.msk.bf16.gmra.mrb[76].mxu1 %vm16087_vm0, %v5785_v60  ;;  %v5764_v32 = vmax.f32 %v14399_v48, 0.0 }
 0x6bf   :  { %v14404_v30 = vadd.f32 %v5653_v35, %v5571_v40  ;;  %v8399_v43 = vpop.f32.mrb[96].mxu0  ;;  %v5762_v62 = vmax.f32 %v14395_v55, 0.0  ;;  %v5669_v56 = vpop.permute.xlu0 %5668 }
 0x6c0   :  { %v5765_v3 = vmax.f32 %v14401_v11, 0.0  ;;  %v5516_v58 = vadd.f32 %v8399_v43, %v14300_v44  ;;  %v5507_v9 = vpop.f32.mrb[97].mxu0  ;;  %v5667_v60 = vpop.permute.xlu1 %5666 }
 0x6c1   :  { %v5763_v45 = vmax.f32 %v14404_v30, 0.0  ;;  %v5508_v19 = vadd.f32 %v14300_v44, %v5507_v9  ;;  %v8400_v41 = vpop.f32.mrb[98].mxu0 }
 0x6c2   :  { %v5576_v35 = vadd.f32 %v5516_v58, %v14173_v25  ;;  %v5519_v18 = vadd.f32 %v8400_v41, %v14300_v44  ;;  %v5510_v63 = vpop.f32.mrb[99].mxu0  ;;  %v5787_v12 = vpack.c.bf16 %v5765_v3, %v5764_v32 }
 0x6c3   :  { %v5574_v31 = vadd.f32 %v5508_v19, %v14156_v0  ;;  %v5511_v1 = vadd.f32 %v14300_v44, %v5510_v63  ;;  %v5786_v51 = vpack.c.bf16 %v5763_v45, %v5762_v62  ;;  %v5673_v19 = vpop.permute.xlu0 %5672 }
 0x6c4   :  { %v5577_v50 = vadd.f32 %v5519_v18, %v14165_v59  ;;  %v14421_v25 = vadd.f32 %v5663_v61, %v5576_v35  ;;  %v5671_v35 = vpop.permute.xlu1 %5670 }
 0x6c5   :  { %v14417_v2 = vadd.f32 %v5659_v36, %v5574_v31  ;;  %v5575_v57 = vadd.f32 %v5511_v1, %v14147_v49  ;;  %8433 = vmatprep.mubr.msk.bf16.mxu1 %vm16126_vm13, %v5786_v51  ;;  %vm16141_vm13 = vmmov %vm16087_vm0 }
 0x6c6   :  { %v14423_v27 = vadd.f32 %v5665_v13, %v5577_v50  ;;  %8434 = vmatmul.mubr.msk.bf16.gmra.mrb[80].mxu1 %vm16127_vm4, %v5787_v12  ;;  %v5768_v3 = vmax.f32 %v14421_v25, 0.0  ;;  %vm16142_vm4 = vmmov %vm16087_vm0 }
 0x6c7   :  { %v14426_v0 = vadd.f32 %v5661_v53, %v5575_v57  ;;  %v8403_v46 = vpop.f32.mrb[100].mxu0  ;;  %v5766_v49 = vmax.f32 %v14417_v2, 0.0  ;;  %v5677_v51 = vpop.permute.xlu0 %5676 }
 0x6c8   :  { %v5769_v59 = vmax.f32 %v14423_v27, 0.0  ;;  %v5532_v23 = vadd.f32 %v8403_v46, %v14300_v44  ;;  %v5523_v37 = vpop.f32.mrb[101].mxu0  ;;  %v5675_v12 = vpop.permute.xlu1 %5674 }
 0x6c9   :  { %v5767_v34 = vmax.f32 %v14426_v0, 0.0  ;;  %v5524_v40 = vadd.f32 %v14300_v44, %v5523_v37  ;;  %v8404_v43 = vpop.f32.mrb[102].mxu0 }
 0x6ca   :  { %v5580_v53 = vadd.f32 %v5532_v23, %v14195_v39  ;;  %v5535_v58 = vadd.f32 %v8404_v43, %v14300_v44  ;;  %v5526_v9 = vpop.f32.mrb[103].mxu0  ;;  %v5789_v32 = vpack.c.bf16 %v5769_v59, %v5768_v3 }
 0x6cb   :  { %v5578_v36 = vadd.f32 %v5524_v40, %v14178_v54  ;;  %v5527_v62 = vadd.f32 %v14300_v44, %v5526_v9  ;;  %v5788_v45 = vpack.c.bf16 %v5767_v34, %v5766_v49  ;;  %v5681_v3 = vpop.permute.xlu0 %5680 }
 0x6cc   :  { %v5581_v41 = vadd.f32 %v5535_v58, %v14187_v6  ;;  %v14443_v39 = vadd.f32 %v5671_v35, %v5580_v53  ;;  %v5679_v53 = vpop.permute.xlu1 %5678  ;;  %v8879_v35 = vld [vmem:[%s15368_s7 + $0x40] sm:$0xff]  }
 0x6cd   :  { %v14439_v18 = vadd.f32 %v5667_v60, %v5578_v36  ;;  %v5579_v63 = vadd.f32 %v5527_v62, %v14169_v4  ;;  %8437 = vmatprep.mubr.msk.bf16.mxu1 %vm16128_vm6, %v5788_v45  ;;  %8489 = vmatprep.subr.bf16.mxu1 %v8879_v35  ;;  %vm16143_vm6 = vmmov %vm16087_vm0 }
 0x6ce   :  { %v14445_v31 = vadd.f32 %v5673_v19, %v5581_v41  ;;  %8438 = vmatmul.mubr.msk.bf16.gmra.mrb[84].mxu1 %vm16129_vm10, %v5789_v32  ;;  %v5772_v59 = vmax.f32 %v14443_v39, 0.0  ;;  %v8877_v41 = vld [vmem:[%s15370_s9 + $0x30] sm:$0xff]   ;;  %v8878_v32 = vld [vmem:[%s15370_s9 + $0x38] sm:$0xff]   ;;  %vm16144_vm10 = vmmov %vm16087_vm0 }
 0x6cf   :  { %v14448_v54 = vadd.f32 %v5669_v56, %v5579_v63  ;;  %v8407_v1 = vpop.f32.mrb[104].mxu0  ;;  %v5770_v4 = vmax.f32 %v14439_v18, 0.0  ;;  %8453 = vmatprep.subr.bf16.mxu0 %v8877_v41  ;;  %8490 = vmatpush3.bf16.msra.mxu1 %v8879_v35  ;;  %v14490_v63 = vld [vmem:[%s15371_s8 + $0x1] ss:$0 sm:$0xff] }
 0x6d0   :  { %v5773_v6 = vmax.f32 %v14445_v31, 0.0  ;;  %v5548_v13 = vadd.f32 %v8407_v1, %v14300_v44  ;;  %v5539_v50 = vpop.f32.mrb[105].mxu0  ;;  %8454 = vmatpush3.bf16.msra.mxu0 %v8877_v41 }
 0x6d1   :  { %v5771_v61 = vmax.f32 %v14448_v54, 0.0  ;;  %v5540_v57 = vadd.f32 %v14300_v44, %v5539_v50  ;;  %v8408_v46 = vpop.f32.mrb[106].mxu0  ;;  %8455 = vmatprep.subr.bf16.mxu0 %v8878_v32 }
 0x6d2   :  { %v5584_v56 = vadd.f32 %v5548_v13, %v14213_v38  ;;  %v5551_v23 = vadd.f32 %v8408_v46, %v14300_v44  ;;  %v5542_v37 = vpop.f32.mrb[107].mxu0  ;;  %v5791_v43 = vpack.c.bf16 %v5773_v6, %v5772_v59 }
 0x6d3   :  { %v5582_v60 = vadd.f32 %v5540_v57, %v14200_v24  ;;  %v5543_v49 = vadd.f32 %v14300_v44, %v5542_v37  ;;  %v5790_v34 = vpack.c.bf16 %v5771_v61, %v5770_v4 }
 0x6d4   :  { %v5585_v40 = vadd.f32 %v5551_v23, %v14209_v42  ;;  %v14465_v38 = vadd.f32 %v5679_v53, %v5584_v56  ;;  %8456 = vmatpush3.bf16.msra.mxu0 %v8878_v32 }
 0x6d5   :  { %v14461_v58 = vadd.f32 %v5675_v12, %v5582_v60  ;;  %v5583_v9 = vadd.f32 %v5543_v49, %v14191_v7  ;;  %8441 = vmatprep.mubr.msk.bf16.mxu1 %vm16130_vm14, %v5790_v34  ;;  %vm16145_vm14 = vmmov %vm16087_vm0 }
 0x6d6   :  { %v14467_v36 = vadd.f32 %v5681_v3, %v5585_v40  ;;  %8442 = vmatmul.mubr.msk.bf16.gmra.mrb[88].mxu1 %vm16131_vm15, %v5791_v43  ;;  %v5776_v45 = vmax.f32 %v14465_v38, 0.0  ;;  %vm16146_vm15 = vmmov %vm16087_vm0 }
 0x6d7   :  { %v14470_v24 = vadd.f32 %v5677_v51, %v5583_v9  ;;  %v5774_v42 = vmax.f32 %v14461_v58, 0.0 }
 0x6d8   :  { %v5777_v44 = vmax.f32 %v14467_v36, 0.0 }
 0x6d9   :  { %v5775_v62 = vmax.f32 %v14470_v24, 0.0 }
 0x6da   :  { %v5793_v7 = vpack.c.bf16 %v5777_v44, %v5776_v45 }
 0x6db   :  { %v5792_v19 = vpack.c.bf16 %v5775_v62, %v5774_v42 }
 0x6dd   :  { %8445 = vmatprep.mubr.msk.bf16.mxu1 %vm16132_vm8, %v5792_v19  ;;  %vm16147_vm8 = vmmov %vm16087_vm0 }
 0x6de   :  { %8446 = vmatmul.mubr.msk.bf16.gmra.mrb[92].mxu1 %vm16133_vm2, %v5793_v7  ;;  %vm16148_vm2 = vmmov %vm16087_vm0 }
 0x75b   :  { %v8419_v1 = vpop.f32.mrb[64].mxu1 }
 0x75c   :  { %v5926_v51 = vadd.f32 %v8419_v1, %v14490_v63  ;;  %v5917_v6 = vpop.f32.mrb[65].mxu1 }
 0x75d   :  { %v5918_v13 = vadd.f32 %v14490_v63, %v5917_v6  ;;  %v8420_v50 = vpop.f32.mrb[66].mxu1 }
 0x75e   :  { %v5929_v12 = vadd.f32 %v8420_v50, %v14490_v63  ;;  %v5920_v4 = vpop.f32.mrb[67].mxu1  ;;  %v6046_v57 = vmax.f32 %v5926_v51, 0.0 }
 0x75f   :  { %v5921_v61 = vadd.f32 %v14490_v63, %v5920_v4  ;;  %v6044_v59 = vmax.f32 %v5918_v13, 0.0 }
 0x760   :  { %v6047_v46 = vmax.f32 %v5929_v12, 0.0 }
 0x761   :  { %v6045_v56 = vmax.f32 %v5921_v61, 0.0 }
 0x762   :  { %v6077_v23 = vpack.c.bf16 %v6047_v46, %v6046_v57 }
 0x763   :  { %v6076_v37 = vpack.c.bf16 %v6045_v56, %v6044_v59 }
 0x765   :  { %8457 = vmatprep.mubr.msk.bf16.mxu0 %vm16134_vm5, %v6076_v37  ;;  %vm16153_vm5 = vmmov %vm16087_vm0 }
 0x766   :  { %8458 = vmatmul.mubr.msk.bf16.vlgmr.msra.gmra.mrb[108].mxu0 %vm16135_vm12, %v6077_v23  ;;  %vm16154_vm12 = vmmov %vm16087_vm0 }
 0x778   :  { %v8423_v60 = vpop.f32.mrb[68].mxu1 }
 0x779   :  { %v5942_v49 = vadd.f32 %v8423_v60, %v14490_v63  ;;  %v5933_v34 = vpop.f32.mrb[69].mxu1 }
 0x77a   :  { %v5934_v40 = vadd.f32 %v14490_v63, %v5933_v34  ;;  %v8424_v43 = vpop.f32.mrb[70].mxu1 }
 0x77b   :  { %v5945_v3 = vadd.f32 %v8424_v43, %v14490_v63  ;;  %v5936_v53 = vpop.f32.mrb[71].mxu1  ;;  %v6050_v44 = vmax.f32 %v5942_v49, 0.0 }
 0x77c   :  { %v5937_v9 = vadd.f32 %v14490_v63, %v5936_v53  ;;  %v6048_v62 = vmax.f32 %v5934_v40, 0.0 }
 0x77d   :  { %v6051_v42 = vmax.f32 %v5945_v3, 0.0 }
 0x77e   :  { %v6049_v45 = vmax.f32 %v5937_v9, 0.0 }
 0x77f   :  { %v6079_v19 = vpack.c.bf16 %v6051_v42, %v6050_v44 }
 0x780   :  { %v6078_v7 = vpack.c.bf16 %v6049_v45, %v6048_v62 }
 0x782   :  { %8461 = vmatprep.mubr.msk.bf16.mxu0 %vm16136_vm3, %v6078_v7  ;;  %vm16159_vm3 = vmmov %vm16087_vm0 }
 0x783   :  { %8462 = vmatmul.mubr.msk.bf16.gmra.mrb[112].mxu0 %vm16137_vm7, %v6079_v19  ;;  %vm16160_vm7 = vmmov %vm16087_vm0 }
 0x789   :  { %v8427_v41 = vpop.f32.mrb[72].mxu1 }
 0x78a   :  { %v5958_v32 = vadd.f32 %v8427_v41, %v14490_v63  ;;  %v5949_v35 = vpop.f32.mrb[73].mxu1 }
 0x78b   :  { %v5950_v1 = vadd.f32 %v14490_v63, %v5949_v35  ;;  %v8428_v51 = vpop.f32.mrb[74].mxu1 }
 0x78c   :  { %v5961_v6 = vadd.f32 %v8428_v51, %v14490_v63  ;;  %v5952_v13 = vpop.f32.mrb[75].mxu1  ;;  %v6054_v12 = vmax.f32 %v5958_v32, 0.0 }
 0x78d   :  { %v5953_v50 = vadd.f32 %v14490_v63, %v5952_v13  ;;  %v6052_v61 = vmax.f32 %v5950_v1, 0.0 }
 0x78e   :  { %v6055_v4 = vmax.f32 %v5961_v6, 0.0 }
 0x78f   :  { %v6053_v57 = vmax.f32 %v5953_v50, 0.0 }
 0x790   :  { %v6081_v46 = vpack.c.bf16 %v6055_v4, %v6054_v12 }
 0x791   :  { %v6080_v59 = vpack.c.bf16 %v6053_v57, %v6052_v61  ;;  %v8431_v56 = vpop.f32.mrb[76].mxu1 }
 0x792   :  { %v5974_v23 = vadd.f32 %v8431_v56, %v14490_v63  ;;  %v5965_v37 = vpop.f32.mrb[77].mxu1 }
 0x793   :  { %v5966_v60 = vadd.f32 %v14490_v63, %v5965_v37  ;;  %v8432_v49 = vpop.f32.mrb[78].mxu1  ;;  %8465 = vmatprep.mubr.msk.bf16.mxu0 %vm16138_vm11, %v6080_v59  ;;  %vm16167_vm11 = vmmov %vm16087_vm0 }
 0x794   :  { %v5977_v34 = vadd.f32 %v8432_v49, %v14490_v63  ;;  %v5968_v40 = vpop.f32.mrb[79].mxu1  ;;  %8466 = vmatmul.mubr.msk.bf16.gmra.mrb[116].mxu0 %vm16139_vm9, %v6081_v46  ;;  %v6058_v3 = vmax.f32 %v5974_v23, 0.0  ;;  %vm16169_vm9 = vmmov %vm16087_vm0 }
 0x795   :  { %v5969_v43 = vadd.f32 %v14490_v63, %v5968_v40  ;;  %v6056_v9 = vmax.f32 %v5966_v60, 0.0 }
 0x796   :  { %v6059_v53 = vmax.f32 %v5977_v34, 0.0 }
 0x797   :  { %v6057_v44 = vmax.f32 %v5969_v43, 0.0 }
 0x798   :  { %v6083_v42 = vpack.c.bf16 %v6059_v53, %v6058_v3 }
 0x799   :  { %v6082_v62 = vpack.c.bf16 %v6057_v44, %v6056_v9  ;;  %v8435_v45 = vpop.f32.mrb[80].mxu1 }
 0x79a   :  { %v5990_v19 = vadd.f32 %v8435_v45, %v14490_v63  ;;  %v5981_v7 = vpop.f32.mrb[81].mxu1 }
 0x79b   :  { %v5982_v41 = vadd.f32 %v14490_v63, %v5981_v7  ;;  %v8436_v32 = vpop.f32.mrb[82].mxu1  ;;  %8469 = vmatprep.mubr.msk.bf16.mxu0 %vm16140_vm1, %v6082_v62  ;;  %vm16173_vm1 = vmmov %vm16087_vm0 }
 0x79c   :  { %v5993_v35 = vadd.f32 %v8436_v32, %v14490_v63  ;;  %v5984_v1 = vpop.f32.mrb[83].mxu1  ;;  %8470 = vmatmul.mubr.msk.bf16.gmra.mrb[120].mxu0 %vm16087_vm0, %v6083_v42  ;;  %v6062_v6 = vmax.f32 %v5990_v19, 0.0 }
 0x79d   :  { %v5985_v51 = vadd.f32 %v14490_v63, %v5984_v1  ;;  %v6060_v50 = vmax.f32 %v5982_v41, 0.0 }
 0x79e   :  { %v6063_v13 = vmax.f32 %v5993_v35, 0.0 }
 0x79f   :  { %v6061_v12 = vmax.f32 %v5985_v51, 0.0 }
 0x7a0   :  { %v6085_v4 = vpack.c.bf16 %v6063_v13, %v6062_v6 }
 0x7a1   :  { %v6084_v61 = vpack.c.bf16 %v6061_v12, %v6060_v50  ;;  %v8439_v57 = vpop.f32.mrb[84].mxu1 }
 0x7a2   :  { %v6006_v46 = vadd.f32 %v8439_v57, %v14490_v63  ;;  %v5997_v59 = vpop.f32.mrb[85].mxu1 }
 0x7a3   :  { %v5998_v56 = vadd.f32 %v14490_v63, %v5997_v59  ;;  %v8440_v23 = vpop.f32.mrb[86].mxu1  ;;  %8473 = vmatprep.mubr.msk.bf16.mxu0 %vm16141_vm13, %v6084_v61  ;;  %vm16178_vm13 = vmmov %vm16087_vm0 }
 0x7a4   :  { %v6009_v37 = vadd.f32 %v8440_v23, %v14490_v63  ;;  %v6000_v60 = vpop.f32.mrb[87].mxu1  ;;  %8474 = vmatmul.mubr.msk.bf16.gmra.mrb[124].mxu0 %vm16142_vm4, %v6085_v4  ;;  %v6066_v34 = vmax.f32 %v6006_v46, 0.0  ;;  %vm16180_vm4 = vmmov %vm16087_vm0 }
 0x7a5   :  { %v6001_v49 = vadd.f32 %v14490_v63, %v6000_v60  ;;  %v6064_v43 = vmax.f32 %v5998_v56, 0.0 }
 0x7a6   :  { %v6067_v40 = vmax.f32 %v6009_v37, 0.0 }
 0x7a7   :  { %v6065_v3 = vmax.f32 %v6001_v49, 0.0 }
 0x7a8   :  { %v6087_v53 = vpack.c.bf16 %v6067_v40, %v6066_v34 }
 0x7a9   :  { %v6086_v9 = vpack.c.bf16 %v6065_v3, %v6064_v43  ;;  %v8443_v44 = vpop.f32.mrb[88].mxu1  ;;  %v8880_v3 = vld [vmem:[%s15368_s7 + $0x48] sm:$0xff]  }
 0x7aa   :  { %v6022_v42 = vadd.f32 %v8443_v44, %v14490_v63  ;;  %v6013_v62 = vpop.f32.mrb[89].mxu1  ;;  %8491 = vmatprep.subr.bf16.mxu1 %v8880_v3  ;;  %v8884_v44 = vld [vmem:[%s15370_s9 + $0x48] sm:$0xff]  }
 0x7ab   :  { %v6014_v45 = vadd.f32 %v14490_v63, %v6013_v62  ;;  %v8444_v19 = vpop.f32.mrb[90].mxu1  ;;  %8477 = vmatprep.mubr.msk.bf16.mxu0 %vm16143_vm6, %v6086_v9  ;;  %8492 = vmatpush3.bf16.msra.mxu1 %v8880_v3  ;;  %v8883_v9 = vld [vmem:[%s15370_s9 + $0x40] sm:$0xff]   ;;  %vm16184_vm6 = vmmov %vm16087_vm0 }
 0x7ac   :  { %v6025_v7 = vadd.f32 %v8444_v19, %v14490_v63  ;;  %v6016_v41 = vpop.f32.mrb[91].mxu1  ;;  %8478 = vmatmul.mubr.msk.bf16.gmra.mrb[128].mxu0 %vm16144_vm10, %v6087_v53  ;;  %v6070_v35 = vmax.f32 %v6022_v42, 0.0  ;;  %v8881_v53 = vld [vmem:[%s15368_s7 + $0x50] sm:$0xff]   ;;  %8529 = vmatprep.subr.bf16.mxu0 %v8883_v9  ;;  %v14558_v42 = vld [vmem:[%s15372_s10 + $0x1] ss:$0 sm:$0xff]  ;;  %vm16186_vm10 = vmmov %vm16087_vm0 }
 0x7ad   :  { %v6017_v32 = vadd.f32 %v14490_v63, %v6016_v41  ;;  %v6068_v51 = vmax.f32 %v6014_v45, 0.0  ;;  %8493 = vmatprep.subr.bf16.mxu1 %v8881_v53  ;;  %8530 = vmatpush3.bf16.msra.mxu0 %v8883_v9 }
 0x7ae   :  { %v6071_v1 = vmax.f32 %v6025_v7, 0.0  ;;  %8531 = vmatprep.subr.bf16.mxu0 %v8884_v44 }
 0x7af   :  { %v6069_v6 = vmax.f32 %v6017_v32, 0.0  ;;  %8494 = vmatpush3.bf16.msra.mxu1 %v8881_v53 }
 0x7b0   :  { %v6089_v13 = vpack.c.bf16 %v6071_v1, %v6070_v35 }
 0x7b1   :  { %v6088_v50 = vpack.c.bf16 %v6069_v6, %v6068_v51  ;;  %v8447_v12 = vpop.f32.mrb[92].mxu1  ;;  %8532 = vmatpush3.bf16.msra.mxu0 %v8884_v44 }
 0x7b2   :  { %v6038_v4 = vadd.f32 %v8447_v12, %v14490_v63  ;;  %v6029_v61 = vpop.f32.mrb[93].mxu1 }
 0x7b3   :  { %v6030_v57 = vadd.f32 %v14490_v63, %v6029_v61  ;;  %v8448_v46 = vpop.f32.mrb[94].mxu1  ;;  %8481 = vmatprep.mubr.msk.bf16.mxu0 %vm16145_vm14, %v6088_v50  ;;  %vm16190_vm14 = vmmov %vm16087_vm0 }
 0x7b4   :  { %v6041_v59 = vadd.f32 %v8448_v46, %v14490_v63  ;;  %v6032_v56 = vpop.f32.mrb[95].mxu1  ;;  %8482 = vmatmul.mubr.msk.bf16.gmra.mrb[132].mxu0 %vm16146_vm15, %v6089_v13  ;;  %v6074_v37 = vmax.f32 %v6038_v4, 0.0  ;;  %v16149_v13 = vld [vmem:[#allocation46_spill] sm:$0xff]  ;;  %v16150_v4 = vld [vmem:[#allocation11_spill] sm:$0xff]  ;;  %v16151_v46 = vld [vmem:[#allocation33_spill] sm:$0xff] }
 0x7b5   :  { %v6033_v23 = vadd.f32 %v14490_v63, %v6032_v56  ;;  %v6072_v49 = vmax.f32 %v6030_v57, 0.0  ;;  %v8882_v63 = vld [vmem:[%s15368_s7 + $0x58] sm:$0xff]   ;;  %vm16192_vm15 = vmmov %vm16087_vm0 }
 0x7b6   :  { %v6075_v60 = vmax.f32 %v6041_v59, 0.0  ;;  %8495 = vmatprep.subr.bf16.mxu1 %v8882_v63 }
 0x7b7   :  { %v6073_v34 = vmax.f32 %v6033_v23, 0.0  ;;  %8496 = vmatpush3.bf16.msra.mxu1 %v8882_v63 }
 0x7b8   :  { %v6091_v40 = vpack.c.bf16 %v6075_v60, %v6074_v37 }
 0x7b9   :  { %v6090_v43 = vpack.c.bf16 %v6073_v34, %v6072_v49 }
 0x7bb   :  { %8485 = vmatprep.mubr.msk.bf16.mxu0 %vm16147_vm8, %v6090_v43  ;;  %vm16194_vm8 = vmmov %vm16087_vm0 }
 0x7bc   :  { %8486 = vmatmul.mubr.msk.bf16.gmra.mrb[136].mxu0 %vm16148_vm2, %v6091_v40  ;;  %vm16195_vm2 = vmmov %vm16087_vm0 }
 0x839   :  { %v8459_v62 = vpop.f32.mrb[108].mxu0 }
 0x83a   :  { %v6224_v45 = vadd.f32 %v8459_v62, %v14558_v42  ;;  %v6215_v19 = vpop.f32.mrb[109].mxu0 }
 0x83b   :  { %v6216_v7 = vadd.f32 %v14558_v42, %v6215_v19  ;;  %v8460_v41 = vpop.f32.mrb[110].mxu0 }
 0x83c   :  { %v6344_v32 = vadd.f32 %v6224_v45, %v14312_v29  ;;  %v6227_v35 = vadd.f32 %v8460_v41, %v14558_v42  ;;  %v6218_v1 = vpop.f32.mrb[111].mxu0  ;;  %v16152_v29 = vld [vmem:[#allocation51_spill] sm:$0xff]  ;;  %v16156_v41 = vld [vmem:[#allocation37_spill] sm:$0xff] }
 0x83d   :  { %v6342_v51 = vadd.f32 %v6216_v7, %v14309_v16  ;;  %v6219_v6 = vadd.f32 %v14558_v42, %v6218_v1  ;;  %v16155_v45 = vld [vmem:[#allocation19_spill] sm:$0xff]  ;;  %v16157_v1 = vld [vmem:[#allocation21_spill] sm:$0xff] }
 0x83e   :  { %v14567_v50 = vadd.f32 %v6344_v32, %v16149_v13  ;;  %v6345_v12 = vadd.f32 %v6227_v35, %v14314_v22 }
 0x83f   :  { %v14571_v61 = vadd.f32 %v6342_v51, %v16150_v4  ;;  %v6343_v57 = vadd.f32 %v6219_v6, %v14316_v33 }
 0x840   :  { %v14575_v59 = vadd.f32 %v6345_v12, %v16151_v46  ;;  %v6408_v60 = vmax.f32 %v14567_v50, 0.0 }
 0x841   :  { %v14578_v56 = vadd.f32 %v6343_v57, %v16152_v29  ;;  %v6406_v23 = vmax.f32 %v14571_v61, 0.0 }
 0x842   :  { %v6409_v16 = vmax.f32 %v14575_v59, 0.0 }
 0x843   :  { %v6407_v37 = vmax.f32 %v14578_v56, 0.0 }
 0x844   :  { %v6439_v49 = vpack.c.bf16 %v6409_v16, %v6408_v60 }
 0x845   :  { %v6438_v22 = vpack.c.bf16 %v6407_v37, %v6406_v23 }
 0x847   :  { %8497 = vmatprep.mubr.msk.bf16.mxu1 %vm16153_vm5, %v6438_v22  ;;  %vm16196_vm5 = vmmov %vm16087_vm0 }
 0x848   :  { %8498 = vmatmul.mubr.msk.bf16.vlgmr.msra.gmra.mrb[96].mxu1 %vm16154_vm12, %v6439_v49  ;;  %vm16197_vm12 = vmmov %vm16087_vm0 }
 0x856   :  { %v8463_v33 = vpop.f32.mrb[112].mxu0 }
 0x857   :  { %v6240_v34 = vadd.f32 %v8463_v33, %v14558_v42  ;;  %v6231_v40 = vpop.f32.mrb[113].mxu0 }
 0x858   :  { %v6232_v43 = vadd.f32 %v14558_v42, %v6231_v40  ;;  %v8464_v3 = vpop.f32.mrb[114].mxu0 }
 0x859   :  { %v6348_v53 = vadd.f32 %v6240_v34, %v14334_v52  ;;  %v6243_v63 = vadd.f32 %v8464_v3, %v14558_v42  ;;  %v6234_v9 = vpop.f32.mrb[115].mxu0  ;;  %v16158_v52 = vld [vmem:[#allocation7_spill] sm:$0xff]  ;;  %v16162_v3 = vld [vmem:[#allocation58_spill] sm:$0xff] }
 0x85a   :  { %v6346_v44 = vadd.f32 %v6232_v43, %v14331_v8  ;;  %v6235_v62 = vadd.f32 %v14558_v42, %v6234_v9  ;;  %v16161_v34 = vld [vmem:[#allocation3_spill] sm:$0xff]  ;;  %v16163_v9 = vld [vmem:[#allocation29_spill] sm:$0xff] }
 0x85b   :  { %v14593_v19 = vadd.f32 %v6348_v53, %v16155_v45  ;;  %v6349_v7 = vadd.f32 %v6243_v63, %v14336_v47 }
 0x85c   :  { %v14597_v32 = vadd.f32 %v6346_v44, %v16156_v41  ;;  %v6347_v35 = vadd.f32 %v6235_v62, %v14338_v14 }
 0x85d   :  { %v14601_v51 = vadd.f32 %v6349_v7, %v16157_v1  ;;  %v6412_v4 = vmax.f32 %v14593_v19, 0.0 }
 0x85e   :  { %v14604_v6 = vadd.f32 %v6347_v35, %v16158_v52  ;;  %v6410_v13 = vmax.f32 %v14597_v32, 0.0 }
 0x85f   :  { %v6413_v8 = vmax.f32 %v14601_v51, 0.0 }
 0x860   :  { %v6411_v12 = vmax.f32 %v14604_v6, 0.0 }
 0x861   :  { %v6441_v57 = vpack.c.bf16 %v6413_v8, %v6412_v4 }
 0x862   :  { %v6440_v47 = vpack.c.bf16 %v6411_v12, %v6410_v13 }
 0x864   :  { %8501 = vmatprep.mubr.msk.bf16.mxu1 %vm16159_vm3, %v6440_v47  ;;  %vm16198_vm3 = vmmov %vm16087_vm0 }
 0x865   :  { %8502 = vmatmul.mubr.msk.bf16.gmra.mrb[100].mxu1 %vm16160_vm7, %v6441_v57  ;;  %vm16199_vm7 = vmmov %vm16087_vm0 }
 0x867   :  { %v8467_v14 = vpop.f32.mrb[116].mxu0 }
 0x868   :  { %v6256_v46 = vadd.f32 %v8467_v14, %v14558_v42  ;;  %v6247_v29 = vpop.f32.mrb[117].mxu0  ;;  %v16165_v14 = vld [vmem:[#allocation30_spill] sm:$0xff] }
 0x869   :  { %v6248_v16 = vadd.f32 %v14558_v42, %v6247_v29  ;;  %v8468_v23 = vpop.f32.mrb[118].mxu0 }
 0x86a   :  { %v6352_v37 = vadd.f32 %v6256_v46, %v14356_v21  ;;  %v6259_v60 = vadd.f32 %v8468_v23, %v14558_v42  ;;  %v6250_v22 = vpop.f32.mrb[119].mxu0  ;;  %v16164_v21 = vld [vmem:[#allocation2_spill] sm:$0xff] }
 0x86b   :  { %v6350_v49 = vadd.f32 %v6248_v16, %v14353_v10  ;;  %v6251_v33 = vadd.f32 %v14558_v42, %v6250_v22  ;;  %v16166_v23 = vld [vmem:[#allocation38_spill] sm:$0xff] }
 0x86c   :  { %v14619_v40 = vadd.f32 %v6352_v37, %v16161_v34  ;;  %v6353_v43 = vadd.f32 %v6259_v60, %v14358_v5 }
 0x86d   :  { %v14623_v53 = vadd.f32 %v6350_v49, %v16162_v3  ;;  %v6351_v63 = vadd.f32 %v6251_v33, %v14360_v15 }
 0x86e   :  { %v14627_v44 = vadd.f32 %v6353_v43, %v16163_v9  ;;  %v6416_v15 = vmax.f32 %v14619_v40, 0.0 }
 0x86f   :  { %v14630_v62 = vadd.f32 %v6351_v63, %v16164_v21  ;;  %v8471_v45 = vpop.f32.mrb[120].mxu0  ;;  %v6414_v35 = vmax.f32 %v14623_v53, 0.0 }
 0x870   :  { %v6417_v10 = vmax.f32 %v14627_v44, 0.0  ;;  %v6272_v7 = vadd.f32 %v8471_v45, %v14558_v42  ;;  %v6263_v41 = vpop.f32.mrb[121].mxu0 }
 0x871   :  { %v6415_v5 = vmax.f32 %v14630_v62, 0.0  ;;  %v6264_v1 = vadd.f32 %v14558_v42, %v6263_v41  ;;  %v8472_v52 = vpop.f32.mrb[122].mxu0 }
 0x872   :  { %v6356_v8 = vadd.f32 %v6272_v7, %v14377_v28  ;;  %v6275_v13 = vadd.f32 %v8472_v52, %v14558_v42  ;;  %v6266_v12 = vpop.f32.mrb[123].mxu0  ;;  %v6443_v16 = vpack.c.bf16 %v6417_v10, %v6416_v15  ;;  %v16168_v28 = vld [vmem:[#allocation18_spill] sm:$0xff] }
 0x873   :  { %v6354_v4 = vadd.f32 %v6264_v1, %v14373_v20  ;;  %v6267_v47 = vadd.f32 %v14558_v42, %v6266_v12  ;;  %v6442_v57 = vpack.c.bf16 %v6415_v5, %v6414_v35  ;;  %v16170_v20 = vld [vmem:[#allocation22_spill] sm:$0xff]  ;;  %v16171_v1 = vld [vmem:[#allocation25_spill] sm:$0xff] }
 0x874   :  { %v14643_v46 = vadd.f32 %v6356_v8, %v16165_v14  ;;  %v6357_v29 = vadd.f32 %v6275_v13, %v14379_v26  ;;  %v16172_v13 = vld [vmem:[#allocation40_spill] sm:$0xff] }
 0x875   :  { %v14647_v37 = vadd.f32 %v6354_v4, %v16166_v23  ;;  %v6355_v60 = vadd.f32 %v6267_v47, %v14382_v17  ;;  %8505 = vmatprep.mubr.msk.bf16.mxu1 %vm16167_vm11, %v6442_v57  ;;  %vm16200_vm11 = vmmov %vm16087_vm0 }
 0x876   :  { %v14652_v22 = vadd.f32 %v6357_v29, %v16168_v28  ;;  %8506 = vmatmul.mubr.msk.bf16.gmra.mrb[104].mxu1 %vm16169_vm9, %v6443_v16  ;;  %v6420_v21 = vmax.f32 %v14643_v46, 0.0  ;;  %vm16201_vm9 = vmmov %vm16087_vm0 }
 0x877   :  { %v14656_v49 = vadd.f32 %v6355_v60, %v16170_v20  ;;  %v8475_v33 = vpop.f32.mrb[124].mxu0  ;;  %v6418_v3 = vmax.f32 %v14647_v37, 0.0 }
 0x878   :  { %v6421_v34 = vmax.f32 %v14652_v22, 0.0  ;;  %v6288_v26 = vadd.f32 %v8475_v33, %v14558_v42  ;;  %v6279_v43 = vpop.f32.mrb[125].mxu0 }
 0x879   :  { %v6419_v17 = vmax.f32 %v14656_v49, 0.0  ;;  %v6280_v63 = vadd.f32 %v14558_v42, %v6279_v43  ;;  %v8476_v9 = vpop.f32.mrb[126].mxu0 }
 0x87a   :  { %v6360_v45 = vadd.f32 %v6288_v26, %v14399_v48  ;;  %v6291_v10 = vadd.f32 %v8476_v9, %v14558_v42  ;;  %v6282_v7 = vpop.f32.mrb[127].mxu0  ;;  %v6445_v8 = vpack.c.bf16 %v6421_v34, %v6420_v21  ;;  %v16174_v48 = vld [vmem:[#allocation53_spill] sm:$0xff] }
 0x87b   :  { %v6358_v41 = vadd.f32 %v6280_v63, %v14395_v55  ;;  %v6283_v35 = vadd.f32 %v14558_v42, %v6282_v7  ;;  %v6444_v5 = vpack.c.bf16 %v6419_v17, %v6418_v3  ;;  %v16175_v55 = vld [vmem:[#allocation17_spill] sm:$0xff]  ;;  %v16176_v63 = vld [vmem:[#allocation44_spill] sm:$0xff] }
 0x87c   :  { %v14669_v52 = vadd.f32 %v6360_v45, %v16171_v1  ;;  %v6361_v15 = vadd.f32 %v6291_v10, %v14401_v11  ;;  %v16177_v10 = vld [vmem:[#allocation27_spill] sm:$0xff] }
 0x87d   :  { %v14673_v12 = vadd.f32 %v6358_v41, %v16172_v13  ;;  %v6359_v4 = vadd.f32 %v6283_v35, %v14404_v30  ;;  %8509 = vmatprep.mubr.msk.bf16.mxu1 %vm16173_vm1, %v6444_v5  ;;  %vm16202_vm1 = vmmov %vm16087_vm0 }
 0x87e   :  { %v14678_v47 = vadd.f32 %v6361_v15, %v16174_v48  ;;  %8510 = vmatmul.mubr.msk.bf16.gmra.mrb[108].mxu1 %vm16087_vm0, %v6445_v8  ;;  %v6424_v20 = vmax.f32 %v14669_v52, 0.0 }
 0x87f   :  { %v14682_v57 = vadd.f32 %v6359_v4, %v16175_v55  ;;  %v8479_v14 = vpop.f32.mrb[128].mxu0  ;;  %v6422_v23 = vmax.f32 %v14673_v12, 0.0 }
 0x880   :  { %v6425_v29 = vmax.f32 %v14678_v47, 0.0  ;;  %v6304_v11 = vadd.f32 %v8479_v14, %v14558_v42  ;;  %v6295_v16 = vpop.f32.mrb[129].mxu0 }
 0x881   :  { %v6423_v30 = vmax.f32 %v14682_v57, 0.0  ;;  %v6296_v60 = vadd.f32 %v14558_v42, %v6295_v16  ;;  %v8480_v28 = vpop.f32.mrb[130].mxu0 }
 0x882   :  { %v6364_v33 = vadd.f32 %v6304_v11, %v14421_v25  ;;  %v6307_v34 = vadd.f32 %v8480_v28, %v14558_v42  ;;  %v6298_v26 = vpop.f32.mrb[131].mxu0  ;;  %v6447_v45 = vpack.c.bf16 %v6425_v29, %v6424_v20  ;;  %v16179_v25 = vld [vmem:[#allocation24_spill] sm:$0xff] }
 0x883   :  { %v6362_v43 = vadd.f32 %v6296_v60, %v14417_v2  ;;  %v6299_v3 = vadd.f32 %v14558_v42, %v6298_v26  ;;  %v6446_v17 = vpack.c.bf16 %v6423_v30, %v6422_v23  ;;  %v16181_v2 = vld [vmem:[#allocation28_spill] sm:$0xff]  ;;  %v16182_v60 = vld [vmem:[#allocation10_spill] sm:$0xff] }
 0x884   :  { %v14695_v9 = vadd.f32 %v6364_v33, %v16176_v63  ;;  %v6365_v21 = vadd.f32 %v6307_v34, %v14423_v27  ;;  %v16183_v34 = vld [vmem:[#allocation47_spill] sm:$0xff] }
 0x885   :  { %v14699_v7 = vadd.f32 %v6362_v43, %v16177_v10  ;;  %v6363_v41 = vadd.f32 %v6299_v3, %v14426_v0  ;;  %8513 = vmatprep.mubr.msk.bf16.mxu1 %vm16178_vm13, %v6446_v17  ;;  %vm16203_vm13 = vmmov %vm16087_vm0 }
 0x886   :  { %v14704_v35 = vadd.f32 %v6365_v21, %v16179_v25  ;;  %8514 = vmatmul.mubr.msk.bf16.gmra.mrb[112].mxu1 %vm16180_vm4, %v6447_v45  ;;  %v6428_v55 = vmax.f32 %v14695_v9, 0.0  ;;  %vm16204_vm4 = vmmov %vm16087_vm0 }
 0x887   :  { %v14708_v5 = vadd.f32 %v6363_v41, %v16181_v2  ;;  %v8483_v1 = vpop.f32.mrb[132].mxu0  ;;  %v6426_v13 = vmax.f32 %v14699_v7, 0.0 }
 0x888   :  { %v6429_v15 = vmax.f32 %v14704_v35, 0.0  ;;  %v6320_v27 = vadd.f32 %v8483_v1, %v14558_v42  ;;  %v6311_v8 = vpop.f32.mrb[133].mxu0 }
 0x889   :  { %v6427_v0 = vmax.f32 %v14708_v5, 0.0  ;;  %v6312_v4 = vadd.f32 %v14558_v42, %v6311_v8  ;;  %v8484_v48 = vpop.f32.mrb[134].mxu0 }
 0x88a   :  { %v6368_v14 = vadd.f32 %v6320_v27, %v14443_v39  ;;  %v6323_v29 = vadd.f32 %v8484_v48, %v14558_v42  ;;  %v6314_v11 = vpop.f32.mrb[135].mxu0  ;;  %v6449_v33 = vpack.c.bf16 %v6429_v15, %v6428_v55  ;;  %v16185_v39 = vld [vmem:[#allocation56_spill] sm:$0xff] }
 0x88b   :  { %v6366_v16 = vadd.f32 %v6312_v4, %v14439_v18  ;;  %v6315_v23 = vadd.f32 %v14558_v42, %v6314_v11  ;;  %v6448_v30 = vpack.c.bf16 %v6427_v0, %v6426_v13  ;;  %v16187_v18 = vld [vmem:[#allocation34_spill] sm:$0xff]  ;;  %v16188_v4 = vld [vmem:[#allocation45_spill] sm:$0xff] }
 0x88c   :  { %v14721_v28 = vadd.f32 %v6368_v14, %v16182_v60  ;;  %v6369_v20 = vadd.f32 %v6323_v29, %v14445_v31  ;;  %v16189_v29 = vld [vmem:[#allocation62_spill] sm:$0xff] }
 0x88d   :  { %v14725_v26 = vadd.f32 %v6366_v16, %v16183_v34  ;;  %v6367_v43 = vadd.f32 %v6315_v23, %v14448_v54  ;;  %8517 = vmatprep.mubr.msk.bf16.mxu1 %vm16184_vm6, %v6448_v30  ;;  %v8885_v34 = vld [vmem:[%s15370_s9 + $0x50] sm:$0xff]   ;;  %vm16205_vm6 = vmmov %vm16087_vm0 }
 0x88e   :  { %v14730_v3 = vadd.f32 %v6369_v20, %v16185_v39  ;;  %8518 = vmatmul.mubr.msk.bf16.gmra.mrb[116].mxu1 %vm16186_vm10, %v6449_v33  ;;  %v6432_v2 = vmax.f32 %v14721_v28, 0.0  ;;  %8533 = vmatprep.subr.bf16.mxu0 %v8885_v34  ;;  %v8887_v39 = vld [vmem:[%s15373_s11] sm:$0xff]   ;;  %vm16206_vm10 = vmmov %vm16087_vm0 }
 0x88f   :  { %v14734_v17 = vadd.f32 %v6367_v43, %v16187_v18  ;;  %v8487_v63 = vpop.f32.mrb[136].mxu0  ;;  %v6430_v10 = vmax.f32 %v14725_v26, 0.0  ;;  %v8886_v43 = vld [vmem:[%s15370_s9 + $0x58] sm:$0xff]   ;;  %8534 = vmatpush3.bf16.msra.mxu0 %v8885_v34  ;;  %8569 = vmatprep.subr.bf16.mxu1 %v8887_v39  ;;  %v14780_v18 = vld [vmem:[%s15371_s8 + $0x2] ss:$0 sm:$0xff] }
 0x890   :  { %v6433_v21 = vmax.f32 %v14730_v3, 0.0  ;;  %v6336_v31 = vadd.f32 %v8487_v63, %v14558_v42  ;;  %v6327_v45 = vpop.f32.mrb[137].mxu0  ;;  %8535 = vmatprep.subr.bf16.mxu0 %v8886_v43  ;;  %8570 = vmatpush3.bf16.msra.mxu1 %v8887_v39 }
 0x891   :  { %v6431_v54 = vmax.f32 %v14734_v17, 0.0  ;;  %v6328_v41 = vadd.f32 %v14558_v42, %v6327_v45  ;;  %v8488_v25 = vpop.f32.mrb[138].mxu0 }
 0x892   :  { %v6372_v1 = vadd.f32 %v6336_v31, %v14465_v38  ;;  %v6339_v15 = vadd.f32 %v8488_v25, %v14558_v42  ;;  %v6330_v27 = vpop.f32.mrb[139].mxu0  ;;  %v6451_v14 = vpack.c.bf16 %v6433_v21, %v6432_v2  ;;  %v16191_v38 = vld [vmem:[#allocation42_spill] sm:$0xff] }
 0x893   :  { %v6370_v8 = vadd.f32 %v6328_v41, %v14461_v58  ;;  %v6331_v13 = vadd.f32 %v14558_v42, %v6330_v27  ;;  %v6450_v0 = vpack.c.bf16 %v6431_v54, %v6430_v10  ;;  %v16193_v58 = vld [vmem:[#allocation39_spill] sm:$0xff]  ;;  %8536 = vmatpush3.bf16.msra.mxu0 %v8886_v43 }
 0x894   :  { %v14747_v48 = vadd.f32 %v6372_v1, %v16188_v4  ;;  %v6373_v55 = vadd.f32 %v6339_v15, %v14467_v36 }
 0x895   :  { %v14751_v11 = vadd.f32 %v6370_v8, %v16189_v29  ;;  %v6371_v16 = vadd.f32 %v6331_v13, %v14470_v24  ;;  %8521 = vmatprep.mubr.msk.bf16.mxu1 %vm16190_vm14, %v6450_v0  ;;  %vm16207_vm14 = vmmov %vm16087_vm0 }
 0x896   :  { %v14756_v23 = vadd.f32 %v6373_v55, %v16191_v38  ;;  %8522 = vmatmul.mubr.msk.bf16.gmra.mrb[120].mxu1 %vm16192_vm15, %v6451_v14  ;;  %v6436_v20 = vmax.f32 %v14747_v48, 0.0  ;;  %vm16208_vm15 = vmmov %vm16087_vm0 }
 0x897   :  { %v14760_v42 = vadd.f32 %v6371_v16, %v16193_v58  ;;  %v6434_v36 = vmax.f32 %v14751_v11, 0.0 }
 0x898   :  { %v6437_v30 = vmax.f32 %v14756_v23, 0.0 }
 0x899   :  { %v6435_v60 = vmax.f32 %v14760_v42, 0.0 }
 0x89a   :  { %v6453_v24 = vpack.c.bf16 %v6437_v30, %v6436_v20 }
 0x89b   :  { %v6452_v33 = vpack.c.bf16 %v6435_v60, %v6434_v36 }
 0x89d   :  { %8525 = vmatprep.mubr.msk.bf16.mxu1 %vm16194_vm8, %v6452_v33  ;;  %vm16209_vm8 = vmmov %vm16087_vm0 }
 0x89e   :  { %8526 = vmatmul.mubr.msk.bf16.gmra.mrb[124].mxu1 %vm16195_vm2, %v6453_v24  ;;  %vm16210_vm2 = vmmov %vm16087_vm0 }
 0x91b   :  { %v8499_v63 = vpop.f32.mrb[96].mxu1 }
 0x91c   :  { %v6586_v21 = vadd.f32 %v8499_v63, %v14780_v18  ;;  %v6577_v31 = vpop.f32.mrb[97].mxu1 }
 0x91d   :  { %v6578_v45 = vadd.f32 %v14780_v18, %v6577_v31  ;;  %v8500_v10 = vpop.f32.mrb[98].mxu1 }
 0x91e   :  { %v6589_v54 = vadd.f32 %v8500_v10, %v14780_v18  ;;  %v6580_v41 = vpop.f32.mrb[99].mxu1  ;;  %v6706_v2 = vmax.f32 %v6586_v21, 0.0 }
 0x91f   :  { %v6581_v25 = vadd.f32 %v14780_v18, %v6580_v41  ;;  %v6704_v15 = vmax.f32 %v6578_v45, 0.0 }
 0x920   :  { %v6707_v1 = vmax.f32 %v6589_v54, 0.0 }
 0x921   :  { %v6705_v27 = vmax.f32 %v6581_v25, 0.0 }
 0x922   :  { %v6737_v8 = vpack.c.bf16 %v6707_v1, %v6706_v2 }
 0x923   :  { %v6736_v13 = vpack.c.bf16 %v6705_v27, %v6704_v15 }
 0x925   :  { %8537 = vmatprep.mubr.msk.bf16.mxu0 %vm16196_vm5, %v6736_v13  ;;  %vm16211_vm5 = vmmov %vm16087_vm0 }
 0x926   :  { %8538 = vmatmul.mubr.msk.bf16.vlgmr.msra.gmra.mrb[140].mxu0 %vm16197_vm12, %v6737_v8  ;;  %vm16212_vm12 = vmmov %vm16087_vm0 }
 0x938   :  { %v8503_v0 = vpop.f32.mrb[100].mxu1 }
 0x939   :  { %v6602_v4 = vadd.f32 %v8503_v0, %v14780_v18  ;;  %v6593_v55 = vpop.f32.mrb[101].mxu1 }
 0x93a   :  { %v6594_v14 = vadd.f32 %v14780_v18, %v6593_v55  ;;  %v8504_v29 = vpop.f32.mrb[102].mxu1 }
 0x93b   :  { %v6605_v16 = vadd.f32 %v8504_v29, %v14780_v18  ;;  %v6596_v38 = vpop.f32.mrb[103].mxu1  ;;  %v6710_v30 = vmax.f32 %v6602_v4, 0.0 }
 0x93c   :  { %v6597_v58 = vadd.f32 %v14780_v18, %v6596_v38  ;;  %v6708_v60 = vmax.f32 %v6594_v14, 0.0 }
 0x93d   :  { %v6711_v36 = vmax.f32 %v6605_v16, 0.0 }
 0x93e   :  { %v6709_v20 = vmax.f32 %v6597_v58, 0.0 }
 0x93f   :  { %v6739_v33 = vpack.c.bf16 %v6711_v36, %v6710_v30 }
 0x940   :  { %v6738_v24 = vpack.c.bf16 %v6709_v20, %v6708_v60 }
 0x942   :  { %8541 = vmatprep.mubr.msk.bf16.mxu0 %vm16198_vm3, %v6738_v24  ;;  %vm16213_vm3 = vmmov %vm16087_vm0 }
 0x943   :  { %8542 = vmatmul.mubr.msk.bf16.gmra.mrb[144].mxu0 %vm16199_vm7, %v6739_v33  ;;  %vm16214_vm7 = vmmov %vm16087_vm0 }
 0x949   :  { %v8507_v34 = vpop.f32.mrb[104].mxu1 }
 0x94a   :  { %v6618_v43 = vadd.f32 %v8507_v34, %v14780_v18  ;;  %v6609_v39 = vpop.f32.mrb[105].mxu1 }
 0x94b   :  { %v6610_v63 = vadd.f32 %v14780_v18, %v6609_v39  ;;  %v8508_v21 = vpop.f32.mrb[106].mxu1 }
 0x94c   :  { %v6621_v31 = vadd.f32 %v8508_v21, %v14780_v18  ;;  %v6612_v45 = vpop.f32.mrb[107].mxu1  ;;  %v6714_v54 = vmax.f32 %v6618_v43, 0.0 }
 0x94d   :  { %v6613_v10 = vadd.f32 %v14780_v18, %v6612_v45  ;;  %v6712_v25 = vmax.f32 %v6610_v63, 0.0 }
 0x94e   :  { %v6715_v41 = vmax.f32 %v6621_v31, 0.0 }
 0x94f   :  { %v6713_v2 = vmax.f32 %v6613_v10, 0.0 }
 0x950   :  { %v6741_v1 = vpack.c.bf16 %v6715_v41, %v6714_v54 }
 0x951   :  { %v6740_v15 = vpack.c.bf16 %v6713_v2, %v6712_v25  ;;  %v8511_v27 = vpop.f32.mrb[108].mxu1 }
 0x952   :  { %v6634_v8 = vadd.f32 %v8511_v27, %v14780_v18  ;;  %v6625_v13 = vpop.f32.mrb[109].mxu1 }
 0x953   :  { %v6626_v0 = vadd.f32 %v14780_v18, %v6625_v13  ;;  %v8512_v4 = vpop.f32.mrb[110].mxu1  ;;  %8545 = vmatprep.mubr.msk.bf16.mxu0 %vm16200_vm11, %v6740_v15  ;;  %vm16215_vm11 = vmmov %vm16087_vm0 }
 0x954   :  { %v6637_v55 = vadd.f32 %v8512_v4, %v14780_v18  ;;  %v6628_v14 = vpop.f32.mrb[111].mxu1  ;;  %8546 = vmatmul.mubr.msk.bf16.gmra.mrb[148].mxu0 %vm16201_vm9, %v6741_v1  ;;  %v6718_v16 = vmax.f32 %v6634_v8, 0.0  ;;  %vm16216_vm9 = vmmov %vm16087_vm0 }
 0x955   :  { %v6629_v29 = vadd.f32 %v14780_v18, %v6628_v14  ;;  %v6716_v58 = vmax.f32 %v6626_v0, 0.0 }
 0x956   :  { %v6719_v38 = vmax.f32 %v6637_v55, 0.0 }
 0x957   :  { %v6717_v30 = vmax.f32 %v6629_v29, 0.0 }
 0x958   :  { %v6743_v36 = vpack.c.bf16 %v6719_v38, %v6718_v16 }
 0x959   :  { %v6742_v60 = vpack.c.bf16 %v6717_v30, %v6716_v58  ;;  %v8515_v20 = vpop.f32.mrb[112].mxu1 }
 0x95a   :  { %v6650_v33 = vadd.f32 %v8515_v20, %v14780_v18  ;;  %v6641_v24 = vpop.f32.mrb[113].mxu1 }
 0x95b   :  { %v6642_v34 = vadd.f32 %v14780_v18, %v6641_v24  ;;  %v8516_v43 = vpop.f32.mrb[114].mxu1  ;;  %8549 = vmatprep.mubr.msk.bf16.mxu0 %vm16202_vm1, %v6742_v60  ;;  %vm16217_vm1 = vmmov %vm16087_vm0 }
 0x95c   :  { %v6653_v39 = vadd.f32 %v8516_v43, %v14780_v18  ;;  %v6644_v63 = vpop.f32.mrb[115].mxu1  ;;  %8550 = vmatmul.mubr.msk.bf16.gmra.mrb[152].mxu0 %vm16087_vm0, %v6743_v36  ;;  %v6722_v31 = vmax.f32 %v6650_v33, 0.0 }
 0x95d   :  { %v6645_v21 = vadd.f32 %v14780_v18, %v6644_v63  ;;  %v6720_v10 = vmax.f32 %v6642_v34, 0.0 }
 0x95e   :  { %v6723_v45 = vmax.f32 %v6653_v39, 0.0 }
 0x95f   :  { %v6721_v54 = vmax.f32 %v6645_v21, 0.0 }
 0x960   :  { %v6745_v41 = vpack.c.bf16 %v6723_v45, %v6722_v31 }
 0x961   :  { %v6744_v25 = vpack.c.bf16 %v6721_v54, %v6720_v10  ;;  %v8519_v2 = vpop.f32.mrb[116].mxu1 }
 0x962   :  { %v6666_v1 = vadd.f32 %v8519_v2, %v14780_v18  ;;  %v6657_v15 = vpop.f32.mrb[117].mxu1 }
 0x963   :  { %v6658_v27 = vadd.f32 %v14780_v18, %v6657_v15  ;;  %v8520_v8 = vpop.f32.mrb[118].mxu1  ;;  %8553 = vmatprep.mubr.msk.bf16.mxu0 %vm16203_vm13, %v6744_v25  ;;  %vm16218_vm13 = vmmov %vm16087_vm0 }
 0x964   :  { %v6669_v13 = vadd.f32 %v8520_v8, %v14780_v18  ;;  %v6660_v0 = vpop.f32.mrb[119].mxu1  ;;  %8554 = vmatmul.mubr.msk.bf16.gmra.mrb[156].mxu0 %vm16204_vm4, %v6745_v41  ;;  %v6726_v55 = vmax.f32 %v6666_v1, 0.0  ;;  %vm16219_vm4 = vmmov %vm16087_vm0 }
 0x965   :  { %v6661_v4 = vadd.f32 %v14780_v18, %v6660_v0  ;;  %v6724_v29 = vmax.f32 %v6658_v27, 0.0 }
 0x966   :  { %v6727_v14 = vmax.f32 %v6669_v13, 0.0 }
 0x967   :  { %v6725_v16 = vmax.f32 %v6661_v4, 0.0 }
 0x968   :  { %v6747_v38 = vpack.c.bf16 %v6727_v14, %v6726_v55 }
 0x969   :  { %v6746_v58 = vpack.c.bf16 %v6725_v16, %v6724_v29  ;;  %v8523_v30 = vpop.f32.mrb[120].mxu1  ;;  %v8888_v16 = vld [vmem:[%s15373_s11 + $0x8] sm:$0xff]  }
 0x96a   :  { %v6682_v36 = vadd.f32 %v8523_v30, %v14780_v18  ;;  %v6673_v60 = vpop.f32.mrb[121].mxu1  ;;  %8571 = vmatprep.subr.bf16.mxu1 %v8888_v16 }
 0x96b   :  { %v6674_v20 = vadd.f32 %v14780_v18, %v6673_v60  ;;  %v8524_v33 = vpop.f32.mrb[122].mxu1  ;;  %8557 = vmatprep.mubr.msk.bf16.mxu0 %vm16205_vm6, %v6746_v58  ;;  %8572 = vmatpush3.bf16.msra.mxu1 %v8888_v16  ;;  %v14842_v58 = vld [vmem:[%s15372_s10 + $0x2] ss:$0 sm:$0xff]  ;;  %vm16220_vm6 = vmmov %vm16087_vm0 }
 0x96c   :  { %v6685_v24 = vadd.f32 %v8524_v33, %v14780_v18  ;;  %v6676_v34 = vpop.f32.mrb[123].mxu1  ;;  %8558 = vmatmul.mubr.msk.bf16.gmra.mrb[160].mxu0 %vm16206_vm10, %v6747_v38  ;;  %v6730_v39 = vmax.f32 %v6682_v36, 0.0  ;;  %v8890_v38 = vld [vmem:[%s15373_s11 + $0x18] sm:$0xff]   ;;  %vm16221_vm10 = vmmov %vm16087_vm0 }
 0x96d   :  { %v6677_v43 = vadd.f32 %v14780_v18, %v6676_v34  ;;  %v6728_v21 = vmax.f32 %v6674_v20, 0.0 }
 0x96e   :  { %v6731_v63 = vmax.f32 %v6685_v24, 0.0 }
 0x96f   :  { %v6729_v31 = vmax.f32 %v6677_v43, 0.0 }
 0x970   :  { %v6749_v45 = vpack.c.bf16 %v6731_v63, %v6730_v39 }
 0x971   :  { %v6748_v10 = vpack.c.bf16 %v6729_v31, %v6728_v21  ;;  %v8527_v54 = vpop.f32.mrb[124].mxu1 }
 0x972   :  { %v6698_v41 = vadd.f32 %v8527_v54, %v14780_v18  ;;  %v6689_v25 = vpop.f32.mrb[125].mxu1 }
 0x973   :  { %v6690_v2 = vadd.f32 %v14780_v18, %v6689_v25  ;;  %v8528_v1 = vpop.f32.mrb[126].mxu1  ;;  %8561 = vmatprep.mubr.msk.bf16.mxu0 %vm16207_vm14, %v6748_v10  ;;  %vm16222_vm14 = vmmov %vm16087_vm0 }
 0x974   :  { %v6701_v15 = vadd.f32 %v8528_v1, %v14780_v18  ;;  %v6692_v27 = vpop.f32.mrb[127].mxu1  ;;  %8562 = vmatmul.mubr.msk.bf16.gmra.mrb[164].mxu0 %vm16208_vm15, %v6749_v45  ;;  %v6734_v13 = vmax.f32 %v6698_v41, 0.0  ;;  %vm16223_vm15 = vmmov %vm16087_vm0 }
 0x975   :  { %v6693_v8 = vadd.f32 %v14780_v18, %v6692_v27  ;;  %v6732_v4 = vmax.f32 %v6690_v2, 0.0  ;;  %v8889_v18 = vld [vmem:[%s15373_s11 + $0x10] sm:$0xff]  }
 0x976   :  { %v6735_v0 = vmax.f32 %v6701_v15, 0.0  ;;  %8573 = vmatprep.subr.bf16.mxu1 %v8889_v18 }
 0x977   :  { %v6733_v55 = vmax.f32 %v6693_v8, 0.0  ;;  %8574 = vmatpush3.bf16.msra.mxu1 %v8889_v18 }
 0x978   :  { %v6751_v14 = vpack.c.bf16 %v6735_v0, %v6734_v13  ;;  %8575 = vmatprep.subr.bf16.mxu1 %v8890_v38 }
 0x979   :  { %v6750_v29 = vpack.c.bf16 %v6733_v55, %v6732_v4 }
 0x97b   :  { %8565 = vmatprep.mubr.msk.bf16.mxu0 %vm16209_vm8, %v6750_v29  ;;  %8576 = vmatpush3.bf16.msra.mxu1 %v8890_v38  ;;  %vm16224_vm8 = vmmov %vm16087_vm0 }
 0x97c   :  { %8566 = vmatmul.mubr.msk.bf16.gmra.mrb[168].mxu0 %vm16210_vm2, %v6751_v14  ;;  %vm16225_vm2 = vmmov %vm16087_vm0 }
 0x9f9   :  { %v8539_v30 = vpop.f32.mrb[140].mxu0 }
 0x9fa   :  { %v6884_v36 = vadd.f32 %v8539_v30, %v14842_v58  ;;  %v6875_v60 = vpop.f32.mrb[141].mxu0 }
 0x9fb   :  { %v6876_v20 = vadd.f32 %v14842_v58, %v6875_v60  ;;  %v8540_v33 = vpop.f32.mrb[142].mxu0 }
 0x9fc   :  { %v7004_v24 = vadd.f32 %v6884_v36, %v14567_v50  ;;  %v6887_v34 = vadd.f32 %v8540_v33, %v14842_v58  ;;  %v6878_v43 = vpop.f32.mrb[143].mxu0 }
 0x9fd   :  { %v7002_v39 = vadd.f32 %v6876_v20, %v14571_v61  ;;  %v6879_v63 = vadd.f32 %v14842_v58, %v6878_v43 }
 0x9fe   :  { %v7005_v21 = vadd.f32 %v6887_v34, %v14575_v59  ;;  %v7036_v45 = vmax.f32 %v7004_v24, 0.0 }
 0x9ff   :  { %v7003_v31 = vadd.f32 %v6879_v63, %v14578_v56  ;;  %v7034_v54 = vmax.f32 %v7002_v39, 0.0 }
 0xa00   :  { %v7037_v10 = vmax.f32 %v7005_v21, 0.0 }
 0xa01   :  { %v7035_v41 = vmax.f32 %v7003_v31, 0.0 }
 0xa02   :  { %v7067_v25 = vpack.c.bf16 %v7037_v10, %v7036_v45 }
 0xa03   :  { %v7066_v2 = vpack.c.bf16 %v7035_v41, %v7034_v54 }
 0xa05   :  { %8577 = vmatprep.mubr.msk.bf16.mxu1 %vm16211_vm5, %v7066_v2 }
 0xa06   :  { %8578 = vmatmul.mubr.msk.bf16.vlgmr.msra.gmra.mrb[128].mxu1 %vm16212_vm12, %v7067_v25 }
 0xa16   :  { %v8543_v50 = vpop.f32.mrb[144].mxu0 }
 0xa17   :  { %v6900_v1 = vadd.f32 %v8543_v50, %v14842_v58  ;;  %v6891_v61 = vpop.f32.mrb[145].mxu0 }
 0xa18   :  { %v6892_v15 = vadd.f32 %v14842_v58, %v6891_v61  ;;  %v8544_v27 = vpop.f32.mrb[146].mxu0 }
 0xa19   :  { %v7008_v59 = vadd.f32 %v6900_v1, %v14593_v19  ;;  %v6903_v56 = vadd.f32 %v8544_v27, %v14842_v58  ;;  %v6894_v8 = vpop.f32.mrb[147].mxu0 }
 0xa1a   :  { %v7006_v13 = vadd.f32 %v6892_v15, %v14597_v32  ;;  %v6895_v0 = vadd.f32 %v14842_v58, %v6894_v8 }
 0xa1b   :  { %v7009_v4 = vadd.f32 %v6903_v56, %v14601_v51  ;;  %v7040_v14 = vmax.f32 %v7008_v59, 0.0 }
 0xa1c   :  { %v7007_v55 = vadd.f32 %v6895_v0, %v14604_v6  ;;  %v7038_v16 = vmax.f32 %v7006_v13, 0.0 }
 0xa1d   :  { %v7041_v29 = vmax.f32 %v7009_v4, 0.0 }
 0xa1e   :  { %v7039_v18 = vmax.f32 %v7007_v55, 0.0 }
 0xa1f   :  { %v7069_v38 = vpack.c.bf16 %v7041_v29, %v7040_v14 }
 0xa20   :  { %v7068_v30 = vpack.c.bf16 %v7039_v18, %v7038_v16 }
 0xa22   :  { %8581 = vmatprep.mubr.msk.bf16.mxu1 %vm16213_vm3, %v7068_v30  ;;  %vm7622_vm3 = vcmask 261120  }
 0xa23   :  { %8582 = vmatmul.mubr.msk.bf16.gmra.mrb[132].mxu1 %vm16214_vm7, %v7069_v38 }
 0xa27   :  { %v8547_v19 = vpop.f32.mrb[148].mxu0 }
 0xa28   :  { %v6916_v36 = vadd.f32 %v8547_v19, %v14842_v58  ;;  %v6907_v32 = vpop.f32.mrb[149].mxu0 }
 0xa29   :  { %v6908_v60 = vadd.f32 %v14842_v58, %v6907_v32  ;;  %v8548_v20 = vpop.f32.mrb[150].mxu0 }
 0xa2a   :  { %v7012_v51 = vadd.f32 %v6916_v36, %v14619_v40  ;;  %v6919_v6 = vadd.f32 %v8548_v20, %v14842_v58  ;;  %v6910_v33 = vpop.f32.mrb[151].mxu0 }
 0xa2b   :  { %v7010_v24 = vadd.f32 %v6908_v60, %v14623_v53  ;;  %v6911_v34 = vadd.f32 %v14842_v58, %v6910_v33 }
 0xa2c   :  { %v7013_v43 = vadd.f32 %v6919_v6, %v14627_v44  ;;  %v7044_v63 = vmax.f32 %v7012_v51, 0.0 }
 0xa2d   :  { %v7011_v39 = vadd.f32 %v6911_v34, %v14630_v62  ;;  %v7042_v31 = vmax.f32 %v7010_v24, 0.0 }
 0xa2e   :  { %v7045_v21 = vmax.f32 %v7013_v43, 0.0 }
 0xa2f   :  { %v7043_v45 = vmax.f32 %v7011_v39, 0.0  ;;  %v8551_v10 = vpop.f32.mrb[152].mxu0 }
 0xa30   :  { %v7071_v54 = vpack.c.bf16 %v7045_v21, %v7044_v63  ;;  %v6932_v41 = vadd.f32 %v8551_v10, %v14842_v58  ;;  %v6923_v40 = vpop.f32.mrb[153].mxu0 }
 0xa31   :  { %v7070_v25 = vpack.c.bf16 %v7043_v45, %v7042_v31  ;;  %v6924_v2 = vadd.f32 %v14842_v58, %v6923_v40  ;;  %v8552_v50 = vpop.f32.mrb[154].mxu0 }
 0xa32   :  { %v7016_v53 = vadd.f32 %v6932_v41, %v14643_v46  ;;  %v6935_v1 = vadd.f32 %v8552_v50, %v14842_v58  ;;  %v6926_v44 = vpop.f32.mrb[155].mxu0 }
 0xa33   :  { %v7014_v62 = vadd.f32 %v6924_v2, %v14647_v37  ;;  %v6927_v61 = vadd.f32 %v14842_v58, %v6926_v44  ;;  %8585 = vmatprep.mubr.msk.bf16.mxu1 %vm16215_vm11, %v7070_v25 }
 0xa34   :  { %v7017_v15 = vadd.f32 %v6935_v1, %v14652_v22  ;;  %8586 = vmatmul.mubr.msk.bf16.gmra.mrb[136].mxu1 %vm16216_vm9, %v7071_v54  ;;  %v7048_v59 = vmax.f32 %v7016_v53, 0.0 }
 0xa35   :  { %v7015_v27 = vadd.f32 %v6927_v61, %v14656_v49  ;;  %v7046_v8 = vmax.f32 %v7014_v62, 0.0 }
 0xa36   :  { %v7049_v56 = vmax.f32 %v7017_v15, 0.0 }
 0xa37   :  { %v7047_v13 = vmax.f32 %v7015_v27, 0.0  ;;  %v8555_v46 = vpop.f32.mrb[156].mxu0 }
 0xa38   :  { %v7073_v0 = vpack.c.bf16 %v7049_v56, %v7048_v59  ;;  %v6948_v4 = vadd.f32 %v8555_v46, %v14842_v58  ;;  %v6939_v55 = vpop.f32.mrb[157].mxu0 }
 0xa39   :  { %v7072_v37 = vpack.c.bf16 %v7047_v13, %v7046_v8  ;;  %v6940_v14 = vadd.f32 %v14842_v58, %v6939_v55  ;;  %v8556_v29 = vpop.f32.mrb[158].mxu0 }
 0xa3a   :  { %v7020_v16 = vadd.f32 %v6948_v4, %v14669_v52  ;;  %v6951_v22 = vadd.f32 %v8556_v29, %v14842_v58  ;;  %v6942_v18 = vpop.f32.mrb[159].mxu0 }
 0xa3b   :  { %v7018_v49 = vadd.f32 %v6940_v14, %v14673_v12  ;;  %v6943_v38 = vadd.f32 %v14842_v58, %v6942_v18  ;;  %8589 = vmatprep.mubr.msk.bf16.mxu1 %vm16217_vm1, %v7072_v37 }
 0xa3c   :  { %v7021_v30 = vadd.f32 %v6951_v22, %v14678_v47  ;;  %8590 = vmatmul.mubr.msk.bf16.gmra.mrb[140].mxu1 %vm16087_vm0, %v7073_v0  ;;  %v7052_v36 = vmax.f32 %v7020_v16, 0.0 }
 0xa3d   :  { %v7019_v19 = vadd.f32 %v6943_v38, %v14682_v57  ;;  %v7050_v60 = vmax.f32 %v7018_v49, 0.0 }
 0xa3e   :  { %v7053_v32 = vmax.f32 %v7021_v30, 0.0 }
 0xa3f   :  { %v7051_v20 = vmax.f32 %v7019_v19, 0.0  ;;  %v8559_v52 = vpop.f32.mrb[160].mxu0 }
 0xa40   :  { %v7075_v51 = vpack.c.bf16 %v7053_v32, %v7052_v36  ;;  %v6964_v6 = vadd.f32 %v8559_v52, %v14842_v58  ;;  %v6955_v33 = vpop.f32.mrb[161].mxu0 }
 0xa41   :  { %v7074_v12 = vpack.c.bf16 %v7051_v20, %v7050_v60  ;;  %v6956_v24 = vadd.f32 %v14842_v58, %v6955_v33  ;;  %v8560_v34 = vpop.f32.mrb[162].mxu0 }
 0xa42   :  { %v7024_v43 = vadd.f32 %v6964_v6, %v14695_v9  ;;  %v6967_v47 = vadd.f32 %v8560_v34, %v14842_v58  ;;  %v6958_v39 = vpop.f32.mrb[163].mxu0 }
 0xa43   :  { %v7022_v57 = vadd.f32 %v6956_v24, %v14699_v7  ;;  %v6959_v63 = vadd.f32 %v14842_v58, %v6958_v39  ;;  %8593 = vmatprep.mubr.msk.bf16.mxu1 %vm16218_vm13, %v7074_v12 }
 0xa44   :  { %v7025_v21 = vadd.f32 %v6967_v47, %v14704_v35  ;;  %8594 = vmatmul.mubr.msk.bf16.gmra.mrb[144].mxu1 %vm16219_vm4, %v7075_v51  ;;  %v7056_v45 = vmax.f32 %v7024_v43, 0.0 }
 0xa45   :  { %v7023_v31 = vadd.f32 %v6959_v63, %v14708_v5  ;;  %v7054_v54 = vmax.f32 %v7022_v57, 0.0 }
 0xa46   :  { %v7057_v10 = vmax.f32 %v7025_v21, 0.0 }
 0xa47   :  { %v7055_v41 = vmax.f32 %v7023_v31, 0.0  ;;  %v8563_v9 = vpop.f32.mrb[164].mxu0  ;;  %v16226_v31 = vlaneseq }
 0xa48   :  { %v7077_v40 = vpack.c.bf16 %v7057_v10, %v7056_v45  ;;  %v6980_v25 = vadd.f32 %v8563_v9, %v14842_v58  ;;  %v6971_v2 = vpop.f32.mrb[165].mxu0 }
 0xa49   :  { %v7076_v7 = vpack.c.bf16 %v7055_v41, %v7054_v54  ;;  %v6972_v50 = vadd.f32 %v14842_v58, %v6971_v2  ;;  %v8564_v53 = vpop.f32.mrb[166].mxu0  ;;  %v14934_v45 = vand.u32 127, %v16226_v31 }
 0xa4a   :  { %v7028_v1 = vadd.f32 %v6980_v25, %v14721_v28  ;;  %v6983_v35 = vadd.f32 %v8564_v53, %v14842_v58  ;;  %v6974_v44 = vpop.f32.mrb[167].mxu0 }
 0xa4b   :  { %v7026_v5 = vadd.f32 %v6972_v50, %v14725_v26  ;;  %v6975_v62 = vadd.f32 %v14842_v58, %v6974_v44  ;;  %8597 = vmatprep.mubr.msk.bf16.mxu1 %vm16220_vm6, %v7076_v7  ;;  %vm7525_vm5 = vcmp.eq.s32.totalorder %v14934_v45, 3  ;;  %vm7332_vm12 = vcmp.lt.s32.totalorder %v14934_v45, 3 }
 0xa4c   :  { %v7029_v61 = vadd.f32 %v6983_v35, %v14730_v3  ;;  %8598 = vmatmul.mubr.msk.bf16.gmra.mrb[148].mxu1 %vm16221_vm10, %v7077_v40  ;;  %v7060_v27 = vmax.f32 %v7028_v1, 0.0 }
 0xa4d   :  { %v7027_v15 = vadd.f32 %v6975_v62, %v14734_v17  ;;  %v7058_v56 = vmax.f32 %v7026_v5, 0.0 }
 0xa4e   :  { %v7061_v59 = vmax.f32 %v7029_v61, 0.0 }
 0xa4f   :  { %v7059_v8 = vmax.f32 %v7027_v15, 0.0  ;;  %v8567_v28 = vpop.f32.mrb[168].mxu0 }
 0xa50   :  { %v7079_v13 = vpack.c.bf16 %v7061_v59, %v7060_v27  ;;  %v6996_v46 = vadd.f32 %v8567_v28, %v14842_v58  ;;  %v6987_v0 = vpop.f32.mrb[169].mxu0 }
 0xa51   :  { %v7078_v26 = vpack.c.bf16 %v7059_v8, %v7058_v56  ;;  %v6988_v4 = vadd.f32 %v14842_v58, %v6987_v0  ;;  %v8568_v55 = vpop.f32.mrb[170].mxu0 }
 0xa52   :  { %v7032_v37 = vadd.f32 %v6996_v46, %v14747_v48  ;;  %v6999_v3 = vadd.f32 %v8568_v55, %v14842_v58  ;;  %v6990_v14 = vpop.f32.mrb[171].mxu0 }
 0xa53   :  { %v7030_v17 = vadd.f32 %v6988_v4, %v14751_v11  ;;  %v6991_v29 = vadd.f32 %v14842_v58, %v6990_v14  ;;  %8601 = vmatprep.mubr.msk.bf16.mxu1 %vm16222_vm14, %v7078_v26  ;;  %v14927_v11 = vld [vmem:[%s15374_s12] ss:$0 sm:$0xff] }
 0xa54   :  { %v7033_v16 = vadd.f32 %v6999_v3, %v14756_v23  ;;  %8602 = vmatmul.mubr.msk.bf16.gmra.mrb[152].mxu1 %vm16223_vm15, %v7079_v13  ;;  %v7064_v18 = vmax.f32 %v7032_v37, 0.0 }
 0xa55   :  { %v7031_v22 = vadd.f32 %v6991_v29, %v14760_v42  ;;  %v7062_v38 = vmax.f32 %v7030_v17, 0.0 }
 0xa56   :  { %v7065_v49 = vmax.f32 %v7033_v16, 0.0 }
 0xa57   :  { %v7063_v30 = vmax.f32 %v7031_v22, 0.0 }
 0xa58   :  { %v7081_v48 = vpack.c.bf16 %v7065_v49, %v7064_v18 }
 0xa59   :  { %v7080_v19 = vpack.c.bf16 %v7063_v30, %v7062_v38 }
 0xa5b   :  { %8605 = vmatprep.mubr.msk.bf16.mxu1 %vm16224_vm8, %v7080_v19 }
 0xa5c   :  { %8606 = vmatmul.mubr.msk.bf16.gmra.mrb[156].mxu1 %vm16225_vm2, %v7081_v48 }
 0xad9   :  { %v8579_v23 = vpop.f32.mrb[128].mxu1 }
 0xada   :  { %v7212_v58 = vadd.f32 %v8579_v23, %v14927_v11  ;;  %v7203_v36 = vpop.f32.mrb[129].mxu1 }
 0xadb   :  { %v7204_v42 = vadd.f32 %v14927_v11, %v7203_v36  ;;  %v8580_v32 = vpop.f32.mrb[130].mxu1 }
 0xadc   :  { %v8051_v60 = vmul.f32 -1.442695, %v7212_v58  ;;  %v7215_v20 = vadd.f32 %v8580_v32, %v14927_v11  ;;  %v7206_v52 = vpop.f32.mrb[131].mxu1  ;;  %v7528_v10 = vmax.f32 %v7212_v58, 0.0 }
 0xadd   :  { %v8049_v51 = vmul.f32 -1.442695, %v7204_v42  ;;  %v7207_v6 = vadd.f32 %v14927_v11, %v7206_v52  ;;  %v7526_v54 = vmax.f32 %v7204_v42, 0.0 }
 0xade   :  { %9019 = vpow2.f32 %v8051_v60  ;;  %v8052_v33 = vmul.f32 -1.442695, %v7215_v20  ;;  %v7529_v41 = vmax.f32 %v7215_v20, 0.0  ;;  %v7560_v50 = vsel %vm7525_vm5, %v7528_v10, %v7212_v58 }
 0xadf   :  { %9021 = vpow2.f32 %v8049_v51  ;;  %v8050_v12 = vmul.f32 -1.442695, %v7207_v6  ;;  %v7527_v40 = vmax.f32 %v7207_v6, 0.0  ;;  %v7558_v5 = vsel %vm7525_vm5, %v7526_v54, %v7204_v42 }
 0xae0   :  { %9023 = vpow2.f32 %v8052_v33  ;;  %v7561_v56 = vsel %vm7525_vm5, %v7529_v41, %v7215_v20 }
 0xae1   :  { %9025 = vpow2.f32 %v8050_v12  ;;  %v7559_v0 = vsel %vm7525_vm5, %v7527_v40, %v7207_v6 }
 0xae8   :  { %v9020_v24 = vpop.eup %9019 }
 0xae9   :  { %v9022_v34 = vpop.eup %9021  ;;  %v7431_v43 = vadd.f32 1.0, %v9020_v24 }
 0xaea   :  { %v9024_v47 = vpop.eup %9023  ;;  %v7429_v39 = vadd.f32 1.0, %v9022_v34 }
 0xaeb   :  { %v9026_v57 = vpop.eup %9025  ;;  %9027 = vrcp.f32 %v7431_v43  ;;  %v7432_v63 = vadd.f32 1.0, %v9024_v47 }
 0xaec   :  { %9029 = vrcp.f32 %v7429_v39  ;;  %v7430_v21 = vadd.f32 1.0, %v9026_v57 }
 0xaed   :  { %9031 = vrcp.f32 %v7432_v63 }
 0xaee   :  { %9033 = vrcp.f32 %v7430_v21 }
 0xaf5   :  { %v9028_v7 = vpop.eup %9027 }
 0xaf6   :  { %v8583_v9 = vpop.f32.mrb[132].mxu1  ;;  %v9030_v35 = vpop.eup %9029  ;;  %v7592_v44 = vsel %vm7332_vm12, %v9028_v7, %v7560_v50 }
 0xaf7   :  { %v14939_v25 = vadd.f32 %v8583_v9, %v14927_v11  ;;  %v7219_v2 = vpop.f32.mrb[133].mxu1  ;;  %v9032_v27 = vpop.eup %9031  ;;  %7625 = vst.msk [vmem:[%s15375_s13 + $0x10] sm:$0xff] %vm7622_vm3, %v7592_v44  ;;  %v7590_v59 = vsel %vm7332_vm12, %v9030_v35, %v7558_v5 }
 0xaf8   :  { %v14944_v53 = vadd.f32 %v14927_v11, %v7219_v2  ;;  %v8584_v1 = vpop.f32.mrb[134].mxu1  ;;  %v9034_v13 = vpop.eup %9033  ;;  %7623 = vst.msk [vmem:[%s15375_s13] sm:$0xff] %vm7622_vm3, %v7590_v59  ;;  %v7593_v46 = vsel %vm7332_vm12, %v9032_v27, %v7561_v56 }
 0xaf9   :  { %v8055_v62 = vmul.f32 -1.442695, %v14939_v25  ;;  %v14952_v61 = vadd.f32 %v8584_v1, %v14927_v11  ;;  %v7222_v15 = vpop.f32.mrb[135].mxu1  ;;  %7626 = vst.msk [vmem:[%s15375_s13 + $0x18] sm:$0xff] %vm7622_vm3, %v7593_v46  ;;  %v7591_v4 = vsel %vm7332_vm12, %v9034_v13, %v7559_v0  ;;  %v7532_v20 = vmax.f32 %v14939_v25, 0.0 }
 0xafa   :  { %v8053_v8 = vmul.f32 -1.442695, %v14944_v53  ;;  %v14964_v28 = vadd.f32 %v14927_v11, %v7222_v15  ;;  %7624 = vst.msk [vmem:[%s15375_s13 + $0x8] sm:$0xff] %vm7622_vm3, %v7591_v4  ;;  %v7530_v51 = vmax.f32 %v14944_v53, 0.0 }
 0xafb   :  { %9035 = vpow2.f32 %v8055_v62  ;;  %v8056_v26 = vmul.f32 -1.442695, %v14952_v61  ;;  %v7533_v33 = vmax.f32 %v14952_v61, 0.0  ;;  %v7564_v39 = vsel %vm7525_vm5, %v7532_v20, %v14939_v25 }
 0xafc   :  { %9037 = vpow2.f32 %v8053_v8  ;;  %v8054_v55 = vmul.f32 -1.442695, %v14964_v28  ;;  %v7531_v57 = vmax.f32 %v14964_v28, 0.0  ;;  %v7562_v41 = vsel %vm7525_vm5, %v7530_v51, %v14944_v53 }
 0xafd   :  { %9039 = vpow2.f32 %v8056_v26  ;;  %v7565_v7 = vsel %vm7525_vm5, %v7533_v33, %v14952_v61 }
 0xafe   :  { %9041 = vpow2.f32 %v8054_v55  ;;  %v7563_v35 = vsel %vm7525_vm5, %v7531_v57, %v14964_v28 }
 0xb05   :  { %v9036_v37 = vpop.eup %9035 }
 0xb06   :  { %v9038_v3 = vpop.eup %9037  ;;  %v7435_v14 = vadd.f32 1.0, %v9036_v37 }
 0xb07   :  { %v9040_v17 = vpop.eup %9039  ;;  %v7433_v29 = vadd.f32 1.0, %v9038_v3  ;;  %v8587_v16 = vpop.f32.mrb[136].mxu1 }
 0xb08   :  { %9043 = vrcp.f32 %v7435_v14  ;;  %v7436_v22 = vadd.f32 1.0, %v9040_v17  ;;  %v14987_v18 = vadd.f32 %v8587_v16, %v14927_v11  ;;  %v7235_v49 = vpop.f32.mrb[137].mxu1  ;;  %v9042_v38 = vpop.eup %9041 }
 0xb09   :  { %9045 = vrcp.f32 %v7433_v29  ;;  %v14990_v30 = vadd.f32 %v14927_v11, %v7235_v49  ;;  %v8588_v48 = vpop.f32.mrb[138].mxu1  ;;  %v7434_v19 = vadd.f32 1.0, %v9042_v38 }
 0xb0a   :  { %9047 = vrcp.f32 %v7436_v22  ;;  %v8059_v23 = vmul.f32 -1.442695, %v14987_v18  ;;  %v7238_v58 = vpop.f32.mrb[139].mxu1  ;;  %v14995_v42 = vadd.f32 %v8588_v48, %v14927_v11  ;;  %v7536_v49 = vmax.f32 %v14987_v18, 0.0 }
 0xb0b   :  { %v8057_v36 = vmul.f32 -1.442695, %v14990_v30  ;;  %v14998_v32 = vadd.f32 %v14927_v11, %v7238_v58  ;;  %9049 = vrcp.f32 %v7434_v19  ;;  %v7534_v20 = vmax.f32 %v14990_v30, 0.0 }
 0xb0c   :  { %9051 = vpow2.f32 %v8059_v23  ;;  %v8060_v60 = vmul.f32 -1.442695, %v14995_v42 }
 0xb0d   :  { %9053 = vpow2.f32 %v8057_v36  ;;  %v8058_v52 = vmul.f32 -1.442695, %v14998_v32  ;;  %v7535_v57 = vmax.f32 %v14998_v32, 0.0 }
 0xb0e   :  { %9055 = vpow2.f32 %v8060_v60 }
 0xb0f   :  { %v8591_v6 = vpop.f32.mrb[140].mxu1  ;;  %9057 = vpow2.f32 %v8058_v52 }
 0xb10   :  { %v15006_v12 = vadd.f32 %v8591_v6, %v14927_v11  ;;  %v7251_v24 = vpop.f32.mrb[141].mxu1 }
 0xb11   :  { %v15009_v34 = vadd.f32 %v14927_v11, %v7251_v24  ;;  %v8592_v43 = vpop.f32.mrb[142].mxu1  ;;  %v7537_v24 = vmax.f32 %v14995_v42, 0.0 }
 0xb12   :  { %v9044_v47 = vpop.eup %9043  ;;  %v8063_v63 = vmul.f32 -1.442695, %v15006_v12  ;;  %v15017_v21 = vadd.f32 %v8592_v43, %v14927_v11  ;;  %v7254_v31 = vpop.f32.mrb[143].mxu1 }
 0xb13   :  { %v9046_v10 = vpop.eup %9045  ;;  %v7596_v54 = vsel %vm7332_vm12, %v9044_v47, %v7564_v39  ;;  %v8061_v9 = vmul.f32 -1.442695, %v15009_v34  ;;  %v15026_v40 = vadd.f32 %v14927_v11, %v7254_v31 }
 0xb14   :  { %v9048_v25 = vpop.eup %9047  ;;  %7629 = vst.msk [vmem:[%s15375_s13 + $0x30] sm:$0xff] %vm7622_vm3, %v7596_v54  ;;  %v7594_v2 = vsel %vm7332_vm12, %v9046_v10, %v7562_v41  ;;  %9059 = vpow2.f32 %v8063_v63  ;;  %v8064_v50 = vmul.f32 -1.442695, %v15017_v21  ;;  %v7568_v54 = vsel %vm7525_vm5, %v7536_v49, %v14987_v18 }
 0xb15   :  { %7627 = vst.msk [vmem:[%s15375_s13 + $0x20] sm:$0xff] %vm7622_vm3, %v7594_v2  ;;  %v7597_v53 = vsel %vm7332_vm12, %v9048_v25, %v7565_v7  ;;  %9061 = vpow2.f32 %v8061_v9  ;;  %v9050_v1 = vpop.eup %9049  ;;  %v8062_v44 = vmul.f32 -1.442695, %v15026_v40  ;;  %v7566_v2 = vsel %vm7525_vm5, %v7534_v20, %v14990_v30 }
 0xb16   :  { %7630 = vst.msk [vmem:[%s15375_s13 + $0x38] sm:$0xff] %vm7622_vm3, %v7597_v53  ;;  %9063 = vpow2.f32 %v8064_v50  ;;  %v9052_v5 = vpop.eup %9051  ;;  %v7595_v62 = vsel %vm7332_vm12, %v9050_v1, %v7563_v35  ;;  %v7569_v53 = vsel %vm7525_vm5, %v7537_v24, %v14995_v42  ;;  %v7540_v1 = vmax.f32 %v15006_v12, 0.0 }
 0xb17   :  { %v8595_v61 = vpop.f32.mrb[144].mxu1  ;;  %v9054_v15 = vpop.eup %9053  ;;  %7628 = vst.msk [vmem:[%s15375_s13 + $0x28] sm:$0xff] %vm7622_vm3, %v7595_v62  ;;  %v7439_v27 = vadd.f32 1.0, %v9052_v5  ;;  %9065 = vpow2.f32 %v8062_v44  ;;  %v7567_v44 = vsel %vm7525_vm5, %v7535_v57, %v14998_v32 }
 0xb18   :  { %v15059_v59 = vadd.f32 %v8595_v61, %v14927_v11  ;;  %v7267_v56 = vpop.f32.mrb[145].mxu1  ;;  %v9056_v8 = vpop.eup %9055  ;;  %v7437_v28 = vadd.f32 1.0, %v9054_v15  ;;  %v7538_v15 = vmax.f32 %v15009_v34, 0.0 }
 0xb19   :  { %v15062_v13 = vadd.f32 %v14927_v11, %v7267_v56  ;;  %v8596_v46 = vpop.f32.mrb[146].mxu1  ;;  %v9058_v0 = vpop.eup %9057  ;;  %9067 = vrcp.f32 %v7439_v27  ;;  %v7440_v26 = vadd.f32 1.0, %v9056_v8  ;;  %v7541_v8 = vmax.f32 %v15017_v21, 0.0 }
 0xb1a   :  { %v8067_v4 = vmul.f32 -1.442695, %v15059_v59  ;;  %v7270_v55 = vpop.f32.mrb[147].mxu1  ;;  %9069 = vrcp.f32 %v7437_v28  ;;  %v7438_v37 = vadd.f32 1.0, %v9058_v0  ;;  %v15067_v14 = vadd.f32 %v8596_v46, %v14927_v11 }
 0xb1b   :  { %v8065_v3 = vmul.f32 -1.442695, %v15062_v13  ;;  %9071 = vrcp.f32 %v7440_v26  ;;  %v15070_v17 = vadd.f32 %v14927_v11, %v7270_v55  ;;  %v7573_v20 = vsel %vm7525_vm5, %v7541_v8, %v15017_v21 }
 0xb1c   :  { %9073 = vrcp.f32 %v7438_v37  ;;  %v8068_v16 = vmul.f32 -1.442695, %v15067_v14 }
 0xb1d   :  { %9075 = vpow2.f32 %v8067_v4  ;;  %v8066_v58 = vmul.f32 -1.442695, %v15070_v17  ;;  %v7572_v4 = vsel %vm7525_vm5, %v7540_v1, %v15006_v12  ;;  %v7570_v12 = vsel %vm7525_vm5, %v7538_v15, %v15009_v34 }
 0xb1e   :  { %v9060_v29 = vpop.eup %9059  ;;  %9077 = vpow2.f32 %v8065_v3 }
 0xb1f   :  { %v9062_v22 = vpop.eup %9061  ;;  %v7443_v38 = vadd.f32 1.0, %v9060_v29  ;;  %v8599_v48 = vpop.f32.mrb[148].mxu1  ;;  %9079 = vpow2.f32 %v8068_v16 }
 0xb20   :  { %v9064_v19 = vpop.eup %9063  ;;  %v7441_v23 = vadd.f32 1.0, %v9062_v22  ;;  %v15076_v36 = vadd.f32 %v8599_v48, %v14927_v11  ;;  %v7283_v60 = vpop.f32.mrb[149].mxu1  ;;  %v7539_v22 = vmax.f32 %v15026_v40, 0.0 }
 0xb21   :  { %9081 = vrcp.f32 %v7443_v38  ;;  %v7444_v52 = vadd.f32 1.0, %v9064_v19  ;;  %v15080_v51 = vadd.f32 %v14927_v11, %v7283_v60  ;;  %v8600_v6 = vpop.f32.mrb[150].mxu1  ;;  %v9066_v33 = vpop.eup %9065 }
 0xb22   :  { %9083 = vrcp.f32 %v7441_v23  ;;  %v8071_v43 = vmul.f32 -1.442695, %v15076_v36  ;;  %v15085_v47 = vadd.f32 %v8600_v6, %v14927_v11  ;;  %v7286_v39 = vpop.f32.mrb[151].mxu1  ;;  %v7442_v63 = vadd.f32 1.0, %v9066_v33 }
 0xb23   :  { %9085 = vrcp.f32 %v7444_v52  ;;  %v8069_v31 = vmul.f32 -1.442695, %v15080_v51  ;;  %v9068_v10 = vpop.eup %9067  ;;  %v15099_v7 = vadd.f32 %v14927_v11, %v7286_v39  ;;  %v7571_v21 = vsel %vm7525_vm5, %v7539_v22, %v15026_v40 }
 0xb24   :  { %9087 = vpow2.f32 %v8066_v58  ;;  %v8072_v41 = vmul.f32 -1.442695, %v15085_v47  ;;  %v9070_v9 = vpop.eup %9069  ;;  %v7600_v25 = vsel %vm7332_vm12, %v9068_v10, %v7568_v54 }
 0xb25   :  { %9089 = vrcp.f32 %v7442_v63  ;;  %v9072_v50 = vpop.eup %9071  ;;  %7633 = vst.msk [vmem:[%s15375_s13 + $0x50] sm:$0xff] %vm7622_vm3, %v7600_v25  ;;  %v7598_v18 = vsel %vm7332_vm12, %v9070_v9, %v7566_v2  ;;  %v8070_v5 = vmul.f32 -1.442695, %v15099_v7  ;;  %v7544_v63 = vmax.f32 %v15059_v59, 0.0 }
 0xb26   :  { %9091 = vpow2.f32 %v8071_v43  ;;  %v9074_v30 = vpop.eup %9073  ;;  %7631 = vst.msk [vmem:[%s15375_s13 + $0x40] sm:$0xff] %vm7622_vm3, %v7598_v18  ;;  %v7601_v35 = vsel %vm7332_vm12, %v9072_v50, %v7569_v53  ;;  %v7542_v50 = vmax.f32 %v15062_v13, 0.0 }
 0xb27   :  { %9093 = vpow2.f32 %v8069_v31  ;;  %v8603_v42 = vpop.f32.mrb[152].mxu1  ;;  %v9076_v62 = vpop.eup %9075  ;;  %7634 = vst.msk [vmem:[%s15375_s13 + $0x58] sm:$0xff] %vm7622_vm3, %v7601_v35  ;;  %v7599_v61 = vsel %vm7332_vm12, %v9074_v30, %v7567_v44  ;;  %v7545_v35 = vmax.f32 %v15067_v14, 0.0  ;;  %v7576_v15 = vsel %vm7525_vm5, %v7544_v63, %v15059_v59 }
 0xb28   :  { %9095 = vpow2.f32 %v8072_v41  ;;  %v15129_v27 = vadd.f32 %v8603_v42, %v14927_v11  ;;  %v7299_v32 = vpop.f32.mrb[153].mxu1  ;;  %v9078_v56 = vpop.eup %9077  ;;  %7632 = vst.msk [vmem:[%s15375_s13 + $0x48] sm:$0xff] %vm7622_vm3, %v7599_v61  ;;  %v7447_v28 = vadd.f32 1.0, %v9076_v62 }
 0xb29   :  { %9097 = vpow2.f32 %v8070_v5  ;;  %v15137_v46 = vadd.f32 %v14927_v11, %v7299_v32  ;;  %v8604_v0 = vpop.f32.mrb[154].mxu1  ;;  %v9080_v26 = vpop.eup %9079  ;;  %v7445_v55 = vadd.f32 1.0, %v9078_v56 }
 0xb2a   :  { %v8075_v37 = vmul.f32 -1.442695, %v15129_v27  ;;  %v15144_v3 = vadd.f32 %v8604_v0, %v14927_v11  ;;  %v7302_v29 = vpop.f32.mrb[155].mxu1  ;;  %9099 = vrcp.f32 %v7447_v28  ;;  %v7448_v49 = vadd.f32 1.0, %v9080_v26 }
 0xb2b   :  { %v9082_v16 = vpop.eup %9081  ;;  %v8073_v38 = vmul.f32 -1.442695, %v15137_v46  ;;  %9101 = vrcp.f32 %v7445_v55  ;;  %v15170_v6 = vadd.f32 %v14927_v11, %v7302_v29  ;;  %v7574_v28 = vsel %vm7525_vm5, %v7542_v50, %v15062_v13 }
 0xb2c   :  { %v9084_v48 = vpop.eup %9083  ;;  %v7604_v19 = vsel %vm7332_vm12, %v9082_v16, %v7572_v4  ;;  %v8076_v23 = vmul.f32 -1.442695, %v15144_v3  ;;  %9103 = vrcp.f32 %v7448_v49  ;;  %v7577_v4 = vsel %vm7525_vm5, %v7545_v35, %v15067_v14 }
 0xb2d   :  { %v9086_v58 = vpop.eup %9085  ;;  %7637 = vst.msk [vmem:[%s15375_s13 + $0x70] sm:$0xff] %vm7622_vm3, %v7604_v19  ;;  %v7602_v60 = vsel %vm7332_vm12, %v9084_v48, %v7570_v12  ;;  %9105 = vpow2.f32 %v8075_v37  ;;  %v8074_v31 = vmul.f32 -1.442695, %v15170_v6  ;;  %v7543_v55 = vmax.f32 %v15070_v17, 0.0 }
 0xb2e   :  { %v9088_v52 = vpop.eup %9087  ;;  %7635 = vst.msk [vmem:[%s15375_s13 + $0x60] sm:$0xff] %vm7622_vm3, %v7602_v60  ;;  %v7605_v34 = vsel %vm7332_vm12, %v9086_v58, %v7573_v20  ;;  %9107 = vpow2.f32 %v8073_v38  ;;  %v7548_v14 = vmax.f32 %v15076_v36, 0.0  ;;  %v7546_v49 = vmax.f32 %v15080_v51, 0.0 }
 0xb2f   :  { %v9090_v33 = vpop.eup %9089  ;;  %7638 = vst.msk [vmem:[%s15375_s13 + $0x78] sm:$0xff] %vm7622_vm3, %v7605_v34  ;;  %v7446_v24 = vadd.f32 1.0, %v9088_v52  ;;  %v8607_v43 = vpop.f32.mrb[156].mxu1  ;;  %9109 = vpow2.f32 %v8076_v23  ;;  %v7575_v19 = vsel %vm7525_vm5, %v7543_v55, %v15070_v17  ;;  %v7549_v12 = vmax.f32 %v15085_v47, 0.0 }
 0xb30   :  { %v9092_v39 = vpop.eup %9091  ;;  %v7603_v57 = vsel %vm7332_vm12, %v9090_v33, %v7571_v21  ;;  %v7315_v10 = vpop.f32.mrb[157].mxu1  ;;  %v15188_v41 = vadd.f32 %v8607_v43, %v14927_v11  ;;  %v7547_v20 = vmax.f32 %v15099_v7, 0.0  ;;  %v7580_v17 = vsel %vm7525_vm5, %v7548_v14, %v15076_v36 }
 0xb31   :  { %v9094_v54 = vpop.eup %9093  ;;  %7636 = vst.msk [vmem:[%s15375_s13 + $0x68] sm:$0xff] %vm7622_vm3, %v7603_v57  ;;  %9111 = vrcp.f32 %v7446_v24  ;;  %v7451_v40 = vadd.f32 1.0, %v9092_v39  ;;  %v15191_v9 = vadd.f32 %v14927_v11, %v7315_v10  ;;  %v8608_v25 = vpop.f32.mrb[158].mxu1  ;;  %v7578_v24 = vsel %vm7525_vm5, %v7546_v49, %v15080_v51 }
 0xb32   :  { %v9096_v2 = vpop.eup %9095  ;;  %v7449_v18 = vadd.f32 1.0, %v9094_v54  ;;  %9113 = vpow2.f32 %v8074_v31  ;;  %v15195_v53 = vadd.f32 %v8608_v25, %v14927_v11  ;;  %v7318_v1 = vpop.f32.mrb[159].mxu1  ;;  %v8079_v5 = vmul.f32 -1.442695, %v15188_v41 }
 0xb33   :  { %v9098_v30 = vpop.eup %9097  ;;  %9115 = vrcp.f32 %v7451_v40  ;;  %v7452_v44 = vadd.f32 1.0, %v9096_v2  ;;  %v8077_v62 = vmul.f32 -1.442695, %v15191_v9  ;;  %v15210_v0 = vadd.f32 %v14927_v11, %v7318_v1 }
 0xb34   :  { %9117 = vrcp.f32 %v7449_v18  ;;  %v7450_v42 = vadd.f32 1.0, %v9098_v30  ;;  %v9100_v61 = vpop.eup %9099  ;;  %v8080_v32 = vmul.f32 -1.442695, %v15195_v53  ;;  %v7581_v36 = vsel %vm7525_vm5, %v7549_v12, %v15085_v47 }
 0xb35   :  { %9119 = vrcp.f32 %v7452_v44  ;;  %v9102_v56 = vpop.eup %9101  ;;  %v7608_v8 = vsel %vm7332_vm12, %v9100_v61, %v7576_v15  ;;  %v8078_v37 = vmul.f32 -1.442695, %v15210_v0  ;;  %v7579_v63 = vsel %vm7525_vm5, %v7547_v20, %v15099_v7 }
 0xb36   :  { %9121 = vrcp.f32 %v7450_v42  ;;  %v9104_v26 = vpop.eup %9103  ;;  %7641 = vst.msk [vmem:[%s15375_s13 + $0x90] sm:$0xff] %vm7622_vm3, %v7608_v8  ;;  %v7606_v59 = vsel %vm7332_vm12, %v9102_v56, %v7574_v28  ;;  %v7552_v10 = vmax.f32 %v15129_v27, 0.0  ;;  %v7550_v40 = vmax.f32 %v15137_v46, 0.0 }
 0xb37   :  { %9123 = vpow2.f32 %v8079_v5  ;;  %v9106_v13 = vpop.eup %9105  ;;  %7639 = vst.msk [vmem:[%s15375_s13 + $0x80] sm:$0xff] %vm7622_vm3, %v7606_v59  ;;  %v7609_v11 = vsel %vm7332_vm12, %v9104_v26, %v7577_v4  ;;  %v7553_v2 = vmax.f32 %v15144_v3, 0.0  ;;  %v7551_v44 = vmax.f32 %v15170_v6, 0.0 }
 0xb38   :  { %9125 = vpow2.f32 %v8077_v62  ;;  %v9108_v29 = vpop.eup %9107  ;;  %7642 = vst.msk [vmem:[%s15375_s13 + $0x98] sm:$0xff] %vm7622_vm3, %v7609_v11  ;;  %v7455_v16 = vadd.f32 1.0, %v9106_v13  ;;  %v7584_v35 = vsel %vm7525_vm5, %v7552_v10, %v15129_v27  ;;  %v7582_v61 = vsel %vm7525_vm5, %v7550_v40, %v15137_v46 }
 0xb39   :  { %9127 = vpow2.f32 %v8080_v32  ;;  %v9110_v22 = vpop.eup %9109  ;;  %v7453_v38 = vadd.f32 1.0, %v9108_v29  ;;  %v7585_v32 = vsel %vm7525_vm5, %v7553_v2, %v15144_v3  ;;  %v7583_v8 = vsel %vm7525_vm5, %v7551_v44, %v15170_v6 }
 0xb3a   :  { %9129 = vpow2.f32 %v8078_v37  ;;  %v7456_v23 = vadd.f32 1.0, %v9110_v22  ;;  %v7556_v28 = vmax.f32 %v15188_v41, 0.0  ;;  %v7554_v26 = vmax.f32 %v15191_v9, 0.0 }
 0xb3b   :  { %v9112_v48 = vpop.eup %9111  ;;  %9131 = vrcp.f32 %v7455_v16  ;;  %v7557_v59 = vmax.f32 %v15195_v53, 0.0  ;;  %v7555_v4 = vmax.f32 %v15210_v0, 0.0 }
 0xb3c   :  { %v9114_v58 = vpop.eup %9113  ;;  %v7607_v60 = vsel %vm7332_vm12, %v9112_v48, %v7575_v19  ;;  %9133 = vrcp.f32 %v7453_v38  ;;  %v7588_v6 = vsel %vm7525_vm5, %v7556_v28, %v15188_v41  ;;  %v7586_v37 = vsel %vm7525_vm5, %v7554_v26, %v15191_v9 }
 0xb3d   :  { %v9116_v52 = vpop.eup %9115  ;;  %7640 = vst.msk [vmem:[%s15375_s13 + $0x88] sm:$0xff] %vm7622_vm3, %v7607_v60  ;;  %9135 = vrcp.f32 %v7456_v23  ;;  %v7454_v34 = vadd.f32 1.0, %v9114_v58  ;;  %v7589_v41 = vsel %vm7525_vm5, %v7557_v59, %v15195_v53  ;;  %v7587_v22 = vsel %vm7525_vm5, %v7555_v4, %v15210_v0 }
 0xb3e   :  { %v9118_v33 = vpop.eup %9117  ;;  %v7612_v21 = vsel %vm7332_vm12, %v9116_v52, %v7580_v17 }
 0xb3f   :  { %v9120_v43 = vpop.eup %9119  ;;  %7645 = vst.msk [vmem:[%s15375_s13 + $0xb0] sm:$0xff] %vm7622_vm3, %v7612_v21  ;;  %v7610_v39 = vsel %vm7332_vm12, %v9118_v33, %v7578_v24  ;;  %9137 = vrcp.f32 %v7454_v34 }
 0xb40   :  { %v9122_v57 = vpop.eup %9121  ;;  %7643 = vst.msk [vmem:[%s15375_s13 + $0xa0] sm:$0xff] %vm7622_vm3, %v7610_v39  ;;  %v7613_v51 = vsel %vm7332_vm12, %v9120_v43, %v7581_v36 }
 0xb41   :  { %v9124_v31 = vpop.eup %9123  ;;  %7646 = vst.msk [vmem:[%s15375_s13 + $0xb8] sm:$0xff] %vm7622_vm3, %v7613_v51  ;;  %v7611_v47 = vsel %vm7332_vm12, %v9122_v57, %v7579_v63 }
 0xb42   :  { %v9126_v54 = vpop.eup %9125  ;;  %7644 = vst.msk [vmem:[%s15375_s13 + $0xa8] sm:$0xff] %vm7622_vm3, %v7611_v47  ;;  %v7459_v7 = vadd.f32 1.0, %v9124_v31 }
 0xb43   :  { %v9128_v25 = vpop.eup %9127  ;;  %v7457_v50 = vadd.f32 1.0, %v9126_v54 }
 0xb44   :  { %v9130_v18 = vpop.eup %9129  ;;  %9139 = vrcp.f32 %v7459_v7  ;;  %v7460_v1 = vadd.f32 1.0, %v9128_v25 }
 0xb45   :  { %v9132_v30 = vpop.eup %9131  ;;  %9141 = vrcp.f32 %v7457_v50  ;;  %v7458_v5 = vadd.f32 1.0, %v9130_v18 }
 0xb46   :  { %v9134_v42 = vpop.eup %9133  ;;  %v7616_v62 = vsel %vm7332_vm12, %v9132_v30, %v7584_v35  ;;  %9143 = vrcp.f32 %v7460_v1 }
 0xb47   :  { %v9136_v15 = vpop.eup %9135  ;;  %7649 = vst.msk [vmem:[%s15375_s13 + $0xd0] sm:$0xff] %vm7622_vm3, %v7616_v62  ;;  %v7614_v27 = vsel %vm7332_vm12, %v9134_v42, %v7582_v61  ;;  %9145 = vrcp.f32 %v7458_v5 }
 0xb48   :  { %7647 = vst.msk [vmem:[%s15375_s13 + $0xc0] sm:$0xff] %vm7622_vm3, %v7614_v27  ;;  %v7617_v46 = vsel %vm7332_vm12, %v9136_v15, %v7585_v32 }
 0xb49   :  { %v9138_v56 = vpop.eup %9137  ;;  %7650 = vst.msk [vmem:[%s15375_s13 + $0xd8] sm:$0xff] %vm7622_vm3, %v7617_v46 }
 0xb4a   :  { %v7615_v3 = vsel %vm7332_vm12, %v9138_v56, %v7583_v8 }
 0xb4b   :  { %7648 = vst.msk [vmem:[%s15375_s13 + $0xc8] sm:$0xff] %vm7622_vm3, %v7615_v3 }
 0xb4e   :  { %v9140_v55 = vpop.eup %9139 }
 0xb4f   :  { %v9142_v13 = vpop.eup %9141  ;;  %v7620_v11 = vsel %vm7332_vm12, %v9140_v55, %v7588_v6 }
 0xb50   :  { %v9144_v29 = vpop.eup %9143  ;;  %7653 = vst.msk [vmem:[%s15375_s13 + $0xf0] sm:$0xff] %vm7622_vm3, %v7620_v11  ;;  %v7618_v14 = vsel %vm7332_vm12, %v9142_v13, %v7586_v37 }
 0xb51   :  { %v9146_v16 = vpop.eup %9145  ;;  %7651 = vst.msk [vmem:[%s15375_s13 + $0xe0] sm:$0xff] %vm7622_vm3, %v7618_v14  ;;  %v7621_v9 = vsel %vm7332_vm12, %v9144_v29, %v7589_v41 }
 0xb52   :  { %7654 = vst.msk [vmem:[%s15375_s13 + $0xf8] sm:$0xff] %vm7622_vm3, %v7621_v9  ;;  %v7619_v53 = vsel %vm7332_vm12, %v9146_v16, %v7587_v22 }
 0xb53   :  { %7652 = vst.msk [vmem:[%s15375_s13 + $0xe8] sm:$0xff] %vm7622_vm3, %v7619_v53 }

</bundles_post_ra>
